<compile_context>
chip_gen: v7x
topology: tpu7x:2x2x1
jax: 0.10.0
libtpu: 0.0.40
codegen_flags: <defaults>
</compile_context>

<pallas_src>
import functools
import math

import jax
import jax.numpy as jnp
from jax.experimental import pallas as pl
from jax.experimental.pallas import tpu as pltpu


# Conv layer configs: (Cin, Cout, (kd, kh, kw)); all strides are 2.
_LAYER_CFG = [
    (30, 60, (2, 2, 2)),
    (60, 120, (2, 2, 2)),
    (120, 120, (2, 2, 2)),
    (120, 120, (2, 2, 1)),
    (120, 60, (2, 2, 1)),
    (60, 30, (2, 2, 1)),
]
# Lane padding of each layer's *output* channels.  Padded weight columns and
# bias entries are zero, so padded lanes are exactly 0 through the network.
_COUT_PAD = [64, 128, 128, 128, 64, 32]
# Per-tap input-channel width seen by each layer (= previous layer's padded
# Cout; layer 0 reads the raw 30-channel input, no padding: K = 8*30 = 240).
_CIN_PAD = [30, 64, 128, 128, 128, 64]


# ---------------------------------------------------------------------------
# Parameters: PyTorch-style init, then one-time repack to bf16 matmul weights
# ---------------------------------------------------------------------------
def init_params(key):
    """PyTorch-style Conv3d init (weights in (Cout, Cin, kd, kh, kw) layout)."""
    params = []
    for cin, cout, (kd, kh, kw) in _LAYER_CFG:
        key, k_w, k_b = jax.random.split(key, 3)
        fan_in = cin * kd * kh * kw
        bound = 1.0 / math.sqrt(fan_in)
        w = jax.random.uniform(k_w, (cout, cin, kd, kh, kw),
                               minval=-bound, maxval=bound, dtype=jnp.float32)
        b = jax.random.uniform(k_b, (cout,),
                               minval=-bound, maxval=bound, dtype=jnp.float32)
        params.append((w, b))
    return params


def pack_params(params):
    """Conv weights (Cout, Cin, kd, kh, kw) -> (T*Cin_pad, Cout_pad) bf16 matmul
    weights with rows ordered (kd, kh, kw, cin); biases -> (1, Cout_pad) f32."""
    packed = []
    for (w, b), cin_p, cout_p in zip(params, _CIN_PAD, _COUT_PAD):
        cout, cin, kd, kh, kw = w.shape
        wt = jnp.transpose(w, (2, 3, 4, 1, 0))            # (kd, kh, kw, cin, cout)
        wt = jnp.pad(wt, ((0, 0), (0, 0), (0, 0),
                          (0, cin_p - cin), (0, cout_p - cout)))
        wt = wt.reshape(kd * kh * kw * cin_p, cout_p).astype(jnp.bfloat16)
        bt = jnp.pad(b, (0, cout_p - cout)).reshape(1, cout_p).astype(jnp.float32)
        packed.append((wt, bt))
    return packed


# ---------------------------------------------------------------------------
# Prologue: one XLA transpose = layout conversion + im2col for the whole net
# ---------------------------------------------------------------------------
def _build_patch_matrix(x):
    """NCDHW (B, 30, 64, 64, 8) f32 -> cnn0 patch matrix X0 (4096*B, 240) bf16.

    Row index (outer -> inner) = (kd1, kh1, kw1, kd2, kh2, kw2, kd3, kh3,
    kd4, kh4, kd5, kh5, b): layer-l taps outermost-first, batch innermost.
    With this order, the rows layer-l needs for tap t are the contiguous slice
    [t * M_l, (t+1) * M_l) of the previous layer's output.
    Column index = (kd0, kh0, kw0, c): cnn0's own 2x2x2 patch, channels fastest.

    Since stride == kernel for every conv, this is a pure permutation of the
    input (single XLA transpose, ~8 MB read + ~4 MB bf16 write) and replaces
    both the old NCDHW->NDHWC conversion and every per-layer im2col pass.
    """
    B, C, D, H, W = x.shape
    assert (C, D, H, W) == (30, 64, 64, 8), (
        "volume_to_scalar requires a (B, 30, 64, 64, 8) input")
    # Split every spatial dim into stride-2 "bits" (MSB first):
    #   dims: 0=b, 1=c, 2..7 = d5..d0, 8..13 = h5..h0, 14..16 = w2..w0
    xr = x.reshape((B, C) + (2,) * 15)
    perm = (6, 12, 15,    # kd1, kh1, kw1
            5, 11, 14,    # kd2, kh2, kw2
            4, 10,        # kd3, kh3
            3, 9,         # kd4, kh4
            2, 8,         # kd5, kh5
            0,            # b
            7, 13, 16,    # kd0, kh0, kw0
            1)            # c
    xt = jnp.transpose(xr, perm).astype(jnp.bfloat16)
    return xt.reshape(4096 * B, 8 * C)                    # (4096B, 240)


# ---------------------------------------------------------------------------
# Pallas kernel 1: tiled matmul + bias (cnn0, the only large-M layer)
# ---------------------------------------------------------------------------
def _matmul_bias_kernel(x_ref, w_ref, b_ref, o_ref):
    acc = jnp.dot(x_ref[...], w_ref[...], preferred_element_type=jnp.float32)
    o_ref[...] = (acc + b_ref[...]).astype(o_ref.dtype)


def matmul_bias_pallas(x, w, b):
    """x: (M, K) bf16, w: (K, N) bf16, b: (1, N) f32 -> (M, N) bf16."""
    M, K = x.shape
    N = w.shape[1]
    tm = min(2048, M)                        # M = 4096*B, always divisible
    return pl.pallas_call(
        _matmul_bias_kernel,
        out_shape=jax.ShapeDtypeStruct((M, N), jnp.bfloat16),
        grid_spec=pltpu.PrefetchScalarGridSpec(
            num_scalar_prefetch=0,
            grid=(pl.cdiv(M, tm),),
            in_specs=[
                pl.BlockSpec((tm, K), lambda i: (i, 0)),
                pl.BlockSpec((K, N), lambda i: (0, 0)),
                pl.BlockSpec((1, N), lambda i: (0, 0)),
            ],
            out_specs=pl.BlockSpec((tm, N), lambda i: (i, 0)),
        ),
        compiler_params=pltpu.CompilerParams(
            dimension_semantics=("parallel",)),
    )(x, w, b)


# ---------------------------------------------------------------------------
# Pallas kernel 2: fused tail (cnn1 .. cnn5), everything resident in VMEM
# ---------------------------------------------------------------------------
def _tail_kernel(h0_ref, w1_ref, b1_ref, w2_ref, b2_ref, w3_ref, b3_ref,
                 w4_ref, b4_ref, w5_ref, b5_ref, o_ref, *, batch):
    """Thanks to the tap-major row ordering, every layer is just a sum of
    contiguous-row-slice matmuls (bf16 x bf16 -> f32 accumulate) plus a bias."""
    # --- cnn1: 8 taps, Cin_pad 64, M1 = 512*B output rows --------------------
    m1 = 512 * batch
    acc = None
    for t in range(8):
        ht = h0_ref[pl.ds(t * m1, m1), :]                  # (512B, 64) bf16
        wt = w1_ref[pl.ds(t * 64, 64), :]                  # (64, 128) bf16
        c = jnp.dot(ht, wt, preferred_element_type=jnp.float32)
        acc = c if acc is None else acc + c
    h = (acc + b1_ref[...]).astype(jnp.bfloat16)           # (512B, 128)

    def tap_layer(h, w_ref, b_ref, n_taps, cin_p, m_out):
        acc = None
        for t in range(n_taps):
            ht = h[t * m_out:(t + 1) * m_out, :]
            wt = w_ref[pl.ds(t * cin_p, cin_p), :]
            c = jnp.dot(ht, wt, preferred_element_type=jnp.float32)
            acc = c if acc is None else acc + c
        return (acc + b_ref[...]).astype(jnp.bfloat16)

    h = tap_layer(h, w2_ref, b2_ref, 8, 128, 64 * batch)   # cnn2 -> (64B, 128)
    h = tap_layer(h, w3_ref, b3_ref, 4, 128, 16 * batch)   # cnn3 -> (16B, 128)
    h = tap_layer(h, w4_ref, b4_ref, 4, 128, 4 * batch)    # cnn4 -> (4B, 64)

    # --- cnn5: dot over all 4B rows, then keep this tap's B output rows ------
    # (keeps every MXU matmul at >= 4B rows instead of (B, 64)-row dots)
    acc = None
    for t in range(4):
        wt = w5_ref[pl.ds(t * 64, 64), :]                  # (64, 32)
        g = jnp.dot(h, wt, preferred_element_type=jnp.float32)   # (4B, 32)
        gt = g[t * batch:(t + 1) * batch, :]
        acc = gt if acc is None else acc + gt
    o_ref[...] = (acc + b5_ref[...]).astype(o_ref.dtype)


def tail_pallas(h0, packed, batch):
    (w1, b1), (w2, b2), (w3, b3), (w4, b4), (w5, b5) = packed[1:]
    args = (h0, w1, b1, w2, b2, w3, b3, w4, b4, w5, b5)
    # grid=(1,): h0 (~0.5*B MiB bf16) + all tail weights (~0.6 MiB bf16) live in
    # VMEM.  The default double-buffering of these 1-step inputs is wasted VMEM
    # (< 4 MiB at B=2); pl.Buffered(1) would trim it but is skipped for safety.
    return pl.pallas_call(
        functools.partial(_tail_kernel, batch=batch),
        out_shape=jax.ShapeDtypeStruct((batch, 32), jnp.float32),
        grid_spec=pltpu.PrefetchScalarGridSpec(
            num_scalar_prefetch=0,
            grid=(1,),
            in_specs=[pl.BlockSpec(a.shape, lambda i: (0, 0)) for a in args],
            out_specs=pl.BlockSpec((batch, 32), lambda i: (0, 0)),
        ),
        compiler_params=pltpu.CompilerParams(
            dimension_semantics=("arbitrary",)),
    )(*args)


# ---------------------------------------------------------------------------
# Forward pass: volume_to_scalar
# ---------------------------------------------------------------------------
@jax.jit
def volume_to_scalar_forward(x, packed_params):
    """x: (B, 30, 64, 64, 8) NCDHW float32 -> (B, 30) float32."""
    B = x.shape[0]
    w0, b0 = packed_params[0]

    x0 = _build_patch_matrix(x)                  # (4096B, 240) bf16
    h0 = matmul_bias_pallas(x0, w0, b0)          # cnn0 -> (4096B, 64) bf16
    out = tail_pallas(h0, packed_params, B)      # cnn1..cnn5 -> (B, 32) f32
    return out[:, :30]


def reference_forward(x, params):
    """Pure-XLA f32 reference (six strided Conv3d) for numerical validation."""
    h = x
    for w, b in params:
        h = jax.lax.conv_general_dilated(
            h, w, window_strides=(2, 2, 2), padding="VALID",
            dimension_numbers=("NCDHW", "OIDHW", "NCDHW"),
            precision=jax.lax.Precision.HIGHEST)
        h = h + b.reshape(1, -1, 1, 1, 1)
    return h.reshape(x.shape[0], 30)


if __name__ == "__main__":
    key = jax.random.PRNGKey(0)
    key, xk = jax.random.split(key)

    # Smallest input consistent with the module's forward: the six stride-2
    # convs need (D, H, W) = (64, 64, 8) to collapse the volume to 1x1x1.
    x = jax.random.normal(xk, (2, 30, 64, 64, 8), dtype=jnp.float32)

    raw_params = init_params(key)
    packed_params = pack_params(raw_params)

    out = volume_to_scalar_forward(x, packed_params)
    out = jax.block_until_ready(out)

    assert out.shape == (2, 30), out.shape
    assert out.dtype == jnp.float32
    assert bool(jnp.all(jnp.isfinite(out)))

    # Check against the f32 XLA conv reference (bf16 MXU path -> loose tolerance).
    ref = jax.jit(reference_forward)(x, raw_params)
    err = float(jnp.max(jnp.abs(out - ref)))
    assert err < 3e-2, f"mismatch vs Conv3d reference: max abs err = {err}"

    print("KERNEL_OK")
</pallas_src>

<mosaic_0001>
module attributes {stable_mosaic.version = 11 : i64} {
  func.func @_matmul_bias_kernel(%arg0: i32, %arg1: memref<2048x240xbf16, #tpu.memory_space<vmem>>, %arg2: memref<240x64xbf16, #tpu.memory_space<vmem>>, %arg3: memref<1x64xf32, #tpu.memory_space<vmem>>, %arg4: memref<2048x64xbf16, #tpu.memory_space<vmem>>) attributes {dimension_semantics = [#tpu.dimension_semantics<parallel>], iteration_bounds = array<i64: 4>, scalar_prefetch = 0 : i64, scratch_operands = 0 : i64, tpu.core_type = #tpu.core_type<tc>, window_params = [{transform_indices = @transform_0, window_bounds = array<i64: 2048, 240>}, {pipeline_mode = #tpu.pipeline_mode<synchronous>, transform_indices = @transform_1, window_bounds = array<i64: 240, 64>}, {pipeline_mode = #tpu.pipeline_mode<synchronous>, transform_indices = @transform_2, window_bounds = array<i64: 1, 64>}, {transform_indices = @transform_3, window_bounds = array<i64: 2048, 64>}]} {
    %c0 = arith.constant 0 : index
    %c0_0 = arith.constant 0 : index
    %0 = vector.load %arg1[%c0, %c0_0] : memref<2048x240xbf16, #tpu.memory_space<vmem>>, vector<2048x240xbf16>
    %c0_1 = arith.constant 0 : index
    %c0_2 = arith.constant 0 : index
    %1 = vector.load %arg2[%c0_1, %c0_2] : memref<240x64xbf16, #tpu.memory_space<vmem>>, vector<240x64xbf16>
    %cst = arith.constant dense<0.000000e+00> : vector<2048x64xf32>
    %2 = tpu.matmul %0, %1, %cst {dimension_numbers = #tpu.dot_dimension_numbers<[1], [0], [0], [1], [0, 0, 1, 1], [], []>} : vector<2048x240xbf16>, vector<240x64xbf16>, vector<2048x64xf32> -> vector<2048x64xf32>
    %c0_3 = arith.constant 0 : index
    %c0_4 = arith.constant 0 : index
    %3 = vector.load %arg3[%c0_3, %c0_4] : memref<1x64xf32, #tpu.memory_space<vmem>>, vector<1x64xf32>
    %4 = vector.broadcast %3 : vector<1x64xf32> to vector<2048x64xf32>
    %5 = arith.addf %2, %4 : vector<2048x64xf32>
    %6 = arith.truncf %5 : vector<2048x64xf32> to vector<2048x64xbf16>
    %c0_5 = arith.constant 0 : index
    %c0_6 = arith.constant 0 : index
    %7 = vector.load %arg4[%c0_5, %c0_6] : memref<2048x64xbf16, #tpu.memory_space<vmem>>, vector<2048x64xbf16>
    tpu.vector_store %arg4[%c0_5, %c0_6], %6 {strides = array<i32>} : memref<2048x64xbf16, #tpu.memory_space<vmem>>, vector<2048x64xbf16>,
    return
  }
  func.func @transform_0(%arg0: i32) -> (i32, i32) {
    %c0_i32 = arith.constant 0 : i32
    %c0_i32_0 = arith.constant 0 : i32
    return %arg0, %c0_i32 : i32, i32
  }
  func.func @transform_1(%arg0: i32) -> (i32, i32) {
    %c0_i32 = arith.constant 0 : i32
    %c0_i32_0 = arith.constant 0 : i32
    %c0_i32_1 = arith.constant 0 : i32
    return %c0_i32, %c0_i32_0 : i32, i32
  }
  func.func @transform_2(%arg0: i32) -> (i32, i32) {
    %c0_i32 = arith.constant 0 : i32
    %c0_i32_0 = arith.constant 0 : i32
    %c0_i32_1 = arith.constant 0 : i32
    return %c0_i32, %c0_i32_0 : i32, i32
  }
  func.func @transform_3(%arg0: i32) -> (i32, i32) {
    %c0_i32 = arith.constant 0 : i32
    %c0_i32_0 = arith.constant 0 : i32
    return %arg0, %c0_i32 : i32, i32
  }
}

module attributes {stable_mosaic.version = 11 : i64} {
  func.func @_tail_kernel(%arg0: i32, %arg1: memref<8192x64xbf16, #tpu.memory_space<vmem>>, %arg2: memref<512x128xbf16, #tpu.memory_space<vmem>>, %arg3: memref<1x128xf32, #tpu.memory_space<vmem>>, %arg4: memref<1024x128xbf16, #tpu.memory_space<vmem>>, %arg5: memref<1x128xf32, #tpu.memory_space<vmem>>, %arg6: memref<512x128xbf16, #tpu.memory_space<vmem>>, %arg7: memref<1x128xf32, #tpu.memory_space<vmem>>, %arg8: memref<512x64xbf16, #tpu.memory_space<vmem>>, %arg9: memref<1x64xf32, #tpu.memory_space<vmem>>, %arg10: memref<256x32xbf16, #tpu.memory_space<vmem>>, %arg11: memref<1x32xf32, #tpu.memory_space<vmem>>, %arg12: memref<2x32xf32, #tpu.memory_space<vmem>>) attributes {dimension_semantics = [#tpu.dimension_semantics<arbitrary>], iteration_bounds = array<i64: 1>, scalar_prefetch = 0 : i64, scratch_operands = 0 : i64, tpu.core_type = #tpu.core_type<tc>, window_params = [{pipeline_mode = #tpu.pipeline_mode<synchronous>, transform_indices = @transform_0, window_bounds = array<i64: 8192, 64>}, {pipeline_mode = #tpu.pipeline_mode<synchronous>, transform_indices = @transform_1, window_bounds = array<i64: 512, 128>}, {pipeline_mode = #tpu.pipeline_mode<synchronous>, transform_indices = @transform_2, window_bounds = array<i64: 1, 128>}, {pipeline_mode = #tpu.pipeline_mode<synchronous>, transform_indices = @transform_3, window_bounds = array<i64: 1024, 128>}, {pipeline_mode = #tpu.pipeline_mode<synchronous>, transform_indices = @transform_4, window_bounds = array<i64: 1, 128>}, {pipeline_mode = #tpu.pipeline_mode<synchronous>, transform_indices = @transform_5, window_bounds = array<i64: 512, 128>}, {pipeline_mode = #tpu.pipeline_mode<synchronous>, transform_indices = @transform_6, window_bounds = array<i64: 1, 128>}, {pipeline_mode = #tpu.pipeline_mode<synchronous>, transform_indices = @transform_7, window_bounds = array<i64: 512, 64>}, {pipeline_mode = #tpu.pipeline_mode<synchronous>, transform_indices = @transform_8, window_bounds = array<i64: 1, 64>}, {pipeline_mode = #tpu.pipeline_mode<synchronous>, transform_indices = @transform_9, window_bounds = array<i64: 256, 32>}, {pipeline_mode = #tpu.pipeline_mode<synchronous>, transform_indices = @transform_10, window_bounds = array<i64: 1, 32>}, {pipeline_mode = #tpu.pipeline_mode<synchronous>, transform_indices = @transform_11, window_bounds = array<i64: 2, 32>}]} {
    %c0 = arith.constant 0 : index
    %c0_0 = arith.constant 0 : index
    %0 = vector.load %arg1[%c0, %c0_0] : memref<8192x64xbf16, #tpu.memory_space<vmem>>, vector<1024x64xbf16>
    %c0_1 = arith.constant 0 : index
    %c0_2 = arith.constant 0 : index
    %1 = vector.load %arg2[%c0_1, %c0_2] : memref<512x128xbf16, #tpu.memory_space<vmem>>, vector<64x128xbf16>
    %cst = arith.constant dense<0.000000e+00> : vector<1024x128xf32>
    %2 = tpu.matmul %0, %1, %cst {dimension_numbers = #tpu.dot_dimension_numbers<[1], [0], [0], [1], [0, 0, 1, 1], [], []>} : vector<1024x64xbf16>, vector<64x128xbf16>, vector<1024x128xf32> -> vector<1024x128xf32>
    %c1024 = arith.constant 1024 : index
    %c0_3 = arith.constant 0 : index
    %3 = vector.load %arg1[%c1024, %c0_3] : memref<8192x64xbf16, #tpu.memory_space<vmem>>, vector<1024x64xbf16>
    %c64 = arith.constant 64 : index
    %c0_4 = arith.constant 0 : index
    %4 = vector.load %arg2[%c64, %c0_4] : memref<512x128xbf16, #tpu.memory_space<vmem>>, vector<64x128xbf16>
    %cst_5 = arith.constant dense<0.000000e+00> : vector<1024x128xf32>
    %5 = tpu.matmul %3, %4, %cst_5 {dimension_numbers = #tpu.dot_dimension_numbers<[1], [0], [0], [1], [0, 0, 1, 1], [], []>} : vector<1024x64xbf16>, vector<64x128xbf16>, vector<1024x128xf32> -> vector<1024x128xf32>
    %6 = arith.addf %2, %5 : vector<1024x128xf32>
    %c2048 = arith.constant 2048 : index
    %c0_6 = arith.constant 0 : index
    %7 = vector.load %arg1[%c2048, %c0_6] : memref<8192x64xbf16, #tpu.memory_space<vmem>>, vector<1024x64xbf16>
    %c128 = arith.constant 128 : index
    %c0_7 = arith.constant 0 : index
    %8 = vector.load %arg2[%c128, %c0_7] : memref<512x128xbf16, #tpu.memory_space<vmem>>, vector<64x128xbf16>
    %cst_8 = arith.constant dense<0.000000e+00> : vector<1024x128xf32>
    %9 = tpu.matmul %7, %8, %cst_8 {dimension_numbers = #tpu.dot_dimension_numbers<[1], [0], [0], [1], [0, 0, 1, 1], [], []>} : vector<1024x64xbf16>, vector<64x128xbf16>, vector<1024x128xf32> -> vector<1024x128xf32>
    %10 = arith.addf %6, %9 : vector<1024x128xf32>
    %c3072 = arith.constant 3072 : index
    %c0_9 = arith.constant 0 : index
    %11 = vector.load %arg1[%c3072, %c0_9] : memref<8192x64xbf16, #tpu.memory_space<vmem>>, vector<1024x64xbf16>
    %c192 = arith.constant 192 : index
    %c0_10 = arith.constant 0 : index
    %12 = vector.load %arg2[%c192, %c0_10] : memref<512x128xbf16, #tpu.memory_space<vmem>>, vector<64x128xbf16>
    %cst_11 = arith.constant dense<0.000000e+00> : vector<1024x128xf32>
    %13 = tpu.matmul %11, %12, %cst_11 {dimension_numbers = #tpu.dot_dimension_numbers<[1], [0], [0], [1], [0, 0, 1, 1], [], []>} : vector<1024x64xbf16>, vector<64x128xbf16>, vector<1024x128xf32> -> vector<1024x128xf32>
    %14 = arith.addf %10, %13 : vector<1024x128xf32>
    %c4096 = arith.constant 4096 : index
    %c0_12 = arith.constant 0 : index
    %15 = vector.load %arg1[%c4096, %c0_12] : memref<8192x64xbf16, #tpu.memory_space<vmem>>, vector<1024x64xbf16>
    %c256 = arith.constant 256 : index
    %c0_13 = arith.constant 0 : index
    %16 = vector.load %arg2[%c256, %c0_13] : memref<512x128xbf16, #tpu.memory_space<vmem>>, vector<64x128xbf16>
    %cst_14 = arith.constant dense<0.000000e+00> : vector<1024x128xf32>
    %17 = tpu.matmul %15, %16, %cst_14 {dimension_numbers = #tpu.dot_dimension_numbers<[1], [0], [0], [1], [0, 0, 1, 1], [], []>} : vector<1024x64xbf16>, vector<64x128xbf16>, vector<1024x128xf32> -> vector<1024x128xf32>
    %18 = arith.addf %14, %17 : vector<1024x128xf32>
    %c5120 = arith.constant 5120 : index
    %c0_15 = arith.constant 0 : index
    %19 = vector.load %arg1[%c5120, %c0_15] : memref<8192x64xbf16, #tpu.memory_space<vmem>>, vector<1024x64xbf16>
    %c320 = arith.constant 320 : index
    %c0_16 = arith.constant 0 : index
    %20 = vector.load %arg2[%c320, %c0_16] : memref<512x128xbf16, #tpu.memory_space<vmem>>, vector<64x128xbf16>
    %cst_17 = arith.constant dense<0.000000e+00> : vector<1024x128xf32>
    %21 = tpu.matmul %19, %20, %cst_17 {dimension_numbers = #tpu.dot_dimension_numbers<[1], [0], [0], [1], [0, 0, 1, 1], [], []>} : vector<1024x64xbf16>, vector<64x128xbf16>, vector<1024x128xf32> -> vector<1024x128xf32>
    %22 = arith.addf %18, %21 : vector<1024x128xf32>
    %c6144 = arith.constant 6144 : index
    %c0_18 = arith.constant 0 : index
    %23 = vector.load %arg1[%c6144, %c0_18] : memref<8192x64xbf16, #tpu.memory_space<vmem>>, vector<1024x64xbf16>
    %c384 = arith.constant 384 : index
    %c0_19 = arith.constant 0 : index
    %24 = vector.load %arg2[%c384, %c0_19] : memref<512x128xbf16, #tpu.memory_space<vmem>>, vector<64x128xbf16>
    %cst_20 = arith.constant dense<0.000000e+00> : vector<1024x128xf32>
    %25 = tpu.matmul %23, %24, %cst_20 {dimension_numbers = #tpu.dot_dimension_numbers<[1], [0], [0], [1], [0, 0, 1, 1], [], []>} : vector<1024x64xbf16>, vector<64x128xbf16>, vector<1024x128xf32> -> vector<1024x128xf32>
    %26 = arith.addf %22, %25 : vector<1024x128xf32>
    %c7168 = arith.constant 7168 : index
    %c0_21 = arith.constant 0 : index
    %27 = vector.load %arg1[%c7168, %c0_21] : memref<8192x64xbf16, #tpu.memory_space<vmem>>, vector<1024x64xbf16>
    %c448 = arith.constant 448 : index
    %c0_22 = arith.constant 0 : index
    %28 = vector.load %arg2[%c448, %c0_22] : memref<512x128xbf16, #tpu.memory_space<vmem>>, vector<64x128xbf16>
    %cst_23 = arith.constant dense<0.000000e+00> : vector<1024x128xf32>
    %29 = tpu.matmul %27, %28, %cst_23 {dimension_numbers = #tpu.dot_dimension_numbers<[1], [0], [0], [1], [0, 0, 1, 1], [], []>} : vector<1024x64xbf16>, vector<64x128xbf16>, vector<1024x128xf32> -> vector<1024x128xf32>
    %30 = arith.addf %26, %29 : vector<1024x128xf32>
    %c0_24 = arith.constant 0 : index
    %c0_25 = arith.constant 0 : index
    %31 = vector.load %arg3[%c0_24, %c0_25] : memref<1x128xf32, #tpu.memory_space<vmem>>, vector<1x128xf32>
    %32 = vector.broadcast %31 : vector<1x128xf32> to vector<1024x128xf32>
    %33 = arith.addf %30, %32 : vector<1024x128xf32>
    %34 = arith.truncf %33 : vector<1024x128xf32> to vector<1024x128xbf16>
    %35 = vector.extract_strided_slice %34 {offsets = [0, 0], sizes = [128, 128], strides = [1, 1]} : vector<1024x128xbf16> to vector<128x128xbf16>
    %c0_26 = arith.constant 0 : index
    %c0_27 = arith.constant 0 : index
    %36 = vector.load %arg4[%c0_26, %c0_27] : memref<1024x128xbf16, #tpu.memory_space<vmem>>, vector<128x128xbf16>
    %cst_28 = arith.constant dense<0.000000e+00> : vector<128x128xf32>
    %37 = tpu.matmul %35, %36, %cst_28 {dimension_numbers = #tpu.dot_dimension_numbers<[1], [0], [0], [1], [0, 0, 1, 1], [], []>} : vector<128x128xbf16>, vector<128x128xbf16>, vector<128x128xf32> -> vector<128x128xf32>
    %38 = vector.extract_strided_slice %34 {offsets = [128, 0], sizes = [128, 128], strides = [1, 1]} : vector<1024x128xbf16> to vector<128x128xbf16>
    %c128_29 = arith.constant 128 : index
    %c0_30 = arith.constant 0 : index
    %39 = vector.load %arg4[%c128_29, %c0_30] : memref<1024x128xbf16, #tpu.memory_space<vmem>>, vector<128x128xbf16>
    %cst_31 = arith.constant dense<0.000000e+00> : vector<128x128xf32>
    %40 = tpu.matmul %38, %39, %cst_31 {dimension_numbers = #tpu.dot_dimension_numbers<[1], [0], [0], [1], [0, 0, 1, 1], [], []>} : vector<128x128xbf16>, vector<128x128xbf16>, vector<128x128xf32> -> vector<128x128xf32>
    %41 = arith.addf %37, %40 : vector<128x128xf32>
    %42 = vector.extract_strided_slice %34 {offsets = [256, 0], sizes = [128, 128], strides = [1, 1]} : vector<1024x128xbf16> to vector<128x128xbf16>
    %c256_32 = arith.constant 256 : index
    %c0_33 = arith.constant 0 : index
    %43 = vector.load %arg4[%c256_32, %c0_33] : memref<1024x128xbf16, #tpu.memory_space<vmem>>, vector<128x128xbf16>
    %cst_34 = arith.constant dense<0.000000e+00> : vector<128x128xf32>
    %44 = tpu.matmul %42, %43, %cst_34 {dimension_numbers = #tpu.dot_dimension_numbers<[1], [0], [0], [1], [0, 0, 1, 1], [], []>} : vector<128x128xbf16>, vector<128x128xbf16>, vector<128x128xf32> -> vector<128x128xf32>
    %45 = arith.addf %41, %44 : vector<128x128xf32>
    %46 = vector.extract_strided_slice %34 {offsets = [384, 0], sizes = [128, 128], strides = [1, 1]} : vector<1024x128xbf16> to vector<128x128xbf16>
    %c384_35 = arith.constant 384 : index
    %c0_36 = arith.constant 0 : index
    %47 = vector.load %arg4[%c384_35, %c0_36] : memref<1024x128xbf16, #tpu.memory_space<vmem>>, vector<128x128xbf16>
    %cst_37 = arith.constant dense<0.000000e+00> : vector<128x128xf32>
    %48 = tpu.matmul %46, %47, %cst_37 {dimension_numbers = #tpu.dot_dimension_numbers<[1], [0], [0], [1], [0, 0, 1, 1], [], []>} : vector<128x128xbf16>, vector<128x128xbf16>, vector<128x128xf32> -> vector<128x128xf32>
    %49 = arith.addf %45, %48 : vector<128x128xf32>
    %50 = vector.extract_strided_slice %34 {offsets = [512, 0], sizes = [128, 128], strides = [1, 1]} : vector<1024x128xbf16> to vector<128x128xbf16>
    %c512 = arith.constant 512 : index
    %c0_38 = arith.constant 0 : index
    %51 = vector.load %arg4[%c512, %c0_38] : memref<1024x128xbf16, #tpu.memory_space<vmem>>, vector<128x128xbf16>
    %cst_39 = arith.constant dense<0.000000e+00> : vector<128x128xf32>
    %52 = tpu.matmul %50, %51, %cst_39 {dimension_numbers = #tpu.dot_dimension_numbers<[1], [0], [0], [1], [0, 0, 1, 1], [], []>} : vector<128x128xbf16>, vector<128x128xbf16>, vector<128x128xf32> -> vector<128x128xf32>
    %53 = arith.addf %49, %52 : vector<128x128xf32>
    %54 = vector.extract_strided_slice %34 {offsets = [640, 0], sizes = [128, 128], strides = [1, 1]} : vector<1024x128xbf16> to vector<128x128xbf16>
    %c640 = arith.constant 640 : index
    %c0_40 = arith.constant 0 : index
    %55 = vector.load %arg4[%c640, %c0_40] : memref<1024x128xbf16, #tpu.memory_space<vmem>>, vector<128x128xbf16>
    %cst_41 = arith.constant dense<0.000000e+00> : vector<128x128xf32>
    %56 = tpu.matmul %54, %55, %cst_41 {dimension_numbers = #tpu.dot_dimension_numbers<[1], [0], [0], [1], [0, 0, 1, 1], [], []>} : vector<128x128xbf16>, vector<128x128xbf16>, vector<128x128xf32> -> vector<128x128xf32>
    %57 = arith.addf %53, %56 : vector<128x128xf32>
    %58 = vector.extract_strided_slice %34 {offsets = [768, 0], sizes = [128, 128], strides = [1, 1]} : vector<1024x128xbf16> to vector<128x128xbf16>
    %c768 = arith.constant 768 : index
    %c0_42 = arith.constant 0 : index
    %59 = vector.load %arg4[%c768, %c0_42] : memref<1024x128xbf16, #tpu.memory_space<vmem>>, vector<128x128xbf16>
    %cst_43 = arith.constant dense<0.000000e+00> : vector<128x128xf32>
    %60 = tpu.matmul %58, %59, %cst_43 {dimension_numbers = #tpu.dot_dimension_numbers<[1], [0], [0], [1], [0, 0, 1, 1], [], []>} : vector<128x128xbf16>, vector<128x128xbf16>, vector<128x128xf32> -> vector<128x128xf32>
    %61 = arith.addf %57, %60 : vector<128x128xf32>
    %62 = vector.extract_strided_slice %34 {offsets = [896, 0], sizes = [128, 128], strides = [1, 1]} : vector<1024x128xbf16> to vector<128x128xbf16>
    %c896 = arith.constant 896 : index
    %c0_44 = arith.constant 0 : index
    %63 = vector.load %arg4[%c896, %c0_44] : memref<1024x128xbf16, #tpu.memory_space<vmem>>, vector<128x128xbf16>
    %cst_45 = arith.constant dense<0.000000e+00> : vector<128x128xf32>
    %64 = tpu.matmul %62, %63, %cst_45 {dimension_numbers = #tpu.dot_dimension_numbers<[1], [0], [0], [1], [0, 0, 1, 1], [], []>} : vector<128x128xbf16>, vector<128x128xbf16>, vector<128x128xf32> -> vector<128x128xf32>
    %65 = arith.addf %61, %64 : vector<128x128xf32>
    %c0_46 = arith.constant 0 : index
    %c0_47 = arith.constant 0 : index
    %66 = vector.load %arg5[%c0_46, %c0_47] : memref<1x128xf32, #tpu.memory_space<vmem>>, vector<1x128xf32>
    %67 = vector.broadcast %66 : vector<1x128xf32> to vector<128x128xf32>
    %68 = arith.addf %65, %67 : vector<128x128xf32>
    %69 = arith.truncf %68 : vector<128x128xf32> to vector<128x128xbf16>
    %70 = vector.extract_strided_slice %69 {offsets = [0, 0], sizes = [32, 128], strides = [1, 1]} : vector<128x128xbf16> to vector<32x128xbf16>
    %c0_48 = arith.constant 0 : index
    %c0_49 = arith.constant 0 : index
    %71 = vector.load %arg6[%c0_48, %c0_49] : memref<512x128xbf16, #tpu.memory_space<vmem>>, vector<128x128xbf16>
    %cst_50 = arith.constant dense<0.000000e+00> : vector<32x128xf32>
    %72 = tpu.matmul %70, %71, %cst_50 {dimension_numbers = #tpu.dot_dimension_numbers<[1], [0], [0], [1], [0, 0, 1, 1], [], []>} : vector<32x128xbf16>, vector<128x128xbf16>, vector<32x128xf32> -> vector<32x128xf32>
    %73 = vector.extract_strided_slice %69 {offsets = [32, 0], sizes = [32, 128], strides = [1, 1]} : vector<128x128xbf16> to vector<32x128xbf16>
    %c128_51 = arith.constant 128 : index
    %c0_52 = arith.constant 0 : index
    %74 = vector.load %arg6[%c128_51, %c0_52] : memref<512x128xbf16, #tpu.memory_space<vmem>>, vector<128x128xbf16>
    %cst_53 = arith.constant dense<0.000000e+00> : vector<32x128xf32>
    %75 = tpu.matmul %73, %74, %cst_53 {dimension_numbers = #tpu.dot_dimension_numbers<[1], [0], [0], [1], [0, 0, 1, 1], [], []>} : vector<32x128xbf16>, vector<128x128xbf16>, vector<32x128xf32> -> vector<32x128xf32>
    %76 = arith.addf %72, %75 : vector<32x128xf32>
    %77 = vector.extract_strided_slice %69 {offsets = [64, 0], sizes = [32, 128], strides = [1, 1]} : vector<128x128xbf16> to vector<32x128xbf16>
    %c256_54 = arith.constant 256 : index
    %c0_55 = arith.constant 0 : index
    %78 = vector.load %arg6[%c256_54, %c0_55] : memref<512x128xbf16, #tpu.memory_space<vmem>>, vector<128x128xbf16>
    %cst_56 = arith.constant dense<0.000000e+00> : vector<32x128xf32>
    %79 = tpu.matmul %77, %78, %cst_56 {dimension_numbers = #tpu.dot_dimension_numbers<[1], [0], [0], [1], [0, 0, 1, 1], [], []>} : vector<32x128xbf16>, vector<128x128xbf16>, vector<32x128xf32> -> vector<32x128xf32>
    %80 = arith.addf %76, %79 : vector<32x128xf32>
    %81 = vector.extract_strided_slice %69 {offsets = [96, 0], sizes = [32, 128], strides = [1, 1]} : vector<128x128xbf16> to vector<32x128xbf16>
    %c384_57 = arith.constant 384 : index
    %c0_58 = arith.constant 0 : index
    %82 = vector.load %arg6[%c384_57, %c0_58] : memref<512x128xbf16, #tpu.memory_space<vmem>>, vector<128x128xbf16>
    %cst_59 = arith.constant dense<0.000000e+00> : vector<32x128xf32>
    %83 = tpu.matmul %81, %82, %cst_59 {dimension_numbers = #tpu.dot_dimension_numbers<[1], [0], [0], [1], [0, 0, 1, 1], [], []>} : vector<32x128xbf16>, vector<128x128xbf16>, vector<32x128xf32> -> vector<32x128xf32>
    %84 = arith.addf %80, %83 : vector<32x128xf32>
    %c0_60 = arith.constant 0 : index
    %c0_61 = arith.constant 0 : index
    %85 = vector.load %arg7[%c0_60, %c0_61] : memref<1x128xf32, #tpu.memory_space<vmem>>, vector<1x128xf32>
    %86 = vector.broadcast %85 : vector<1x128xf32> to vector<32x128xf32>
    %87 = arith.addf %84, %86 : vector<32x128xf32>
    %88 = arith.truncf %87 : vector<32x128xf32> to vector<32x128xbf16>
    %89 = vector.extract_strided_slice %88 {offsets = [0, 0], sizes = [8, 128], strides = [1, 1]} : vector<32x128xbf16> to vector<8x128xbf16>
    %c0_62 = arith.constant 0 : index
    %c0_63 = arith.constant 0 : index
    %90 = vector.load %arg8[%c0_62, %c0_63] : memref<512x64xbf16, #tpu.memory_space<vmem>>, vector<128x64xbf16>
    %cst_64 = arith.constant dense<0.000000e+00> : vector<8x64xf32>
    %91 = tpu.matmul %89, %90, %cst_64 {dimension_numbers = #tpu.dot_dimension_numbers<[1], [0], [0], [1], [0, 0, 1, 1], [], []>} : vector<8x128xbf16>, vector<128x64xbf16>, vector<8x64xf32> -> vector<8x64xf32>
    %92 = vector.extract_strided_slice %88 {offsets = [8, 0], sizes = [8, 128], strides = [1, 1]} : vector<32x128xbf16> to vector<8x128xbf16>
    %c128_65 = arith.constant 128 : index
    %c0_66 = arith.constant 0 : index
    %93 = vector.load %arg8[%c128_65, %c0_66] : memref<512x64xbf16, #tpu.memory_space<vmem>>, vector<128x64xbf16>
    %cst_67 = arith.constant dense<0.000000e+00> : vector<8x64xf32>
    %94 = tpu.matmul %92, %93, %cst_67 {dimension_numbers = #tpu.dot_dimension_numbers<[1], [0], [0], [1], [0, 0, 1, 1], [], []>} : vector<8x128xbf16>, vector<128x64xbf16>, vector<8x64xf32> -> vector<8x64xf32>
    %95 = arith.addf %91, %94 : vector<8x64xf32>
    %96 = vector.extract_strided_slice %88 {offsets = [16, 0], sizes = [8, 128], strides = [1, 1]} : vector<32x128xbf16> to vector<8x128xbf16>
    %c256_68 = arith.constant 256 : index
    %c0_69 = arith.constant 0 : index
    %97 = vector.load %arg8[%c256_68, %c0_69] : memref<512x64xbf16, #tpu.memory_space<vmem>>, vector<128x64xbf16>
    %cst_70 = arith.constant dense<0.000000e+00> : vector<8x64xf32>
    %98 = tpu.matmul %96, %97, %cst_70 {dimension_numbers = #tpu.dot_dimension_numbers<[1], [0], [0], [1], [0, 0, 1, 1], [], []>} : vector<8x128xbf16>, vector<128x64xbf16>, vector<8x64xf32> -> vector<8x64xf32>
    %99 = arith.addf %95, %98 : vector<8x64xf32>
    %100 = vector.extract_strided_slice %88 {offsets = [24, 0], sizes = [8, 128], strides = [1, 1]} : vector<32x128xbf16> to vector<8x128xbf16>
    %c384_71 = arith.constant 384 : index
    %c0_72 = arith.constant 0 : index
    %101 = vector.load %arg8[%c384_71, %c0_72] : memref<512x64xbf16, #tpu.memory_space<vmem>>, vector<128x64xbf16>
    %cst_73 = arith.constant dense<0.000000e+00> : vector<8x64xf32>
    %102 = tpu.matmul %100, %101, %cst_73 {dimension_numbers = #tpu.dot_dimension_numbers<[1], [0], [0], [1], [0, 0, 1, 1], [], []>} : vector<8x128xbf16>, vector<128x64xbf16>, vector<8x64xf32> -> vector<8x64xf32>
    %103 = arith.addf %99, %102 : vector<8x64xf32>
    %c0_74 = arith.constant 0 : index
    %c0_75 = arith.constant 0 : index
    %104 = vector.load %arg9[%c0_74, %c0_75] : memref<1x64xf32, #tpu.memory_space<vmem>>, vector<1x64xf32>
    %105 = vector.broadcast %104 : vector<1x64xf32> to vector<8x64xf32>
    %106 = arith.addf %103, %105 : vector<8x64xf32>
    %107 = arith.truncf %106 : vector<8x64xf32> to vector<8x64xbf16>
    %c0_76 = arith.constant 0 : index
    %c0_77 = arith.constant 0 : index
    %108 = vector.load %arg10[%c0_76, %c0_77] : memref<256x32xbf16, #tpu.memory_space<vmem>>, vector<64x32xbf16>
    %cst_78 = arith.constant dense<0.000000e+00> : vector<8x32xf32>
    %109 = tpu.matmul %107, %108, %cst_78 {dimension_numbers = #tpu.dot_dimension_numbers<[1], [0], [0], [1], [0, 0, 1, 1], [], []>} : vector<8x64xbf16>, vector<64x32xbf16>, vector<8x32xf32> -> vector<8x32xf32>
    %110 = vector.extract_strided_slice %109 {offsets = [0, 0], sizes = [2, 32], strides = [1, 1]} : vector<8x32xf32> to vector<2x32xf32>
    %c64_79 = arith.constant 64 : index
    %c0_80 = arith.constant 0 : index
    %111 = vector.load %arg10[%c64_79, %c0_80] : memref<256x32xbf16, #tpu.memory_space<vmem>>, vector<64x32xbf16>
    %cst_81 = arith.constant dense<0.000000e+00> : vector<8x32xf32>
    %112 = tpu.matmul %107, %111, %cst_81 {dimension_numbers = #tpu.dot_dimension_numbers<[1], [0], [0], [1], [0, 0, 1, 1], [], []>} : vector<8x64xbf16>, vector<64x32xbf16>, vector<8x32xf32> -> vector<8x32xf32>
    %113 = vector.extract_strided_slice %112 {offsets = [2, 0], sizes = [2, 32], strides = [1, 1]} : vector<8x32xf32> to vector<2x32xf32>
    %114 = arith.addf %110, %113 : vector<2x32xf32>
    %c128_82 = arith.constant 128 : index
    %c0_83 = arith.constant 0 : index
    %115 = vector.load %arg10[%c128_82, %c0_83] : memref<256x32xbf16, #tpu.memory_space<vmem>>, vector<64x32xbf16>
    %cst_84 = arith.constant dense<0.000000e+00> : vector<8x32xf32>
    %116 = tpu.matmul %107, %115, %cst_84 {dimension_numbers = #tpu.dot_dimension_numbers<[1], [0], [0], [1], [0, 0, 1, 1], [], []>} : vector<8x64xbf16>, vector<64x32xbf16>, vector<8x32xf32> -> vector<8x32xf32>
    %117 = vector.extract_strided_slice %116 {offsets = [4, 0], sizes = [2, 32], strides = [1, 1]} : vector<8x32xf32> to vector<2x32xf32>
    %118 = arith.addf %114, %117 : vector<2x32xf32>
    %c192_85 = arith.constant 192 : index
    %c0_86 = arith.constant 0 : index
    %119 = vector.load %arg10[%c192_85, %c0_86] : memref<256x32xbf16, #tpu.memory_space<vmem>>, vector<64x32xbf16>
    %cst_87 = arith.constant dense<0.000000e+00> : vector<8x32xf32>
    %120 = tpu.matmul %107, %119, %cst_87 {dimension_numbers = #tpu.dot_dimension_numbers<[1], [0], [0], [1], [0, 0, 1, 1], [], []>} : vector<8x64xbf16>, vector<64x32xbf16>, vector<8x32xf32> -> vector<8x32xf32>
    %121 = vector.extract_strided_slice %120 {offsets = [6, 0], sizes = [2, 32], strides = [1, 1]} : vector<8x32xf32> to vector<2x32xf32>
    %122 = arith.addf %118, %121 : vector<2x32xf32>
    %c0_88 = arith.constant 0 : index
    %c0_89 = arith.constant 0 : index
    %123 = vector.load %arg11[%c0_88, %c0_89] : memref<1x32xf32, #tpu.memory_space<vmem>>, vector<1x32xf32>
    %124 = vector.broadcast %123 : vector<1x32xf32> to vector<2x32xf32>
    %125 = arith.addf %122, %124 : vector<2x32xf32>
    %c0_90 = arith.constant 0 : index
    %c0_91 = arith.constant 0 : index
    %126 = vector.load %arg12[%c0_90, %c0_91] : memref<2x32xf32, #tpu.memory_space<vmem>>, vector<2x32xf32>
    tpu.vector_store %arg12[%c0_90, %c0_91], %125 {strides = array<i32>} : memref<2x32xf32, #tpu.memory_space<vmem>>, vector<2x32xf32>,
    return
  }
  func.func @transform_0(%arg0: i32) -> (i32, i32) {
    %c0_i32 = arith.constant 0 : i32
    %c0_i32_0 = arith.constant 0 : i32
    %c0_i32_1 = arith.constant 0 : i32
    return %c0_i32, %c0_i32_0 : i32, i32
  }
  func.func @transform_1(%arg0: i32) -> (i32, i32) {
    %c0_i32 = arith.constant 0 : i32
    %c0_i32_0 = arith.constant 0 : i32
    %c0_i32_1 = arith.constant 0 : i32
    return %c0_i32, %c0_i32_0 : i32, i32
  }
  func.func @transform_2(%arg0: i32) -> (i32, i32) {
    %c0_i32 = arith.constant 0 : i32
    %c0_i32_0 = arith.constant 0 : i32
    %c0_i32_1 = arith.constant 0 : i32
    return %c0_i32, %c0_i32_0 : i32, i32
  }
  func.func @transform_3(%arg0: i32) -> (i32, i32) {
    %c0_i32 = arith.constant 0 : i32
    %c0_i32_0 = arith.constant 0 : i32
    %c0_i32_1 = arith.constant 0 : i32
    return %c0_i32, %c0_i32_0 : i32, i32
  }
  func.func @transform_4(%arg0: i32) -> (i32, i32) {
    %c0_i32 = arith.constant 0 : i32
    %c0_i32_0 = arith.constant 0 : i32
    %c0_i32_1 = arith.constant 0 : i32
    return %c0_i32, %c0_i32_0 : i32, i32
  }
  func.func @transform_5(%arg0: i32) -> (i32, i32) {
    %c0_i32 = arith.constant 0 : i32
    %c0_i32_0 = arith.constant 0 : i32
    %c0_i32_1 = arith.constant 0 : i32
    return %c0_i32, %c0_i32_0 : i32, i32
  }
  func.func @transform_6(%arg0: i32) -> (i32, i32) {
    %c0_i32 = arith.constant 0 : i32
    %c0_i32_0 = arith.constant 0 : i32
    %c0_i32_1 = arith.constant 0 : i32
    return %c0_i32, %c0_i32_0 : i32, i32
  }
  func.func @transform_7(%arg0: i32) -> (i32, i32) {
    %c0_i32 = arith.constant 0 : i32
    %c0_i32_0 = arith.constant 0 : i32
    %c0_i32_1 = arith.constant 0 : i32
    return %c0_i32, %c0_i32_0 : i32, i32
  }
  func.func @transform_8(%arg0: i32) -> (i32, i32) {
    %c0_i32 = arith.constant 0 : i32
    %c0_i32_0 = arith.constant 0 : i32
    %c0_i32_1 = arith.constant 0 : i32
    return %c0_i32, %c0_i32_0 : i32, i32
  }
  func.func @transform_9(%arg0: i32) -> (i32, i32) {
    %c0_i32 = arith.constant 0 : i32
    %c0_i32_0 = arith.constant 0 : i32
    %c0_i32_1 = arith.constant 0 : i32
    return %c0_i32, %c0_i32_0 : i32, i32
  }
  func.func @transform_10(%arg0: i32) -> (i32, i32) {
    %c0_i32 = arith.constant 0 : i32
    %c0_i32_0 = arith.constant 0 : i32
    %c0_i32_1 = arith.constant 0 : i32
    return %c0_i32, %c0_i32_0 : i32, i32
  }
  func.func @transform_11(%arg0: i32) -> (i32, i32) {
    %c0_i32 = arith.constant 0 : i32
    %c0_i32_0 = arith.constant 0 : i32
    %c0_i32_1 = arith.constant 0 : i32
    return %c0_i32, %c0_i32_0 : i32, i32
  }
}

</mosaic_0001>

<bundles_post_ra>
// kernel: volume_to_scalar_forward.2
= control target key start
LH: loop header
LB: loop body
LE: loop exit
PB: predicated region body
PF: predicated region fallthrough
CT: control target
= control target key end

     0   :  { %s5887_s12 = smov 0   ;;  %s7149_s0 = inlined_call_operand.vmem [shape: bf16[8192,240], index: 0, kind: input, shape index: {}]   ;;  %s7150_s1 = inlined_call_operand.vmem [shape: bf16[240,64], index: 1, kind: input, shape index: {}]   ;;  %s7151_s2 = inlined_call_operand.vmem [shape: f32[1,64], index: 2, kind: input, shape index: {}]   ;;  %s7152_s3 = inlined_call_operand.vmem [shape: bf16[8192,64], index: 3, kind: output, shape index: {}]  }
   0x1 LB: > { %s4492_s13 = sadd.s32 4294967295, %s5864_s12   ;;  %p4496_p0 = scmp.ge.s32.totalorder %s5864_s12, 1  ;;  %s5864_s12 = sphi %s5887_s12, %s13_s12  }
   0x2   : > { %p139_p1 = scmp.lt.s32.totalorder %s5864_s12, 5 }
   0x4   : > { %p140_p2 = pnand %p4496_p0, %p139_p1 }
   0x5   : > { %v5456_v0 = vld [vmem:[%s7150_s1] sm:$0xff] (!%p140_p2)   ;;  %v5866_v1 = vmov (!%p140_p2), 0   ;;  %s4497_s16 = sshll.u32 (!%p140_p2), %s4492_s13, 8  ;;  %v5457_v2 = vld [vmem:[%s7150_s1 + $0x8] sm:$0xff] (!%p140_p2)   ;;  %v5458_v3 = vld [vmem:[%s7150_s1 + $0x10] sm:$0xff] (!%p140_p2)   ;;  %vm1713_vm0 = vcmask (!%p140_p2), 916480  }
   0x6   : > { %143 = sbr.rel (%p140_p2) target bundleno = 789 (0x315), region = 32  ;;  %2098 = vmatprep.subr.bf16.mxu0 (!%p140_p2), %v5866_v1  ;;  %5417 = vmatprep.subr.bf16.mxu1 (!%p140_p2), %v5866_v1  ;;  %p165_p3 = scmp.lt.s32.totalorder (!%p140_p2), %s4497_s16, 1023  ;;  %v5459_v4 = vld [vmem:[%s7150_s1 + $0x18] sm:$0xff] (!%p140_p2)   ;;  %v5460_v5 = vld [vmem:[%s7150_s1 + $0x20] sm:$0xff] (!%p140_p2)   ;;  %v5461_v8 = vld [vmem:[%s7150_s1 + $0x28] sm:$0xff] (!%p140_p2)   ;;  %vm4179_vm1 = vcmask (!%p140_p2), 519168  }
   0x7   : > { %2099 = vmatpush1.bf16.msra.mxu0 (!%p140_p2), %v5456_v0  ;;  %5432 = vmatpush1.bf16.msra.mxu1 (!%p140_p2), %v5456_v0  ;;  %v5462_v9 = vld [vmem:[%s7150_s1 + $0x30] sm:$0xff] (!%p140_p2)   ;;  %v5463_v10 = vld [vmem:[%s7150_s1 + $0x38] sm:$0xff] (!%p140_p2)   ;;  %v5464_v11 = vld [vmem:[%s7150_s1 + $0x40] sm:$0xff] (!%p140_p2)  }
   0x8   : > { %2100 = vmatprep.subr.bf16.mxu0 (!%p140_p2), %v5866_v1  ;;  %5418 = vmatprep.subr.bf16.mxu1 (!%p140_p2), %v5866_v1  ;;  %v5465_v12 = vld [vmem:[%s7150_s1 + $0x48] sm:$0xff] (!%p140_p2)   ;;  %v5466_v13 = vld [vmem:[%s7150_s1 + $0x50] sm:$0xff] (!%p140_p2)   ;;  %v5467_v14 = vld [vmem:[%s7150_s1 + $0x58] sm:$0xff] (!%p140_p2)  }
   0x9   : > { %v5468_v15 = vld [vmem:[%s7150_s1 + $0x60] sm:$0xff] (!%p140_p2)   ;;  %v5469_v16 = vld [vmem:[%s7150_s1 + $0x68] sm:$0xff] (!%p140_p2)   ;;  %v5470_v17 = vld [vmem:[%s7150_s1 + $0x70] sm:$0xff] (!%p140_p2)  }
   0xb   : > { %2101 = vmatpush1.bf16.msra.mxu0 (!%p140_p2), %v5457_v2  ;;  %5433 = vmatpush1.bf16.msra.mxu1 (!%p140_p2), %v5457_v2 }
   0xc   : > { %2102 = vmatprep.subr.bf16.mxu0 (!%p140_p2), %v5866_v1  ;;  %5419 = vmatprep.subr.bf16.mxu1 (!%p140_p2), %v5866_v1 }
   0xd   : > { %s7154_s16 = smov (!%p165_p3, %s4497_s16), 1023 }
   0xe   : > { %s5160_s23 = sshll.u32 %s7154_s16, 3  ;;  %s4501_s27 = sshll.u32 %s7154_s16, 2 }
   0xf   : > { %2103 = vmatpush1.bf16.msra.mxu0 %v5458_v3  ;;  %5434 = vmatpush1.bf16.msra.mxu1 %v5458_v3  ;;  %s5921_s26 = scalar_lea.vmem %s7149_s0, %s5160_s23  ;;  %s6157_s30 = scalar_lea.vmem %s7152_s3, %s4501_s27 }
  0x10   : > { %2104 = vmatprep.subr.bf16.mxu0 %v5866_v1  ;;  %5420 = vmatprep.subr.bf16.mxu1 %v5866_v1  ;;  %v5473_v6 = vld [vmem:[%s5921_s26 + $0x4] ss:$8 sps:$4 sm:$0xff]   ;;  %v5471_v18 = vld [vmem:[%s5921_s26] ss:$8 sps:$4 sm:$0xff]   ;;  %v5477_v20 = vld [vmem:[%s5921_s26 + $0x14] ss:$8 sps:$4 sm:$0xff]  }
  0x11   : > { %v5476_v7 = vld [vmem:[%s5921_s26 + $0x404] ss:$8 sps:$4 sm:$0xff]   ;;  %4774 = vmatprep.mubr.msk.bf16.mxu0 %vm1713_vm0, %v5473_v6  ;;  %v5474_v19 = vld [vmem:[%s5921_s26 + $0x400] ss:$8 sps:$4 sm:$0xff]   ;;  %v5479_v21 = vld [vmem:[%s5921_s26 + $0x414] ss:$8 sps:$4 sm:$0xff]  }
  0x12   : > { %4838 = vmatprep.mubr.msk.bf16.mxu1 %vm1713_vm0, %v5476_v7  ;;  %v5481_v22 = vld [vmem:[%s5921_s26 + $0x10] ss:$8 sps:$4 sm:$0xff]   ;;  %v5483_v24 = vld [vmem:[%s5921_s26 + $0x24] ss:$8 sps:$4 sm:$0xff]   ;;  %v5487_v26 = vld [vmem:[%s5921_s26 + $0x20] ss:$8 sps:$4 sm:$0xff]  }
  0x13   : > { %2105 = vmatpush1.bf16.msra.mxu0 %v5459_v4  ;;  %5435 = vmatpush1.bf16.msra.mxu1 %v5459_v4  ;;  %v5482_v23 = vld [vmem:[%s5921_s26 + $0x410] ss:$8 sps:$4 sm:$0xff]   ;;  %v5485_v25 = vld [vmem:[%s5921_s26 + $0x424] ss:$8 sps:$4 sm:$0xff]   ;;  %v5488_v27 = vld [vmem:[%s5921_s26 + $0x420] ss:$8 sps:$4 sm:$0xff]  }
  0x14   : > { %2106 = vmatprep.subr.bf16.mxu0 %v5866_v1  ;;  %5421 = vmatprep.subr.bf16.mxu1 %v5866_v1  ;;  %v5489_v28 = vld [vmem:[%s5921_s26 + $0x34] ss:$8 sps:$4 sm:$0xff]   ;;  %v5493_v30 = vld [vmem:[%s5921_s26 + $0x30] ss:$8 sps:$4 sm:$0xff]   ;;  %v5495_v32 = vld [vmem:[%s5921_s26 + $0x44] ss:$8 sps:$4 sm:$0xff]  }
  0x15   : > { %v5491_v29 = vld [vmem:[%s5921_s26 + $0x434] ss:$8 sps:$4 sm:$0xff]   ;;  %v5494_v31 = vld [vmem:[%s5921_s26 + $0x430] ss:$8 sps:$4 sm:$0xff]   ;;  %v5497_v33 = vld [vmem:[%s5921_s26 + $0x444] ss:$8 sps:$4 sm:$0xff]  }
  0x16   : > { %v5499_v34 = vld [vmem:[%s5921_s26 + $0x40] ss:$8 sps:$4 sm:$0xff]   ;;  %v5501_v36 = vld [vmem:[%s5921_s26 + $0x54] ss:$8 sps:$4 sm:$0xff]   ;;  %v5505_v38 = vld [vmem:[%s5921_s26 + $0x50] ss:$8 sps:$4 sm:$0xff]  }
  0x17   : > { %2107 = vmatpush1.bf16.msra.mxu0 %v5460_v5  ;;  %5436 = vmatpush1.bf16.msra.mxu1 %v5460_v5  ;;  %v5500_v35 = vld [vmem:[%s5921_s26 + $0x440] ss:$8 sps:$4 sm:$0xff]   ;;  %v5503_v37 = vld [vmem:[%s5921_s26 + $0x454] ss:$8 sps:$4 sm:$0xff]   ;;  %v5506_v39 = vld [vmem:[%s5921_s26 + $0x450] ss:$8 sps:$4 sm:$0xff]  }
  0x18   : > { %2108 = vmatprep.subr.bf16.mxu0 %v5866_v1  ;;  %5422 = vmatprep.subr.bf16.mxu1 %v5866_v1  ;;  %v5507_v40 = vld [vmem:[%s5921_s26 + $0x64] ss:$8 sps:$4 sm:$0xff]   ;;  %v5511_v42 = vld [vmem:[%s5921_s26 + $0x60] ss:$8 sps:$4 sm:$0xff]   ;;  %v5513_v44 = vld [vmem:[%s5921_s26 + $0x74] ss:$8 sps:$4 sm:$0xff]  }
  0x19   : > { %v5509_v41 = vld [vmem:[%s5921_s26 + $0x464] ss:$8 sps:$4 sm:$0xff]   ;;  %v5512_v43 = vld [vmem:[%s5921_s26 + $0x460] ss:$8 sps:$4 sm:$0xff]   ;;  %v5515_v45 = vld [vmem:[%s5921_s26 + $0x474] ss:$8 sps:$4 sm:$0xff]  }
  0x1a   : > { %v5517_v46 = vld [vmem:[%s5921_s26 + $0x70] ss:$8 sps:$4 sm:$0xff]   ;;  %v5519_v48 = vld [vmem:[%s5921_s26 + $0x84] ss:$8 sps:$4 sm:$0xff]   ;;  %v5523_v50 = vld [vmem:[%s5921_s26 + $0x80] ss:$8 sps:$4 sm:$0xff]  }
  0x1b   : > { %2109 = vmatpush1.bf16.msra.mxu0 %v5461_v8  ;;  %5437 = vmatpush1.bf16.msra.mxu1 %v5461_v8  ;;  %v5518_v47 = vld [vmem:[%s5921_s26 + $0x470] ss:$8 sps:$4 sm:$0xff]   ;;  %v5521_v49 = vld [vmem:[%s5921_s26 + $0x484] ss:$8 sps:$4 sm:$0xff]   ;;  %v5524_v51 = vld [vmem:[%s5921_s26 + $0x480] ss:$8 sps:$4 sm:$0xff]  }
  0x1c   : > { %2110 = vmatprep.subr.bf16.mxu0 %v5866_v1  ;;  %5423 = vmatprep.subr.bf16.mxu1 %v5866_v1  ;;  %v5525_v52 = vld [vmem:[%s5921_s26 + $0x94] ss:$8 sps:$4 sm:$0xff]   ;;  %v5529_v54 = vld [vmem:[%s5921_s26 + $0x90] ss:$8 sps:$4 sm:$0xff]   ;;  %v5531_v56 = vld [vmem:[%s5921_s26 + $0xa4] ss:$8 sps:$4 sm:$0xff]  }
  0x1d   : > { %v5527_v53 = vld [vmem:[%s5921_s26 + $0x494] ss:$8 sps:$4 sm:$0xff]   ;;  %v5530_v55 = vld [vmem:[%s5921_s26 + $0x490] ss:$8 sps:$4 sm:$0xff]   ;;  %v5533_v57 = vld [vmem:[%s5921_s26 + $0x4a4] ss:$8 sps:$4 sm:$0xff]  }
  0x1e   : > { %v5535_v58 = vld [vmem:[%s5921_s26 + $0xa0] ss:$8 sps:$4 sm:$0xff]   ;;  %v5537_v60 = vld [vmem:[%s5921_s26 + $0xb4] ss:$8 sps:$4 sm:$0xff]   ;;  %v5541_v62 = vld [vmem:[%s5921_s26 + $0xb0] ss:$8 sps:$4 sm:$0xff]  }
  0x1f   : > { %2111 = vmatpush1.bf16.msra.mxu0 %v5462_v9  ;;  %5438 = vmatpush1.bf16.msra.mxu1 %v5462_v9  ;;  %v5536_v59 = vld [vmem:[%s5921_s26 + $0x4a0] ss:$8 sps:$4 sm:$0xff]   ;;  %v5539_v61 = vld [vmem:[%s5921_s26 + $0x4b4] ss:$8 sps:$4 sm:$0xff]   ;;  %v5542_v63 = vld [vmem:[%s5921_s26 + $0x4b0] ss:$8 sps:$4 sm:$0xff]  }
  0x20   : > { %2112 = vmatprep.subr.bf16.mxu0 %v5866_v1  ;;  %5424 = vmatprep.subr.bf16.mxu1 %v5866_v1  ;;  %v5543_v0 = vld [vmem:[%s5921_s26 + $0xc4] ss:$8 sps:$4 sm:$0xff]   ;;  %v5547_v2 = vld [vmem:[%s5921_s26 + $0xc0] ss:$8 sps:$4 sm:$0xff]   ;;  %v5549_v4 = vld [vmem:[%s5921_s26 + $0xd4] ss:$8 sps:$4 sm:$0xff]  }
  0x21   : > { %v5548_v3 = vld [vmem:[%s5921_s26 + $0x4c0] ss:$8 sps:$4 sm:$0xff]   ;;  %v5551_v5 = vld [vmem:[%s5921_s26 + $0x4d4] ss:$8 sps:$4 sm:$0xff]   ;;  %v5553_v6 = vld [vmem:[%s5921_s26 + $0xd0] ss:$8 sps:$4 sm:$0xff]  }
  0x22   : > { %v5554_v7 = vld [vmem:[%s5921_s26 + $0x4d0] ss:$8 sps:$4 sm:$0xff]   ;;  %v5555_v8 = vld [vmem:[%s5921_s26 + $0xe4] ss:$8 sps:$4 sm:$0xff]  }
  0x23   : > { %2113 = vmatpush1.bf16.msra.mxu0 %v5463_v10  ;;  %5439 = vmatpush1.bf16.msra.mxu1 %v5463_v10  ;;  %v5557_v9 = vld [vmem:[%s5921_s26 + $0x4e4] ss:$8 sps:$4 sm:$0xff]   ;;  %v5559_v10 = vld [vmem:[%s5921_s26 + $0xe0] ss:$8 sps:$4 sm:$0xff]  }
  0x24   : > { %2114 = vmatprep.subr.bf16.mxu0 %v5866_v1  ;;  %5425 = vmatprep.subr.bf16.mxu1 %v5866_v1 }
  0x27   : > { %2115 = vmatpush1.bf16.msra.mxu0 %v5464_v11  ;;  %5440 = vmatpush1.bf16.msra.mxu1 %v5464_v11  ;;  %v5560_v11 = vld [vmem:[%s5921_s26 + $0x4e0] ss:$8 sps:$4 sm:$0xff]  }
  0x28   : > { %2116 = vmatprep.subr.bf16.mxu0 %v5866_v1  ;;  %5426 = vmatprep.subr.bf16.mxu1 %v5866_v1 }
  0x2b   : > { %2117 = vmatpush1.bf16.msra.mxu0 %v5465_v12  ;;  %5441 = vmatpush1.bf16.msra.mxu1 %v5465_v12  ;;  %v5561_v12 = vld [vmem:[%s5921_s26 + $0xf4] ss:$8 sps:$4 sm:$0xff]  }
  0x2c   : > { %2118 = vmatprep.subr.bf16.mxu0 %v5866_v1  ;;  %5427 = vmatprep.subr.bf16.mxu1 %v5866_v1 }
  0x2f   : > { %2119 = vmatpush1.bf16.msra.mxu0 %v5466_v13  ;;  %5442 = vmatpush1.bf16.msra.mxu1 %v5466_v13  ;;  %v5563_v13 = vld [vmem:[%s5921_s26 + $0x4f4] ss:$8 sps:$4 sm:$0xff]  }
  0x30   : > { %2120 = vmatprep.subr.bf16.mxu0 %v5866_v1  ;;  %5428 = vmatprep.subr.bf16.mxu1 %v5866_v1 }
  0x33   : > { %2121 = vmatpush1.bf16.msra.mxu0 %v5467_v14  ;;  %5443 = vmatpush1.bf16.msra.mxu1 %v5467_v14  ;;  %v5565_v14 = vld [vmem:[%s5921_s26 + $0xf0] ss:$8 sps:$4 sm:$0xff]  }
  0x34   : > { %2122 = vmatprep.subr.bf16.mxu0 %v5866_v1  ;;  %5429 = vmatprep.subr.bf16.mxu1 %v5866_v1 }
  0x37   : > { %2123 = vmatpush1.bf16.msra.mxu0 %v5468_v15  ;;  %5444 = vmatpush1.bf16.msra.mxu1 %v5468_v15  ;;  %v5566_v15 = vld [vmem:[%s5921_s26 + $0x4f0] ss:$8 sps:$4 sm:$0xff]  }
  0x38   : > { %2124 = vmatprep.subr.bf16.mxu0 %v5866_v1  ;;  %5430 = vmatprep.subr.bf16.mxu1 %v5866_v1 }
  0x3b   : > { %2125 = vmatpush1.bf16.msra.mxu0 %v5469_v16  ;;  %5445 = vmatpush1.bf16.msra.mxu1 %v5469_v16  ;;  %v5567_v16 = vld [vmem:[%s5921_s26 + $0x104] ss:$8 sps:$4 sm:$0xff]  }
  0x3c   : > { %2126 = vmatprep.subr.bf16.mxu0 %v5866_v1  ;;  %5431 = vmatprep.subr.bf16.mxu1 %v5866_v1  ;;  %v5545_v1 = vld [vmem:[%s5921_s26 + $0x4c4] ss:$8 sps:$4 sm:$0xff]  }
  0x3f   : > { %2127 = vmatpush1.bf16.msra.mxu0 %v5470_v17  ;;  %5446 = vmatpush1.bf16.msra.mxu1 %v5470_v17  ;;  %v5569_v17 = vld [vmem:[%s5921_s26 + $0x504] ss:$8 sps:$4 sm:$0xff]  }
  0x42   : > { %2131 = vmatmul.mubr.bf16.vlgmr.msra.gmra.mrb[0].mxu0 %v5471_v18  ;;  %2643 = vmatmul.mubr.bf16.vlgmr.msra.gmra.mrb[0].mxu1 %v5474_v19  ;;  %v5571_v18 = vld [vmem:[%s5921_s26 + $0x100] ss:$8 sps:$4 sm:$0xff]  }
  0x43   : > { %4775 = vmatprep.mubr.msk.bf16.mxu0 %vm1713_vm0, %v5477_v20  ;;  %4839 = vmatprep.mubr.msk.bf16.mxu1 %vm1713_vm0, %v5479_v21  ;;  %v5572_v19 = vld [vmem:[%s5921_s26 + $0x500] ss:$8 sps:$4 sm:$0xff]   ;;  %v5573_v20 = vld [vmem:[%s5921_s26 + $0x114] ss:$8 sps:$4 sm:$0xff]  }
  0x44   : > { %v5575_v21 = vld [vmem:[%s5921_s26 + $0x514] ss:$8 sps:$4 sm:$0xff]  }
  0x4a   : > { %2139 = vmatmul.mubr.bf16.gmra.mrb[4].mxu0 %v5481_v22  ;;  %2651 = vmatmul.mubr.bf16.gmra.mrb[4].mxu1 %v5482_v23  ;;  %v5577_v22 = vld [vmem:[%s5921_s26 + $0x110] ss:$8 sps:$4 sm:$0xff]  }
  0x4b   : > { %4776 = vmatprep.mubr.msk.bf16.mxu0 %vm1713_vm0, %v5483_v24  ;;  %4840 = vmatprep.mubr.msk.bf16.mxu1 %vm1713_vm0, %v5485_v25  ;;  %v5578_v23 = vld [vmem:[%s5921_s26 + $0x510] ss:$8 sps:$4 sm:$0xff]   ;;  %v5579_v24 = vld [vmem:[%s5921_s26 + $0x124] ss:$8 sps:$4 sm:$0xff]  }
  0x4c   : > { %v5581_v25 = vld [vmem:[%s5921_s26 + $0x524] ss:$8 sps:$4 sm:$0xff]  }
  0x52   : > { %2147 = vmatmul.mubr.bf16.gmra.mrb[8].mxu0 %v5487_v26  ;;  %2659 = vmatmul.mubr.bf16.gmra.mrb[8].mxu1 %v5488_v27  ;;  %v5583_v26 = vld [vmem:[%s5921_s26 + $0x120] ss:$8 sps:$4 sm:$0xff]  }
  0x53   : > { %4777 = vmatprep.mubr.msk.bf16.mxu0 %vm1713_vm0, %v5489_v28  ;;  %4841 = vmatprep.mubr.msk.bf16.mxu1 %vm1713_vm0, %v5491_v29  ;;  %v5584_v27 = vld [vmem:[%s5921_s26 + $0x520] ss:$8 sps:$4 sm:$0xff]   ;;  %v5585_v28 = vld [vmem:[%s5921_s26 + $0x134] ss:$8 sps:$4 sm:$0xff]  }
  0x54   : > { %v5587_v29 = vld [vmem:[%s5921_s26 + $0x534] ss:$8 sps:$4 sm:$0xff]  }
  0x5a   : > { %2155 = vmatmul.mubr.bf16.gmra.mrb[12].mxu0 %v5493_v30  ;;  %2667 = vmatmul.mubr.bf16.gmra.mrb[12].mxu1 %v5494_v31  ;;  %v5589_v30 = vld [vmem:[%s5921_s26 + $0x130] ss:$8 sps:$4 sm:$0xff]  }
  0x5b   : > { %4778 = vmatprep.mubr.msk.bf16.mxu0 %vm1713_vm0, %v5495_v32  ;;  %4842 = vmatprep.mubr.msk.bf16.mxu1 %vm1713_vm0, %v5497_v33  ;;  %v5590_v31 = vld [vmem:[%s5921_s26 + $0x530] ss:$8 sps:$4 sm:$0xff]   ;;  %v5591_v32 = vld [vmem:[%s5921_s26 + $0x144] ss:$8 sps:$4 sm:$0xff]  }
  0x5c   : > { %v5593_v33 = vld [vmem:[%s5921_s26 + $0x544] ss:$8 sps:$4 sm:$0xff]  }
  0x62   : > { %2163 = vmatmul.mubr.bf16.gmra.mrb[16].mxu0 %v5499_v34  ;;  %2675 = vmatmul.mubr.bf16.gmra.mrb[16].mxu1 %v5500_v35  ;;  %v5595_v34 = vld [vmem:[%s5921_s26 + $0x140] ss:$8 sps:$4 sm:$0xff]  }
  0x63   : > { %4779 = vmatprep.mubr.msk.bf16.mxu0 %vm1713_vm0, %v5501_v36  ;;  %4843 = vmatprep.mubr.msk.bf16.mxu1 %vm1713_vm0, %v5503_v37  ;;  %v5596_v35 = vld [vmem:[%s5921_s26 + $0x540] ss:$8 sps:$4 sm:$0xff]   ;;  %v5597_v36 = vld [vmem:[%s5921_s26 + $0x154] ss:$8 sps:$4 sm:$0xff]  }
  0x64   : > { %v5599_v37 = vld [vmem:[%s5921_s26 + $0x554] ss:$8 sps:$4 sm:$0xff]  }
  0x6a   : > { %2171 = vmatmul.mubr.bf16.gmra.mrb[20].mxu0 %v5505_v38  ;;  %2683 = vmatmul.mubr.bf16.gmra.mrb[20].mxu1 %v5506_v39  ;;  %v5601_v38 = vld [vmem:[%s5921_s26 + $0x150] ss:$8 sps:$4 sm:$0xff]  }
  0x6b   : > { %4780 = vmatprep.mubr.msk.bf16.mxu0 %vm1713_vm0, %v5507_v40  ;;  %4844 = vmatprep.mubr.msk.bf16.mxu1 %vm1713_vm0, %v5509_v41  ;;  %v5602_v39 = vld [vmem:[%s5921_s26 + $0x550] ss:$8 sps:$4 sm:$0xff]   ;;  %v5603_v40 = vld [vmem:[%s5921_s26 + $0x164] ss:$8 sps:$4 sm:$0xff]  }
  0x6c   : > { %v5605_v41 = vld [vmem:[%s5921_s26 + $0x564] ss:$8 sps:$4 sm:$0xff]  }
  0x72   : > { %2179 = vmatmul.mubr.bf16.gmra.mrb[24].mxu0 %v5511_v42  ;;  %2691 = vmatmul.mubr.bf16.gmra.mrb[24].mxu1 %v5512_v43  ;;  %v5607_v42 = vld [vmem:[%s5921_s26 + $0x160] ss:$8 sps:$4 sm:$0xff]  }
  0x73   : > { %4781 = vmatprep.mubr.msk.bf16.mxu0 %vm1713_vm0, %v5513_v44  ;;  %4845 = vmatprep.mubr.msk.bf16.mxu1 %vm1713_vm0, %v5515_v45  ;;  %v5608_v43 = vld [vmem:[%s5921_s26 + $0x560] ss:$8 sps:$4 sm:$0xff]   ;;  %v5609_v44 = vld [vmem:[%s5921_s26 + $0x174] ss:$8 sps:$4 sm:$0xff]  }
  0x74   : > { %v5611_v45 = vld [vmem:[%s5921_s26 + $0x574] ss:$8 sps:$4 sm:$0xff]  }
  0x7a   : > { %2187 = vmatmul.mubr.bf16.gmra.mrb[28].mxu0 %v5517_v46  ;;  %2699 = vmatmul.mubr.bf16.gmra.mrb[28].mxu1 %v5518_v47  ;;  %v5613_v46 = vld [vmem:[%s5921_s26 + $0x170] ss:$8 sps:$4 sm:$0xff]  }
  0x7b   : > { %4782 = vmatprep.mubr.msk.bf16.mxu0 %vm1713_vm0, %v5519_v48  ;;  %4846 = vmatprep.mubr.msk.bf16.mxu1 %vm1713_vm0, %v5521_v49  ;;  %v5614_v47 = vld [vmem:[%s5921_s26 + $0x570] ss:$8 sps:$4 sm:$0xff]   ;;  %v5615_v48 = vld [vmem:[%s5921_s26 + $0x184] ss:$8 sps:$4 sm:$0xff]  }
  0x7c   : > { %v5617_v49 = vld [vmem:[%s5921_s26 + $0x584] ss:$8 sps:$4 sm:$0xff]  }
  0x82   : > { %2195 = vmatmul.mubr.bf16.gmra.mrb[32].mxu0 %v5523_v50  ;;  %2707 = vmatmul.mubr.bf16.gmra.mrb[32].mxu1 %v5524_v51  ;;  %v5619_v50 = vld [vmem:[%s5921_s26 + $0x180] ss:$8 sps:$4 sm:$0xff]  }
  0x83   : > { %4783 = vmatprep.mubr.msk.bf16.mxu0 %vm1713_vm0, %v5525_v52  ;;  %4847 = vmatprep.mubr.msk.bf16.mxu1 %vm1713_vm0, %v5527_v53  ;;  %v5620_v51 = vld [vmem:[%s5921_s26 + $0x580] ss:$8 sps:$4 sm:$0xff]   ;;  %v5621_v52 = vld [vmem:[%s5921_s26 + $0x194] ss:$8 sps:$4 sm:$0xff]  }
  0x84   : > { %v5623_v53 = vld [vmem:[%s5921_s26 + $0x594] ss:$8 sps:$4 sm:$0xff]  }
  0x8a   : > { %2203 = vmatmul.mubr.bf16.gmra.mrb[36].mxu0 %v5529_v54  ;;  %2715 = vmatmul.mubr.bf16.gmra.mrb[36].mxu1 %v5530_v55  ;;  %v5625_v54 = vld [vmem:[%s5921_s26 + $0x190] ss:$8 sps:$4 sm:$0xff]  }
  0x8b   : > { %4784 = vmatprep.mubr.msk.bf16.mxu0 %vm1713_vm0, %v5531_v56  ;;  %4848 = vmatprep.mubr.msk.bf16.mxu1 %vm1713_vm0, %v5533_v57  ;;  %v5626_v55 = vld [vmem:[%s5921_s26 + $0x590] ss:$8 sps:$4 sm:$0xff]   ;;  %v5627_v56 = vld [vmem:[%s5921_s26 + $0x1a4] ss:$8 sps:$4 sm:$0xff]  }
  0x8c   : > { %v5629_v57 = vld [vmem:[%s5921_s26 + $0x5a4] ss:$8 sps:$4 sm:$0xff]  }
  0x92   : > { %2211 = vmatmul.mubr.bf16.gmra.mrb[40].mxu0 %v5535_v58  ;;  %2723 = vmatmul.mubr.bf16.gmra.mrb[40].mxu1 %v5536_v59  ;;  %v5631_v58 = vld [vmem:[%s5921_s26 + $0x1a0] ss:$8 sps:$4 sm:$0xff]  }
  0x93   : > { %4785 = vmatprep.mubr.msk.bf16.mxu0 %vm1713_vm0, %v5537_v60  ;;  %4849 = vmatprep.mubr.msk.bf16.mxu1 %vm1713_vm0, %v5539_v61  ;;  %v5632_v59 = vld [vmem:[%s5921_s26 + $0x5a0] ss:$8 sps:$4 sm:$0xff]   ;;  %v5633_v60 = vld [vmem:[%s5921_s26 + $0x1b4] ss:$8 sps:$4 sm:$0xff]  }
  0x94   : > { %v5635_v61 = vld [vmem:[%s5921_s26 + $0x5b4] ss:$8 sps:$4 sm:$0xff]  }
  0x9a   : > { %2219 = vmatmul.mubr.bf16.gmra.mrb[44].mxu0 %v5541_v62  ;;  %2731 = vmatmul.mubr.bf16.gmra.mrb[44].mxu1 %v5542_v63  ;;  %v6145_v62 = vld [vmem:[%s7151_s2] ss:$0 sm:$0xff] }
  0x9b   : > { %4786 = vmatprep.mubr.msk.bf16.mxu0 %vm1713_vm0, %v5543_v0  ;;  %4850 = vmatprep.mubr.msk.bf16.mxu1 %vm1713_vm0, %v5545_v1 }
  0xa2   : > { %2227 = vmatmul.mubr.bf16.gmra.mrb[48].mxu0 %v5547_v2  ;;  %2739 = vmatmul.mubr.bf16.gmra.mrb[48].mxu1 %v5548_v3 }
  0xa3   : > { %4787 = vmatprep.mubr.msk.bf16.mxu0 %vm1713_vm0, %v5549_v4  ;;  %4851 = vmatprep.mubr.msk.bf16.mxu1 %vm1713_vm0, %v5551_v5  ;;  %v5637_v5 = vld [vmem:[%s5921_s26 + $0x1b0] ss:$8 sps:$4 sm:$0xff]  }
  0xaa   : > { %2235 = vmatmul.mubr.bf16.gmra.mrb[52].mxu0 %v5553_v6  ;;  %2747 = vmatmul.mubr.bf16.gmra.mrb[52].mxu1 %v5554_v7  ;;  %v5638_v6 = vld [vmem:[%s5921_s26 + $0x5b0] ss:$8 sps:$4 sm:$0xff]  }
  0xab   : > { %4788 = vmatprep.mubr.msk.bf16.mxu0 %vm1713_vm0, %v5555_v8  ;;  %4852 = vmatprep.mubr.msk.bf16.mxu1 %vm1713_vm0, %v5557_v9  ;;  %v5639_v9 = vld [vmem:[%s5921_s26 + $0x1c4] ss:$8 sps:$4 sm:$0xff]  }
  0xb2   : > { %2243 = vmatmul.mubr.bf16.gmra.mrb[56].mxu0 %v5559_v10  ;;  %2755 = vmatmul.mubr.bf16.gmra.mrb[56].mxu1 %v5560_v11  ;;  %v5641_v10 = vld [vmem:[%s5921_s26 + $0x5c4] ss:$8 sps:$4 sm:$0xff]  }
  0xb3   : > { %4789 = vmatprep.mubr.msk.bf16.mxu0 %vm1713_vm0, %v5561_v12  ;;  %4853 = vmatprep.mubr.msk.bf16.mxu1 %vm1713_vm0, %v5563_v13 }
  0xba   : > { %2251 = vmatmul.mubr.bf16.gmra.mrb[60].mxu0 %v5565_v14  ;;  %2763 = vmatmul.mubr.bf16.gmra.mrb[60].mxu1 %v5566_v15 }
  0xbb   : > { %4790 = vmatprep.mubr.msk.bf16.mxu0 %vm1713_vm0, %v5567_v16  ;;  %4854 = vmatprep.mubr.msk.bf16.mxu1 %vm1713_vm0, %v5569_v17 }
  0xc2   : > { %2259 = vmatmul.mubr.bf16.gmra.mrb[64].mxu0 %v5571_v18  ;;  %2771 = vmatmul.mubr.bf16.gmra.mrb[64].mxu1 %v5572_v19 }
  0xc3   : > { %4791 = vmatprep.mubr.msk.bf16.mxu0 %vm1713_vm0, %v5573_v20  ;;  %4855 = vmatprep.mubr.msk.bf16.mxu1 %vm1713_vm0, %v5575_v21 }
  0xca   : > { %2267 = vmatmul.mubr.bf16.gmra.mrb[68].mxu0 %v5577_v22  ;;  %2779 = vmatmul.mubr.bf16.gmra.mrb[68].mxu1 %v5578_v23 }
  0xcb   : > { %4792 = vmatprep.mubr.msk.bf16.mxu0 %vm1713_vm0, %v5579_v24  ;;  %4856 = vmatprep.mubr.msk.bf16.mxu1 %vm1713_vm0, %v5581_v25  ;;  %v5643_v25 = vld [vmem:[%s5921_s26 + $0x1c0] ss:$8 sps:$4 sm:$0xff]  }
  0xd2   : > { %2275 = vmatmul.mubr.bf16.gmra.mrb[72].mxu0 %v5583_v26  ;;  %2787 = vmatmul.mubr.bf16.gmra.mrb[72].mxu1 %v5584_v27  ;;  %v5644_v26 = vld [vmem:[%s5921_s26 + $0x5c0] ss:$8 sps:$4 sm:$0xff]  }
  0xd3   : > { %4793 = vmatprep.mubr.msk.bf16.mxu0 %vm1713_vm0, %v5585_v28  ;;  %4857 = vmatprep.mubr.msk.bf16.mxu1 %vm1713_vm0, %v5587_v29  ;;  %v5645_v29 = vld [vmem:[%s5921_s26 + $0x1d4] ss:$8 sps:$4 sm:$0xff]  }
  0xda   : > { %2283 = vmatmul.mubr.bf16.gmra.mrb[76].mxu0 %v5589_v30  ;;  %2795 = vmatmul.mubr.bf16.gmra.mrb[76].mxu1 %v5590_v31  ;;  %v5647_v30 = vld [vmem:[%s5921_s26 + $0x5d4] ss:$8 sps:$4 sm:$0xff]  }
  0xdb   : > { %4794 = vmatprep.mubr.msk.bf16.mxu0 %vm1713_vm0, %v5591_v32  ;;  %4858 = vmatprep.mubr.msk.bf16.mxu1 %vm1713_vm0, %v5593_v33 }
  0xe2   : > { %2291 = vmatmul.mubr.bf16.gmra.mrb[80].mxu0 %v5595_v34  ;;  %2803 = vmatmul.mubr.bf16.gmra.mrb[80].mxu1 %v5596_v35 }
  0xe3   : > { %4795 = vmatprep.mubr.msk.bf16.mxu0 %vm1713_vm0, %v5597_v36  ;;  %4859 = vmatprep.mubr.msk.bf16.mxu1 %vm1713_vm0, %v5599_v37 }
  0xea   : > { %2299 = vmatmul.mubr.bf16.gmra.mrb[84].mxu0 %v5601_v38  ;;  %2811 = vmatmul.mubr.bf16.gmra.mrb[84].mxu1 %v5602_v39 }
  0xeb   : > { %4796 = vmatprep.mubr.msk.bf16.mxu0 %vm1713_vm0, %v5603_v40  ;;  %4860 = vmatprep.mubr.msk.bf16.mxu1 %vm1713_vm0, %v5605_v41 }
  0xf2   : > { %2307 = vmatmul.mubr.bf16.gmra.mrb[88].mxu0 %v5607_v42  ;;  %2819 = vmatmul.mubr.bf16.gmra.mrb[88].mxu1 %v5608_v43 }
  0xf3   : > { %4797 = vmatprep.mubr.msk.bf16.mxu0 %vm1713_vm0, %v5609_v44  ;;  %4861 = vmatprep.mubr.msk.bf16.mxu1 %vm1713_vm0, %v5611_v45  ;;  %v5649_v45 = vld [vmem:[%s5921_s26 + $0x1d0] ss:$8 sps:$4 sm:$0xff]  }
  0xfa   : > { %2315 = vmatmul.mubr.bf16.gmra.mrb[92].mxu0 %v5613_v46  ;;  %2827 = vmatmul.mubr.bf16.gmra.mrb[92].mxu1 %v5614_v47  ;;  %v5650_v46 = vld [vmem:[%s5921_s26 + $0x5d0] ss:$8 sps:$4 sm:$0xff]  }
  0xfb   : > { %4798 = vmatprep.mubr.msk.bf16.mxu0 %vm1713_vm0, %v5615_v48  ;;  %4862 = vmatprep.mubr.msk.bf16.mxu1 %vm1713_vm0, %v5617_v49  ;;  %v5651_v49 = vld [vmem:[%s5921_s26 + $0x1e4] ss:$8 sps:$4 sm:$0xff]  }
 0x102   : > { %2323 = vmatmul.mubr.bf16.gmra.mrb[96].mxu0 %v5619_v50  ;;  %2835 = vmatmul.mubr.bf16.gmra.mrb[96].mxu1 %v5620_v51  ;;  %v5653_v50 = vld [vmem:[%s5921_s26 + $0x5e4] ss:$8 sps:$4 sm:$0xff]  }
 0x103   : > { %4799 = vmatprep.mubr.msk.bf16.mxu0 %vm1713_vm0, %v5621_v52  ;;  %4863 = vmatprep.mubr.msk.bf16.mxu1 %vm1713_vm0, %v5623_v53 }
 0x10a   : > { %2331 = vmatmul.mubr.bf16.gmra.mrb[100].mxu0 %v5625_v54  ;;  %2843 = vmatmul.mubr.bf16.gmra.mrb[100].mxu1 %v5626_v55 }
 0x10b   : > { %4800 = vmatprep.mubr.msk.bf16.mxu0 %vm1713_vm0, %v5627_v56  ;;  %4864 = vmatprep.mubr.msk.bf16.mxu1 %vm1713_vm0, %v5629_v57 }
 0x112   : > { %2339 = vmatmul.mubr.bf16.gmra.mrb[104].mxu0 %v5631_v58  ;;  %2851 = vmatmul.mubr.bf16.gmra.mrb[104].mxu1 %v5632_v59 }
 0x113   : > { %4801 = vmatprep.mubr.msk.bf16.mxu0 %vm1713_vm0, %v5633_v60  ;;  %4865 = vmatprep.mubr.msk.bf16.mxu1 %vm1713_vm0, %v5635_v61 }
 0x115   : > { %v2132_v63 = vpop.f32.mrb[0].mxu0  ;;  %v2644_v0 = vpop.f32.mrb[0].mxu1 }
 0x116   : > { %v2133_v1 = vadd.f32 %v6145_v62, %v2132_v63  ;;  %v2645_v2 = vadd.f32 %v6145_v62, %v2644_v0  ;;  %v2134_v3 = vpop.f32.mrb[1].mxu0  ;;  %v2646_v4 = vpop.f32.mrb[1].mxu1 }
 0x117   : > { %v2135_v7 = vpop.f32.mrb[2].mxu0  ;;  %v2647_v8 = vpop.f32.mrb[2].mxu1  ;;  %v5656_v3 = vld [vmem:[%s5921_s26 + $0x5e0] ss:$8 sps:$4 sm:$0xff]  }
 0x118   : > { %v5161_v11 = vpack.c.bf16 %v2133_v1, %v2133_v1  ;;  %v5289_v12 = vpack.c.bf16 %v2645_v2, %v2645_v2  ;;  %v2136_v13 = vadd.f32 %v6145_v62, %v2135_v7  ;;  %v2648_v14 = vadd.f32 %v6145_v62, %v2647_v8  ;;  %v2137_v15 = vpop.f32.mrb[3].mxu0  ;;  %v2649_v16 = vpop.f32.mrb[3].mxu1  ;;  %v5655_v2 = vld [vmem:[%s5921_s26 + $0x1e0] ss:$8 sps:$4 sm:$0xff]   ;;  %v5659_v7 = vld [vmem:[%s5921_s26 + $0x5f4] ss:$8 sps:$4 sm:$0xff]  }
 0x11a   : > { %4180 = vst.msk [vmem:[%s6157_s30] sm:$0xf] %vm4179_vm1, %v5161_v11  ;;  %4308 = vst.msk [vmem:[%s6157_s30 + $0x200] sm:$0xf] %vm4179_vm1, %v5289_v12  ;;  %v5162_v17 = vpack.c.bf16 %v2136_v13, %v2136_v13  ;;  %v5290_v18 = vpack.c.bf16 %v2648_v14, %v2648_v14  ;;  %2347 = vmatmul.mubr.bf16.gmra.mrb[108].mxu0 %v5637_v5  ;;  %2859 = vmatmul.mubr.bf16.gmra.mrb[108].mxu1 %v5638_v6  ;;  %v5657_v6 = vld [vmem:[%s5921_s26 + $0x1f4] ss:$8 sps:$4 sm:$0xff]  }
 0x11b   : > { %4802 = vmatprep.mubr.msk.bf16.mxu0 %vm1713_vm0, %v5639_v9  ;;  %4866 = vmatprep.mubr.msk.bf16.mxu1 %vm1713_vm0, %v5641_v10 }
 0x11c   : > { %4181 = vst.msk [vmem:[%s6157_s30 + $0x4] sm:$0xf] %vm4179_vm1, %v5162_v17  ;;  %4309 = vst.msk [vmem:[%s6157_s30 + $0x204] sm:$0xf] %vm4179_vm1, %v5290_v18 }
 0x11d   : > { %v2140_v19 = vpop.f32.mrb[4].mxu0  ;;  %v2652_v20 = vpop.f32.mrb[4].mxu1 }
 0x11e   : > { %v2141_v21 = vadd.f32 %v6145_v62, %v2140_v19  ;;  %v2653_v22 = vadd.f32 %v6145_v62, %v2652_v20  ;;  %v2142_v23 = vpop.f32.mrb[5].mxu0  ;;  %v2654_v24 = vpop.f32.mrb[5].mxu1 }
 0x11f   : > { %v2143_v27 = vpop.f32.mrb[6].mxu0  ;;  %v2655_v28 = vpop.f32.mrb[6].mxu1  ;;  %v5662_v23 = vld [vmem:[%s5921_s26 + $0x5f0] ss:$8 sps:$4 sm:$0xff]  }
 0x120   : > { %v5163_v31 = vpack.c.bf16 %v2141_v21, %v2141_v21  ;;  %v5291_v32 = vpack.c.bf16 %v2653_v22, %v2653_v22  ;;  %v2144_v33 = vadd.f32 %v6145_v62, %v2143_v27  ;;  %v2656_v34 = vadd.f32 %v6145_v62, %v2655_v28  ;;  %v2145_v35 = vpop.f32.mrb[7].mxu0  ;;  %v2657_v36 = vpop.f32.mrb[7].mxu1  ;;  %v5661_v22 = vld [vmem:[%s5921_s26 + $0x1f0] ss:$8 sps:$4 sm:$0xff]   ;;  %v5665_v27 = vld [vmem:[%s5921_s26 + $0x604] ss:$8 sps:$4 sm:$0xff]  }
 0x122   : > { %4182 = vst.msk [vmem:[%s6157_s30 + $0x8] sm:$0xf] %vm4179_vm1, %v5163_v31  ;;  %4310 = vst.msk [vmem:[%s6157_s30 + $0x208] sm:$0xf] %vm4179_vm1, %v5291_v32  ;;  %v5164_v37 = vpack.c.bf16 %v2144_v33, %v2144_v33  ;;  %v5292_v38 = vpack.c.bf16 %v2656_v34, %v2656_v34  ;;  %2355 = vmatmul.mubr.bf16.gmra.mrb[112].mxu0 %v5643_v25  ;;  %2867 = vmatmul.mubr.bf16.gmra.mrb[112].mxu1 %v5644_v26  ;;  %v5663_v26 = vld [vmem:[%s5921_s26 + $0x204] ss:$8 sps:$4 sm:$0xff]  }
 0x123   : > { %4803 = vmatprep.mubr.msk.bf16.mxu0 %vm1713_vm0, %v5645_v29  ;;  %4867 = vmatprep.mubr.msk.bf16.mxu1 %vm1713_vm0, %v5647_v30 }
 0x124   : > { %4183 = vst.msk [vmem:[%s6157_s30 + $0xc] sm:$0xf] %vm4179_vm1, %v5164_v37  ;;  %4311 = vst.msk [vmem:[%s6157_s30 + $0x20c] sm:$0xf] %vm4179_vm1, %v5292_v38 }
 0x125   : > { %v2148_v39 = vpop.f32.mrb[8].mxu0  ;;  %v2660_v40 = vpop.f32.mrb[8].mxu1 }
 0x126   : > { %v2149_v41 = vadd.f32 %v6145_v62, %v2148_v39  ;;  %v2661_v42 = vadd.f32 %v6145_v62, %v2660_v40  ;;  %v2150_v43 = vpop.f32.mrb[9].mxu0  ;;  %v2662_v44 = vpop.f32.mrb[9].mxu1 }
 0x127   : > { %v2151_v47 = vpop.f32.mrb[10].mxu0  ;;  %v2663_v48 = vpop.f32.mrb[10].mxu1  ;;  %v5668_v43 = vld [vmem:[%s5921_s26 + $0x600] ss:$8 sps:$4 sm:$0xff]  }
 0x128   : > { %v5165_v51 = vpack.c.bf16 %v2149_v41, %v2149_v41  ;;  %v5293_v52 = vpack.c.bf16 %v2661_v42, %v2661_v42  ;;  %v2152_v53 = vadd.f32 %v6145_v62, %v2151_v47  ;;  %v2664_v54 = vadd.f32 %v6145_v62, %v2663_v48  ;;  %v2153_v55 = vpop.f32.mrb[11].mxu0  ;;  %v2665_v56 = vpop.f32.mrb[11].mxu1  ;;  %v5667_v42 = vld [vmem:[%s5921_s26 + $0x200] ss:$8 sps:$4 sm:$0xff]   ;;  %v5671_v47 = vld [vmem:[%s5921_s26 + $0x614] ss:$8 sps:$4 sm:$0xff]  }
 0x12a   : > { %4184 = vst.msk [vmem:[%s6157_s30 + $0x10] sm:$0xf] %vm4179_vm1, %v5165_v51  ;;  %4312 = vst.msk [vmem:[%s6157_s30 + $0x210] sm:$0xf] %vm4179_vm1, %v5293_v52  ;;  %v5166_v57 = vpack.c.bf16 %v2152_v53, %v2152_v53  ;;  %v5294_v58 = vpack.c.bf16 %v2664_v54, %v2664_v54  ;;  %2363 = vmatmul.mubr.bf16.gmra.mrb[116].mxu0 %v5649_v45  ;;  %2875 = vmatmul.mubr.bf16.gmra.mrb[116].mxu1 %v5650_v46  ;;  %v5669_v46 = vld [vmem:[%s5921_s26 + $0x214] ss:$8 sps:$4 sm:$0xff]  }
 0x12b   : > { %4804 = vmatprep.mubr.msk.bf16.mxu0 %vm1713_vm0, %v5651_v49  ;;  %4868 = vmatprep.mubr.msk.bf16.mxu1 %vm1713_vm0, %v5653_v50 }
 0x12c   : > { %4185 = vst.msk [vmem:[%s6157_s30 + $0x14] sm:$0xf] %vm4179_vm1, %v5166_v57  ;;  %4313 = vst.msk [vmem:[%s6157_s30 + $0x214] sm:$0xf] %vm4179_vm1, %v5294_v58 }
 0x12d   : > { %v2156_v59 = vpop.f32.mrb[12].mxu0  ;;  %v2668_v60 = vpop.f32.mrb[12].mxu1 }
 0x12e   : > { %v2157_v61 = vadd.f32 %v6145_v62, %v2156_v59  ;;  %v2669_v63 = vadd.f32 %v6145_v62, %v2668_v60  ;;  %v2158_v0 = vpop.f32.mrb[13].mxu0  ;;  %v2670_v1 = vpop.f32.mrb[13].mxu1 }
 0x12f   : > { %v2159_v4 = vpop.f32.mrb[14].mxu0  ;;  %v2671_v5 = vpop.f32.mrb[14].mxu1  ;;  %v5674_v0 = vld [vmem:[%s5921_s26 + $0x610] ss:$8 sps:$4 sm:$0xff]  }
 0x130   : > { %v5167_v8 = vpack.c.bf16 %v2157_v61, %v2157_v61  ;;  %v5295_v9 = vpack.c.bf16 %v2669_v63, %v2669_v63  ;;  %v2160_v10 = vadd.f32 %v6145_v62, %v2159_v4  ;;  %v2672_v11 = vadd.f32 %v6145_v62, %v2671_v5  ;;  %v2161_v12 = vpop.f32.mrb[15].mxu0  ;;  %v2673_v13 = vpop.f32.mrb[15].mxu1  ;;  %v5673_v63 = vld [vmem:[%s5921_s26 + $0x210] ss:$8 sps:$4 sm:$0xff]   ;;  %v5677_v4 = vld [vmem:[%s5921_s26 + $0x624] ss:$8 sps:$4 sm:$0xff]  }
 0x132   : > { %4186 = vst.msk [vmem:[%s6157_s30 + $0x18] sm:$0xf] %vm4179_vm1, %v5167_v8  ;;  %4314 = vst.msk [vmem:[%s6157_s30 + $0x218] sm:$0xf] %vm4179_vm1, %v5295_v9  ;;  %v5168_v14 = vpack.c.bf16 %v2160_v10, %v2160_v10  ;;  %v5296_v15 = vpack.c.bf16 %v2672_v11, %v2672_v11  ;;  %2371 = vmatmul.mubr.bf16.gmra.mrb[120].mxu0 %v5655_v2  ;;  %2883 = vmatmul.mubr.bf16.gmra.mrb[120].mxu1 %v5656_v3  ;;  %v5675_v3 = vld [vmem:[%s5921_s26 + $0x224] ss:$8 sps:$4 sm:$0xff]  }
 0x133   : > { %4805 = vmatprep.mubr.msk.bf16.mxu0 %vm1713_vm0, %v5657_v6  ;;  %4869 = vmatprep.mubr.msk.bf16.mxu1 %vm1713_vm0, %v5659_v7 }
 0x134   : > { %4187 = vst.msk [vmem:[%s6157_s30 + $0x1c] sm:$0xf] %vm4179_vm1, %v5168_v14  ;;  %4315 = vst.msk [vmem:[%s6157_s30 + $0x21c] sm:$0xf] %vm4179_vm1, %v5296_v15 }
 0x135   : > { %v2164_v16 = vpop.f32.mrb[16].mxu0  ;;  %v2676_v17 = vpop.f32.mrb[16].mxu1 }
 0x136   : > { %v2165_v18 = vadd.f32 %v6145_v62, %v2164_v16  ;;  %v2677_v19 = vadd.f32 %v6145_v62, %v2676_v17  ;;  %v2166_v20 = vpop.f32.mrb[17].mxu0  ;;  %v2678_v21 = vpop.f32.mrb[17].mxu1 }
 0x137   : > { %v2167_v24 = vpop.f32.mrb[18].mxu0  ;;  %v2679_v25 = vpop.f32.mrb[18].mxu1  ;;  %v5680_v20 = vld [vmem:[%s5921_s26 + $0x620] ss:$8 sps:$4 sm:$0xff]  }
 0x138   : > { %v5169_v28 = vpack.c.bf16 %v2165_v18, %v2165_v18  ;;  %v5297_v29 = vpack.c.bf16 %v2677_v19, %v2677_v19  ;;  %v2168_v30 = vadd.f32 %v6145_v62, %v2167_v24  ;;  %v2680_v31 = vadd.f32 %v6145_v62, %v2679_v25  ;;  %v2169_v32 = vpop.f32.mrb[19].mxu0  ;;  %v2681_v33 = vpop.f32.mrb[19].mxu1  ;;  %v5679_v19 = vld [vmem:[%s5921_s26 + $0x220] ss:$8 sps:$4 sm:$0xff]   ;;  %v5683_v24 = vld [vmem:[%s5921_s26 + $0x634] ss:$8 sps:$4 sm:$0xff]  }
 0x13a   : > { %4188 = vst.msk [vmem:[%s6157_s30 + $0x20] sm:$0xf] %vm4179_vm1, %v5169_v28  ;;  %4316 = vst.msk [vmem:[%s6157_s30 + $0x220] sm:$0xf] %vm4179_vm1, %v5297_v29  ;;  %v5170_v34 = vpack.c.bf16 %v2168_v30, %v2168_v30  ;;  %v5298_v35 = vpack.c.bf16 %v2680_v31, %v2680_v31  ;;  %2379 = vmatmul.mubr.bf16.gmra.mrb[124].mxu0 %v5661_v22  ;;  %2891 = vmatmul.mubr.bf16.gmra.mrb[124].mxu1 %v5662_v23  ;;  %v5681_v23 = vld [vmem:[%s5921_s26 + $0x234] ss:$8 sps:$4 sm:$0xff]  }
 0x13b   : > { %4806 = vmatprep.mubr.msk.bf16.mxu0 %vm1713_vm0, %v5663_v26  ;;  %4870 = vmatprep.mubr.msk.bf16.mxu1 %vm1713_vm0, %v5665_v27 }
 0x13c   : > { %4189 = vst.msk [vmem:[%s6157_s30 + $0x24] sm:$0xf] %vm4179_vm1, %v5170_v34  ;;  %4317 = vst.msk [vmem:[%s6157_s30 + $0x224] sm:$0xf] %vm4179_vm1, %v5298_v35 }
 0x13d   : > { %v2172_v36 = vpop.f32.mrb[20].mxu0  ;;  %v2684_v37 = vpop.f32.mrb[20].mxu1 }
 0x13e   : > { %v2173_v38 = vadd.f32 %v6145_v62, %v2172_v36  ;;  %v2685_v39 = vadd.f32 %v6145_v62, %v2684_v37  ;;  %v2174_v40 = vpop.f32.mrb[21].mxu0  ;;  %v2686_v41 = vpop.f32.mrb[21].mxu1 }
 0x13f   : > { %v2175_v44 = vpop.f32.mrb[22].mxu0  ;;  %v2687_v45 = vpop.f32.mrb[22].mxu1  ;;  %v5686_v40 = vld [vmem:[%s5921_s26 + $0x630] ss:$8 sps:$4 sm:$0xff]  }
 0x140   : > { %v5171_v48 = vpack.c.bf16 %v2173_v38, %v2173_v38  ;;  %v5299_v49 = vpack.c.bf16 %v2685_v39, %v2685_v39  ;;  %v2176_v50 = vadd.f32 %v6145_v62, %v2175_v44  ;;  %v2688_v51 = vadd.f32 %v6145_v62, %v2687_v45  ;;  %v2177_v52 = vpop.f32.mrb[23].mxu0  ;;  %v2689_v53 = vpop.f32.mrb[23].mxu1  ;;  %v5685_v39 = vld [vmem:[%s5921_s26 + $0x230] ss:$8 sps:$4 sm:$0xff]   ;;  %v5689_v44 = vld [vmem:[%s5921_s26 + $0x644] ss:$8 sps:$4 sm:$0xff]  }
 0x142   : > { %4190 = vst.msk [vmem:[%s6157_s30 + $0x28] sm:$0xf] %vm4179_vm1, %v5171_v48  ;;  %4318 = vst.msk [vmem:[%s6157_s30 + $0x228] sm:$0xf] %vm4179_vm1, %v5299_v49  ;;  %v5172_v54 = vpack.c.bf16 %v2176_v50, %v2176_v50  ;;  %v5300_v55 = vpack.c.bf16 %v2688_v51, %v2688_v51  ;;  %2387 = vmatmul.mubr.bf16.gmra.mrb[128].mxu0 %v5667_v42  ;;  %2899 = vmatmul.mubr.bf16.gmra.mrb[128].mxu1 %v5668_v43  ;;  %v5687_v43 = vld [vmem:[%s5921_s26 + $0x244] ss:$8 sps:$4 sm:$0xff]  }
 0x143   : > { %4807 = vmatprep.mubr.msk.bf16.mxu0 %vm1713_vm0, %v5669_v46  ;;  %4871 = vmatprep.mubr.msk.bf16.mxu1 %vm1713_vm0, %v5671_v47 }
 0x144   : > { %4191 = vst.msk [vmem:[%s6157_s30 + $0x2c] sm:$0xf] %vm4179_vm1, %v5172_v54  ;;  %4319 = vst.msk [vmem:[%s6157_s30 + $0x22c] sm:$0xf] %vm4179_vm1, %v5300_v55 }
 0x145   : > { %v2180_v56 = vpop.f32.mrb[24].mxu0  ;;  %v2692_v57 = vpop.f32.mrb[24].mxu1 }
 0x146   : > { %v2181_v58 = vadd.f32 %v6145_v62, %v2180_v56  ;;  %v2693_v59 = vadd.f32 %v6145_v62, %v2692_v57  ;;  %v2182_v60 = vpop.f32.mrb[25].mxu0  ;;  %v2694_v61 = vpop.f32.mrb[25].mxu1 }
 0x147   : > { %v2183_v1 = vpop.f32.mrb[26].mxu0  ;;  %v2695_v2 = vpop.f32.mrb[26].mxu1  ;;  %v5692_v60 = vld [vmem:[%s5921_s26 + $0x640] ss:$8 sps:$4 sm:$0xff]  }
 0x148   : > { %v5173_v5 = vpack.c.bf16 %v2181_v58, %v2181_v58  ;;  %v5301_v6 = vpack.c.bf16 %v2693_v59, %v2693_v59  ;;  %v2184_v7 = vadd.f32 %v6145_v62, %v2183_v1  ;;  %v2696_v8 = vadd.f32 %v6145_v62, %v2695_v2  ;;  %v2185_v9 = vpop.f32.mrb[27].mxu0  ;;  %v2697_v10 = vpop.f32.mrb[27].mxu1  ;;  %v5691_v59 = vld [vmem:[%s5921_s26 + $0x240] ss:$8 sps:$4 sm:$0xff]   ;;  %v5695_v1 = vld [vmem:[%s5921_s26 + $0x654] ss:$8 sps:$4 sm:$0xff]  }
 0x14a   : > { %4192 = vst.msk [vmem:[%s6157_s30 + $0x30] sm:$0xf] %vm4179_vm1, %v5173_v5  ;;  %4320 = vst.msk [vmem:[%s6157_s30 + $0x230] sm:$0xf] %vm4179_vm1, %v5301_v6  ;;  %v5174_v11 = vpack.c.bf16 %v2184_v7, %v2184_v7  ;;  %v5302_v12 = vpack.c.bf16 %v2696_v8, %v2696_v8  ;;  %2395 = vmatmul.mubr.bf16.gmra.mrb[132].mxu0 %v5673_v63  ;;  %2907 = vmatmul.mubr.bf16.gmra.mrb[132].mxu1 %v5674_v0  ;;  %v5693_v0 = vld [vmem:[%s5921_s26 + $0x254] ss:$8 sps:$4 sm:$0xff]  }
 0x14b   : > { %4808 = vmatprep.mubr.msk.bf16.mxu0 %vm1713_vm0, %v5675_v3  ;;  %4872 = vmatprep.mubr.msk.bf16.mxu1 %vm1713_vm0, %v5677_v4 }
 0x14c   : > { %4193 = vst.msk [vmem:[%s6157_s30 + $0x34] sm:$0xf] %vm4179_vm1, %v5174_v11  ;;  %4321 = vst.msk [vmem:[%s6157_s30 + $0x234] sm:$0xf] %vm4179_vm1, %v5302_v12 }
 0x14d   : > { %v2188_v13 = vpop.f32.mrb[28].mxu0  ;;  %v2700_v14 = vpop.f32.mrb[28].mxu1 }
 0x14e   : > { %v2189_v15 = vadd.f32 %v6145_v62, %v2188_v13  ;;  %v2701_v16 = vadd.f32 %v6145_v62, %v2700_v14  ;;  %v2190_v17 = vpop.f32.mrb[29].mxu0  ;;  %v2702_v18 = vpop.f32.mrb[29].mxu1 }
 0x14f   : > { %v2191_v21 = vpop.f32.mrb[30].mxu0  ;;  %v2703_v22 = vpop.f32.mrb[30].mxu1  ;;  %v5698_v17 = vld [vmem:[%s5921_s26 + $0x650] ss:$8 sps:$4 sm:$0xff]  }
 0x150   : > { %v5175_v25 = vpack.c.bf16 %v2189_v15, %v2189_v15  ;;  %v5303_v26 = vpack.c.bf16 %v2701_v16, %v2701_v16  ;;  %v2192_v27 = vadd.f32 %v6145_v62, %v2191_v21  ;;  %v2704_v28 = vadd.f32 %v6145_v62, %v2703_v22  ;;  %v2193_v29 = vpop.f32.mrb[31].mxu0  ;;  %v2705_v30 = vpop.f32.mrb[31].mxu1  ;;  %v5697_v16 = vld [vmem:[%s5921_s26 + $0x250] ss:$8 sps:$4 sm:$0xff]   ;;  %v5701_v21 = vld [vmem:[%s5921_s26 + $0x664] ss:$8 sps:$4 sm:$0xff]  }
 0x152   : > { %4194 = vst.msk [vmem:[%s6157_s30 + $0x38] sm:$0xf] %vm4179_vm1, %v5175_v25  ;;  %4322 = vst.msk [vmem:[%s6157_s30 + $0x238] sm:$0xf] %vm4179_vm1, %v5303_v26  ;;  %v5176_v31 = vpack.c.bf16 %v2192_v27, %v2192_v27  ;;  %v5304_v32 = vpack.c.bf16 %v2704_v28, %v2704_v28  ;;  %2403 = vmatmul.mubr.bf16.gmra.mrb[136].mxu0 %v5679_v19  ;;  %2915 = vmatmul.mubr.bf16.gmra.mrb[136].mxu1 %v5680_v20  ;;  %v5699_v20 = vld [vmem:[%s5921_s26 + $0x264] ss:$8 sps:$4 sm:$0xff]  }
 0x153   : > { %4809 = vmatprep.mubr.msk.bf16.mxu0 %vm1713_vm0, %v5681_v23  ;;  %4873 = vmatprep.mubr.msk.bf16.mxu1 %vm1713_vm0, %v5683_v24 }
 0x154   : > { %4195 = vst.msk [vmem:[%s6157_s30 + $0x3c] sm:$0xf] %vm4179_vm1, %v5176_v31  ;;  %4323 = vst.msk [vmem:[%s6157_s30 + $0x23c] sm:$0xf] %vm4179_vm1, %v5304_v32 }
 0x155   : > { %v2196_v33 = vpop.f32.mrb[32].mxu0  ;;  %v2708_v34 = vpop.f32.mrb[32].mxu1 }
 0x156   : > { %v2197_v35 = vadd.f32 %v6145_v62, %v2196_v33  ;;  %v2709_v36 = vadd.f32 %v6145_v62, %v2708_v34  ;;  %v2198_v37 = vpop.f32.mrb[33].mxu0  ;;  %v2710_v38 = vpop.f32.mrb[33].mxu1 }
 0x157   : > { %v2199_v41 = vpop.f32.mrb[34].mxu0  ;;  %v2711_v42 = vpop.f32.mrb[34].mxu1  ;;  %v5704_v37 = vld [vmem:[%s5921_s26 + $0x660] ss:$8 sps:$4 sm:$0xff]  }
 0x158   : > { %v5177_v45 = vpack.c.bf16 %v2197_v35, %v2197_v35  ;;  %v5305_v46 = vpack.c.bf16 %v2709_v36, %v2709_v36  ;;  %v2200_v47 = vadd.f32 %v6145_v62, %v2199_v41  ;;  %v2712_v48 = vadd.f32 %v6145_v62, %v2711_v42  ;;  %v2201_v49 = vpop.f32.mrb[35].mxu0  ;;  %v2713_v50 = vpop.f32.mrb[35].mxu1  ;;  %v5703_v36 = vld [vmem:[%s5921_s26 + $0x260] ss:$8 sps:$4 sm:$0xff]   ;;  %v5707_v41 = vld [vmem:[%s5921_s26 + $0x674] ss:$8 sps:$4 sm:$0xff]  }
 0x15a   : > { %4196 = vst.msk [vmem:[%s6157_s30 + $0x40] sm:$0xf] %vm4179_vm1, %v5177_v45  ;;  %4324 = vst.msk [vmem:[%s6157_s30 + $0x240] sm:$0xf] %vm4179_vm1, %v5305_v46  ;;  %v5178_v51 = vpack.c.bf16 %v2200_v47, %v2200_v47  ;;  %v5306_v52 = vpack.c.bf16 %v2712_v48, %v2712_v48  ;;  %2411 = vmatmul.mubr.bf16.gmra.mrb[140].mxu0 %v5685_v39  ;;  %2923 = vmatmul.mubr.bf16.gmra.mrb[140].mxu1 %v5686_v40  ;;  %v5705_v40 = vld [vmem:[%s5921_s26 + $0x274] ss:$8 sps:$4 sm:$0xff]  }
 0x15b   : > { %4810 = vmatprep.mubr.msk.bf16.mxu0 %vm1713_vm0, %v5687_v43  ;;  %4874 = vmatprep.mubr.msk.bf16.mxu1 %vm1713_vm0, %v5689_v44 }
 0x15c   : > { %4197 = vst.msk [vmem:[%s6157_s30 + $0x44] sm:$0xf] %vm4179_vm1, %v5178_v51  ;;  %4325 = vst.msk [vmem:[%s6157_s30 + $0x244] sm:$0xf] %vm4179_vm1, %v5306_v52 }
 0x15d   : > { %v2204_v53 = vpop.f32.mrb[36].mxu0  ;;  %v2716_v54 = vpop.f32.mrb[36].mxu1 }
 0x15e   : > { %v2205_v55 = vadd.f32 %v6145_v62, %v2204_v53  ;;  %v2717_v56 = vadd.f32 %v6145_v62, %v2716_v54  ;;  %v2206_v57 = vpop.f32.mrb[37].mxu0  ;;  %v2718_v58 = vpop.f32.mrb[37].mxu1 }
 0x15f   : > { %v2207_v61 = vpop.f32.mrb[38].mxu0  ;;  %v2719_v63 = vpop.f32.mrb[38].mxu1  ;;  %v5710_v57 = vld [vmem:[%s5921_s26 + $0x670] ss:$8 sps:$4 sm:$0xff]  }
 0x160   : > { %v5179_v2 = vpack.c.bf16 %v2205_v55, %v2205_v55  ;;  %v5307_v3 = vpack.c.bf16 %v2717_v56, %v2717_v56  ;;  %v2208_v4 = vadd.f32 %v6145_v62, %v2207_v61  ;;  %v2720_v5 = vadd.f32 %v6145_v62, %v2719_v63  ;;  %v2209_v6 = vpop.f32.mrb[39].mxu0  ;;  %v2721_v7 = vpop.f32.mrb[39].mxu1  ;;  %v5709_v56 = vld [vmem:[%s5921_s26 + $0x270] ss:$8 sps:$4 sm:$0xff]   ;;  %v5713_v61 = vld [vmem:[%s5921_s26 + $0x684] ss:$8 sps:$4 sm:$0xff]  }
 0x162   : > { %4198 = vst.msk [vmem:[%s6157_s30 + $0x48] sm:$0xf] %vm4179_vm1, %v5179_v2  ;;  %4326 = vst.msk [vmem:[%s6157_s30 + $0x248] sm:$0xf] %vm4179_vm1, %v5307_v3  ;;  %v5180_v8 = vpack.c.bf16 %v2208_v4, %v2208_v4  ;;  %v5308_v9 = vpack.c.bf16 %v2720_v5, %v2720_v5  ;;  %2419 = vmatmul.mubr.bf16.gmra.mrb[144].mxu0 %v5691_v59  ;;  %2931 = vmatmul.mubr.bf16.gmra.mrb[144].mxu1 %v5692_v60  ;;  %v5711_v60 = vld [vmem:[%s5921_s26 + $0x284] ss:$8 sps:$4 sm:$0xff]  }
 0x163   : > { %4811 = vmatprep.mubr.msk.bf16.mxu0 %vm1713_vm0, %v5693_v0  ;;  %4875 = vmatprep.mubr.msk.bf16.mxu1 %vm1713_vm0, %v5695_v1 }
 0x164   : > { %4199 = vst.msk [vmem:[%s6157_s30 + $0x4c] sm:$0xf] %vm4179_vm1, %v5180_v8  ;;  %4327 = vst.msk [vmem:[%s6157_s30 + $0x24c] sm:$0xf] %vm4179_vm1, %v5308_v9 }
 0x165   : > { %v2212_v10 = vpop.f32.mrb[40].mxu0  ;;  %v2724_v11 = vpop.f32.mrb[40].mxu1 }
 0x166   : > { %v2213_v12 = vadd.f32 %v6145_v62, %v2212_v10  ;;  %v2725_v13 = vadd.f32 %v6145_v62, %v2724_v11  ;;  %v2214_v14 = vpop.f32.mrb[41].mxu0  ;;  %v2726_v15 = vpop.f32.mrb[41].mxu1 }
 0x167   : > { %v2215_v18 = vpop.f32.mrb[42].mxu0  ;;  %v2727_v19 = vpop.f32.mrb[42].mxu1  ;;  %v5716_v14 = vld [vmem:[%s5921_s26 + $0x680] ss:$8 sps:$4 sm:$0xff]  }
 0x168   : > { %v5181_v22 = vpack.c.bf16 %v2213_v12, %v2213_v12  ;;  %v5309_v23 = vpack.c.bf16 %v2725_v13, %v2725_v13  ;;  %v2216_v24 = vadd.f32 %v6145_v62, %v2215_v18  ;;  %v2728_v25 = vadd.f32 %v6145_v62, %v2727_v19  ;;  %v2217_v26 = vpop.f32.mrb[43].mxu0  ;;  %v2729_v27 = vpop.f32.mrb[43].mxu1  ;;  %v5715_v13 = vld [vmem:[%s5921_s26 + $0x280] ss:$8 sps:$4 sm:$0xff]   ;;  %v5719_v18 = vld [vmem:[%s5921_s26 + $0x694] ss:$8 sps:$4 sm:$0xff]  }
 0x16a   : > { %4200 = vst.msk [vmem:[%s6157_s30 + $0x50] sm:$0xf] %vm4179_vm1, %v5181_v22  ;;  %4328 = vst.msk [vmem:[%s6157_s30 + $0x250] sm:$0xf] %vm4179_vm1, %v5309_v23  ;;  %v5182_v28 = vpack.c.bf16 %v2216_v24, %v2216_v24  ;;  %v5310_v29 = vpack.c.bf16 %v2728_v25, %v2728_v25  ;;  %2427 = vmatmul.mubr.bf16.gmra.mrb[148].mxu0 %v5697_v16  ;;  %2939 = vmatmul.mubr.bf16.gmra.mrb[148].mxu1 %v5698_v17  ;;  %v5717_v17 = vld [vmem:[%s5921_s26 + $0x294] ss:$8 sps:$4 sm:$0xff]  }
 0x16b   : > { %4812 = vmatprep.mubr.msk.bf16.mxu0 %vm1713_vm0, %v5699_v20  ;;  %4876 = vmatprep.mubr.msk.bf16.mxu1 %vm1713_vm0, %v5701_v21 }
 0x16c   : > { %4201 = vst.msk [vmem:[%s6157_s30 + $0x54] sm:$0xf] %vm4179_vm1, %v5182_v28  ;;  %4329 = vst.msk [vmem:[%s6157_s30 + $0x254] sm:$0xf] %vm4179_vm1, %v5310_v29 }
 0x16d   : > { %v2220_v30 = vpop.f32.mrb[44].mxu0  ;;  %v2732_v31 = vpop.f32.mrb[44].mxu1 }
 0x16e   : > { %v2221_v32 = vadd.f32 %v6145_v62, %v2220_v30  ;;  %v2733_v33 = vadd.f32 %v6145_v62, %v2732_v31  ;;  %v2222_v34 = vpop.f32.mrb[45].mxu0  ;;  %v2734_v35 = vpop.f32.mrb[45].mxu1 }
 0x16f   : > { %v2223_v38 = vpop.f32.mrb[46].mxu0  ;;  %v2735_v39 = vpop.f32.mrb[46].mxu1  ;;  %v5722_v34 = vld [vmem:[%s5921_s26 + $0x690] ss:$8 sps:$4 sm:$0xff]  }
 0x170   : > { %v5183_v42 = vpack.c.bf16 %v2221_v32, %v2221_v32  ;;  %v5311_v43 = vpack.c.bf16 %v2733_v33, %v2733_v33  ;;  %v2224_v44 = vadd.f32 %v6145_v62, %v2223_v38  ;;  %v2736_v45 = vadd.f32 %v6145_v62, %v2735_v39  ;;  %v2225_v46 = vpop.f32.mrb[47].mxu0  ;;  %v2737_v47 = vpop.f32.mrb[47].mxu1  ;;  %v5721_v33 = vld [vmem:[%s5921_s26 + $0x290] ss:$8 sps:$4 sm:$0xff]   ;;  %v5725_v38 = vld [vmem:[%s5921_s26 + $0x6a4] ss:$8 sps:$4 sm:$0xff]  }
 0x172   : > { %4202 = vst.msk [vmem:[%s6157_s30 + $0x58] sm:$0xf] %vm4179_vm1, %v5183_v42  ;;  %4330 = vst.msk [vmem:[%s6157_s30 + $0x258] sm:$0xf] %vm4179_vm1, %v5311_v43  ;;  %v5184_v48 = vpack.c.bf16 %v2224_v44, %v2224_v44  ;;  %v5312_v49 = vpack.c.bf16 %v2736_v45, %v2736_v45  ;;  %2435 = vmatmul.mubr.bf16.gmra.mrb[152].mxu0 %v5703_v36  ;;  %2947 = vmatmul.mubr.bf16.gmra.mrb[152].mxu1 %v5704_v37  ;;  %v5723_v37 = vld [vmem:[%s5921_s26 + $0x2a4] ss:$8 sps:$4 sm:$0xff]  }
 0x173   : > { %4813 = vmatprep.mubr.msk.bf16.mxu0 %vm1713_vm0, %v5705_v40  ;;  %4877 = vmatprep.mubr.msk.bf16.mxu1 %vm1713_vm0, %v5707_v41 }
 0x174   : > { %4203 = vst.msk [vmem:[%s6157_s30 + $0x5c] sm:$0xf] %vm4179_vm1, %v5184_v48  ;;  %4331 = vst.msk [vmem:[%s6157_s30 + $0x25c] sm:$0xf] %vm4179_vm1, %v5312_v49 }
 0x175   : > { %v2228_v50 = vpop.f32.mrb[48].mxu0  ;;  %v2740_v51 = vpop.f32.mrb[48].mxu1 }
 0x176   : > { %v2229_v52 = vadd.f32 %v6145_v62, %v2228_v50  ;;  %v2741_v53 = vadd.f32 %v6145_v62, %v2740_v51  ;;  %v2230_v54 = vpop.f32.mrb[49].mxu0  ;;  %v2742_v55 = vpop.f32.mrb[49].mxu1 }
 0x177   : > { %v2231_v58 = vpop.f32.mrb[50].mxu0  ;;  %v2743_v59 = vpop.f32.mrb[50].mxu1  ;;  %v5728_v54 = vld [vmem:[%s5921_s26 + $0x6a0] ss:$8 sps:$4 sm:$0xff]  }
 0x178   : > { %v5185_v63 = vpack.c.bf16 %v2229_v52, %v2229_v52  ;;  %v5313_v0 = vpack.c.bf16 %v2741_v53, %v2741_v53  ;;  %v2232_v1 = vadd.f32 %v6145_v62, %v2231_v58  ;;  %v2744_v2 = vadd.f32 %v6145_v62, %v2743_v59  ;;  %v2233_v3 = vpop.f32.mrb[51].mxu0  ;;  %v2745_v4 = vpop.f32.mrb[51].mxu1  ;;  %v5727_v53 = vld [vmem:[%s5921_s26 + $0x2a0] ss:$8 sps:$4 sm:$0xff]   ;;  %v5731_v58 = vld [vmem:[%s5921_s26 + $0x6b4] ss:$8 sps:$4 sm:$0xff]  }
 0x17a   : > { %4204 = vst.msk [vmem:[%s6157_s30 + $0x60] sm:$0xf] %vm4179_vm1, %v5185_v63  ;;  %4332 = vst.msk [vmem:[%s6157_s30 + $0x260] sm:$0xf] %vm4179_vm1, %v5313_v0  ;;  %v5186_v5 = vpack.c.bf16 %v2232_v1, %v2232_v1  ;;  %v5314_v6 = vpack.c.bf16 %v2744_v2, %v2744_v2  ;;  %2443 = vmatmul.mubr.bf16.gmra.mrb[156].mxu0 %v5709_v56  ;;  %2955 = vmatmul.mubr.bf16.gmra.mrb[156].mxu1 %v5710_v57  ;;  %v5729_v57 = vld [vmem:[%s5921_s26 + $0x2b4] ss:$8 sps:$4 sm:$0xff]  }
 0x17b   : > { %4814 = vmatprep.mubr.msk.bf16.mxu0 %vm1713_vm0, %v5711_v60  ;;  %4878 = vmatprep.mubr.msk.bf16.mxu1 %vm1713_vm0, %v5713_v61 }
 0x17c   : > { %4205 = vst.msk [vmem:[%s6157_s30 + $0x64] sm:$0xf] %vm4179_vm1, %v5186_v5  ;;  %4333 = vst.msk [vmem:[%s6157_s30 + $0x264] sm:$0xf] %vm4179_vm1, %v5314_v6 }
 0x17d   : > { %v2236_v7 = vpop.f32.mrb[52].mxu0  ;;  %v2748_v8 = vpop.f32.mrb[52].mxu1 }
 0x17e   : > { %v2237_v9 = vadd.f32 %v6145_v62, %v2236_v7  ;;  %v2749_v10 = vadd.f32 %v6145_v62, %v2748_v8  ;;  %v2238_v11 = vpop.f32.mrb[53].mxu0  ;;  %v2750_v12 = vpop.f32.mrb[53].mxu1 }
 0x17f   : > { %v2239_v15 = vpop.f32.mrb[54].mxu0  ;;  %v2751_v16 = vpop.f32.mrb[54].mxu1  ;;  %v5734_v11 = vld [vmem:[%s5921_s26 + $0x6b0] ss:$8 sps:$4 sm:$0xff]  }
 0x180   : > { %v5187_v19 = vpack.c.bf16 %v2237_v9, %v2237_v9  ;;  %v5315_v20 = vpack.c.bf16 %v2749_v10, %v2749_v10  ;;  %v2240_v21 = vadd.f32 %v6145_v62, %v2239_v15  ;;  %v2752_v22 = vadd.f32 %v6145_v62, %v2751_v16  ;;  %v2241_v23 = vpop.f32.mrb[55].mxu0  ;;  %v2753_v24 = vpop.f32.mrb[55].mxu1  ;;  %v5733_v10 = vld [vmem:[%s5921_s26 + $0x2b0] ss:$8 sps:$4 sm:$0xff]   ;;  %v5737_v15 = vld [vmem:[%s5921_s26 + $0x6c4] ss:$8 sps:$4 sm:$0xff]  }
 0x182   : > { %4206 = vst.msk [vmem:[%s6157_s30 + $0x68] sm:$0xf] %vm4179_vm1, %v5187_v19  ;;  %4334 = vst.msk [vmem:[%s6157_s30 + $0x268] sm:$0xf] %vm4179_vm1, %v5315_v20  ;;  %v5188_v25 = vpack.c.bf16 %v2240_v21, %v2240_v21  ;;  %v5316_v26 = vpack.c.bf16 %v2752_v22, %v2752_v22  ;;  %2451 = vmatmul.mubr.bf16.gmra.mrb[160].mxu0 %v5715_v13  ;;  %2963 = vmatmul.mubr.bf16.gmra.mrb[160].mxu1 %v5716_v14  ;;  %v5735_v14 = vld [vmem:[%s5921_s26 + $0x2c4] ss:$8 sps:$4 sm:$0xff]  }
 0x183   : > { %4815 = vmatprep.mubr.msk.bf16.mxu0 %vm1713_vm0, %v5717_v17  ;;  %4879 = vmatprep.mubr.msk.bf16.mxu1 %vm1713_vm0, %v5719_v18 }
 0x184   : > { %4207 = vst.msk [vmem:[%s6157_s30 + $0x6c] sm:$0xf] %vm4179_vm1, %v5188_v25  ;;  %4335 = vst.msk [vmem:[%s6157_s30 + $0x26c] sm:$0xf] %vm4179_vm1, %v5316_v26 }
 0x185   : > { %v2244_v27 = vpop.f32.mrb[56].mxu0  ;;  %v2756_v28 = vpop.f32.mrb[56].mxu1 }
 0x186   : > { %v2245_v29 = vadd.f32 %v6145_v62, %v2244_v27  ;;  %v2757_v30 = vadd.f32 %v6145_v62, %v2756_v28  ;;  %v2246_v31 = vpop.f32.mrb[57].mxu0  ;;  %v2758_v32 = vpop.f32.mrb[57].mxu1 }
 0x187   : > { %v2247_v35 = vpop.f32.mrb[58].mxu0  ;;  %v2759_v36 = vpop.f32.mrb[58].mxu1  ;;  %v5740_v31 = vld [vmem:[%s5921_s26 + $0x6c0] ss:$8 sps:$4 sm:$0xff]  }
 0x188   : > { %v5189_v39 = vpack.c.bf16 %v2245_v29, %v2245_v29  ;;  %v5317_v40 = vpack.c.bf16 %v2757_v30, %v2757_v30  ;;  %v2248_v41 = vadd.f32 %v6145_v62, %v2247_v35  ;;  %v2760_v42 = vadd.f32 %v6145_v62, %v2759_v36  ;;  %v2249_v43 = vpop.f32.mrb[59].mxu0  ;;  %v2761_v44 = vpop.f32.mrb[59].mxu1  ;;  %v5739_v30 = vld [vmem:[%s5921_s26 + $0x2c0] ss:$8 sps:$4 sm:$0xff]   ;;  %v5743_v35 = vld [vmem:[%s5921_s26 + $0x6d4] ss:$8 sps:$4 sm:$0xff]  }
 0x18a   : > { %4208 = vst.msk [vmem:[%s6157_s30 + $0x70] sm:$0xf] %vm4179_vm1, %v5189_v39  ;;  %4336 = vst.msk [vmem:[%s6157_s30 + $0x270] sm:$0xf] %vm4179_vm1, %v5317_v40  ;;  %v5190_v45 = vpack.c.bf16 %v2248_v41, %v2248_v41  ;;  %v5318_v46 = vpack.c.bf16 %v2760_v42, %v2760_v42  ;;  %2459 = vmatmul.mubr.bf16.gmra.mrb[164].mxu0 %v5721_v33  ;;  %2971 = vmatmul.mubr.bf16.gmra.mrb[164].mxu1 %v5722_v34  ;;  %v5741_v34 = vld [vmem:[%s5921_s26 + $0x2d4] ss:$8 sps:$4 sm:$0xff]  }
 0x18b   : > { %4816 = vmatprep.mubr.msk.bf16.mxu0 %vm1713_vm0, %v5723_v37  ;;  %4880 = vmatprep.mubr.msk.bf16.mxu1 %vm1713_vm0, %v5725_v38 }
 0x18c   : > { %4209 = vst.msk [vmem:[%s6157_s30 + $0x74] sm:$0xf] %vm4179_vm1, %v5190_v45  ;;  %4337 = vst.msk [vmem:[%s6157_s30 + $0x274] sm:$0xf] %vm4179_vm1, %v5318_v46  ;;  %v6482_v45 = vld [vmem:[%s7151_s2] ss:$0 sm:$0xff] }
 0x18d   : > { %v2252_v47 = vpop.f32.mrb[60].mxu0  ;;  %v2764_v48 = vpop.f32.mrb[60].mxu1 }
 0x18e   : > { %v2253_v49 = vadd.f32 %v6145_v62, %v2252_v47  ;;  %v2765_v50 = vadd.f32 %v6145_v62, %v2764_v48  ;;  %v2254_v51 = vpop.f32.mrb[61].mxu0  ;;  %v2766_v52 = vpop.f32.mrb[61].mxu1 }
 0x18f   : > { %v2255_v55 = vpop.f32.mrb[62].mxu0  ;;  %v2767_v56 = vpop.f32.mrb[62].mxu1  ;;  %v5746_v51 = vld [vmem:[%s5921_s26 + $0x6d0] ss:$8 sps:$4 sm:$0xff]  }
 0x190   : > { %v5191_v59 = vpack.c.bf16 %v2253_v49, %v2253_v49  ;;  %v5319_v60 = vpack.c.bf16 %v2765_v50, %v2765_v50  ;;  %v2256_v61 = vadd.f32 %v6145_v62, %v2255_v55  ;;  %v2768_v63 = vadd.f32 %v6145_v62, %v2767_v56  ;;  %v2257_v0 = vpop.f32.mrb[63].mxu0  ;;  %v2769_v1 = vpop.f32.mrb[63].mxu1  ;;  %v5745_v50 = vld [vmem:[%s5921_s26 + $0x2d0] ss:$8 sps:$4 sm:$0xff]   ;;  %v5749_v55 = vld [vmem:[%s5921_s26 + $0x6e4] ss:$8 sps:$4 sm:$0xff]  }
 0x192   : > { %4210 = vst.msk [vmem:[%s6157_s30 + $0x78] sm:$0xf] %vm4179_vm1, %v5191_v59  ;;  %4338 = vst.msk [vmem:[%s6157_s30 + $0x278] sm:$0xf] %vm4179_vm1, %v5319_v60  ;;  %v5192_v2 = vpack.c.bf16 %v2256_v61, %v2256_v61  ;;  %v5320_v3 = vpack.c.bf16 %v2768_v63, %v2768_v63  ;;  %2467 = vmatmul.mubr.bf16.gmra.mrb[168].mxu0 %v5727_v53  ;;  %2979 = vmatmul.mubr.bf16.gmra.mrb[168].mxu1 %v5728_v54  ;;  %v5747_v54 = vld [vmem:[%s5921_s26 + $0x2e4] ss:$8 sps:$4 sm:$0xff]  }
 0x193   : > { %4817 = vmatprep.mubr.msk.bf16.mxu0 %vm1713_vm0, %v5729_v57  ;;  %4881 = vmatprep.mubr.msk.bf16.mxu1 %vm1713_vm0, %v5731_v58 }
 0x194   : > { %4211 = vst.msk [vmem:[%s6157_s30 + $0x7c] sm:$0xf] %vm4179_vm1, %v5192_v2  ;;  %4339 = vst.msk [vmem:[%s6157_s30 + $0x27c] sm:$0xf] %vm4179_vm1, %v5320_v3 }
 0x195   : > { %v2260_v4 = vpop.f32.mrb[64].mxu0  ;;  %v2772_v5 = vpop.f32.mrb[64].mxu1 }
 0x196   : > { %v2261_v6 = vadd.f32 %v6145_v62, %v2260_v4  ;;  %v2773_v7 = vadd.f32 %v6145_v62, %v2772_v5  ;;  %v2262_v8 = vpop.f32.mrb[65].mxu0  ;;  %v2774_v9 = vpop.f32.mrb[65].mxu1 }
 0x197   : > { %v2263_v12 = vpop.f32.mrb[66].mxu0  ;;  %v2775_v13 = vpop.f32.mrb[66].mxu1  ;;  %v5752_v8 = vld [vmem:[%s5921_s26 + $0x6e0] ss:$8 sps:$4 sm:$0xff]  }
 0x198   : > { %v5193_v16 = vpack.c.bf16 %v2261_v6, %v2261_v6  ;;  %v5321_v17 = vpack.c.bf16 %v2773_v7, %v2773_v7  ;;  %v2264_v18 = vadd.f32 %v6145_v62, %v2263_v12  ;;  %v2776_v19 = vadd.f32 %v6145_v62, %v2775_v13  ;;  %v2265_v20 = vpop.f32.mrb[67].mxu0  ;;  %v2777_v21 = vpop.f32.mrb[67].mxu1  ;;  %v5751_v7 = vld [vmem:[%s5921_s26 + $0x2e0] ss:$8 sps:$4 sm:$0xff]   ;;  %v5755_v12 = vld [vmem:[%s5921_s26 + $0x6f4] ss:$8 sps:$4 sm:$0xff]  }
 0x19a   : > { %4212 = vst.msk [vmem:[%s6157_s30 + $0x80] sm:$0xf] %vm4179_vm1, %v5193_v16  ;;  %4340 = vst.msk [vmem:[%s6157_s30 + $0x280] sm:$0xf] %vm4179_vm1, %v5321_v17  ;;  %v5194_v22 = vpack.c.bf16 %v2264_v18, %v2264_v18  ;;  %v5322_v23 = vpack.c.bf16 %v2776_v19, %v2776_v19  ;;  %2475 = vmatmul.mubr.bf16.gmra.mrb[172].mxu0 %v5733_v10  ;;  %2987 = vmatmul.mubr.bf16.gmra.mrb[172].mxu1 %v5734_v11  ;;  %v5753_v11 = vld [vmem:[%s5921_s26 + $0x2f4] ss:$8 sps:$4 sm:$0xff]  }
 0x19b   : > { %4818 = vmatprep.mubr.msk.bf16.mxu0 %vm1713_vm0, %v5735_v14  ;;  %4882 = vmatprep.mubr.msk.bf16.mxu1 %vm1713_vm0, %v5737_v15 }
 0x19c   : > { %4213 = vst.msk [vmem:[%s6157_s30 + $0x84] sm:$0xf] %vm4179_vm1, %v5194_v22  ;;  %4341 = vst.msk [vmem:[%s6157_s30 + $0x284] sm:$0xf] %vm4179_vm1, %v5322_v23 }
 0x19d   : > { %v2268_v24 = vpop.f32.mrb[68].mxu0  ;;  %v2780_v25 = vpop.f32.mrb[68].mxu1 }
 0x19e   : > { %v2269_v26 = vadd.f32 %v6145_v62, %v2268_v24  ;;  %v2781_v27 = vadd.f32 %v6145_v62, %v2780_v25  ;;  %v2270_v28 = vpop.f32.mrb[69].mxu0  ;;  %v2782_v29 = vpop.f32.mrb[69].mxu1 }
 0x19f   : > { %v2271_v32 = vpop.f32.mrb[70].mxu0  ;;  %v2783_v33 = vpop.f32.mrb[70].mxu1  ;;  %v5758_v28 = vld [vmem:[%s5921_s26 + $0x6f0] ss:$8 sps:$4 sm:$0xff]  }
 0x1a0   : > { %v5195_v36 = vpack.c.bf16 %v2269_v26, %v2269_v26  ;;  %v5323_v37 = vpack.c.bf16 %v2781_v27, %v2781_v27  ;;  %v2272_v38 = vadd.f32 %v6145_v62, %v2271_v32  ;;  %v2784_v39 = vadd.f32 %v6145_v62, %v2783_v33  ;;  %v2273_v40 = vpop.f32.mrb[71].mxu0  ;;  %v2785_v41 = vpop.f32.mrb[71].mxu1  ;;  %v5757_v27 = vld [vmem:[%s5921_s26 + $0x2f0] ss:$8 sps:$4 sm:$0xff]   ;;  %v5761_v32 = vld [vmem:[%s5921_s26 + $0x704] ss:$8 sps:$4 sm:$0xff]  }
 0x1a2   : > { %4214 = vst.msk [vmem:[%s6157_s30 + $0x88] sm:$0xf] %vm4179_vm1, %v5195_v36  ;;  %4342 = vst.msk [vmem:[%s6157_s30 + $0x288] sm:$0xf] %vm4179_vm1, %v5323_v37  ;;  %v5196_v42 = vpack.c.bf16 %v2272_v38, %v2272_v38  ;;  %v5324_v43 = vpack.c.bf16 %v2784_v39, %v2784_v39  ;;  %2483 = vmatmul.mubr.bf16.gmra.mrb[176].mxu0 %v5739_v30  ;;  %2995 = vmatmul.mubr.bf16.gmra.mrb[176].mxu1 %v5740_v31  ;;  %v5759_v31 = vld [vmem:[%s5921_s26 + $0x304] ss:$8 sps:$4 sm:$0xff]  }
 0x1a3   : > { %4819 = vmatprep.mubr.msk.bf16.mxu0 %vm1713_vm0, %v5741_v34  ;;  %4883 = vmatprep.mubr.msk.bf16.mxu1 %vm1713_vm0, %v5743_v35 }
 0x1a4   : > { %4215 = vst.msk [vmem:[%s6157_s30 + $0x8c] sm:$0xf] %vm4179_vm1, %v5196_v42  ;;  %4343 = vst.msk [vmem:[%s6157_s30 + $0x28c] sm:$0xf] %vm4179_vm1, %v5324_v43 }
 0x1a5   : > { %v2276_v62 = vpop.f32.mrb[72].mxu0  ;;  %v2788_v44 = vpop.f32.mrb[72].mxu1 }
 0x1a6   : > { %v2277_v46 = vadd.f32 %v6482_v45, %v2276_v62  ;;  %v2789_v47 = vadd.f32 %v6482_v45, %v2788_v44  ;;  %v2278_v48 = vpop.f32.mrb[73].mxu0  ;;  %v2790_v49 = vpop.f32.mrb[73].mxu1 }
 0x1a7   : > { %v2279_v52 = vpop.f32.mrb[74].mxu0  ;;  %v2791_v53 = vpop.f32.mrb[74].mxu1  ;;  %v5764_v48 = vld [vmem:[%s5921_s26 + $0x700] ss:$8 sps:$4 sm:$0xff]  }
 0x1a8   : > { %v5197_v56 = vpack.c.bf16 %v2277_v46, %v2277_v46  ;;  %v5325_v57 = vpack.c.bf16 %v2789_v47, %v2789_v47  ;;  %v2280_v58 = vadd.f32 %v6482_v45, %v2279_v52  ;;  %v2792_v59 = vadd.f32 %v6482_v45, %v2791_v53  ;;  %v2281_v60 = vpop.f32.mrb[75].mxu0  ;;  %v2793_v61 = vpop.f32.mrb[75].mxu1  ;;  %v5763_v47 = vld [vmem:[%s5921_s26 + $0x300] ss:$8 sps:$4 sm:$0xff]   ;;  %v5767_v52 = vld [vmem:[%s5921_s26 + $0x714] ss:$8 sps:$4 sm:$0xff]  }
 0x1aa   : > { %4216 = vst.msk [vmem:[%s6157_s30 + $0x90] sm:$0xf] %vm4179_vm1, %v5197_v56  ;;  %4344 = vst.msk [vmem:[%s6157_s30 + $0x290] sm:$0xf] %vm4179_vm1, %v5325_v57  ;;  %v5198_v63 = vpack.c.bf16 %v2280_v58, %v2280_v58  ;;  %v5326_v0 = vpack.c.bf16 %v2792_v59, %v2792_v59  ;;  %2491 = vmatmul.mubr.bf16.gmra.mrb[180].mxu0 %v5745_v50  ;;  %3003 = vmatmul.mubr.bf16.gmra.mrb[180].mxu1 %v5746_v51  ;;  %v5765_v51 = vld [vmem:[%s5921_s26 + $0x314] ss:$8 sps:$4 sm:$0xff]  }
 0x1ab   : > { %4820 = vmatprep.mubr.msk.bf16.mxu0 %vm1713_vm0, %v5747_v54  ;;  %4884 = vmatprep.mubr.msk.bf16.mxu1 %vm1713_vm0, %v5749_v55 }
 0x1ac   : > { %4217 = vst.msk [vmem:[%s6157_s30 + $0x94] sm:$0xf] %vm4179_vm1, %v5198_v63  ;;  %4345 = vst.msk [vmem:[%s6157_s30 + $0x294] sm:$0xf] %vm4179_vm1, %v5326_v0 }
 0x1ad   : > { %v2284_v1 = vpop.f32.mrb[76].mxu0  ;;  %v2796_v2 = vpop.f32.mrb[76].mxu1 }
 0x1ae   : > { %v2285_v3 = vadd.f32 %v6482_v45, %v2284_v1  ;;  %v2797_v4 = vadd.f32 %v6482_v45, %v2796_v2  ;;  %v2286_v5 = vpop.f32.mrb[77].mxu0  ;;  %v2798_v6 = vpop.f32.mrb[77].mxu1 }
 0x1af   : > { %v2287_v9 = vpop.f32.mrb[78].mxu0  ;;  %v2799_v10 = vpop.f32.mrb[78].mxu1  ;;  %v5770_v5 = vld [vmem:[%s5921_s26 + $0x710] ss:$8 sps:$4 sm:$0xff]  }
 0x1b0   : > { %v5199_v13 = vpack.c.bf16 %v2285_v3, %v2285_v3  ;;  %v5327_v14 = vpack.c.bf16 %v2797_v4, %v2797_v4  ;;  %v2288_v15 = vadd.f32 %v6482_v45, %v2287_v9  ;;  %v2800_v16 = vadd.f32 %v6482_v45, %v2799_v10  ;;  %v2289_v17 = vpop.f32.mrb[79].mxu0  ;;  %v2801_v18 = vpop.f32.mrb[79].mxu1  ;;  %v5769_v4 = vld [vmem:[%s5921_s26 + $0x310] ss:$8 sps:$4 sm:$0xff]   ;;  %v5773_v9 = vld [vmem:[%s5921_s26 + $0x724] ss:$8 sps:$4 sm:$0xff]  }
 0x1b2   : > { %4218 = vst.msk [vmem:[%s6157_s30 + $0x98] sm:$0xf] %vm4179_vm1, %v5199_v13  ;;  %4346 = vst.msk [vmem:[%s6157_s30 + $0x298] sm:$0xf] %vm4179_vm1, %v5327_v14  ;;  %v5200_v19 = vpack.c.bf16 %v2288_v15, %v2288_v15  ;;  %v5328_v20 = vpack.c.bf16 %v2800_v16, %v2800_v16  ;;  %2499 = vmatmul.mubr.bf16.gmra.mrb[184].mxu0 %v5751_v7  ;;  %3011 = vmatmul.mubr.bf16.gmra.mrb[184].mxu1 %v5752_v8  ;;  %v5771_v8 = vld [vmem:[%s5921_s26 + $0x324] ss:$8 sps:$4 sm:$0xff]  }
 0x1b3   : > { %4821 = vmatprep.mubr.msk.bf16.mxu0 %vm1713_vm0, %v5753_v11  ;;  %4885 = vmatprep.mubr.msk.bf16.mxu1 %vm1713_vm0, %v5755_v12 }
 0x1b4   : > { %4219 = vst.msk [vmem:[%s6157_s30 + $0x9c] sm:$0xf] %vm4179_vm1, %v5200_v19  ;;  %4347 = vst.msk [vmem:[%s6157_s30 + $0x29c] sm:$0xf] %vm4179_vm1, %v5328_v20 }
 0x1b5   : > { %v2292_v21 = vpop.f32.mrb[80].mxu0  ;;  %v2804_v22 = vpop.f32.mrb[80].mxu1 }
 0x1b6   : > { %v2293_v23 = vadd.f32 %v6482_v45, %v2292_v21  ;;  %v2805_v24 = vadd.f32 %v6482_v45, %v2804_v22  ;;  %v2294_v25 = vpop.f32.mrb[81].mxu0  ;;  %v2806_v26 = vpop.f32.mrb[81].mxu1 }
 0x1b7   : > { %v2295_v29 = vpop.f32.mrb[82].mxu0  ;;  %v2807_v30 = vpop.f32.mrb[82].mxu1  ;;  %v5776_v25 = vld [vmem:[%s5921_s26 + $0x720] ss:$8 sps:$4 sm:$0xff]  }
 0x1b8   : > { %v5201_v33 = vpack.c.bf16 %v2293_v23, %v2293_v23  ;;  %v5329_v34 = vpack.c.bf16 %v2805_v24, %v2805_v24  ;;  %v2296_v35 = vadd.f32 %v6482_v45, %v2295_v29  ;;  %v2808_v36 = vadd.f32 %v6482_v45, %v2807_v30  ;;  %v2297_v37 = vpop.f32.mrb[83].mxu0  ;;  %v2809_v38 = vpop.f32.mrb[83].mxu1  ;;  %v5775_v24 = vld [vmem:[%s5921_s26 + $0x320] ss:$8 sps:$4 sm:$0xff]   ;;  %v5779_v29 = vld [vmem:[%s5921_s26 + $0x734] ss:$8 sps:$4 sm:$0xff]  }
 0x1ba   : > { %4220 = vst.msk [vmem:[%s6157_s30 + $0xa0] sm:$0xf] %vm4179_vm1, %v5201_v33  ;;  %4348 = vst.msk [vmem:[%s6157_s30 + $0x2a0] sm:$0xf] %vm4179_vm1, %v5329_v34  ;;  %v5202_v39 = vpack.c.bf16 %v2296_v35, %v2296_v35  ;;  %v5330_v40 = vpack.c.bf16 %v2808_v36, %v2808_v36  ;;  %2507 = vmatmul.mubr.bf16.gmra.mrb[188].mxu0 %v5757_v27  ;;  %3019 = vmatmul.mubr.bf16.gmra.mrb[188].mxu1 %v5758_v28  ;;  %v5777_v28 = vld [vmem:[%s5921_s26 + $0x334] ss:$8 sps:$4 sm:$0xff]  }
 0x1bb   : > { %4822 = vmatprep.mubr.msk.bf16.mxu0 %vm1713_vm0, %v5759_v31  ;;  %4886 = vmatprep.mubr.msk.bf16.mxu1 %vm1713_vm0, %v5761_v32 }
 0x1bc   : > { %4221 = vst.msk [vmem:[%s6157_s30 + $0xa4] sm:$0xf] %vm4179_vm1, %v5202_v39  ;;  %4349 = vst.msk [vmem:[%s6157_s30 + $0x2a4] sm:$0xf] %vm4179_vm1, %v5330_v40 }
 0x1bd   : > { %v2300_v41 = vpop.f32.mrb[84].mxu0  ;;  %v2812_v42 = vpop.f32.mrb[84].mxu1 }
 0x1be   : > { %v2301_v43 = vadd.f32 %v6482_v45, %v2300_v41  ;;  %v2813_v62 = vadd.f32 %v6482_v45, %v2812_v42  ;;  %v2302_v44 = vpop.f32.mrb[85].mxu0  ;;  %v2814_v46 = vpop.f32.mrb[85].mxu1 }
 0x1bf   : > { %v2303_v49 = vpop.f32.mrb[86].mxu0  ;;  %v2815_v50 = vpop.f32.mrb[86].mxu1  ;;  %v5782_v44 = vld [vmem:[%s5921_s26 + $0x730] ss:$8 sps:$4 sm:$0xff]  }
 0x1c0   : > { %v5203_v53 = vpack.c.bf16 %v2301_v43, %v2301_v43  ;;  %v5331_v54 = vpack.c.bf16 %v2813_v62, %v2813_v62  ;;  %v2304_v55 = vadd.f32 %v6482_v45, %v2303_v49  ;;  %v2816_v56 = vadd.f32 %v6482_v45, %v2815_v50  ;;  %v2305_v57 = vpop.f32.mrb[87].mxu0  ;;  %v2817_v58 = vpop.f32.mrb[87].mxu1  ;;  %v5781_v62 = vld [vmem:[%s5921_s26 + $0x330] ss:$8 sps:$4 sm:$0xff]   ;;  %v5785_v49 = vld [vmem:[%s5921_s26 + $0x744] ss:$8 sps:$4 sm:$0xff]  }
 0x1c2   : > { %4222 = vst.msk [vmem:[%s6157_s30 + $0xa8] sm:$0xf] %vm4179_vm1, %v5203_v53  ;;  %4350 = vst.msk [vmem:[%s6157_s30 + $0x2a8] sm:$0xf] %vm4179_vm1, %v5331_v54  ;;  %v5204_v59 = vpack.c.bf16 %v2304_v55, %v2304_v55  ;;  %v5332_v60 = vpack.c.bf16 %v2816_v56, %v2816_v56  ;;  %2515 = vmatmul.mubr.bf16.gmra.mrb[192].mxu0 %v5763_v47  ;;  %3027 = vmatmul.mubr.bf16.gmra.mrb[192].mxu1 %v5764_v48  ;;  %v5783_v48 = vld [vmem:[%s5921_s26 + $0x344] ss:$8 sps:$4 sm:$0xff]  }
 0x1c3   : > { %4823 = vmatprep.mubr.msk.bf16.mxu0 %vm1713_vm0, %v5765_v51  ;;  %4887 = vmatprep.mubr.msk.bf16.mxu1 %vm1713_vm0, %v5767_v52 }
 0x1c4   : > { %4223 = vst.msk [vmem:[%s6157_s30 + $0xac] sm:$0xf] %vm4179_vm1, %v5204_v59  ;;  %4351 = vst.msk [vmem:[%s6157_s30 + $0x2ac] sm:$0xf] %vm4179_vm1, %v5332_v60 }
 0x1c5   : > { %v2308_v61 = vpop.f32.mrb[88].mxu0  ;;  %v2820_v63 = vpop.f32.mrb[88].mxu1 }
 0x1c6   : > { %v2309_v0 = vadd.f32 %v6482_v45, %v2308_v61  ;;  %v2821_v1 = vadd.f32 %v6482_v45, %v2820_v63  ;;  %v2310_v2 = vpop.f32.mrb[89].mxu0  ;;  %v2822_v3 = vpop.f32.mrb[89].mxu1 }
 0x1c7   : > { %v2311_v6 = vpop.f32.mrb[90].mxu0  ;;  %v2823_v7 = vpop.f32.mrb[90].mxu1  ;;  %v5788_v2 = vld [vmem:[%s5921_s26 + $0x740] ss:$8 sps:$4 sm:$0xff]  }
 0x1c8   : > { %v5205_v10 = vpack.c.bf16 %v2309_v0, %v2309_v0  ;;  %v5333_v11 = vpack.c.bf16 %v2821_v1, %v2821_v1  ;;  %v2312_v12 = vadd.f32 %v6482_v45, %v2311_v6  ;;  %v2824_v13 = vadd.f32 %v6482_v45, %v2823_v7  ;;  %v2313_v14 = vpop.f32.mrb[91].mxu0  ;;  %v2825_v15 = vpop.f32.mrb[91].mxu1  ;;  %v5787_v1 = vld [vmem:[%s5921_s26 + $0x340] ss:$8 sps:$4 sm:$0xff]   ;;  %v5791_v6 = vld [vmem:[%s5921_s26 + $0x754] ss:$8 sps:$4 sm:$0xff]  }
 0x1ca   : > { %4224 = vst.msk [vmem:[%s6157_s30 + $0xb0] sm:$0xf] %vm4179_vm1, %v5205_v10  ;;  %4352 = vst.msk [vmem:[%s6157_s30 + $0x2b0] sm:$0xf] %vm4179_vm1, %v5333_v11  ;;  %v5206_v16 = vpack.c.bf16 %v2312_v12, %v2312_v12  ;;  %v5334_v17 = vpack.c.bf16 %v2824_v13, %v2824_v13  ;;  %2523 = vmatmul.mubr.bf16.gmra.mrb[196].mxu0 %v5769_v4  ;;  %3035 = vmatmul.mubr.bf16.gmra.mrb[196].mxu1 %v5770_v5  ;;  %v5789_v5 = vld [vmem:[%s5921_s26 + $0x354] ss:$8 sps:$4 sm:$0xff]  }
 0x1cb   : > { %4824 = vmatprep.mubr.msk.bf16.mxu0 %vm1713_vm0, %v5771_v8  ;;  %4888 = vmatprep.mubr.msk.bf16.mxu1 %vm1713_vm0, %v5773_v9 }
 0x1cc   : > { %4225 = vst.msk [vmem:[%s6157_s30 + $0xb4] sm:$0xf] %vm4179_vm1, %v5206_v16  ;;  %4353 = vst.msk [vmem:[%s6157_s30 + $0x2b4] sm:$0xf] %vm4179_vm1, %v5334_v17 }
 0x1cd   : > { %v2316_v18 = vpop.f32.mrb[92].mxu0  ;;  %v2828_v19 = vpop.f32.mrb[92].mxu1 }
 0x1ce   : > { %v2317_v20 = vadd.f32 %v6482_v45, %v2316_v18  ;;  %v2829_v21 = vadd.f32 %v6482_v45, %v2828_v19  ;;  %v2318_v22 = vpop.f32.mrb[93].mxu0  ;;  %v2830_v23 = vpop.f32.mrb[93].mxu1 }
 0x1cf   : > { %v2319_v26 = vpop.f32.mrb[94].mxu0  ;;  %v2831_v27 = vpop.f32.mrb[94].mxu1  ;;  %v5794_v22 = vld [vmem:[%s5921_s26 + $0x750] ss:$8 sps:$4 sm:$0xff]  }
 0x1d0   : > { %v5207_v30 = vpack.c.bf16 %v2317_v20, %v2317_v20  ;;  %v5335_v31 = vpack.c.bf16 %v2829_v21, %v2829_v21  ;;  %v2320_v32 = vadd.f32 %v6482_v45, %v2319_v26  ;;  %v2832_v33 = vadd.f32 %v6482_v45, %v2831_v27  ;;  %v2321_v34 = vpop.f32.mrb[95].mxu0  ;;  %v2833_v35 = vpop.f32.mrb[95].mxu1  ;;  %v5793_v21 = vld [vmem:[%s5921_s26 + $0x350] ss:$8 sps:$4 sm:$0xff]   ;;  %v5797_v26 = vld [vmem:[%s5921_s26 + $0x764] ss:$8 sps:$4 sm:$0xff]  }
 0x1d2   : > { %4226 = vst.msk [vmem:[%s6157_s30 + $0xb8] sm:$0xf] %vm4179_vm1, %v5207_v30  ;;  %4354 = vst.msk [vmem:[%s6157_s30 + $0x2b8] sm:$0xf] %vm4179_vm1, %v5335_v31  ;;  %v5208_v36 = vpack.c.bf16 %v2320_v32, %v2320_v32  ;;  %v5336_v37 = vpack.c.bf16 %v2832_v33, %v2832_v33  ;;  %2531 = vmatmul.mubr.bf16.gmra.mrb[200].mxu0 %v5775_v24  ;;  %3043 = vmatmul.mubr.bf16.gmra.mrb[200].mxu1 %v5776_v25  ;;  %v5795_v25 = vld [vmem:[%s5921_s26 + $0x364] ss:$8 sps:$4 sm:$0xff]  }
 0x1d3   : > { %4825 = vmatprep.mubr.msk.bf16.mxu0 %vm1713_vm0, %v5777_v28  ;;  %4889 = vmatprep.mubr.msk.bf16.mxu1 %vm1713_vm0, %v5779_v29 }
 0x1d4   : > { %4227 = vst.msk [vmem:[%s6157_s30 + $0xbc] sm:$0xf] %vm4179_vm1, %v5208_v36  ;;  %4355 = vst.msk [vmem:[%s6157_s30 + $0x2bc] sm:$0xf] %vm4179_vm1, %v5336_v37 }
 0x1d5   : > { %v2324_v38 = vpop.f32.mrb[96].mxu0  ;;  %v2836_v39 = vpop.f32.mrb[96].mxu1 }
 0x1d6   : > { %v2325_v40 = vadd.f32 %v6482_v45, %v2324_v38  ;;  %v2837_v41 = vadd.f32 %v6482_v45, %v2836_v39  ;;  %v2326_v42 = vpop.f32.mrb[97].mxu0  ;;  %v2838_v43 = vpop.f32.mrb[97].mxu1 }
 0x1d7   : > { %v2327_v46 = vpop.f32.mrb[98].mxu0  ;;  %v2839_v47 = vpop.f32.mrb[98].mxu1  ;;  %v5800_v42 = vld [vmem:[%s5921_s26 + $0x760] ss:$8 sps:$4 sm:$0xff]  }
 0x1d8   : > { %v5209_v50 = vpack.c.bf16 %v2325_v40, %v2325_v40  ;;  %v5337_v51 = vpack.c.bf16 %v2837_v41, %v2837_v41  ;;  %v2328_v52 = vadd.f32 %v6482_v45, %v2327_v46  ;;  %v2840_v53 = vadd.f32 %v6482_v45, %v2839_v47  ;;  %v2329_v54 = vpop.f32.mrb[99].mxu0  ;;  %v2841_v55 = vpop.f32.mrb[99].mxu1  ;;  %v5799_v41 = vld [vmem:[%s5921_s26 + $0x360] ss:$8 sps:$4 sm:$0xff]   ;;  %v5803_v46 = vld [vmem:[%s5921_s26 + $0x774] ss:$8 sps:$4 sm:$0xff]  }
 0x1da   : > { %4228 = vst.msk [vmem:[%s6157_s30 + $0xc0] sm:$0xf] %vm4179_vm1, %v5209_v50  ;;  %4356 = vst.msk [vmem:[%s6157_s30 + $0x2c0] sm:$0xf] %vm4179_vm1, %v5337_v51  ;;  %v5210_v56 = vpack.c.bf16 %v2328_v52, %v2328_v52  ;;  %v5338_v57 = vpack.c.bf16 %v2840_v53, %v2840_v53  ;;  %2539 = vmatmul.mubr.bf16.gmra.mrb[204].mxu0 %v5781_v62  ;;  %3051 = vmatmul.mubr.bf16.gmra.mrb[204].mxu1 %v5782_v44  ;;  %v5801_v44 = vld [vmem:[%s5921_s26 + $0x374] ss:$8 sps:$4 sm:$0xff]  }
 0x1db   : > { %4826 = vmatprep.mubr.msk.bf16.mxu0 %vm1713_vm0, %v5783_v48  ;;  %4890 = vmatprep.mubr.msk.bf16.mxu1 %vm1713_vm0, %v5785_v49 }
 0x1dc   : > { %4229 = vst.msk [vmem:[%s6157_s30 + $0xc4] sm:$0xf] %vm4179_vm1, %v5210_v56  ;;  %4357 = vst.msk [vmem:[%s6157_s30 + $0x2c4] sm:$0xf] %vm4179_vm1, %v5338_v57 }
 0x1dd   : > { %v2332_v58 = vpop.f32.mrb[100].mxu0  ;;  %v2844_v59 = vpop.f32.mrb[100].mxu1 }
 0x1de   : > { %v2333_v60 = vadd.f32 %v6482_v45, %v2332_v58  ;;  %v2845_v61 = vadd.f32 %v6482_v45, %v2844_v59  ;;  %v2334_v63 = vpop.f32.mrb[101].mxu0  ;;  %v2846_v0 = vpop.f32.mrb[101].mxu1 }
 0x1df   : > { %v2335_v3 = vpop.f32.mrb[102].mxu0  ;;  %v2847_v4 = vpop.f32.mrb[102].mxu1  ;;  %v5806_v63 = vld [vmem:[%s5921_s26 + $0x770] ss:$8 sps:$4 sm:$0xff]  }
 0x1e0   : > { %v5211_v7 = vpack.c.bf16 %v2333_v60, %v2333_v60  ;;  %v5339_v8 = vpack.c.bf16 %v2845_v61, %v2845_v61  ;;  %v2336_v9 = vadd.f32 %v6482_v45, %v2335_v3  ;;  %v2848_v10 = vadd.f32 %v6482_v45, %v2847_v4  ;;  %v2337_v11 = vpop.f32.mrb[103].mxu0  ;;  %v2849_v12 = vpop.f32.mrb[103].mxu1  ;;  %v5805_v61 = vld [vmem:[%s5921_s26 + $0x370] ss:$8 sps:$4 sm:$0xff]   ;;  %v5809_v3 = vld [vmem:[%s5921_s26 + $0x784] ss:$8 sps:$4 sm:$0xff]  }
 0x1e2   : > { %4230 = vst.msk [vmem:[%s6157_s30 + $0xc8] sm:$0xf] %vm4179_vm1, %v5211_v7  ;;  %4358 = vst.msk [vmem:[%s6157_s30 + $0x2c8] sm:$0xf] %vm4179_vm1, %v5339_v8  ;;  %v5212_v13 = vpack.c.bf16 %v2336_v9, %v2336_v9  ;;  %v5340_v14 = vpack.c.bf16 %v2848_v10, %v2848_v10  ;;  %2547 = vmatmul.mubr.bf16.gmra.mrb[208].mxu0 %v5787_v1  ;;  %3059 = vmatmul.mubr.bf16.gmra.mrb[208].mxu1 %v5788_v2  ;;  %v5807_v2 = vld [vmem:[%s5921_s26 + $0x384] ss:$8 sps:$4 sm:$0xff]  }
 0x1e3   : > { %4827 = vmatprep.mubr.msk.bf16.mxu0 %vm1713_vm0, %v5789_v5  ;;  %4891 = vmatprep.mubr.msk.bf16.mxu1 %vm1713_vm0, %v5791_v6 }
 0x1e4   : > { %4231 = vst.msk [vmem:[%s6157_s30 + $0xcc] sm:$0xf] %vm4179_vm1, %v5212_v13  ;;  %4359 = vst.msk [vmem:[%s6157_s30 + $0x2cc] sm:$0xf] %vm4179_vm1, %v5340_v14 }
 0x1e5   : > { %v2340_v15 = vpop.f32.mrb[104].mxu0  ;;  %v2852_v16 = vpop.f32.mrb[104].mxu1 }
 0x1e6   : > { %v2341_v17 = vadd.f32 %v6482_v45, %v2340_v15  ;;  %v2853_v18 = vadd.f32 %v6482_v45, %v2852_v16  ;;  %v2342_v19 = vpop.f32.mrb[105].mxu0  ;;  %v2854_v20 = vpop.f32.mrb[105].mxu1 }
 0x1e7   : > { %v2343_v23 = vpop.f32.mrb[106].mxu0  ;;  %v2855_v24 = vpop.f32.mrb[106].mxu1  ;;  %v5812_v19 = vld [vmem:[%s5921_s26 + $0x780] ss:$8 sps:$4 sm:$0xff]  }
 0x1e8   : > { %v5213_v27 = vpack.c.bf16 %v2341_v17, %v2341_v17  ;;  %v5341_v28 = vpack.c.bf16 %v2853_v18, %v2853_v18  ;;  %v2344_v29 = vadd.f32 %v6482_v45, %v2343_v23  ;;  %v2856_v30 = vadd.f32 %v6482_v45, %v2855_v24  ;;  %v2345_v31 = vpop.f32.mrb[107].mxu0  ;;  %v2857_v32 = vpop.f32.mrb[107].mxu1  ;;  %v5811_v18 = vld [vmem:[%s5921_s26 + $0x380] ss:$8 sps:$4 sm:$0xff]   ;;  %v5815_v23 = vld [vmem:[%s5921_s26 + $0x794] ss:$8 sps:$4 sm:$0xff]  }
 0x1ea   : > { %4232 = vst.msk [vmem:[%s6157_s30 + $0xd0] sm:$0xf] %vm4179_vm1, %v5213_v27  ;;  %4360 = vst.msk [vmem:[%s6157_s30 + $0x2d0] sm:$0xf] %vm4179_vm1, %v5341_v28  ;;  %v5214_v33 = vpack.c.bf16 %v2344_v29, %v2344_v29  ;;  %v5342_v34 = vpack.c.bf16 %v2856_v30, %v2856_v30  ;;  %2555 = vmatmul.mubr.bf16.gmra.mrb[212].mxu0 %v5793_v21  ;;  %3067 = vmatmul.mubr.bf16.gmra.mrb[212].mxu1 %v5794_v22  ;;  %v5813_v22 = vld [vmem:[%s5921_s26 + $0x394] ss:$8 sps:$4 sm:$0xff]  }
 0x1eb   : > { %4828 = vmatprep.mubr.msk.bf16.mxu0 %vm1713_vm0, %v5795_v25  ;;  %4892 = vmatprep.mubr.msk.bf16.mxu1 %vm1713_vm0, %v5797_v26 }
 0x1ec   : > { %4233 = vst.msk [vmem:[%s6157_s30 + $0xd4] sm:$0xf] %vm4179_vm1, %v5214_v33  ;;  %4361 = vst.msk [vmem:[%s6157_s30 + $0x2d4] sm:$0xf] %vm4179_vm1, %v5342_v34 }
 0x1ed   : > { %v2348_v35 = vpop.f32.mrb[108].mxu0  ;;  %v2860_v36 = vpop.f32.mrb[108].mxu1 }
 0x1ee   : > { %v2349_v37 = vadd.f32 %v6482_v45, %v2348_v35  ;;  %v2861_v38 = vadd.f32 %v6482_v45, %v2860_v36  ;;  %v2350_v39 = vpop.f32.mrb[109].mxu0  ;;  %v2862_v40 = vpop.f32.mrb[109].mxu1 }
 0x1ef   : > { %v2351_v43 = vpop.f32.mrb[110].mxu0  ;;  %v2863_v62 = vpop.f32.mrb[110].mxu1  ;;  %v5818_v39 = vld [vmem:[%s5921_s26 + $0x790] ss:$8 sps:$4 sm:$0xff]  }
 0x1f0   : > { %v5215_v47 = vpack.c.bf16 %v2349_v37, %v2349_v37  ;;  %v5343_v48 = vpack.c.bf16 %v2861_v38, %v2861_v38  ;;  %v2352_v49 = vadd.f32 %v6482_v45, %v2351_v43  ;;  %v2864_v50 = vadd.f32 %v6482_v45, %v2863_v62  ;;  %v2353_v51 = vpop.f32.mrb[111].mxu0  ;;  %v2865_v52 = vpop.f32.mrb[111].mxu1  ;;  %v5817_v38 = vld [vmem:[%s5921_s26 + $0x390] ss:$8 sps:$4 sm:$0xff]   ;;  %v5821_v43 = vld [vmem:[%s5921_s26 + $0x7a4] ss:$8 sps:$4 sm:$0xff]  }
 0x1f2   : > { %4234 = vst.msk [vmem:[%s6157_s30 + $0xd8] sm:$0xf] %vm4179_vm1, %v5215_v47  ;;  %4362 = vst.msk [vmem:[%s6157_s30 + $0x2d8] sm:$0xf] %vm4179_vm1, %v5343_v48  ;;  %v5216_v53 = vpack.c.bf16 %v2352_v49, %v2352_v49  ;;  %v5344_v54 = vpack.c.bf16 %v2864_v50, %v2864_v50  ;;  %2563 = vmatmul.mubr.bf16.gmra.mrb[216].mxu0 %v5799_v41  ;;  %3075 = vmatmul.mubr.bf16.gmra.mrb[216].mxu1 %v5800_v42  ;;  %v5819_v42 = vld [vmem:[%s5921_s26 + $0x3a4] ss:$8 sps:$4 sm:$0xff]  }
 0x1f3   : > { %4829 = vmatprep.mubr.msk.bf16.mxu0 %vm1713_vm0, %v5801_v44  ;;  %4893 = vmatprep.mubr.msk.bf16.mxu1 %vm1713_vm0, %v5803_v46 }
 0x1f4   : > { %4235 = vst.msk [vmem:[%s6157_s30 + $0xdc] sm:$0xf] %vm4179_vm1, %v5216_v53  ;;  %4363 = vst.msk [vmem:[%s6157_s30 + $0x2dc] sm:$0xf] %vm4179_vm1, %v5344_v54 }
 0x1f5   : > { %v2356_v55 = vpop.f32.mrb[112].mxu0  ;;  %v2868_v56 = vpop.f32.mrb[112].mxu1 }
 0x1f6   : > { %v2357_v57 = vadd.f32 %v6482_v45, %v2356_v55  ;;  %v2869_v58 = vadd.f32 %v6482_v45, %v2868_v56  ;;  %v2358_v59 = vpop.f32.mrb[113].mxu0  ;;  %v2870_v60 = vpop.f32.mrb[113].mxu1 }
 0x1f7   : > { %v2359_v0 = vpop.f32.mrb[114].mxu0  ;;  %v2871_v1 = vpop.f32.mrb[114].mxu1  ;;  %v5824_v59 = vld [vmem:[%s5921_s26 + $0x7a0] ss:$8 sps:$4 sm:$0xff]  }
 0x1f8   : > { %v5217_v4 = vpack.c.bf16 %v2357_v57, %v2357_v57  ;;  %v5345_v5 = vpack.c.bf16 %v2869_v58, %v2869_v58  ;;  %v2360_v6 = vadd.f32 %v6482_v45, %v2359_v0  ;;  %v2872_v7 = vadd.f32 %v6482_v45, %v2871_v1  ;;  %v2361_v8 = vpop.f32.mrb[115].mxu0  ;;  %v2873_v9 = vpop.f32.mrb[115].mxu1  ;;  %v5823_v58 = vld [vmem:[%s5921_s26 + $0x3a0] ss:$8 sps:$4 sm:$0xff]   ;;  %v5827_v0 = vld [vmem:[%s5921_s26 + $0x7b4] ss:$8 sps:$4 sm:$0xff]  }
 0x1fa   : > { %4236 = vst.msk [vmem:[%s6157_s30 + $0xe0] sm:$0xf] %vm4179_vm1, %v5217_v4  ;;  %4364 = vst.msk [vmem:[%s6157_s30 + $0x2e0] sm:$0xf] %vm4179_vm1, %v5345_v5  ;;  %v5218_v10 = vpack.c.bf16 %v2360_v6, %v2360_v6  ;;  %v5346_v11 = vpack.c.bf16 %v2872_v7, %v2872_v7  ;;  %2571 = vmatmul.mubr.bf16.gmra.mrb[220].mxu0 %v5805_v61  ;;  %3083 = vmatmul.mubr.bf16.gmra.mrb[220].mxu1 %v5806_v63  ;;  %v5825_v63 = vld [vmem:[%s5921_s26 + $0x3b4] ss:$8 sps:$4 sm:$0xff]  }
 0x1fb   : > { %4830 = vmatprep.mubr.msk.bf16.mxu0 %vm1713_vm0, %v5807_v2  ;;  %4894 = vmatprep.mubr.msk.bf16.mxu1 %vm1713_vm0, %v5809_v3 }
 0x1fc   : > { %4237 = vst.msk [vmem:[%s6157_s30 + $0xe4] sm:$0xf] %vm4179_vm1, %v5218_v10  ;;  %4365 = vst.msk [vmem:[%s6157_s30 + $0x2e4] sm:$0xf] %vm4179_vm1, %v5346_v11 }
 0x1fd   : > { %v2364_v12 = vpop.f32.mrb[116].mxu0  ;;  %v2876_v13 = vpop.f32.mrb[116].mxu1 }
 0x1fe   : > { %v2365_v14 = vadd.f32 %v6482_v45, %v2364_v12  ;;  %v2877_v15 = vadd.f32 %v6482_v45, %v2876_v13  ;;  %v2366_v16 = vpop.f32.mrb[117].mxu0  ;;  %v2878_v17 = vpop.f32.mrb[117].mxu1 }
 0x1ff   : > { %v2367_v20 = vpop.f32.mrb[118].mxu0  ;;  %v2879_v21 = vpop.f32.mrb[118].mxu1  ;;  %v5830_v16 = vld [vmem:[%s5921_s26 + $0x7b0] ss:$8 sps:$4 sm:$0xff]  }
 0x200   : > { %v5219_v24 = vpack.c.bf16 %v2365_v14, %v2365_v14  ;;  %v5347_v25 = vpack.c.bf16 %v2877_v15, %v2877_v15  ;;  %v2368_v26 = vadd.f32 %v6482_v45, %v2367_v20  ;;  %v2880_v27 = vadd.f32 %v6482_v45, %v2879_v21  ;;  %v2369_v28 = vpop.f32.mrb[119].mxu0  ;;  %v2881_v29 = vpop.f32.mrb[119].mxu1  ;;  %v5829_v15 = vld [vmem:[%s5921_s26 + $0x3b0] ss:$8 sps:$4 sm:$0xff]   ;;  %v5833_v20 = vld [vmem:[%s5921_s26 + $0x7c4] ss:$8 sps:$4 sm:$0xff]  }
 0x202   : > { %4238 = vst.msk [vmem:[%s6157_s30 + $0xe8] sm:$0xf] %vm4179_vm1, %v5219_v24  ;;  %4366 = vst.msk [vmem:[%s6157_s30 + $0x2e8] sm:$0xf] %vm4179_vm1, %v5347_v25  ;;  %v5220_v30 = vpack.c.bf16 %v2368_v26, %v2368_v26  ;;  %v5348_v31 = vpack.c.bf16 %v2880_v27, %v2880_v27  ;;  %2579 = vmatmul.mubr.bf16.gmra.mrb[224].mxu0 %v5811_v18  ;;  %3091 = vmatmul.mubr.bf16.gmra.mrb[224].mxu1 %v5812_v19  ;;  %v5831_v19 = vld [vmem:[%s5921_s26 + $0x3c4] ss:$8 sps:$4 sm:$0xff]  }
 0x203   : > { %4831 = vmatprep.mubr.msk.bf16.mxu0 %vm1713_vm0, %v5813_v22  ;;  %4895 = vmatprep.mubr.msk.bf16.mxu1 %vm1713_vm0, %v5815_v23 }
 0x204   : > { %4239 = vst.msk [vmem:[%s6157_s30 + $0xec] sm:$0xf] %vm4179_vm1, %v5220_v30  ;;  %4367 = vst.msk [vmem:[%s6157_s30 + $0x2ec] sm:$0xf] %vm4179_vm1, %v5348_v31 }
 0x205   : > { %v2372_v32 = vpop.f32.mrb[120].mxu0  ;;  %v2884_v33 = vpop.f32.mrb[120].mxu1 }
 0x206   : > { %v2373_v34 = vadd.f32 %v6482_v45, %v2372_v32  ;;  %v2885_v35 = vadd.f32 %v6482_v45, %v2884_v33  ;;  %v2374_v36 = vpop.f32.mrb[121].mxu0  ;;  %v2886_v37 = vpop.f32.mrb[121].mxu1 }
 0x207   : > { %v2375_v40 = vpop.f32.mrb[122].mxu0  ;;  %v2887_v41 = vpop.f32.mrb[122].mxu1  ;;  %v5836_v36 = vld [vmem:[%s5921_s26 + $0x7c0] ss:$8 sps:$4 sm:$0xff]  }
 0x208   : > { %v5221_v62 = vpack.c.bf16 %v2373_v34, %v2373_v34  ;;  %v5349_v44 = vpack.c.bf16 %v2885_v35, %v2885_v35  ;;  %v2376_v46 = vadd.f32 %v6482_v45, %v2375_v40  ;;  %v2888_v47 = vadd.f32 %v6482_v45, %v2887_v41  ;;  %v2377_v48 = vpop.f32.mrb[123].mxu0  ;;  %v2889_v49 = vpop.f32.mrb[123].mxu1  ;;  %v5835_v35 = vld [vmem:[%s5921_s26 + $0x3c0] ss:$8 sps:$4 sm:$0xff]   ;;  %v5839_v40 = vld [vmem:[%s5921_s26 + $0x7d4] ss:$8 sps:$4 sm:$0xff]  }
 0x20a   : > { %4240 = vst.msk [vmem:[%s6157_s30 + $0xf0] sm:$0xf] %vm4179_vm1, %v5221_v62  ;;  %4368 = vst.msk [vmem:[%s6157_s30 + $0x2f0] sm:$0xf] %vm4179_vm1, %v5349_v44  ;;  %v5222_v50 = vpack.c.bf16 %v2376_v46, %v2376_v46  ;;  %v5350_v51 = vpack.c.bf16 %v2888_v47, %v2888_v47  ;;  %2587 = vmatmul.mubr.bf16.gmra.mrb[228].mxu0 %v5817_v38  ;;  %3099 = vmatmul.mubr.bf16.gmra.mrb[228].mxu1 %v5818_v39  ;;  %v5837_v39 = vld [vmem:[%s5921_s26 + $0x3d4] ss:$8 sps:$4 sm:$0xff]  }
 0x20b   : > { %4832 = vmatprep.mubr.msk.bf16.mxu0 %vm1713_vm0, %v5819_v42  ;;  %4896 = vmatprep.mubr.msk.bf16.mxu1 %vm1713_vm0, %v5821_v43 }
 0x20c   : > { %4241 = vst.msk [vmem:[%s6157_s30 + $0xf4] sm:$0xf] %vm4179_vm1, %v5222_v50  ;;  %4369 = vst.msk [vmem:[%s6157_s30 + $0x2f4] sm:$0xf] %vm4179_vm1, %v5350_v51 }
 0x20d   : > { %v2380_v52 = vpop.f32.mrb[124].mxu0  ;;  %v2892_v53 = vpop.f32.mrb[124].mxu1 }
 0x20e   : > { %v2381_v54 = vadd.f32 %v6482_v45, %v2380_v52  ;;  %v2893_v55 = vadd.f32 %v6482_v45, %v2892_v53  ;;  %v2382_v56 = vpop.f32.mrb[125].mxu0  ;;  %v2894_v57 = vpop.f32.mrb[125].mxu1 }
 0x20f   : > { %v2383_v60 = vpop.f32.mrb[126].mxu0  ;;  %v2895_v61 = vpop.f32.mrb[126].mxu1  ;;  %v5842_v56 = vld [vmem:[%s5921_s26 + $0x7d0] ss:$8 sps:$4 sm:$0xff]  }
 0x210   : > { %v5223_v1 = vpack.c.bf16 %v2381_v54, %v2381_v54  ;;  %v5351_v2 = vpack.c.bf16 %v2893_v55, %v2893_v55  ;;  %v2384_v3 = vadd.f32 %v6482_v45, %v2383_v60  ;;  %v2896_v4 = vadd.f32 %v6482_v45, %v2895_v61  ;;  %v2385_v5 = vpop.f32.mrb[127].mxu0  ;;  %v2897_v6 = vpop.f32.mrb[127].mxu1  ;;  %v5841_v55 = vld [vmem:[%s5921_s26 + $0x3d0] ss:$8 sps:$4 sm:$0xff]   ;;  %v5845_v60 = vld [vmem:[%s5921_s26 + $0x7e4] ss:$8 sps:$4 sm:$0xff]  }
 0x212   : > { %4242 = vst.msk [vmem:[%s6157_s30 + $0xf8] sm:$0xf] %vm4179_vm1, %v5223_v1  ;;  %4370 = vst.msk [vmem:[%s6157_s30 + $0x2f8] sm:$0xf] %vm4179_vm1, %v5351_v2  ;;  %v5224_v7 = vpack.c.bf16 %v2384_v3, %v2384_v3  ;;  %v5352_v8 = vpack.c.bf16 %v2896_v4, %v2896_v4  ;;  %2595 = vmatmul.mubr.bf16.gmra.mrb[232].mxu0 %v5823_v58  ;;  %3107 = vmatmul.mubr.bf16.gmra.mrb[232].mxu1 %v5824_v59  ;;  %v5843_v59 = vld [vmem:[%s5921_s26 + $0x3e4] ss:$8 sps:$4 sm:$0xff]  }
 0x213   : > { %4833 = vmatprep.mubr.msk.bf16.mxu0 %vm1713_vm0, %v5825_v63  ;;  %4897 = vmatprep.mubr.msk.bf16.mxu1 %vm1713_vm0, %v5827_v0 }
 0x214   : > { %4243 = vst.msk [vmem:[%s6157_s30 + $0xfc] sm:$0xf] %vm4179_vm1, %v5224_v7  ;;  %4371 = vst.msk [vmem:[%s6157_s30 + $0x2fc] sm:$0xf] %vm4179_vm1, %v5352_v8 }
 0x215   : > { %v2388_v9 = vpop.f32.mrb[128].mxu0  ;;  %v2900_v10 = vpop.f32.mrb[128].mxu1 }
 0x216   : > { %v2389_v11 = vadd.f32 %v6482_v45, %v2388_v9  ;;  %v2901_v12 = vadd.f32 %v6482_v45, %v2900_v10  ;;  %v2390_v13 = vpop.f32.mrb[129].mxu0  ;;  %v2902_v14 = vpop.f32.mrb[129].mxu1 }
 0x217   : > { %v2391_v17 = vpop.f32.mrb[130].mxu0  ;;  %v2903_v18 = vpop.f32.mrb[130].mxu1  ;;  %v5848_v13 = vld [vmem:[%s5921_s26 + $0x7e0] ss:$8 sps:$4 sm:$0xff]  }
 0x218   : > { %v5225_v21 = vpack.c.bf16 %v2389_v11, %v2389_v11  ;;  %v5353_v22 = vpack.c.bf16 %v2901_v12, %v2901_v12  ;;  %v2392_v23 = vadd.f32 %v6482_v45, %v2391_v17  ;;  %v2904_v24 = vadd.f32 %v6482_v45, %v2903_v18  ;;  %v2393_v25 = vpop.f32.mrb[131].mxu0  ;;  %v2905_v26 = vpop.f32.mrb[131].mxu1  ;;  %v5847_v12 = vld [vmem:[%s5921_s26 + $0x3e0] ss:$8 sps:$4 sm:$0xff]   ;;  %v5851_v17 = vld [vmem:[%s5921_s26 + $0x7f4] ss:$8 sps:$4 sm:$0xff]  }
 0x21a   : > { %4244 = vst.msk [vmem:[%s6157_s30 + $0x100] sm:$0xf] %vm4179_vm1, %v5225_v21  ;;  %4372 = vst.msk [vmem:[%s6157_s30 + $0x300] sm:$0xf] %vm4179_vm1, %v5353_v22  ;;  %v5226_v27 = vpack.c.bf16 %v2392_v23, %v2392_v23  ;;  %v5354_v28 = vpack.c.bf16 %v2904_v24, %v2904_v24  ;;  %2603 = vmatmul.mubr.bf16.gmra.mrb[236].mxu0 %v5829_v15  ;;  %3115 = vmatmul.mubr.bf16.gmra.mrb[236].mxu1 %v5830_v16  ;;  %v5849_v16 = vld [vmem:[%s5921_s26 + $0x3f4] ss:$8 sps:$4 sm:$0xff]  }
 0x21b   : > { %4834 = vmatprep.mubr.msk.bf16.mxu0 %vm1713_vm0, %v5831_v19  ;;  %4898 = vmatprep.mubr.msk.bf16.mxu1 %vm1713_vm0, %v5833_v20 }
 0x21c   : > { %4245 = vst.msk [vmem:[%s6157_s30 + $0x104] sm:$0xf] %vm4179_vm1, %v5226_v27  ;;  %4373 = vst.msk [vmem:[%s6157_s30 + $0x304] sm:$0xf] %vm4179_vm1, %v5354_v28 }
 0x21d   : > { %v2396_v29 = vpop.f32.mrb[132].mxu0  ;;  %v2908_v30 = vpop.f32.mrb[132].mxu1 }
 0x21e   : > { %v2397_v31 = vadd.f32 %v6482_v45, %v2396_v29  ;;  %v2909_v32 = vadd.f32 %v6482_v45, %v2908_v30  ;;  %v2398_v33 = vpop.f32.mrb[133].mxu0  ;;  %v2910_v34 = vpop.f32.mrb[133].mxu1 }
 0x21f   : > { %v2399_v37 = vpop.f32.mrb[134].mxu0  ;;  %v2911_v38 = vpop.f32.mrb[134].mxu1  ;;  %v5854_v33 = vld [vmem:[%s5921_s26 + $0x7f0] ss:$8 sps:$4 sm:$0xff]  }
 0x220   : > { %v5227_v41 = vpack.c.bf16 %v2397_v31, %v2397_v31  ;;  %v5355_v42 = vpack.c.bf16 %v2909_v32, %v2909_v32  ;;  %v2400_v43 = vadd.f32 %v6482_v45, %v2399_v37  ;;  %v2912_v62 = vadd.f32 %v6482_v45, %v2911_v38  ;;  %v2401_v44 = vpop.f32.mrb[135].mxu0  ;;  %v2913_v46 = vpop.f32.mrb[135].mxu1  ;;  %v5853_v32 = vld [vmem:[%s5921_s26 + $0x3f0] ss:$8 sps:$4 sm:$0xff]   ;;  %v6815_v38 = vld [vmem:[%s7151_s2] ss:$0 sm:$0xff] }
 0x222   : > { %4246 = vst.msk [vmem:[%s6157_s30 + $0x108] sm:$0xf] %vm4179_vm1, %v5227_v41  ;;  %4374 = vst.msk [vmem:[%s6157_s30 + $0x308] sm:$0xf] %vm4179_vm1, %v5355_v42  ;;  %v5228_v47 = vpack.c.bf16 %v2400_v43, %v2400_v43  ;;  %v5356_v48 = vpack.c.bf16 %v2912_v62, %v2912_v62  ;;  %2611 = vmatmul.mubr.bf16.gmra.mrb[240].mxu0 %v5835_v35  ;;  %3123 = vmatmul.mubr.bf16.gmra.mrb[240].mxu1 %v5836_v36 }
 0x223   : > { %4835 = vmatprep.mubr.msk.bf16.mxu0 %vm1713_vm0, %v5837_v39  ;;  %4899 = vmatprep.mubr.msk.bf16.mxu1 %vm1713_vm0, %v5839_v40 }
 0x224   : > { %4247 = vst.msk [vmem:[%s6157_s30 + $0x10c] sm:$0xf] %vm4179_vm1, %v5228_v47  ;;  %4375 = vst.msk [vmem:[%s6157_s30 + $0x30c] sm:$0xf] %vm4179_vm1, %v5356_v48 }
 0x225   : > { %v2404_v49 = vpop.f32.mrb[136].mxu0  ;;  %v2916_v50 = vpop.f32.mrb[136].mxu1 }
 0x226   : > { %v2405_v51 = vadd.f32 %v6482_v45, %v2404_v49  ;;  %v2917_v52 = vadd.f32 %v6482_v45, %v2916_v50  ;;  %v2406_v53 = vpop.f32.mrb[137].mxu0  ;;  %v2918_v54 = vpop.f32.mrb[137].mxu1 }
 0x227   : > { %v2407_v57 = vpop.f32.mrb[138].mxu0  ;;  %v2919_v58 = vpop.f32.mrb[138].mxu1 }
 0x228   : > { %v5229_v61 = vpack.c.bf16 %v2405_v51, %v2405_v51  ;;  %v5357_v63 = vpack.c.bf16 %v2917_v52, %v2917_v52  ;;  %v2408_v0 = vadd.f32 %v6482_v45, %v2407_v57  ;;  %v2920_v1 = vadd.f32 %v6482_v45, %v2919_v58  ;;  %v2409_v2 = vpop.f32.mrb[139].mxu0  ;;  %v2921_v3 = vpop.f32.mrb[139].mxu1 }
 0x22a   : > { %4248 = vst.msk [vmem:[%s6157_s30 + $0x110] sm:$0xf] %vm4179_vm1, %v5229_v61  ;;  %4376 = vst.msk [vmem:[%s6157_s30 + $0x310] sm:$0xf] %vm4179_vm1, %v5357_v63  ;;  %v5230_v4 = vpack.c.bf16 %v2408_v0, %v2408_v0  ;;  %v5358_v5 = vpack.c.bf16 %v2920_v1, %v2920_v1  ;;  %2619 = vmatmul.mubr.bf16.gmra.mrb[244].mxu0 %v5841_v55  ;;  %3131 = vmatmul.mubr.bf16.gmra.mrb[244].mxu1 %v5842_v56 }
 0x22b   : > { %4836 = vmatprep.mubr.msk.bf16.mxu0 %vm1713_vm0, %v5843_v59  ;;  %4900 = vmatprep.mubr.msk.bf16.mxu1 %vm1713_vm0, %v5845_v60 }
 0x22c   : > { %4249 = vst.msk [vmem:[%s6157_s30 + $0x114] sm:$0xf] %vm4179_vm1, %v5230_v4  ;;  %4377 = vst.msk [vmem:[%s6157_s30 + $0x314] sm:$0xf] %vm4179_vm1, %v5358_v5 }
 0x22d   : > { %v2412_v6 = vpop.f32.mrb[140].mxu0  ;;  %v2924_v7 = vpop.f32.mrb[140].mxu1 }
 0x22e   : > { %v2413_v8 = vadd.f32 %v6482_v45, %v2412_v6  ;;  %v2925_v9 = vadd.f32 %v6482_v45, %v2924_v7  ;;  %v2414_v10 = vpop.f32.mrb[141].mxu0  ;;  %v2926_v11 = vpop.f32.mrb[141].mxu1 }
 0x22f   : > { %v2415_v14 = vpop.f32.mrb[142].mxu0  ;;  %v2927_v15 = vpop.f32.mrb[142].mxu1 }
 0x230   : > { %v5231_v18 = vpack.c.bf16 %v2413_v8, %v2413_v8  ;;  %v5359_v19 = vpack.c.bf16 %v2925_v9, %v2925_v9  ;;  %v2416_v20 = vadd.f32 %v6482_v45, %v2415_v14  ;;  %v2928_v21 = vadd.f32 %v6482_v45, %v2927_v15  ;;  %v2417_v22 = vpop.f32.mrb[143].mxu0  ;;  %v2929_v23 = vpop.f32.mrb[143].mxu1 }
 0x232   : > { %4250 = vst.msk [vmem:[%s6157_s30 + $0x118] sm:$0xf] %vm4179_vm1, %v5231_v18  ;;  %4378 = vst.msk [vmem:[%s6157_s30 + $0x318] sm:$0xf] %vm4179_vm1, %v5359_v19  ;;  %v5232_v24 = vpack.c.bf16 %v2416_v20, %v2416_v20  ;;  %v5360_v25 = vpack.c.bf16 %v2928_v21, %v2928_v21  ;;  %2627 = vmatmul.mubr.bf16.gmra.mrb[248].mxu0 %v5847_v12  ;;  %3139 = vmatmul.mubr.bf16.gmra.mrb[248].mxu1 %v5848_v13 }
 0x233   : > { %4837 = vmatprep.mubr.msk.bf16.mxu0 %vm1713_vm0, %v5849_v16  ;;  %4901 = vmatprep.mubr.msk.bf16.mxu1 %vm1713_vm0, %v5851_v17 }
 0x234   : > { %4251 = vst.msk [vmem:[%s6157_s30 + $0x11c] sm:$0xf] %vm4179_vm1, %v5232_v24  ;;  %4379 = vst.msk [vmem:[%s6157_s30 + $0x31c] sm:$0xf] %vm4179_vm1, %v5360_v25 }
 0x235   : > { %v2420_v26 = vpop.f32.mrb[144].mxu0  ;;  %v2932_v27 = vpop.f32.mrb[144].mxu1 }
 0x236   : > { %v2421_v28 = vadd.f32 %v6482_v45, %v2420_v26  ;;  %v2933_v29 = vadd.f32 %v6482_v45, %v2932_v27  ;;  %v2422_v30 = vpop.f32.mrb[145].mxu0  ;;  %v2934_v31 = vpop.f32.mrb[145].mxu1 }
 0x237   : > { %v2423_v34 = vpop.f32.mrb[146].mxu0  ;;  %v2935_v35 = vpop.f32.mrb[146].mxu1 }
 0x238   : > { %v5233_v36 = vpack.c.bf16 %v2421_v28, %v2421_v28  ;;  %v5361_v37 = vpack.c.bf16 %v2933_v29, %v2933_v29  ;;  %v2424_v39 = vadd.f32 %v6815_v38, %v2423_v34  ;;  %v2936_v40 = vadd.f32 %v6815_v38, %v2935_v35  ;;  %v2425_v45 = vpop.f32.mrb[147].mxu0  ;;  %v2937_v41 = vpop.f32.mrb[147].mxu1 }
 0x23a   : > { %4252 = vst.msk [vmem:[%s6157_s30 + $0x120] sm:$0xf] %vm4179_vm1, %v5233_v36  ;;  %4380 = vst.msk [vmem:[%s6157_s30 + $0x320] sm:$0xf] %vm4179_vm1, %v5361_v37  ;;  %v5234_v42 = vpack.c.bf16 %v2424_v39, %v2424_v39  ;;  %v5362_v43 = vpack.c.bf16 %v2936_v40, %v2936_v40  ;;  %2635 = vmatmul.mubr.bf16.gmra.mrb[252].mxu0 %v5853_v32  ;;  %3147 = vmatmul.mubr.bf16.gmra.mrb[252].mxu1 %v5854_v33 }
 0x23c   : > { %4253 = vst.msk [vmem:[%s6157_s30 + $0x124] sm:$0xf] %vm4179_vm1, %v5234_v42  ;;  %4381 = vst.msk [vmem:[%s6157_s30 + $0x324] sm:$0xf] %vm4179_vm1, %v5362_v43 }
 0x23d   : > { %v2428_v62 = vpop.f32.mrb[148].mxu0  ;;  %v2940_v44 = vpop.f32.mrb[148].mxu1 }
 0x23e   : > { %v2429_v46 = vadd.f32 %v6815_v38, %v2428_v62  ;;  %v2941_v47 = vadd.f32 %v6815_v38, %v2940_v44  ;;  %v2430_v48 = vpop.f32.mrb[149].mxu0  ;;  %v2942_v49 = vpop.f32.mrb[149].mxu1 }
 0x23f   : > { %v2431_v50 = vpop.f32.mrb[150].mxu0  ;;  %v2943_v51 = vpop.f32.mrb[150].mxu1 }
 0x240   : > { %v5235_v52 = vpack.c.bf16 %v2429_v46, %v2429_v46  ;;  %v5363_v53 = vpack.c.bf16 %v2941_v47, %v2941_v47  ;;  %v2432_v54 = vadd.f32 %v6815_v38, %v2431_v50  ;;  %v2944_v55 = vadd.f32 %v6815_v38, %v2943_v51  ;;  %v2433_v56 = vpop.f32.mrb[151].mxu0  ;;  %v2945_v57 = vpop.f32.mrb[151].mxu1 }
 0x242   : > { %4254 = vst.msk [vmem:[%s6157_s30 + $0x128] sm:$0xf] %vm4179_vm1, %v5235_v52  ;;  %4382 = vst.msk [vmem:[%s6157_s30 + $0x328] sm:$0xf] %vm4179_vm1, %v5363_v53  ;;  %v5236_v58 = vpack.c.bf16 %v2432_v54, %v2432_v54  ;;  %v5364_v59 = vpack.c.bf16 %v2944_v55, %v2944_v55 }
 0x244   : > { %4255 = vst.msk [vmem:[%s6157_s30 + $0x12c] sm:$0xf] %vm4179_vm1, %v5236_v58  ;;  %4383 = vst.msk [vmem:[%s6157_s30 + $0x32c] sm:$0xf] %vm4179_vm1, %v5364_v59 }
 0x245   : > { %v2436_v60 = vpop.f32.mrb[152].mxu0  ;;  %v2948_v61 = vpop.f32.mrb[152].mxu1 }
 0x246   : > { %v2437_v63 = vadd.f32 %v6815_v38, %v2436_v60  ;;  %v2949_v0 = vadd.f32 %v6815_v38, %v2948_v61  ;;  %v2438_v1 = vpop.f32.mrb[153].mxu0  ;;  %v2950_v2 = vpop.f32.mrb[153].mxu1 }
 0x247   : > { %v2439_v3 = vpop.f32.mrb[154].mxu0  ;;  %v2951_v4 = vpop.f32.mrb[154].mxu1 }
 0x248   : > { %v5237_v5 = vpack.c.bf16 %v2437_v63, %v2437_v63  ;;  %v5365_v6 = vpack.c.bf16 %v2949_v0, %v2949_v0  ;;  %v2440_v7 = vadd.f32 %v6815_v38, %v2439_v3  ;;  %v2952_v8 = vadd.f32 %v6815_v38, %v2951_v4  ;;  %v2441_v9 = vpop.f32.mrb[155].mxu0  ;;  %v2953_v10 = vpop.f32.mrb[155].mxu1 }
 0x24a   : > { %4256 = vst.msk [vmem:[%s6157_s30 + $0x130] sm:$0xf] %vm4179_vm1, %v5237_v5  ;;  %4384 = vst.msk [vmem:[%s6157_s30 + $0x330] sm:$0xf] %vm4179_vm1, %v5365_v6  ;;  %v5238_v11 = vpack.c.bf16 %v2440_v7, %v2440_v7  ;;  %v5366_v12 = vpack.c.bf16 %v2952_v8, %v2952_v8 }
 0x24c   : > { %4257 = vst.msk [vmem:[%s6157_s30 + $0x134] sm:$0xf] %vm4179_vm1, %v5238_v11  ;;  %4385 = vst.msk [vmem:[%s6157_s30 + $0x334] sm:$0xf] %vm4179_vm1, %v5366_v12 }
 0x24d   : > { %v2444_v13 = vpop.f32.mrb[156].mxu0  ;;  %v2956_v14 = vpop.f32.mrb[156].mxu1 }
 0x24e   : > { %v2445_v15 = vadd.f32 %v6815_v38, %v2444_v13  ;;  %v2957_v16 = vadd.f32 %v6815_v38, %v2956_v14  ;;  %v2446_v17 = vpop.f32.mrb[157].mxu0  ;;  %v2958_v18 = vpop.f32.mrb[157].mxu1 }
 0x24f   : > { %v2447_v19 = vpop.f32.mrb[158].mxu0  ;;  %v2959_v20 = vpop.f32.mrb[158].mxu1 }
 0x250   : > { %v5239_v21 = vpack.c.bf16 %v2445_v15, %v2445_v15  ;;  %v5367_v22 = vpack.c.bf16 %v2957_v16, %v2957_v16  ;;  %v2448_v23 = vadd.f32 %v6815_v38, %v2447_v19  ;;  %v2960_v24 = vadd.f32 %v6815_v38, %v2959_v20  ;;  %v2449_v25 = vpop.f32.mrb[159].mxu0  ;;  %v2961_v26 = vpop.f32.mrb[159].mxu1 }
 0x252   : > { %4258 = vst.msk [vmem:[%s6157_s30 + $0x138] sm:$0xf] %vm4179_vm1, %v5239_v21  ;;  %4386 = vst.msk [vmem:[%s6157_s30 + $0x338] sm:$0xf] %vm4179_vm1, %v5367_v22  ;;  %v5240_v27 = vpack.c.bf16 %v2448_v23, %v2448_v23  ;;  %v5368_v28 = vpack.c.bf16 %v2960_v24, %v2960_v24 }
 0x254   : > { %4259 = vst.msk [vmem:[%s6157_s30 + $0x13c] sm:$0xf] %vm4179_vm1, %v5240_v27  ;;  %4387 = vst.msk [vmem:[%s6157_s30 + $0x33c] sm:$0xf] %vm4179_vm1, %v5368_v28 }
 0x255   : > { %v2452_v29 = vpop.f32.mrb[160].mxu0  ;;  %v2964_v30 = vpop.f32.mrb[160].mxu1 }
 0x256   : > { %v2453_v31 = vadd.f32 %v6815_v38, %v2452_v29  ;;  %v2965_v32 = vadd.f32 %v6815_v38, %v2964_v30  ;;  %v2454_v33 = vpop.f32.mrb[161].mxu0  ;;  %v2966_v34 = vpop.f32.mrb[161].mxu1 }
 0x257   : > { %v2455_v35 = vpop.f32.mrb[162].mxu0  ;;  %v2967_v36 = vpop.f32.mrb[162].mxu1 }
 0x258   : > { %v5241_v37 = vpack.c.bf16 %v2453_v31, %v2453_v31  ;;  %v5369_v39 = vpack.c.bf16 %v2965_v32, %v2965_v32  ;;  %v2456_v40 = vadd.f32 %v6815_v38, %v2455_v35  ;;  %v2968_v45 = vadd.f32 %v6815_v38, %v2967_v36  ;;  %v2457_v41 = vpop.f32.mrb[163].mxu0  ;;  %v2969_v42 = vpop.f32.mrb[163].mxu1 }
 0x25a   : > { %4260 = vst.msk [vmem:[%s6157_s30 + $0x140] sm:$0xf] %vm4179_vm1, %v5241_v37  ;;  %4388 = vst.msk [vmem:[%s6157_s30 + $0x340] sm:$0xf] %vm4179_vm1, %v5369_v39  ;;  %v5242_v43 = vpack.c.bf16 %v2456_v40, %v2456_v40  ;;  %v5370_v62 = vpack.c.bf16 %v2968_v45, %v2968_v45 }
 0x25c   : > { %4261 = vst.msk [vmem:[%s6157_s30 + $0x144] sm:$0xf] %vm4179_vm1, %v5242_v43  ;;  %4389 = vst.msk [vmem:[%s6157_s30 + $0x344] sm:$0xf] %vm4179_vm1, %v5370_v62 }
 0x25d   : > { %v2460_v44 = vpop.f32.mrb[164].mxu0  ;;  %v2972_v46 = vpop.f32.mrb[164].mxu1 }
 0x25e   : > { %v2461_v47 = vadd.f32 %v6815_v38, %v2460_v44  ;;  %v2973_v48 = vadd.f32 %v6815_v38, %v2972_v46  ;;  %v2462_v49 = vpop.f32.mrb[165].mxu0  ;;  %v2974_v50 = vpop.f32.mrb[165].mxu1 }
 0x25f   : > { %v2463_v51 = vpop.f32.mrb[166].mxu0  ;;  %v2975_v52 = vpop.f32.mrb[166].mxu1 }
 0x260   : > { %v5243_v53 = vpack.c.bf16 %v2461_v47, %v2461_v47  ;;  %v5371_v54 = vpack.c.bf16 %v2973_v48, %v2973_v48  ;;  %v2464_v55 = vadd.f32 %v6815_v38, %v2463_v51  ;;  %v2976_v56 = vadd.f32 %v6815_v38, %v2975_v52  ;;  %v2465_v57 = vpop.f32.mrb[167].mxu0  ;;  %v2977_v58 = vpop.f32.mrb[167].mxu1 }
 0x262   : > { %4262 = vst.msk [vmem:[%s6157_s30 + $0x148] sm:$0xf] %vm4179_vm1, %v5243_v53  ;;  %4390 = vst.msk [vmem:[%s6157_s30 + $0x348] sm:$0xf] %vm4179_vm1, %v5371_v54  ;;  %v5244_v59 = vpack.c.bf16 %v2464_v55, %v2464_v55  ;;  %v5372_v60 = vpack.c.bf16 %v2976_v56, %v2976_v56 }
 0x264   : > { %4263 = vst.msk [vmem:[%s6157_s30 + $0x14c] sm:$0xf] %vm4179_vm1, %v5244_v59  ;;  %4391 = vst.msk [vmem:[%s6157_s30 + $0x34c] sm:$0xf] %vm4179_vm1, %v5372_v60 }
 0x265   : > { %v2468_v61 = vpop.f32.mrb[168].mxu0  ;;  %v2980_v63 = vpop.f32.mrb[168].mxu1 }
 0x266   : > { %v2469_v0 = vadd.f32 %v6815_v38, %v2468_v61  ;;  %v2981_v1 = vadd.f32 %v6815_v38, %v2980_v63  ;;  %v2470_v2 = vpop.f32.mrb[169].mxu0  ;;  %v2982_v3 = vpop.f32.mrb[169].mxu1 }
 0x267   : > { %v2471_v4 = vpop.f32.mrb[170].mxu0  ;;  %v2983_v5 = vpop.f32.mrb[170].mxu1 }
 0x268   : > { %v5245_v6 = vpack.c.bf16 %v2469_v0, %v2469_v0  ;;  %v5373_v7 = vpack.c.bf16 %v2981_v1, %v2981_v1  ;;  %v2472_v8 = vadd.f32 %v6815_v38, %v2471_v4  ;;  %v2984_v9 = vadd.f32 %v6815_v38, %v2983_v5  ;;  %v2473_v10 = vpop.f32.mrb[171].mxu0  ;;  %v2985_v11 = vpop.f32.mrb[171].mxu1 }
 0x26a   : > { %4264 = vst.msk [vmem:[%s6157_s30 + $0x150] sm:$0xf] %vm4179_vm1, %v5245_v6  ;;  %4392 = vst.msk [vmem:[%s6157_s30 + $0x350] sm:$0xf] %vm4179_vm1, %v5373_v7  ;;  %v5246_v12 = vpack.c.bf16 %v2472_v8, %v2472_v8  ;;  %v5374_v13 = vpack.c.bf16 %v2984_v9, %v2984_v9 }
 0x26c   : > { %4265 = vst.msk [vmem:[%s6157_s30 + $0x154] sm:$0xf] %vm4179_vm1, %v5246_v12  ;;  %4393 = vst.msk [vmem:[%s6157_s30 + $0x354] sm:$0xf] %vm4179_vm1, %v5374_v13 }
 0x26d   : > { %v2476_v14 = vpop.f32.mrb[172].mxu0  ;;  %v2988_v15 = vpop.f32.mrb[172].mxu1 }
 0x26e   : > { %v2477_v16 = vadd.f32 %v6815_v38, %v2476_v14  ;;  %v2989_v17 = vadd.f32 %v6815_v38, %v2988_v15  ;;  %v2478_v18 = vpop.f32.mrb[173].mxu0  ;;  %v2990_v19 = vpop.f32.mrb[173].mxu1 }
 0x26f   : > { %v2479_v20 = vpop.f32.mrb[174].mxu0  ;;  %v2991_v21 = vpop.f32.mrb[174].mxu1 }
 0x270   : > { %v5247_v22 = vpack.c.bf16 %v2477_v16, %v2477_v16  ;;  %v5375_v23 = vpack.c.bf16 %v2989_v17, %v2989_v17  ;;  %v2480_v24 = vadd.f32 %v6815_v38, %v2479_v20  ;;  %v2992_v25 = vadd.f32 %v6815_v38, %v2991_v21  ;;  %v2481_v26 = vpop.f32.mrb[175].mxu0  ;;  %v2993_v27 = vpop.f32.mrb[175].mxu1 }
 0x272   : > { %4266 = vst.msk [vmem:[%s6157_s30 + $0x158] sm:$0xf] %vm4179_vm1, %v5247_v22  ;;  %4394 = vst.msk [vmem:[%s6157_s30 + $0x358] sm:$0xf] %vm4179_vm1, %v5375_v23  ;;  %v5248_v28 = vpack.c.bf16 %v2480_v24, %v2480_v24  ;;  %v5376_v29 = vpack.c.bf16 %v2992_v25, %v2992_v25 }
 0x274   : > { %4267 = vst.msk [vmem:[%s6157_s30 + $0x15c] sm:$0xf] %vm4179_vm1, %v5248_v28  ;;  %4395 = vst.msk [vmem:[%s6157_s30 + $0x35c] sm:$0xf] %vm4179_vm1, %v5376_v29 }
 0x275   : > { %v2484_v30 = vpop.f32.mrb[176].mxu0  ;;  %v2996_v31 = vpop.f32.mrb[176].mxu1 }
 0x276   : > { %v2485_v32 = vadd.f32 %v6815_v38, %v2484_v30  ;;  %v2997_v33 = vadd.f32 %v6815_v38, %v2996_v31  ;;  %v2486_v34 = vpop.f32.mrb[177].mxu0  ;;  %v2998_v35 = vpop.f32.mrb[177].mxu1 }
 0x277   : > { %v2487_v36 = vpop.f32.mrb[178].mxu0  ;;  %v2999_v37 = vpop.f32.mrb[178].mxu1 }
 0x278   : > { %v5249_v39 = vpack.c.bf16 %v2485_v32, %v2485_v32  ;;  %v5377_v40 = vpack.c.bf16 %v2997_v33, %v2997_v33  ;;  %v2488_v45 = vadd.f32 %v6815_v38, %v2487_v36  ;;  %v3000_v41 = vadd.f32 %v6815_v38, %v2999_v37  ;;  %v2489_v42 = vpop.f32.mrb[179].mxu0  ;;  %v3001_v43 = vpop.f32.mrb[179].mxu1 }
 0x27a   : > { %4268 = vst.msk [vmem:[%s6157_s30 + $0x160] sm:$0xf] %vm4179_vm1, %v5249_v39  ;;  %4396 = vst.msk [vmem:[%s6157_s30 + $0x360] sm:$0xf] %vm4179_vm1, %v5377_v40  ;;  %v5250_v62 = vpack.c.bf16 %v2488_v45, %v2488_v45  ;;  %v5378_v44 = vpack.c.bf16 %v3000_v41, %v3000_v41 }
 0x27c   : > { %4269 = vst.msk [vmem:[%s6157_s30 + $0x164] sm:$0xf] %vm4179_vm1, %v5250_v62  ;;  %4397 = vst.msk [vmem:[%s6157_s30 + $0x364] sm:$0xf] %vm4179_vm1, %v5378_v44 }
 0x27d   : > { %v2492_v46 = vpop.f32.mrb[180].mxu0  ;;  %v3004_v47 = vpop.f32.mrb[180].mxu1 }
 0x27e   : > { %v2493_v48 = vadd.f32 %v6815_v38, %v2492_v46  ;;  %v3005_v49 = vadd.f32 %v6815_v38, %v3004_v47  ;;  %v2494_v50 = vpop.f32.mrb[181].mxu0  ;;  %v3006_v51 = vpop.f32.mrb[181].mxu1 }
 0x27f   : > { %v2495_v52 = vpop.f32.mrb[182].mxu0  ;;  %v3007_v53 = vpop.f32.mrb[182].mxu1 }
 0x280   : > { %v5251_v54 = vpack.c.bf16 %v2493_v48, %v2493_v48  ;;  %v5379_v55 = vpack.c.bf16 %v3005_v49, %v3005_v49  ;;  %v2496_v56 = vadd.f32 %v6815_v38, %v2495_v52  ;;  %v3008_v57 = vadd.f32 %v6815_v38, %v3007_v53  ;;  %v2497_v58 = vpop.f32.mrb[183].mxu0  ;;  %v3009_v59 = vpop.f32.mrb[183].mxu1 }
 0x282   : > { %4270 = vst.msk [vmem:[%s6157_s30 + $0x168] sm:$0xf] %vm4179_vm1, %v5251_v54  ;;  %4398 = vst.msk [vmem:[%s6157_s30 + $0x368] sm:$0xf] %vm4179_vm1, %v5379_v55  ;;  %v5252_v60 = vpack.c.bf16 %v2496_v56, %v2496_v56  ;;  %v5380_v61 = vpack.c.bf16 %v3008_v57, %v3008_v57 }
 0x284   : > { %4271 = vst.msk [vmem:[%s6157_s30 + $0x16c] sm:$0xf] %vm4179_vm1, %v5252_v60  ;;  %4399 = vst.msk [vmem:[%s6157_s30 + $0x36c] sm:$0xf] %vm4179_vm1, %v5380_v61 }
 0x285   : > { %v2500_v63 = vpop.f32.mrb[184].mxu0  ;;  %v3012_v0 = vpop.f32.mrb[184].mxu1 }
 0x286   : > { %v2501_v1 = vadd.f32 %v6815_v38, %v2500_v63  ;;  %v3013_v2 = vadd.f32 %v6815_v38, %v3012_v0  ;;  %v2502_v3 = vpop.f32.mrb[185].mxu0  ;;  %v3014_v4 = vpop.f32.mrb[185].mxu1 }
 0x287   : > { %v2503_v5 = vpop.f32.mrb[186].mxu0  ;;  %v3015_v6 = vpop.f32.mrb[186].mxu1 }
 0x288   : > { %v5253_v7 = vpack.c.bf16 %v2501_v1, %v2501_v1  ;;  %v5381_v8 = vpack.c.bf16 %v3013_v2, %v3013_v2  ;;  %v2504_v9 = vadd.f32 %v6815_v38, %v2503_v5  ;;  %v3016_v10 = vadd.f32 %v6815_v38, %v3015_v6  ;;  %v2505_v11 = vpop.f32.mrb[187].mxu0  ;;  %v3017_v12 = vpop.f32.mrb[187].mxu1 }
 0x28a   : > { %4272 = vst.msk [vmem:[%s6157_s30 + $0x170] sm:$0xf] %vm4179_vm1, %v5253_v7  ;;  %4400 = vst.msk [vmem:[%s6157_s30 + $0x370] sm:$0xf] %vm4179_vm1, %v5381_v8  ;;  %v5254_v13 = vpack.c.bf16 %v2504_v9, %v2504_v9  ;;  %v5382_v14 = vpack.c.bf16 %v3016_v10, %v3016_v10 }
 0x28c   : > { %4273 = vst.msk [vmem:[%s6157_s30 + $0x174] sm:$0xf] %vm4179_vm1, %v5254_v13  ;;  %4401 = vst.msk [vmem:[%s6157_s30 + $0x374] sm:$0xf] %vm4179_vm1, %v5382_v14 }
 0x28d   : > { %v2508_v15 = vpop.f32.mrb[188].mxu0  ;;  %v3020_v16 = vpop.f32.mrb[188].mxu1 }
 0x28e   : > { %v2509_v17 = vadd.f32 %v6815_v38, %v2508_v15  ;;  %v3021_v18 = vadd.f32 %v6815_v38, %v3020_v16  ;;  %v2510_v19 = vpop.f32.mrb[189].mxu0  ;;  %v3022_v20 = vpop.f32.mrb[189].mxu1 }
 0x28f   : > { %v2511_v21 = vpop.f32.mrb[190].mxu0  ;;  %v3023_v22 = vpop.f32.mrb[190].mxu1 }
 0x290   : > { %v5255_v23 = vpack.c.bf16 %v2509_v17, %v2509_v17  ;;  %v5383_v24 = vpack.c.bf16 %v3021_v18, %v3021_v18  ;;  %v2512_v25 = vadd.f32 %v6815_v38, %v2511_v21  ;;  %v3024_v26 = vadd.f32 %v6815_v38, %v3023_v22  ;;  %v2513_v27 = vpop.f32.mrb[191].mxu0  ;;  %v3025_v28 = vpop.f32.mrb[191].mxu1 }
 0x292   : > { %4274 = vst.msk [vmem:[%s6157_s30 + $0x178] sm:$0xf] %vm4179_vm1, %v5255_v23  ;;  %4402 = vst.msk [vmem:[%s6157_s30 + $0x378] sm:$0xf] %vm4179_vm1, %v5383_v24  ;;  %v5256_v29 = vpack.c.bf16 %v2512_v25, %v2512_v25  ;;  %v5384_v30 = vpack.c.bf16 %v3024_v26, %v3024_v26 }
 0x294   : > { %4275 = vst.msk [vmem:[%s6157_s30 + $0x17c] sm:$0xf] %vm4179_vm1, %v5256_v29  ;;  %4403 = vst.msk [vmem:[%s6157_s30 + $0x37c] sm:$0xf] %vm4179_vm1, %v5384_v30 }
 0x295   : > { %v2516_v31 = vpop.f32.mrb[192].mxu0  ;;  %v3028_v32 = vpop.f32.mrb[192].mxu1 }
 0x296   : > { %v2517_v33 = vadd.f32 %v6815_v38, %v2516_v31  ;;  %v3029_v34 = vadd.f32 %v6815_v38, %v3028_v32  ;;  %v2518_v35 = vpop.f32.mrb[193].mxu0  ;;  %v3030_v36 = vpop.f32.mrb[193].mxu1 }
 0x297   : > { %v2519_v37 = vpop.f32.mrb[194].mxu0  ;;  %v3031_v39 = vpop.f32.mrb[194].mxu1 }
 0x298   : > { %v5257_v40 = vpack.c.bf16 %v2517_v33, %v2517_v33  ;;  %v5385_v45 = vpack.c.bf16 %v3029_v34, %v3029_v34  ;;  %v2520_v41 = vadd.f32 %v6815_v38, %v2519_v37  ;;  %v3032_v42 = vadd.f32 %v6815_v38, %v3031_v39  ;;  %v2521_v43 = vpop.f32.mrb[195].mxu0  ;;  %v3033_v62 = vpop.f32.mrb[195].mxu1 }
 0x29a   : > { %4276 = vst.msk [vmem:[%s6157_s30 + $0x180] sm:$0xf] %vm4179_vm1, %v5257_v40  ;;  %4404 = vst.msk [vmem:[%s6157_s30 + $0x380] sm:$0xf] %vm4179_vm1, %v5385_v45  ;;  %v5258_v44 = vpack.c.bf16 %v2520_v41, %v2520_v41  ;;  %v5386_v46 = vpack.c.bf16 %v3032_v42, %v3032_v42 }
 0x29c   : > { %4277 = vst.msk [vmem:[%s6157_s30 + $0x184] sm:$0xf] %vm4179_vm1, %v5258_v44  ;;  %4405 = vst.msk [vmem:[%s6157_s30 + $0x384] sm:$0xf] %vm4179_vm1, %v5386_v46 }
 0x29d   : > { %v2524_v47 = vpop.f32.mrb[196].mxu0  ;;  %v3036_v48 = vpop.f32.mrb[196].mxu1 }
 0x29e   : > { %v2525_v49 = vadd.f32 %v6815_v38, %v2524_v47  ;;  %v3037_v50 = vadd.f32 %v6815_v38, %v3036_v48  ;;  %v2526_v51 = vpop.f32.mrb[197].mxu0  ;;  %v3038_v52 = vpop.f32.mrb[197].mxu1 }
 0x29f   : > { %v2527_v53 = vpop.f32.mrb[198].mxu0  ;;  %v3039_v54 = vpop.f32.mrb[198].mxu1 }
 0x2a0   : > { %v5259_v55 = vpack.c.bf16 %v2525_v49, %v2525_v49  ;;  %v5387_v56 = vpack.c.bf16 %v3037_v50, %v3037_v50  ;;  %v2528_v57 = vadd.f32 %v6815_v38, %v2527_v53  ;;  %v3040_v58 = vadd.f32 %v6815_v38, %v3039_v54  ;;  %v2529_v59 = vpop.f32.mrb[199].mxu0  ;;  %v3041_v60 = vpop.f32.mrb[199].mxu1 }
 0x2a2   : > { %4278 = vst.msk [vmem:[%s6157_s30 + $0x188] sm:$0xf] %vm4179_vm1, %v5259_v55  ;;  %4406 = vst.msk [vmem:[%s6157_s30 + $0x388] sm:$0xf] %vm4179_vm1, %v5387_v56  ;;  %v5260_v61 = vpack.c.bf16 %v2528_v57, %v2528_v57  ;;  %v5388_v63 = vpack.c.bf16 %v3040_v58, %v3040_v58 }
 0x2a4   : > { %4279 = vst.msk [vmem:[%s6157_s30 + $0x18c] sm:$0xf] %vm4179_vm1, %v5260_v61  ;;  %4407 = vst.msk [vmem:[%s6157_s30 + $0x38c] sm:$0xf] %vm4179_vm1, %v5388_v63 }
 0x2a5   : > { %v2532_v0 = vpop.f32.mrb[200].mxu0  ;;  %v3044_v1 = vpop.f32.mrb[200].mxu1 }
 0x2a6   : > { %v2533_v2 = vadd.f32 %v6815_v38, %v2532_v0  ;;  %v3045_v3 = vadd.f32 %v6815_v38, %v3044_v1  ;;  %v2534_v4 = vpop.f32.mrb[201].mxu0  ;;  %v3046_v5 = vpop.f32.mrb[201].mxu1 }
 0x2a7   : > { %v2535_v6 = vpop.f32.mrb[202].mxu0  ;;  %v3047_v7 = vpop.f32.mrb[202].mxu1 }
 0x2a8   : > { %v5261_v8 = vpack.c.bf16 %v2533_v2, %v2533_v2  ;;  %v5389_v9 = vpack.c.bf16 %v3045_v3, %v3045_v3  ;;  %v2536_v10 = vadd.f32 %v6815_v38, %v2535_v6  ;;  %v3048_v11 = vadd.f32 %v6815_v38, %v3047_v7  ;;  %v2537_v12 = vpop.f32.mrb[203].mxu0  ;;  %v3049_v13 = vpop.f32.mrb[203].mxu1 }
 0x2aa   : > { %4280 = vst.msk [vmem:[%s6157_s30 + $0x190] sm:$0xf] %vm4179_vm1, %v5261_v8  ;;  %4408 = vst.msk [vmem:[%s6157_s30 + $0x390] sm:$0xf] %vm4179_vm1, %v5389_v9  ;;  %v5262_v14 = vpack.c.bf16 %v2536_v10, %v2536_v10  ;;  %v5390_v15 = vpack.c.bf16 %v3048_v11, %v3048_v11 }
 0x2ac   : > { %4281 = vst.msk [vmem:[%s6157_s30 + $0x194] sm:$0xf] %vm4179_vm1, %v5262_v14  ;;  %4409 = vst.msk [vmem:[%s6157_s30 + $0x394] sm:$0xf] %vm4179_vm1, %v5390_v15 }
 0x2ad   : > { %v2540_v16 = vpop.f32.mrb[204].mxu0  ;;  %v3052_v17 = vpop.f32.mrb[204].mxu1 }
 0x2ae   : > { %v2541_v18 = vadd.f32 %v6815_v38, %v2540_v16  ;;  %v3053_v19 = vadd.f32 %v6815_v38, %v3052_v17  ;;  %v2542_v20 = vpop.f32.mrb[205].mxu0  ;;  %v3054_v21 = vpop.f32.mrb[205].mxu1 }
 0x2af   : > { %v2543_v22 = vpop.f32.mrb[206].mxu0  ;;  %v3055_v23 = vpop.f32.mrb[206].mxu1 }
 0x2b0   : > { %v5263_v24 = vpack.c.bf16 %v2541_v18, %v2541_v18  ;;  %v5391_v25 = vpack.c.bf16 %v3053_v19, %v3053_v19  ;;  %v2544_v26 = vadd.f32 %v6815_v38, %v2543_v22  ;;  %v3056_v27 = vadd.f32 %v6815_v38, %v3055_v23  ;;  %v2545_v28 = vpop.f32.mrb[207].mxu0  ;;  %v3057_v29 = vpop.f32.mrb[207].mxu1 }
 0x2b2   : > { %4282 = vst.msk [vmem:[%s6157_s30 + $0x198] sm:$0xf] %vm4179_vm1, %v5263_v24  ;;  %4410 = vst.msk [vmem:[%s6157_s30 + $0x398] sm:$0xf] %vm4179_vm1, %v5391_v25  ;;  %v5264_v30 = vpack.c.bf16 %v2544_v26, %v2544_v26  ;;  %v5392_v31 = vpack.c.bf16 %v3056_v27, %v3056_v27 }
 0x2b4   : > { %4283 = vst.msk [vmem:[%s6157_s30 + $0x19c] sm:$0xf] %vm4179_vm1, %v5264_v30  ;;  %4411 = vst.msk [vmem:[%s6157_s30 + $0x39c] sm:$0xf] %vm4179_vm1, %v5392_v31 }
 0x2b5   : > { %v2548_v32 = vpop.f32.mrb[208].mxu0  ;;  %v3060_v33 = vpop.f32.mrb[208].mxu1 }
 0x2b6   : > { %v2549_v34 = vadd.f32 %v6815_v38, %v2548_v32  ;;  %v3061_v35 = vadd.f32 %v6815_v38, %v3060_v33  ;;  %v2550_v36 = vpop.f32.mrb[209].mxu0  ;;  %v3062_v37 = vpop.f32.mrb[209].mxu1 }
 0x2b7   : > { %v2551_v39 = vpop.f32.mrb[210].mxu0  ;;  %v3063_v40 = vpop.f32.mrb[210].mxu1 }
 0x2b8   : > { %v5265_v45 = vpack.c.bf16 %v2549_v34, %v2549_v34  ;;  %v5393_v41 = vpack.c.bf16 %v3061_v35, %v3061_v35  ;;  %v2552_v42 = vadd.f32 %v6815_v38, %v2551_v39  ;;  %v3064_v43 = vadd.f32 %v6815_v38, %v3063_v40  ;;  %v2553_v62 = vpop.f32.mrb[211].mxu0  ;;  %v3065_v44 = vpop.f32.mrb[211].mxu1 }
 0x2ba   : > { %4284 = vst.msk [vmem:[%s6157_s30 + $0x1a0] sm:$0xf] %vm4179_vm1, %v5265_v45  ;;  %4412 = vst.msk [vmem:[%s6157_s30 + $0x3a0] sm:$0xf] %vm4179_vm1, %v5393_v41  ;;  %v5266_v46 = vpack.c.bf16 %v2552_v42, %v2552_v42  ;;  %v5394_v47 = vpack.c.bf16 %v3064_v43, %v3064_v43 }
 0x2bc   : > { %4285 = vst.msk [vmem:[%s6157_s30 + $0x1a4] sm:$0xf] %vm4179_vm1, %v5266_v46  ;;  %4413 = vst.msk [vmem:[%s6157_s30 + $0x3a4] sm:$0xf] %vm4179_vm1, %v5394_v47 }
 0x2bd   : > { %v2556_v48 = vpop.f32.mrb[212].mxu0  ;;  %v3068_v49 = vpop.f32.mrb[212].mxu1 }
 0x2be   : > { %v2557_v50 = vadd.f32 %v6815_v38, %v2556_v48  ;;  %v3069_v51 = vadd.f32 %v6815_v38, %v3068_v49  ;;  %v2558_v52 = vpop.f32.mrb[213].mxu0  ;;  %v3070_v53 = vpop.f32.mrb[213].mxu1 }
 0x2bf   : > { %v2559_v54 = vpop.f32.mrb[214].mxu0  ;;  %v3071_v55 = vpop.f32.mrb[214].mxu1 }
 0x2c0   : > { %v5267_v56 = vpack.c.bf16 %v2557_v50, %v2557_v50  ;;  %v5395_v57 = vpack.c.bf16 %v3069_v51, %v3069_v51  ;;  %v2560_v58 = vadd.f32 %v6815_v38, %v2559_v54  ;;  %v3072_v59 = vadd.f32 %v6815_v38, %v3071_v55  ;;  %v2561_v60 = vpop.f32.mrb[215].mxu0  ;;  %v3073_v61 = vpop.f32.mrb[215].mxu1 }
 0x2c2   : > { %4286 = vst.msk [vmem:[%s6157_s30 + $0x1a8] sm:$0xf] %vm4179_vm1, %v5267_v56  ;;  %4414 = vst.msk [vmem:[%s6157_s30 + $0x3a8] sm:$0xf] %vm4179_vm1, %v5395_v57  ;;  %v5268_v63 = vpack.c.bf16 %v2560_v58, %v2560_v58  ;;  %v5396_v0 = vpack.c.bf16 %v3072_v59, %v3072_v59 }
 0x2c4   : > { %4287 = vst.msk [vmem:[%s6157_s30 + $0x1ac] sm:$0xf] %vm4179_vm1, %v5268_v63  ;;  %4415 = vst.msk [vmem:[%s6157_s30 + $0x3ac] sm:$0xf] %vm4179_vm1, %v5396_v0 }
 0x2c5   : > { %v2564_v1 = vpop.f32.mrb[216].mxu0  ;;  %v3076_v2 = vpop.f32.mrb[216].mxu1 }
 0x2c6   : > { %v2565_v3 = vadd.f32 %v6815_v38, %v2564_v1  ;;  %v3077_v4 = vadd.f32 %v6815_v38, %v3076_v2  ;;  %v2566_v5 = vpop.f32.mrb[217].mxu0  ;;  %v3078_v6 = vpop.f32.mrb[217].mxu1 }
 0x2c7   : > { %v2567_v7 = vpop.f32.mrb[218].mxu0  ;;  %v3079_v8 = vpop.f32.mrb[218].mxu1 }
 0x2c8   : > { %v5269_v9 = vpack.c.bf16 %v2565_v3, %v2565_v3  ;;  %v5397_v10 = vpack.c.bf16 %v3077_v4, %v3077_v4  ;;  %v2568_v11 = vadd.f32 %v6815_v38, %v2567_v7  ;;  %v3080_v12 = vadd.f32 %v6815_v38, %v3079_v8  ;;  %v2569_v13 = vpop.f32.mrb[219].mxu0  ;;  %v3081_v14 = vpop.f32.mrb[219].mxu1 }
 0x2ca   : > { %4288 = vst.msk [vmem:[%s6157_s30 + $0x1b0] sm:$0xf] %vm4179_vm1, %v5269_v9  ;;  %4416 = vst.msk [vmem:[%s6157_s30 + $0x3b0] sm:$0xf] %vm4179_vm1, %v5397_v10  ;;  %v5270_v15 = vpack.c.bf16 %v2568_v11, %v2568_v11  ;;  %v5398_v16 = vpack.c.bf16 %v3080_v12, %v3080_v12 }
 0x2cc   : > { %4289 = vst.msk [vmem:[%s6157_s30 + $0x1b4] sm:$0xf] %vm4179_vm1, %v5270_v15  ;;  %4417 = vst.msk [vmem:[%s6157_s30 + $0x3b4] sm:$0xf] %vm4179_vm1, %v5398_v16 }
 0x2cd   : > { %v2572_v17 = vpop.f32.mrb[220].mxu0  ;;  %v3084_v18 = vpop.f32.mrb[220].mxu1 }
 0x2ce   : > { %v2573_v19 = vadd.f32 %v6815_v38, %v2572_v17  ;;  %v3085_v20 = vadd.f32 %v6815_v38, %v3084_v18  ;;  %v2574_v21 = vpop.f32.mrb[221].mxu0  ;;  %v3086_v22 = vpop.f32.mrb[221].mxu1 }
 0x2cf   : > { %v2575_v23 = vpop.f32.mrb[222].mxu0  ;;  %v3087_v24 = vpop.f32.mrb[222].mxu1 }
 0x2d0   : > { %v5271_v25 = vpack.c.bf16 %v2573_v19, %v2573_v19  ;;  %v5399_v26 = vpack.c.bf16 %v3085_v20, %v3085_v20  ;;  %v2576_v27 = vadd.f32 %v6815_v38, %v2575_v23  ;;  %v3088_v28 = vadd.f32 %v6815_v38, %v3087_v24  ;;  %v2577_v29 = vpop.f32.mrb[223].mxu0  ;;  %v3089_v30 = vpop.f32.mrb[223].mxu1 }
 0x2d2   : > { %4290 = vst.msk [vmem:[%s6157_s30 + $0x1b8] sm:$0xf] %vm4179_vm1, %v5271_v25  ;;  %4418 = vst.msk [vmem:[%s6157_s30 + $0x3b8] sm:$0xf] %vm4179_vm1, %v5399_v26  ;;  %v5272_v31 = vpack.c.bf16 %v2576_v27, %v2576_v27  ;;  %v5400_v32 = vpack.c.bf16 %v3088_v28, %v3088_v28 }
 0x2d4   : > { %4291 = vst.msk [vmem:[%s6157_s30 + $0x1bc] sm:$0xf] %vm4179_vm1, %v5272_v31  ;;  %4419 = vst.msk [vmem:[%s6157_s30 + $0x3bc] sm:$0xf] %vm4179_vm1, %v5400_v32 }
 0x2d5   : > { %v2580_v33 = vpop.f32.mrb[224].mxu0  ;;  %v3092_v34 = vpop.f32.mrb[224].mxu1 }
 0x2d6   : > { %v2581_v35 = vadd.f32 %v6815_v38, %v2580_v33  ;;  %v3093_v36 = vadd.f32 %v6815_v38, %v3092_v34  ;;  %v2582_v37 = vpop.f32.mrb[225].mxu0  ;;  %v3094_v39 = vpop.f32.mrb[225].mxu1 }
 0x2d7   : > { %v2583_v40 = vpop.f32.mrb[226].mxu0  ;;  %v3095_v45 = vpop.f32.mrb[226].mxu1 }
 0x2d8   : > { %v5273_v41 = vpack.c.bf16 %v2581_v35, %v2581_v35  ;;  %v5401_v42 = vpack.c.bf16 %v3093_v36, %v3093_v36  ;;  %v2584_v43 = vadd.f32 %v6815_v38, %v2583_v40  ;;  %v3096_v62 = vadd.f32 %v6815_v38, %v3095_v45  ;;  %v2585_v44 = vpop.f32.mrb[227].mxu0  ;;  %v3097_v46 = vpop.f32.mrb[227].mxu1 }
 0x2da   : > { %4292 = vst.msk [vmem:[%s6157_s30 + $0x1c0] sm:$0xf] %vm4179_vm1, %v5273_v41  ;;  %4420 = vst.msk [vmem:[%s6157_s30 + $0x3c0] sm:$0xf] %vm4179_vm1, %v5401_v42  ;;  %v5274_v47 = vpack.c.bf16 %v2584_v43, %v2584_v43  ;;  %v5402_v48 = vpack.c.bf16 %v3096_v62, %v3096_v62 }
 0x2dc   : > { %4293 = vst.msk [vmem:[%s6157_s30 + $0x1c4] sm:$0xf] %vm4179_vm1, %v5274_v47  ;;  %4421 = vst.msk [vmem:[%s6157_s30 + $0x3c4] sm:$0xf] %vm4179_vm1, %v5402_v48 }
 0x2dd   : > { %v2588_v49 = vpop.f32.mrb[228].mxu0  ;;  %v3100_v50 = vpop.f32.mrb[228].mxu1 }
 0x2de   : > { %v2589_v51 = vadd.f32 %v6815_v38, %v2588_v49  ;;  %v3101_v52 = vadd.f32 %v6815_v38, %v3100_v50  ;;  %v2590_v53 = vpop.f32.mrb[229].mxu0  ;;  %v3102_v54 = vpop.f32.mrb[229].mxu1 }
 0x2df   : > { %v2591_v55 = vpop.f32.mrb[230].mxu0  ;;  %v3103_v56 = vpop.f32.mrb[230].mxu1 }
 0x2e0   : > { %v5275_v57 = vpack.c.bf16 %v2589_v51, %v2589_v51  ;;  %v5403_v58 = vpack.c.bf16 %v3101_v52, %v3101_v52  ;;  %v2592_v59 = vadd.f32 %v6815_v38, %v2591_v55  ;;  %v3104_v60 = vadd.f32 %v6815_v38, %v3103_v56  ;;  %v2593_v61 = vpop.f32.mrb[231].mxu0  ;;  %v3105_v63 = vpop.f32.mrb[231].mxu1 }
 0x2e2   : > { %4294 = vst.msk [vmem:[%s6157_s30 + $0x1c8] sm:$0xf] %vm4179_vm1, %v5275_v57  ;;  %4422 = vst.msk [vmem:[%s6157_s30 + $0x3c8] sm:$0xf] %vm4179_vm1, %v5403_v58  ;;  %v5276_v0 = vpack.c.bf16 %v2592_v59, %v2592_v59  ;;  %v5404_v1 = vpack.c.bf16 %v3104_v60, %v3104_v60 }
 0x2e4   : > { %4295 = vst.msk [vmem:[%s6157_s30 + $0x1cc] sm:$0xf] %vm4179_vm1, %v5276_v0  ;;  %4423 = vst.msk [vmem:[%s6157_s30 + $0x3cc] sm:$0xf] %vm4179_vm1, %v5404_v1 }
 0x2e5   : > { %v2596_v2 = vpop.f32.mrb[232].mxu0  ;;  %v3108_v3 = vpop.f32.mrb[232].mxu1 }
 0x2e6   : > { %v2597_v4 = vadd.f32 %v6815_v38, %v2596_v2  ;;  %v3109_v5 = vadd.f32 %v6815_v38, %v3108_v3  ;;  %v2598_v6 = vpop.f32.mrb[233].mxu0  ;;  %v3110_v7 = vpop.f32.mrb[233].mxu1 }
 0x2e7   : > { %v2599_v8 = vpop.f32.mrb[234].mxu0  ;;  %v3111_v9 = vpop.f32.mrb[234].mxu1 }
 0x2e8   : > { %v5277_v10 = vpack.c.bf16 %v2597_v4, %v2597_v4  ;;  %v5405_v11 = vpack.c.bf16 %v3109_v5, %v3109_v5  ;;  %v2600_v12 = vadd.f32 %v6815_v38, %v2599_v8  ;;  %v3112_v13 = vadd.f32 %v6815_v38, %v3111_v9  ;;  %v2601_v14 = vpop.f32.mrb[235].mxu0  ;;  %v3113_v15 = vpop.f32.mrb[235].mxu1 }
 0x2ea   : > { %4296 = vst.msk [vmem:[%s6157_s30 + $0x1d0] sm:$0xf] %vm4179_vm1, %v5277_v10  ;;  %4424 = vst.msk [vmem:[%s6157_s30 + $0x3d0] sm:$0xf] %vm4179_vm1, %v5405_v11  ;;  %v5278_v16 = vpack.c.bf16 %v2600_v12, %v2600_v12  ;;  %v5406_v17 = vpack.c.bf16 %v3112_v13, %v3112_v13 }
 0x2ec   : > { %4297 = vst.msk [vmem:[%s6157_s30 + $0x1d4] sm:$0xf] %vm4179_vm1, %v5278_v16  ;;  %4425 = vst.msk [vmem:[%s6157_s30 + $0x3d4] sm:$0xf] %vm4179_vm1, %v5406_v17 }
 0x2ed   : > { %v2604_v18 = vpop.f32.mrb[236].mxu0  ;;  %v3116_v19 = vpop.f32.mrb[236].mxu1 }
 0x2ee   : > { %v2605_v20 = vadd.f32 %v6815_v38, %v2604_v18  ;;  %v3117_v21 = vadd.f32 %v6815_v38, %v3116_v19  ;;  %v2606_v22 = vpop.f32.mrb[237].mxu0  ;;  %v3118_v23 = vpop.f32.mrb[237].mxu1 }
 0x2ef   : > { %v2607_v24 = vpop.f32.mrb[238].mxu0  ;;  %v3119_v25 = vpop.f32.mrb[238].mxu1 }
 0x2f0   : > { %v5279_v26 = vpack.c.bf16 %v2605_v20, %v2605_v20  ;;  %v5407_v27 = vpack.c.bf16 %v3117_v21, %v3117_v21  ;;  %v2608_v28 = vadd.f32 %v6815_v38, %v2607_v24  ;;  %v3120_v29 = vadd.f32 %v6815_v38, %v3119_v25  ;;  %v2609_v30 = vpop.f32.mrb[239].mxu0  ;;  %v3121_v31 = vpop.f32.mrb[239].mxu1 }
 0x2f2   : > { %4298 = vst.msk [vmem:[%s6157_s30 + $0x1d8] sm:$0xf] %vm4179_vm1, %v5279_v26  ;;  %4426 = vst.msk [vmem:[%s6157_s30 + $0x3d8] sm:$0xf] %vm4179_vm1, %v5407_v27  ;;  %v5280_v32 = vpack.c.bf16 %v2608_v28, %v2608_v28  ;;  %v5408_v33 = vpack.c.bf16 %v3120_v29, %v3120_v29 }
 0x2f4   : > { %4299 = vst.msk [vmem:[%s6157_s30 + $0x1dc] sm:$0xf] %vm4179_vm1, %v5280_v32  ;;  %4427 = vst.msk [vmem:[%s6157_s30 + $0x3dc] sm:$0xf] %vm4179_vm1, %v5408_v33 }
 0x2f5   : > { %v2612_v34 = vpop.f32.mrb[240].mxu0  ;;  %v3124_v35 = vpop.f32.mrb[240].mxu1 }
 0x2f6   : > { %v2613_v36 = vadd.f32 %v6815_v38, %v2612_v34  ;;  %v3125_v37 = vadd.f32 %v6815_v38, %v3124_v35  ;;  %v2614_v39 = vpop.f32.mrb[241].mxu0  ;;  %v3126_v40 = vpop.f32.mrb[241].mxu1 }
 0x2f7   : > { %v2615_v45 = vpop.f32.mrb[242].mxu0  ;;  %v3127_v41 = vpop.f32.mrb[242].mxu1 }
 0x2f8   : > { %v5281_v42 = vpack.c.bf16 %v2613_v36, %v2613_v36  ;;  %v5409_v43 = vpack.c.bf16 %v3125_v37, %v3125_v37  ;;  %v2616_v62 = vadd.f32 %v6815_v38, %v2615_v45  ;;  %v3128_v44 = vadd.f32 %v6815_v38, %v3127_v41  ;;  %v2617_v46 = vpop.f32.mrb[243].mxu0  ;;  %v3129_v47 = vpop.f32.mrb[243].mxu1 }
 0x2fa   : > { %4300 = vst.msk [vmem:[%s6157_s30 + $0x1e0] sm:$0xf] %vm4179_vm1, %v5281_v42  ;;  %4428 = vst.msk [vmem:[%s6157_s30 + $0x3e0] sm:$0xf] %vm4179_vm1, %v5409_v43  ;;  %v5282_v48 = vpack.c.bf16 %v2616_v62, %v2616_v62  ;;  %v5410_v49 = vpack.c.bf16 %v3128_v44, %v3128_v44 }
 0x2fc   : > { %4301 = vst.msk [vmem:[%s6157_s30 + $0x1e4] sm:$0xf] %vm4179_vm1, %v5282_v48  ;;  %4429 = vst.msk [vmem:[%s6157_s30 + $0x3e4] sm:$0xf] %vm4179_vm1, %v5410_v49 }
 0x2fd   : > { %v2620_v50 = vpop.f32.mrb[244].mxu0  ;;  %v3132_v51 = vpop.f32.mrb[244].mxu1 }
 0x2fe   : > { %v2621_v52 = vadd.f32 %v6815_v38, %v2620_v50  ;;  %v3133_v53 = vadd.f32 %v6815_v38, %v3132_v51  ;;  %v2622_v54 = vpop.f32.mrb[245].mxu0  ;;  %v3134_v55 = vpop.f32.mrb[245].mxu1 }
 0x2ff   : > { %v2623_v56 = vpop.f32.mrb[246].mxu0  ;;  %v3135_v57 = vpop.f32.mrb[246].mxu1 }
 0x300   : > { %v5283_v58 = vpack.c.bf16 %v2621_v52, %v2621_v52  ;;  %v5411_v59 = vpack.c.bf16 %v3133_v53, %v3133_v53  ;;  %v2624_v60 = vadd.f32 %v6815_v38, %v2623_v56  ;;  %v3136_v61 = vadd.f32 %v6815_v38, %v3135_v57  ;;  %v2625_v63 = vpop.f32.mrb[247].mxu0  ;;  %v3137_v0 = vpop.f32.mrb[247].mxu1  ;;  %v5857_v38 = vld [vmem:[%s7151_s2] ss:$0 sm:$0xff] }
 0x302   : > { %4302 = vst.msk [vmem:[%s6157_s30 + $0x1e8] sm:$0xf] %vm4179_vm1, %v5283_v58  ;;  %4430 = vst.msk [vmem:[%s6157_s30 + $0x3e8] sm:$0xf] %vm4179_vm1, %v5411_v59  ;;  %v5284_v1 = vpack.c.bf16 %v2624_v60, %v2624_v60  ;;  %v5412_v2 = vpack.c.bf16 %v3136_v61, %v3136_v61 }
 0x304   : > { %4303 = vst.msk [vmem:[%s6157_s30 + $0x1ec] sm:$0xf] %vm4179_vm1, %v5284_v1  ;;  %4431 = vst.msk [vmem:[%s6157_s30 + $0x3ec] sm:$0xf] %vm4179_vm1, %v5412_v2 }
 0x305   : > { %v2628_v3 = vpop.f32.mrb[248].mxu0  ;;  %v3140_v4 = vpop.f32.mrb[248].mxu1 }
 0x306   : > { %v2629_v5 = vadd.f32 %v5857_v38, %v2628_v3  ;;  %v3141_v6 = vadd.f32 %v5857_v38, %v3140_v4  ;;  %v2630_v7 = vpop.f32.mrb[249].mxu0  ;;  %v3142_v8 = vpop.f32.mrb[249].mxu1 }
 0x307   : > { %v2631_v9 = vpop.f32.mrb[250].mxu0  ;;  %v3143_v10 = vpop.f32.mrb[250].mxu1 }
 0x308   : > { %v5285_v11 = vpack.c.bf16 %v2629_v5, %v2629_v5  ;;  %v5413_v12 = vpack.c.bf16 %v3141_v6, %v3141_v6  ;;  %v2632_v13 = vadd.f32 %v5857_v38, %v2631_v9  ;;  %v3144_v14 = vadd.f32 %v5857_v38, %v3143_v10  ;;  %v2633_v15 = vpop.f32.mrb[251].mxu0  ;;  %v3145_v16 = vpop.f32.mrb[251].mxu1 }
 0x30a   : > { %4304 = vst.msk [vmem:[%s6157_s30 + $0x1f0] sm:$0xf] %vm4179_vm1, %v5285_v11  ;;  %4432 = vst.msk [vmem:[%s6157_s30 + $0x3f0] sm:$0xf] %vm4179_vm1, %v5413_v12  ;;  %v5286_v17 = vpack.c.bf16 %v2632_v13, %v2632_v13  ;;  %v5414_v18 = vpack.c.bf16 %v3144_v14, %v3144_v14 }
 0x30c   : > { %4305 = vst.msk [vmem:[%s6157_s30 + $0x1f4] sm:$0xf] %vm4179_vm1, %v5286_v17  ;;  %4433 = vst.msk [vmem:[%s6157_s30 + $0x3f4] sm:$0xf] %vm4179_vm1, %v5414_v18 }
 0x30d   : > { %v2636_v19 = vpop.f32.mrb[252].mxu0  ;;  %v3148_v20 = vpop.f32.mrb[252].mxu1 }
 0x30e   : > { %v2637_v21 = vadd.f32 %v5857_v38, %v2636_v19  ;;  %v3149_v22 = vadd.f32 %v5857_v38, %v3148_v20  ;;  %v2638_v23 = vpop.f32.mrb[253].mxu0  ;;  %v3150_v24 = vpop.f32.mrb[253].mxu1 }
 0x30f   : > { %v2639_v25 = vpop.f32.mrb[254].mxu0  ;;  %v3151_v26 = vpop.f32.mrb[254].mxu1 }
 0x310   : > { %v5287_v27 = vpack.c.bf16 %v2637_v21, %v2637_v21  ;;  %v5415_v28 = vpack.c.bf16 %v3149_v22, %v3149_v22  ;;  %v2640_v29 = vadd.f32 %v5857_v38, %v2639_v25  ;;  %v3152_v30 = vadd.f32 %v5857_v38, %v3151_v26  ;;  %v2641_v31 = vpop.f32.mrb[255].mxu0  ;;  %v3153_v32 = vpop.f32.mrb[255].mxu1 }
 0x312   : > { %4306 = vst.msk [vmem:[%s6157_s30 + $0x1f8] sm:$0xf] %vm4179_vm1, %v5287_v27  ;;  %4434 = vst.msk [vmem:[%s6157_s30 + $0x3f8] sm:$0xf] %vm4179_vm1, %v5415_v28  ;;  %v5288_v33 = vpack.c.bf16 %v2640_v29, %v2640_v29  ;;  %v5416_v34 = vpack.c.bf16 %v3152_v30, %v3152_v30 }
 0x314   : > { %4307 = vst.msk [vmem:[%s6157_s30 + $0x1fc] sm:$0xf] %vm4179_vm1, %v5288_v33  ;;  %4435 = vst.msk [vmem:[%s6157_s30 + $0x3fc] sm:$0xf] %vm4179_vm1, %v5416_v34 }
 0x315 PF: > { %s13_s12 = sadd.s32 1, %s5864_s12  }
 0x316   : > { %p10_p4 = scmp.ge.s32.totalorder %s13_s12, 6  }
 0x318   :  { %12 = sbr.rel (!%p10_p4) target bundleno = 1 (0x1), region = 62 }

// kernel: volume_to_scalar_forward.3
= control target key start
LH: loop header
LB: loop body
LE: loop exit
PB: predicated region body
PF: predicated region fallthrough
CT: control target
= control target key end

     0   :  { %vm656_vm0 = vcmask 523264   ;;  %s22438_s0 = inlined_call_operand.vmem [shape: bf16[8192,64], index: 0, kind: input, shape index: {}]   ;;  %s22439_s1 = inlined_call_operand.vmem [shape: bf16[512,128], index: 1, kind: input, shape index: {}]   ;;  %s22440_s2 = inlined_call_operand.vmem [shape: f32[1,128], index: 2, kind: input, shape index: {}]   ;;  %s22441_s3 = inlined_call_operand.vmem [shape: bf16[1024,128], index: 3, kind: input, shape index: {}]   ;;  %s22442_s4 = inlined_call_operand.vmem [shape: f32[1,128], index: 4, kind: input, shape index: {}]   ;;  %s22443_s5 = inlined_call_operand.vmem [shape: bf16[512,128], index: 5, kind: input, shape index: {}]   ;;  %s22444_s6 = inlined_call_operand.vmem [shape: f32[1,128], index: 6, kind: input, shape index: {}]   ;;  %s22445_s7 = inlined_call_operand.vmem [shape: bf16[512,64], index: 7, kind: input, shape index: {}]   ;;  %s22446_s8 = inlined_call_operand.vmem [shape: f32[1,64], index: 8, kind: input, shape index: {}]   ;;  %s22447_s9 = inlined_call_operand.vmem [shape: bf16[256,32], index: 9, kind: input, shape index: {}]   ;;  %s22448_s10 = inlined_call_operand.vmem [shape: f32[1,32], index: 10, kind: input, shape index: {}]   ;;  %s22449_s11 = inlined_call_operand.hbm [shape: f32[2,32], index: 11, kind: output, shape index: {}]  }
   0x1   :  { %v17952_v0 = vld [vmem:[%s22439_s1 + $0x40] sm:$0xff]   ;;  %v17953_v1 = vld [vmem:[%s22439_s1 + $0x48] sm:$0xff]   ;;  %v17954_v2 = vld [vmem:[%s22439_s1 + $0x50] sm:$0xff]  }
   0x2   :  { %15641 = vmatprep.subr.bf16.mxu0 %v17952_v0  ;;  %v17956_v3 = vld [vmem:[%s22438_s0 + $0x400] sm:$0xff]   ;;  %v17955_v4 = vld [vmem:[%s22439_s1 + $0x58] sm:$0xff]   ;;  %v17957_v6 = vld [vmem:[%s22438_s0 + $0x408] sm:$0xff]  }
   0x3   :  { %15642 = vmatpush3.bf16.msra.mxu0 %v17952_v0  ;;  %15649 = vmatprep.mubr.msk.bf16.mxu0 %vm656_vm0, %v17956_v3  ;;  %v17958_v5 = vld [vmem:[%s22439_s1 + $0x60] sm:$0xff]   ;;  %v17960_v7 = vld [vmem:[%s22438_s0 + $0x410] sm:$0xff]   ;;  %v17959_v8 = vld [vmem:[%s22439_s1 + $0x68] sm:$0xff]  }
   0x4   :  { %15643 = vmatprep.subr.bf16.mxu0 %v17953_v1  ;;  %v17969_v9 = vld [vmem:[%s22439_s1 + $0x20] sm:$0xff]   ;;  %v17971_v10 = vld [vmem:[%s22439_s1 + $0x28] sm:$0xff]   ;;  %v17962_v11 = vld [vmem:[%s22439_s1 + $0x70] sm:$0xff]  }
   0x5   :  { %15369 = vmatprep.subr.bf16.mxu1 %v17969_v9  ;;  %v17961_v12 = vld [vmem:[%s22438_s0 + $0x418] sm:$0xff]   ;;  %v17973_v13 = vld [vmem:[%s22439_s1 + $0x30] sm:$0xff]   ;;  %v17964_v14 = vld [vmem:[%s22438_s0 + $0x600] sm:$0xff]  }
   0x6   :  { %15370 = vmatpush3.bf16.msra.mxu1 %v17969_v9  ;;  %v17963_v15 = vld [vmem:[%s22439_s1 + $0x78] sm:$0xff]   ;;  %v17977_v16 = vld [vmem:[%s22438_s0 + $0x200] sm:$0xff]   ;;  %v17965_v19 = vld [vmem:[%s22438_s0 + $0x608] sm:$0xff]  }
   0x7   :  { %15644 = vmatpush3.bf16.msra.mxu0 %v17953_v1  ;;  %15371 = vmatprep.subr.bf16.mxu1 %v17971_v10  ;;  %v17975_v17 = vld [vmem:[%s22439_s1 + $0x38] sm:$0xff]   ;;  %v17966_v18 = vld [vmem:[%s22439_s1 + $0x80] sm:$0xff]   ;;  %v17967_v20 = vld [vmem:[%s22438_s0 + $0x610] sm:$0xff]  }
   0x8   :  { %15645 = vmatprep.subr.bf16.mxu0 %v17954_v2  ;;  %15377 = vmatprep.mubr.msk.bf16.mxu1 %vm656_vm0, %v17977_v16  ;;  %v17978_v21 = vld [vmem:[%s22438_s0 + $0x208] sm:$0xff]   ;;  %v17981_v22 = vld [vmem:[%s22438_s0 + $0x210] sm:$0xff]   ;;  %v17968_v23 = vld [vmem:[%s22438_s0 + $0x618] sm:$0xff]  }
   0x9   :  { %v17970_v24 = vld [vmem:[%s22438_s0 + $0x620] sm:$0xff]   ;;  %v17982_v25 = vld [vmem:[%s22438_s0 + $0x218] sm:$0xff]   ;;  %v17997_v27 = vld [vmem:[%s22439_s1 + $0x88] sm:$0xff]  }
   0xa   :  { %15372 = vmatpush3.bf16.msra.mxu1 %v17971_v10  ;;  %v17985_v26 = vld [vmem:[%s22438_s0 + $0x220] sm:$0xff]   ;;  %v17972_v28 = vld [vmem:[%s22438_s0 + $0x628] sm:$0xff]   ;;  %v17974_v29 = vld [vmem:[%s22438_s0 + $0x630] sm:$0xff]  }
   0xb   :  { %15646 = vmatpush3.bf16.msra.mxu0 %v17954_v2  ;;  %15373 = vmatprep.subr.bf16.mxu1 %v17973_v13  ;;  %v17986_v30 = vld [vmem:[%s22438_s0 + $0x228] sm:$0xff]   ;;  %v17989_v31 = vld [vmem:[%s22438_s0 + $0x230] sm:$0xff]   ;;  %v17976_v32 = vld [vmem:[%s22438_s0 + $0x638] sm:$0xff]  }
   0xc   :  { %15647 = vmatprep.subr.bf16.mxu0 %v17955_v4  ;;  %v17979_v33 = vld [vmem:[%s22438_s0 + $0x640] sm:$0xff]   ;;  %v17990_v34 = vld [vmem:[%s22438_s0 + $0x238] sm:$0xff]   ;;  %v17980_v36 = vld [vmem:[%s22438_s0 + $0x648] sm:$0xff]  }
   0xd   :  { %v17993_v35 = vld [vmem:[%s22438_s0 + $0x240] sm:$0xff]   ;;  %v17983_v37 = vld [vmem:[%s22438_s0 + $0x650] sm:$0xff]   ;;  %v17994_v38 = vld [vmem:[%s22438_s0 + $0x248] sm:$0xff]  }
   0xe   :  { %15374 = vmatpush3.bf16.msra.mxu1 %v17973_v13  ;;  %v17998_v39 = vld [vmem:[%s22438_s0 + $0x250] sm:$0xff]   ;;  %v17984_v40 = vld [vmem:[%s22438_s0 + $0x658] sm:$0xff]   ;;  %v17987_v41 = vld [vmem:[%s22438_s0 + $0x660] sm:$0xff]  }
   0xf   :  { %15648 = vmatpush3.bf16.msra.mxu0 %v17955_v4  ;;  %15375 = vmatprep.subr.bf16.mxu1 %v17975_v17  ;;  %v17999_v42 = vld [vmem:[%s22438_s0 + $0x258] sm:$0xff]   ;;  %v18002_v43 = vld [vmem:[%s22438_s0 + $0x260] sm:$0xff]   ;;  %v17988_v44 = vld [vmem:[%s22438_s0 + $0x668] sm:$0xff]  }
  0x10   :  { %15777 = vmatprep.subr.bf16.mxu0 %v17958_v5  ;;  %v18030_v45 = vld [vmem:[%s22439_s1 + $0x90] sm:$0xff]   ;;  %v18003_v47 = vld [vmem:[%s22438_s0 + $0x268] sm:$0xff]   ;;  %v17992_v49 = vld [vmem:[%s22438_s0 + $0x678] sm:$0xff]  }
  0x11   :  { %v17991_v46 = vld [vmem:[%s22438_s0 + $0x670] sm:$0xff]   ;;  %v17995_v50 = vld [vmem:[%s22438_s0 + $0x680] sm:$0xff]   ;;  %v18007_v51 = vld [vmem:[%s22438_s0 + $0x278] sm:$0xff]  }
  0x12   :  { %15650 = vmatmul.mubr.msk.bf16.vlgmr.msra.gmra.mrb[0].mxu0 %vm656_vm0, %v17957_v6  ;;  %15376 = vmatpush3.bf16.msra.mxu1 %v17975_v17  ;;  %v18006_v48 = vld [vmem:[%s22438_s0 + $0x270] sm:$0xff]   ;;  %v18010_v52 = vld [vmem:[%s22438_s0 + $0x280] sm:$0xff]   ;;  %v17996_v53 = vld [vmem:[%s22438_s0 + $0x688] sm:$0xff]  }
  0x13   :  { %15778 = vmatpush3.bf16.msra.mxu0 %v17958_v5  ;;  %15653 = vmatprep.mubr.msk.bf16.mxu0 %vm656_vm0, %v17960_v7  ;;  %v18000_v54 = vld [vmem:[%s22438_s0 + $0x690] sm:$0xff]   ;;  %v18011_v55 = vld [vmem:[%s22438_s0 + $0x288] sm:$0xff]   ;;  %v18001_v57 = vld [vmem:[%s22438_s0 + $0x698] sm:$0xff]  }
  0x14   :  { %15779 = vmatprep.subr.bf16.mxu0 %v17959_v8  ;;  %v18014_v56 = vld [vmem:[%s22438_s0 + $0x290] sm:$0xff]   ;;  %v18004_v58 = vld [vmem:[%s22438_s0 + $0x6a0] sm:$0xff]   ;;  %v18015_v59 = vld [vmem:[%s22438_s0 + $0x298] sm:$0xff]  }
  0x15   :  { %15378 = vmatmul.mubr.msk.bf16.vlgmr.msra.gmra.mrb[0].mxu1 %vm656_vm0, %v17978_v21  ;;  %v18018_v60 = vld [vmem:[%s22438_s0 + $0x2a0] sm:$0xff]   ;;  %v18005_v61 = vld [vmem:[%s22438_s0 + $0x6a8] sm:$0xff]   ;;  %v18008_v62 = vld [vmem:[%s22438_s0 + $0x6b0] sm:$0xff]  }
  0x16   :  { %15381 = vmatprep.mubr.msk.bf16.mxu1 %vm656_vm0, %v17981_v22  ;;  %v18063_v63 = vld [vmem:[%s22439_s1 + $0x98] sm:$0xff]   ;;  %v18019_v0 = vld [vmem:[%s22438_s0 + $0x2a8] sm:$0xff]   ;;  %v18022_v1 = vld [vmem:[%s22438_s0 + $0x2b0] sm:$0xff]  }
  0x17   :  { %15780 = vmatpush3.bf16.msra.mxu0 %v17959_v8  ;;  %v18009_v2 = vld [vmem:[%s22438_s0 + $0x6b8] sm:$0xff]   ;;  %v18012_v3 = vld [vmem:[%s22438_s0 + $0x6c0] sm:$0xff]   ;;  %v18013_v6 = vld [vmem:[%s22438_s0 + $0x6c8] sm:$0xff]  }
  0x18   :  { %15781 = vmatprep.subr.bf16.mxu0 %v17962_v11  ;;  %v18023_v4 = vld [vmem:[%s22438_s0 + $0x2b8] sm:$0xff]   ;;  %v18026_v5 = vld [vmem:[%s22438_s0 + $0x2c0] sm:$0xff]   ;;  %v18016_v7 = vld [vmem:[%s22438_s0 + $0x6d0] sm:$0xff]  }
  0x19   :  { %v18027_v8 = vld [vmem:[%s22438_s0 + $0x2c8] sm:$0xff]   ;;  %v18031_v9 = vld [vmem:[%s22438_s0 + $0x2d0] sm:$0xff]   ;;  %v18017_v10 = vld [vmem:[%s22438_s0 + $0x6d8] sm:$0xff]  }
  0x1a   :  { %15654 = vmatmul.mubr.msk.bf16.gmra.mrb[4].mxu0 %vm656_vm0, %v17961_v12  ;;  %v18032_v12 = vld [vmem:[%s22438_s0 + $0x2d8] sm:$0xff]   ;;  %v18035_v13 = vld [vmem:[%s22438_s0 + $0x2e0] sm:$0xff]   ;;  %v18036_v16 = vld [vmem:[%s22438_s0 + $0x2e8] sm:$0xff]  }
  0x1b   :  { %15782 = vmatpush3.bf16.msra.mxu0 %v17962_v11  ;;  %15785 = vmatprep.mubr.msk.bf16.mxu0 %vm656_vm0, %v17964_v14  ;;  %v18020_v11 = vld [vmem:[%s22438_s0 + $0x6e0] sm:$0xff]   ;;  %v18021_v14 = vld [vmem:[%s22438_s0 + $0x6e8] sm:$0xff]   ;;  %v18039_v17 = vld [vmem:[%s22438_s0 + $0x2f0] sm:$0xff]  }
  0x1c   :  { %15783 = vmatprep.subr.bf16.mxu0 %v17963_v15  ;;  %v18043_v21 = vld [vmem:[%s22438_s0 + $0x300] sm:$0xff]   ;;  %v18029_v22 = vld [vmem:[%s22438_s0 + $0x708] sm:$0xff]  }
  0x1d   :  { %15382 = vmatmul.mubr.msk.bf16.gmra.mrb[4].mxu1 %vm656_vm0, %v17982_v25  ;;  %v18047_v25 = vld [vmem:[%s22438_s0 + $0x310] sm:$0xff]  }
  0x1e   :  { %15385 = vmatprep.mubr.msk.bf16.mxu1 %vm656_vm0, %v17985_v26  ;;  %v19076_v26 = vld [vmem:[%s22439_s1 + $0xa0] sm:$0xff]  }
  0x1f   :  { %15784 = vmatpush3.bf16.msra.mxu0 %v17963_v15  ;;  %v18024_v15 = vld [vmem:[%s22438_s0 + $0x6f0] sm:$0xff]  }
  0x20   :  { %15913 = vmatprep.subr.bf16.mxu0 %v17966_v18 }
  0x22   :  { %15786 = vmatmul.mubr.msk.bf16.vlgmr.msra.gmra.mrb[0].mxu0 %vm656_vm0, %v17965_v19  ;;  %v18028_v19 = vld [vmem:[%s22438_s0 + $0x700] sm:$0xff]  }
  0x23   :  { %15914 = vmatpush3.bf16.msra.mxu0 %v17966_v18  ;;  %15789 = vmatprep.mubr.msk.bf16.mxu0 %vm656_vm0, %v17967_v20  ;;  %v18025_v18 = vld [vmem:[%s22438_s0 + $0x6f8] sm:$0xff]  }
  0x24   :  { %15915 = vmatprep.subr.bf16.mxu0 %v17997_v27  ;;  %v18040_v20 = vld [vmem:[%s22438_s0 + $0x2f8] sm:$0xff]  }
  0x25   :  { %15386 = vmatmul.mubr.msk.bf16.gmra.mrb[8].mxu1 %vm656_vm0, %v17986_v30  ;;  %v18051_v30 = vld [vmem:[%s22438_s0 + $0x320] sm:$0xff]  }
  0x26   :  { %15389 = vmatprep.mubr.msk.bf16.mxu1 %vm656_vm0, %v17989_v31  ;;  %v18103_v31 = vld [vmem:[%s22439_s1] sm:$0xff]  }
  0x27   :  { %15916 = vmatpush3.bf16.msra.mxu0 %v17997_v27  ;;  %v18034_v27 = vld [vmem:[%s22438_s0 + $0x718] sm:$0xff]   ;;  %15505 = vmatprep.subr.bf16.mxu1 %v18103_v31 }
  0x28   :  { %15917 = vmatprep.subr.bf16.mxu0 %v18030_v45  ;;  %15506 = vmatpush3.bf16.msra.mxu1 %v18103_v31  ;;  %v18114_v31 = vld [vmem:[%s22438_s0 + $0x8] sm:$0xff]  }
  0x2a   :  { %15790 = vmatmul.mubr.msk.bf16.gmra.mrb[4].mxu0 %vm656_vm0, %v17968_v23  ;;  %v18033_v23 = vld [vmem:[%s22438_s0 + $0x710] sm:$0xff]  }
  0x2b   :  { %15793 = vmatprep.mubr.msk.bf16.mxu0 %vm656_vm0, %v17970_v24  ;;  %15918 = vmatpush3.bf16.msra.mxu0 %v18030_v45  ;;  %v18044_v24 = vld [vmem:[%s22438_s0 + $0x308] sm:$0xff]   ;;  %v18049_v45 = vld [vmem:[%s22438_s0 + $0x750] sm:$0xff]  }
  0x2c   :  { %15919 = vmatprep.subr.bf16.mxu0 %v18063_v63 }
  0x2d   :  { %15390 = vmatmul.mubr.msk.bf16.gmra.mrb[12].mxu1 %vm656_vm0, %v17990_v34  ;;  %v18041_v34 = vld [vmem:[%s22438_s0 + $0x730] sm:$0xff]  }
  0x2e   :  { %15393 = vmatprep.mubr.msk.bf16.mxu1 %vm656_vm0, %v17993_v35  ;;  %v18052_v35 = vld [vmem:[%s22438_s0 + $0x328] sm:$0xff]  }
  0x2f   :  { %15920 = vmatpush3.bf16.msra.mxu0 %v18063_v63  ;;  %v18080_v63 = vld [vmem:[%s22438_s0 + $0x390] sm:$0xff]  }
  0x30   :  { %16049 = vmatprep.subr.bf16.mxu0 %v19076_v26 }
  0x32   :  { %15794 = vmatmul.mubr.msk.bf16.gmra.mrb[8].mxu0 %vm656_vm0, %v17972_v28  ;;  %v18037_v28 = vld [vmem:[%s22438_s0 + $0x720] sm:$0xff]  }
  0x33   :  { %15797 = vmatprep.mubr.msk.bf16.mxu0 %vm656_vm0, %v17974_v29  ;;  %v18048_v29 = vld [vmem:[%s22438_s0 + $0x318] sm:$0xff]  }
  0x35   :  { %15394 = vmatmul.mubr.msk.bf16.gmra.mrb[16].mxu1 %vm656_vm0, %v17994_v38  ;;  %v18111_v38 = vld [vmem:[%s22439_s1 + $0x18] sm:$0xff]  }
  0x36   :  { %15397 = vmatprep.mubr.msk.bf16.mxu1 %vm656_vm0, %v17998_v39  ;;  %v18042_v39 = vld [vmem:[%s22438_s0 + $0x738] sm:$0xff]  }
  0x3a   :  { %15798 = vmatmul.mubr.msk.bf16.gmra.mrb[12].mxu0 %vm656_vm0, %v17976_v32  ;;  %v18105_v32 = vld [vmem:[%s22439_s1 + $0x8] sm:$0xff]  }
  0x3b   :  { %15801 = vmatprep.mubr.msk.bf16.mxu0 %vm656_vm0, %v17979_v33  ;;  %v18038_v33 = vld [vmem:[%s22438_s0 + $0x728] sm:$0xff]   ;;  %15507 = vmatprep.subr.bf16.mxu1 %v18105_v32 }
  0x3c   :  { %15508 = vmatpush3.bf16.msra.mxu1 %v18105_v32  ;;  %v18133_v32 = vld [vmem:[%s22439_s1 + $0xa8] sm:$0xff]  }
  0x3d   :  { %15398 = vmatmul.mubr.msk.bf16.gmra.mrb[20].mxu1 %vm656_vm0, %v17999_v42  ;;  %v18059_v42 = vld [vmem:[%s22438_s0 + $0x340] sm:$0xff]  }
  0x3e   :  { %15401 = vmatprep.mubr.msk.bf16.mxu1 %vm656_vm0, %v18002_v43  ;;  %v19142_v43 = vld [vmem:[%s22439_s1 + $0x40] sm:$0xff]  }
  0x42   :  { %15802 = vmatmul.mubr.msk.bf16.gmra.mrb[16].mxu0 %vm656_vm0, %v17980_v36  ;;  %v18055_v36 = vld [vmem:[%s22438_s0 + $0x330] sm:$0xff]  }
  0x43   :  { %15805 = vmatprep.mubr.msk.bf16.mxu0 %vm656_vm0, %v17983_v37  ;;  %v18109_v37 = vld [vmem:[%s22439_s1 + $0x10] sm:$0xff]  }
  0x44   :  { %15509 = vmatprep.subr.bf16.mxu1 %v18109_v37 }
  0x45   :  { %15402 = vmatmul.mubr.msk.bf16.gmra.mrb[24].mxu1 %vm656_vm0, %v18003_v47  ;;  %v18064_v47 = vld [vmem:[%s22438_s0 + $0x350] sm:$0xff]  }
  0x46   :  { %15405 = vmatprep.mubr.msk.bf16.mxu1 %vm656_vm0, %v18006_v48  ;;  %15510 = vmatpush3.bf16.msra.mxu1 %v18109_v37  ;;  %v18050_v48 = vld [vmem:[%s22438_s0 + $0x758] sm:$0xff]   ;;  %v18641_v37 = vld [vmem:[%s22439_s1 + $0x48] sm:$0xff]  }
  0x47   :  { %15511 = vmatprep.subr.bf16.mxu1 %v18111_v38 }
  0x4a   :  { %15806 = vmatmul.mubr.msk.bf16.gmra.mrb[20].mxu0 %vm656_vm0, %v17984_v40  ;;  %v18045_v40 = vld [vmem:[%s22438_s0 + $0x740] sm:$0xff]   ;;  %15512 = vmatpush3.bf16.msra.mxu1 %v18111_v38 }
  0x4b   :  { %15809 = vmatprep.mubr.msk.bf16.mxu0 %vm656_vm0, %v17987_v41  ;;  %v18056_v41 = vld [vmem:[%s22438_s0 + $0x338] sm:$0xff]   ;;  %16921 = vmatprep.subr.bf16.mxu1 %v19142_v43  ;;  %v18121_v38 = vld [vmem:[%s22438_s0 + $0x20] sm:$0xff]  }
  0x4d   :  { %15406 = vmatmul.mubr.msk.bf16.gmra.mrb[28].mxu1 %vm656_vm0, %v18007_v51  ;;  %v18068_v51 = vld [vmem:[%s22438_s0 + $0x360] sm:$0xff]  }
  0x4e   :  { %15409 = vmatprep.mubr.msk.bf16.mxu1 %vm656_vm0, %v18010_v52  ;;  %v18054_v52 = vld [vmem:[%s22438_s0 + $0x768] sm:$0xff]  }
  0x52   :  { %15810 = vmatmul.mubr.msk.bf16.gmra.mrb[24].mxu0 %vm656_vm0, %v17988_v44  ;;  %v18046_v44 = vld [vmem:[%s22438_s0 + $0x748] sm:$0xff]  }
  0x53   :  { %15813 = vmatprep.mubr.msk.bf16.mxu0 %vm656_vm0, %v17991_v46  ;;  %v18060_v46 = vld [vmem:[%s22438_s0 + $0x348] sm:$0xff]  }
  0x55   :  { %15410 = vmatmul.mubr.msk.bf16.gmra.mrb[32].mxu1 %vm656_vm0, %v18011_v55  ;;  %v18072_v55 = vld [vmem:[%s22438_s0 + $0x370] sm:$0xff]  }
  0x56   :  { %15413 = vmatprep.mubr.msk.bf16.mxu1 %vm656_vm0, %v18014_v56  ;;  %v18058_v56 = vld [vmem:[%s22438_s0 + $0x778] sm:$0xff]  }
  0x5a   :  { %15814 = vmatmul.mubr.msk.bf16.gmra.mrb[28].mxu0 %vm656_vm0, %v17992_v49  ;;  %v18053_v49 = vld [vmem:[%s22438_s0 + $0x760] sm:$0xff]  }
  0x5b   :  { %15817 = vmatprep.mubr.msk.bf16.mxu0 %vm656_vm0, %v17995_v50  ;;  %v18065_v50 = vld [vmem:[%s22438_s0 + $0x358] sm:$0xff]  }
  0x5d   :  { %15414 = vmatmul.mubr.msk.bf16.gmra.mrb[36].mxu1 %vm656_vm0, %v18015_v59  ;;  %v18076_v59 = vld [vmem:[%s22438_s0 + $0x380] sm:$0xff]  }
  0x5e   :  { %15417 = vmatprep.mubr.msk.bf16.mxu1 %vm656_vm0, %v18018_v60  ;;  %v18062_v60 = vld [vmem:[%s22438_s0 + $0x788] sm:$0xff]  }
  0x62   :  { %15818 = vmatmul.mubr.msk.bf16.gmra.mrb[32].mxu0 %vm656_vm0, %v17996_v53  ;;  %v18057_v53 = vld [vmem:[%s22438_s0 + $0x770] sm:$0xff]  }
  0x63   :  { %15821 = vmatprep.mubr.msk.bf16.mxu0 %vm656_vm0, %v18000_v54  ;;  %v18069_v54 = vld [vmem:[%s22438_s0 + $0x368] sm:$0xff]  }
  0x65   :  { %15418 = vmatmul.mubr.msk.bf16.gmra.mrb[40].mxu1 %vm656_vm0, %v18019_v0  ;;  %v18067_v0 = vld [vmem:[%s22438_s0 + $0x798] sm:$0xff]  }
  0x66   :  { %15421 = vmatprep.mubr.msk.bf16.mxu1 %vm656_vm0, %v18022_v1  ;;  %v18070_v1 = vld [vmem:[%s22438_s0 + $0x7a0] sm:$0xff]  }
  0x6a   :  { %15822 = vmatmul.mubr.msk.bf16.gmra.mrb[36].mxu0 %vm656_vm0, %v18001_v57  ;;  %v18061_v57 = vld [vmem:[%s22438_s0 + $0x780] sm:$0xff]  }
  0x6b   :  { %15825 = vmatprep.mubr.msk.bf16.mxu0 %vm656_vm0, %v18004_v58  ;;  %v18073_v58 = vld [vmem:[%s22438_s0 + $0x378] sm:$0xff]  }
  0x6d   :  { %15422 = vmatmul.mubr.msk.bf16.gmra.mrb[44].mxu1 %vm656_vm0, %v18023_v4  ;;  %v18071_v4 = vld [vmem:[%s22438_s0 + $0x7a8] sm:$0xff]  }
  0x6e   :  { %15425 = vmatprep.mubr.msk.bf16.mxu1 %vm656_vm0, %v18026_v5  ;;  %v18074_v5 = vld [vmem:[%s22438_s0 + $0x7b0] sm:$0xff]  }
  0x72   :  { %15826 = vmatmul.mubr.msk.bf16.gmra.mrb[40].mxu0 %vm656_vm0, %v18005_v61  ;;  %v18066_v61 = vld [vmem:[%s22438_s0 + $0x790] sm:$0xff]  }
  0x73   :  { %15829 = vmatprep.mubr.msk.bf16.mxu0 %vm656_vm0, %v18008_v62  ;;  %v18077_v62 = vld [vmem:[%s22438_s0 + $0x388] sm:$0xff]  }
  0x75   :  { %15426 = vmatmul.mubr.msk.bf16.gmra.mrb[48].mxu1 %vm656_vm0, %v18027_v8  ;;  %v18075_v8 = vld [vmem:[%s22438_s0 + $0x7b8] sm:$0xff]  }
  0x76   :  { %15429 = vmatprep.mubr.msk.bf16.mxu1 %vm656_vm0, %v18031_v9  ;;  %v18078_v9 = vld [vmem:[%s22438_s0 + $0x7c0] sm:$0xff]  }
  0x7a   :  { %15830 = vmatmul.mubr.msk.bf16.gmra.mrb[44].mxu0 %vm656_vm0, %v18009_v2  ;;  %v18081_v2 = vld [vmem:[%s22438_s0 + $0x398] sm:$0xff]  }
  0x7b   :  { %15833 = vmatprep.mubr.msk.bf16.mxu0 %vm656_vm0, %v18012_v3  ;;  %v18084_v3 = vld [vmem:[%s22438_s0 + $0x3a0] sm:$0xff]  }
  0x7d   :  { %15430 = vmatmul.mubr.msk.bf16.gmra.mrb[52].mxu1 %vm656_vm0, %v18032_v12  ;;  %v18079_v12 = vld [vmem:[%s22438_s0 + $0x7c8] sm:$0xff]  }
  0x7e   :  { %15433 = vmatprep.mubr.msk.bf16.mxu1 %vm656_vm0, %v18035_v13  ;;  %v18082_v13 = vld [vmem:[%s22438_s0 + $0x7d0] sm:$0xff]  }
  0x82   :  { %15834 = vmatmul.mubr.msk.bf16.gmra.mrb[48].mxu0 %vm656_vm0, %v18013_v6  ;;  %v18085_v6 = vld [vmem:[%s22438_s0 + $0x3a8] sm:$0xff]  }
  0x83   :  { %15837 = vmatprep.mubr.msk.bf16.mxu0 %vm656_vm0, %v18016_v7  ;;  %v18088_v7 = vld [vmem:[%s22438_s0 + $0x3b0] sm:$0xff]  }
  0x85   :  { %15434 = vmatmul.mubr.msk.bf16.gmra.mrb[56].mxu1 %vm656_vm0, %v18036_v16  ;;  %v18083_v16 = vld [vmem:[%s22438_s0 + $0x7d8] sm:$0xff]  }
  0x86   :  { %15437 = vmatprep.mubr.msk.bf16.mxu1 %vm656_vm0, %v18039_v17  ;;  %v18086_v17 = vld [vmem:[%s22438_s0 + $0x7e0] sm:$0xff]  }
  0x8a   :  { %15838 = vmatmul.mubr.msk.bf16.gmra.mrb[52].mxu0 %vm656_vm0, %v18017_v10  ;;  %v18089_v10 = vld [vmem:[%s22438_s0 + $0x3b8] sm:$0xff]  }
  0x8b   :  { %15841 = vmatprep.mubr.msk.bf16.mxu0 %vm656_vm0, %v18020_v11  ;;  %v18092_v11 = vld [vmem:[%s22438_s0 + $0x3c0] sm:$0xff]  }
  0x8d   :  { %15438 = vmatmul.mubr.msk.bf16.gmra.mrb[60].mxu1 %vm656_vm0, %v18040_v20  ;;  %v18087_v20 = vld [vmem:[%s22438_s0 + $0x7e8] sm:$0xff]  }
  0x8e   :  { %15441 = vmatprep.mubr.msk.bf16.mxu1 %vm656_vm0, %v18043_v21  ;;  %v18090_v21 = vld [vmem:[%s22438_s0 + $0x7f0] sm:$0xff]  }
  0x92   :  { %15842 = vmatmul.mubr.msk.bf16.gmra.mrb[56].mxu0 %vm656_vm0, %v18021_v14  ;;  %v18093_v14 = vld [vmem:[%s22438_s0 + $0x3c8] sm:$0xff]  }
  0x93   :  { %15845 = vmatprep.mubr.msk.bf16.mxu0 %vm656_vm0, %v18024_v15  ;;  %v18097_v15 = vld [vmem:[%s22438_s0 + $0x3d0] sm:$0xff]  }
  0x95   :  { %15442 = vmatmul.mubr.msk.bf16.gmra.mrb[64].mxu1 %vm656_vm0, %v18044_v24  ;;  %v18091_v24 = vld [vmem:[%s22438_s0 + $0x7f8] sm:$0xff]  }
  0x96   :  { %15445 = vmatprep.mubr.msk.bf16.mxu1 %vm656_vm0, %v18047_v25  ;;  %v18094_v25 = vld [vmem:[%s22438_s0 + $0x800] sm:$0xff]  }
  0x9a   :  { %15846 = vmatmul.mubr.msk.bf16.gmra.mrb[60].mxu0 %vm656_vm0, %v18025_v18  ;;  %v18098_v18 = vld [vmem:[%s22438_s0 + $0x3d8] sm:$0xff]  }
  0x9b   :  { %15849 = vmatprep.mubr.msk.bf16.mxu0 %vm656_vm0, %v18028_v19  ;;  %v18101_v19 = vld [vmem:[%s22438_s0 + $0x3e0] sm:$0xff]  }
  0x9d   :  { %15446 = vmatmul.mubr.msk.bf16.gmra.mrb[68].mxu1 %vm656_vm0, %v18048_v29  ;;  %v18095_v29 = vld [vmem:[%s22438_s0 + $0x808] sm:$0xff]  }
  0x9e   :  { %15449 = vmatprep.mubr.msk.bf16.mxu1 %vm656_vm0, %v18051_v30  ;;  %v18099_v30 = vld [vmem:[%s22438_s0 + $0x810] sm:$0xff]  }
  0xa2   :  { %15850 = vmatmul.mubr.msk.bf16.gmra.mrb[64].mxu0 %vm656_vm0, %v18029_v22  ;;  %v18102_v22 = vld [vmem:[%s22438_s0 + $0x3e8] sm:$0xff]  }
  0xa3   :  { %15853 = vmatprep.mubr.msk.bf16.mxu0 %vm656_vm0, %v18033_v23  ;;  %v18107_v23 = vld [vmem:[%s22438_s0 + $0x3f0] sm:$0xff]  }
  0xa5   :  { %15450 = vmatmul.mubr.msk.bf16.gmra.mrb[72].mxu1 %vm656_vm0, %v18052_v35  ;;  %v18100_v35 = vld [vmem:[%s22438_s0 + $0x818] sm:$0xff]  }
  0xa6   :  { %15453 = vmatprep.mubr.msk.bf16.mxu1 %vm656_vm0, %v18055_v36  ;;  %v18104_v36 = vld [vmem:[%s22438_s0 + $0x820] sm:$0xff]  }
  0xaa   :  { %15854 = vmatmul.mubr.msk.bf16.gmra.mrb[68].mxu0 %vm656_vm0, %v18034_v27  ;;  %v18108_v27 = vld [vmem:[%s22438_s0 + $0x3f8] sm:$0xff]  }
  0xab   :  { %15857 = vmatprep.mubr.msk.bf16.mxu0 %vm656_vm0, %v18037_v28  ;;  %v18113_v28 = vld [vmem:[%s22438_s0] sm:$0xff]  }
  0xad   :  { %15454 = vmatmul.mubr.msk.bf16.gmra.mrb[76].mxu1 %vm656_vm0, %v18056_v41  ;;  %v18110_v41 = vld [vmem:[%s22438_s0 + $0x830] sm:$0xff]  }
  0xae   :  { %15457 = vmatprep.mubr.msk.bf16.mxu1 %vm656_vm0, %v18059_v42  ;;  %v18122_v42 = vld [vmem:[%s22438_s0 + $0x28] sm:$0xff]  }
  0xb2   :  { %15858 = vmatmul.mubr.msk.bf16.gmra.mrb[72].mxu0 %vm656_vm0, %v18038_v33  ;;  %v18117_v33 = vld [vmem:[%s22438_s0 + $0x10] sm:$0xff]  }
  0xb3   :  { %15861 = vmatprep.mubr.msk.bf16.mxu0 %vm656_vm0, %v18041_v34  ;;  %v18166_v34 = vld [vmem:[%s22439_s1 + $0xb0] sm:$0xff]  }
  0xb5   :  { %15458 = vmatmul.mubr.msk.bf16.gmra.mrb[80].mxu1 %vm656_vm0, %v18060_v46  ;;  %v18115_v46 = vld [vmem:[%s22438_s0 + $0x840] sm:$0xff]  }
  0xb6   :  { %15461 = vmatprep.mubr.msk.bf16.mxu1 %vm656_vm0, %v18064_v47  ;;  %v18126_v47 = vld [vmem:[%s22438_s0 + $0x38] sm:$0xff]  }
  0xba   :  { %15862 = vmatmul.mubr.msk.bf16.gmra.mrb[76].mxu0 %vm656_vm0, %v18042_v39  ;;  %v18642_v39 = vld [vmem:[%s22439_s1 + $0x50] sm:$0xff]  }
  0xbb   :  { %15865 = vmatprep.mubr.msk.bf16.mxu0 %vm656_vm0, %v18045_v40  ;;  %v18106_v40 = vld [vmem:[%s22438_s0 + $0x828] sm:$0xff]  }
  0xbd   :  { %15462 = vmatmul.mubr.msk.bf16.gmra.mrb[84].mxu1 %vm656_vm0, %v18065_v50  ;;  %v18119_v50 = vld [vmem:[%s22438_s0 + $0x850] sm:$0xff]  }
  0xbe   :  { %15465 = vmatprep.mubr.msk.bf16.mxu1 %vm656_vm0, %v18068_v51  ;;  %v18130_v51 = vld [vmem:[%s22438_s0 + $0x48] sm:$0xff]  }
  0xc2   :  { %15866 = vmatmul.mubr.msk.bf16.gmra.mrb[80].mxu0 %vm656_vm0, %v18046_v44  ;;  %v18125_v44 = vld [vmem:[%s22438_s0 + $0x30] sm:$0xff]  }
  0xc3   :  { %15869 = vmatprep.mubr.msk.bf16.mxu0 %vm656_vm0, %v18049_v45  ;;  %v18112_v45 = vld [vmem:[%s22438_s0 + $0x838] sm:$0xff]  }
  0xc5   :  { %15466 = vmatmul.mubr.msk.bf16.gmra.mrb[88].mxu1 %vm656_vm0, %v18069_v54  ;;  %v18123_v54 = vld [vmem:[%s22438_s0 + $0x860] sm:$0xff]  }
  0xc6   :  { %15469 = vmatprep.mubr.msk.bf16.mxu1 %vm656_vm0, %v18072_v55  ;;  %v18135_v55 = vld [vmem:[%s22438_s0 + $0x58] sm:$0xff]  }
  0xca   :  { %15870 = vmatmul.mubr.msk.bf16.gmra.mrb[84].mxu0 %vm656_vm0, %v18050_v48  ;;  %v18129_v48 = vld [vmem:[%s22438_s0 + $0x40] sm:$0xff]  }
  0xcb   :  { %15873 = vmatprep.mubr.msk.bf16.mxu0 %vm656_vm0, %v18053_v49  ;;  %v18116_v49 = vld [vmem:[%s22438_s0 + $0x848] sm:$0xff]  }
  0xcd   :  { %15470 = vmatmul.mubr.msk.bf16.gmra.mrb[92].mxu1 %vm656_vm0, %v18073_v58  ;;  %v18127_v58 = vld [vmem:[%s22438_s0 + $0x870] sm:$0xff]  }
  0xce   :  { %15473 = vmatprep.mubr.msk.bf16.mxu1 %vm656_vm0, %v18076_v59  ;;  %v18139_v59 = vld [vmem:[%s22438_s0 + $0x68] sm:$0xff]  }
  0xd2   :  { %15874 = vmatmul.mubr.msk.bf16.gmra.mrb[88].mxu0 %vm656_vm0, %v18054_v52  ;;  %v18134_v52 = vld [vmem:[%s22438_s0 + $0x50] sm:$0xff]  }
  0xd3   :  { %15877 = vmatprep.mubr.msk.bf16.mxu0 %vm656_vm0, %v18057_v53  ;;  %v18120_v53 = vld [vmem:[%s22438_s0 + $0x858] sm:$0xff]  }
  0xd5   :  { %15474 = vmatmul.mubr.msk.bf16.gmra.mrb[96].mxu1 %vm656_vm0, %v18077_v62  ;;  %v18131_v62 = vld [vmem:[%s22438_s0 + $0x880] sm:$0xff]  }
  0xd6   :  { %15477 = vmatprep.mubr.msk.bf16.mxu1 %vm656_vm0, %v18080_v63  ;;  %v18143_v63 = vld [vmem:[%s22438_s0 + $0x78] sm:$0xff]  }
  0xda   :  { %15878 = vmatmul.mubr.msk.bf16.gmra.mrb[92].mxu0 %vm656_vm0, %v18058_v56  ;;  %v18138_v56 = vld [vmem:[%s22438_s0 + $0x60] sm:$0xff]  }
  0xdb   :  { %15881 = vmatprep.mubr.msk.bf16.mxu0 %vm656_vm0, %v18061_v57  ;;  %v18124_v57 = vld [vmem:[%s22438_s0 + $0x868] sm:$0xff]  }
  0xdd   :  { %15478 = vmatmul.mubr.msk.bf16.gmra.mrb[100].mxu1 %vm656_vm0, %v18081_v2  ;;  %v18136_v2 = vld [vmem:[%s22438_s0 + $0x890] sm:$0xff]  }
  0xde   :  { %15481 = vmatprep.mubr.msk.bf16.mxu1 %vm656_vm0, %v18084_v3  ;;  %v18147_v3 = vld [vmem:[%s22438_s0 + $0x88] sm:$0xff]  }
  0xe2   :  { %15882 = vmatmul.mubr.msk.bf16.gmra.mrb[96].mxu0 %vm656_vm0, %v18062_v60  ;;  %v18142_v60 = vld [vmem:[%s22438_s0 + $0x70] sm:$0xff]  }
  0xe3   :  { %15885 = vmatprep.mubr.msk.bf16.mxu0 %vm656_vm0, %v18066_v61  ;;  %v18128_v61 = vld [vmem:[%s22438_s0 + $0x878] sm:$0xff]  }
  0xe5   :  { %15482 = vmatmul.mubr.msk.bf16.gmra.mrb[104].mxu1 %vm656_vm0, %v18085_v6  ;;  %v18137_v6 = vld [vmem:[%s22438_s0 + $0x898] sm:$0xff]  }
  0xe6   :  { %15485 = vmatprep.mubr.msk.bf16.mxu1 %vm656_vm0, %v18088_v7  ;;  %v18140_v7 = vld [vmem:[%s22438_s0 + $0x8a0] sm:$0xff]  }
  0xea   :  { %15886 = vmatmul.mubr.msk.bf16.gmra.mrb[100].mxu0 %vm656_vm0, %v18067_v0  ;;  %v18146_v0 = vld [vmem:[%s22438_s0 + $0x80] sm:$0xff]  }
  0xeb   :  { %15889 = vmatprep.mubr.msk.bf16.mxu0 %vm656_vm0, %v18070_v1  ;;  %v18132_v1 = vld [vmem:[%s22438_s0 + $0x888] sm:$0xff]  }
  0xed   :  { %15486 = vmatmul.mubr.msk.bf16.gmra.mrb[108].mxu1 %vm656_vm0, %v18089_v10  ;;  %v18141_v10 = vld [vmem:[%s22438_s0 + $0x8a8] sm:$0xff]  }
  0xee   :  { %15489 = vmatprep.mubr.msk.bf16.mxu1 %vm656_vm0, %v18092_v11  ;;  %v18144_v11 = vld [vmem:[%s22438_s0 + $0x8b0] sm:$0xff]  }
  0xf2   :  { %15890 = vmatmul.mubr.msk.bf16.gmra.mrb[104].mxu0 %vm656_vm0, %v18071_v4  ;;  %v18150_v4 = vld [vmem:[%s22438_s0 + $0x90] sm:$0xff]  }
  0xf3   :  { %15893 = vmatprep.mubr.msk.bf16.mxu0 %vm656_vm0, %v18074_v5  ;;  %v18199_v5 = vld [vmem:[%s22439_s1 + $0xb8] sm:$0xff]  }
  0xf5   :  { %15490 = vmatmul.mubr.msk.bf16.gmra.mrb[112].mxu1 %vm656_vm0, %v18093_v14  ;;  %v18145_v14 = vld [vmem:[%s22438_s0 + $0x8b8] sm:$0xff]  }
  0xf6   :  { %15493 = vmatprep.mubr.msk.bf16.mxu1 %vm656_vm0, %v18097_v15  ;;  %v18148_v15 = vld [vmem:[%s22438_s0 + $0x8c0] sm:$0xff]  }
  0xfa   :  { %15894 = vmatmul.mubr.msk.bf16.gmra.mrb[108].mxu0 %vm656_vm0, %v18075_v8  ;;  %v18151_v8 = vld [vmem:[%s22438_s0 + $0x98] sm:$0xff]  }
  0xfb   :  { %15897 = vmatprep.mubr.msk.bf16.mxu0 %vm656_vm0, %v18078_v9  ;;  %v18154_v9 = vld [vmem:[%s22438_s0 + $0xa0] sm:$0xff]  }
  0xfd   :  { %15494 = vmatmul.mubr.msk.bf16.gmra.mrb[116].mxu1 %vm656_vm0, %v18098_v18  ;;  %v18149_v18 = vld [vmem:[%s22438_s0 + $0x8c8] sm:$0xff]  }
  0xfe   :  { %15497 = vmatprep.mubr.msk.bf16.mxu1 %vm656_vm0, %v18101_v19  ;;  %v18152_v19 = vld [vmem:[%s22438_s0 + $0x8d0] sm:$0xff]  }
 0x102   :  { %15898 = vmatmul.mubr.msk.bf16.gmra.mrb[112].mxu0 %vm656_vm0, %v18079_v12  ;;  %v18155_v12 = vld [vmem:[%s22438_s0 + $0xa8] sm:$0xff]  }
 0x103   :  { %15901 = vmatprep.mubr.msk.bf16.mxu0 %vm656_vm0, %v18082_v13  ;;  %v18158_v13 = vld [vmem:[%s22438_s0 + $0xb0] sm:$0xff]  }
 0x105   :  { %15498 = vmatmul.mubr.msk.bf16.gmra.mrb[120].mxu1 %vm656_vm0, %v18102_v22  ;;  %v18153_v22 = vld [vmem:[%s22438_s0 + $0x8d8] sm:$0xff]  }
 0x106   :  { %15501 = vmatprep.mubr.msk.bf16.mxu1 %vm656_vm0, %v18107_v23  ;;  %v18156_v23 = vld [vmem:[%s22438_s0 + $0x8e0] sm:$0xff]  }
 0x10a   :  { %15902 = vmatmul.mubr.msk.bf16.gmra.mrb[116].mxu0 %vm656_vm0, %v18083_v16  ;;  %v18159_v16 = vld [vmem:[%s22438_s0 + $0xb8] sm:$0xff]  }
 0x10b   :  { %15905 = vmatprep.mubr.msk.bf16.mxu0 %vm656_vm0, %v18086_v17  ;;  %v18162_v17 = vld [vmem:[%s22438_s0 + $0xc0] sm:$0xff]  }
 0x10d   :  { %15502 = vmatmul.mubr.msk.bf16.gmra.mrb[124].mxu1 %vm656_vm0, %v18108_v27  ;;  %v18157_v27 = vld [vmem:[%s22438_s0 + $0x8e8] sm:$0xff]  }
 0x10e   :  { %15513 = vmatprep.mubr.msk.bf16.mxu1 %vm656_vm0, %v18113_v28  ;;  %v18160_v28 = vld [vmem:[%s22438_s0 + $0x8f0] sm:$0xff]  }
 0x112   :  { %15906 = vmatmul.mubr.msk.bf16.gmra.mrb[120].mxu0 %vm656_vm0, %v18087_v20  ;;  %v18163_v20 = vld [vmem:[%s22438_s0 + $0xc8] sm:$0xff]  }
 0x113   :  { %15909 = vmatprep.mubr.msk.bf16.mxu0 %vm656_vm0, %v18090_v21  ;;  %v18167_v21 = vld [vmem:[%s22438_s0 + $0xd0] sm:$0xff]  }
 0x115   :  { %15514 = vmatmul.mubr.msk.bf16.vlgmr.msra.gmra.mrb[0].mxu1 %vm656_vm0, %v18114_v31  ;;  %v18161_v31 = vld [vmem:[%s22438_s0 + $0x8f8] sm:$0xff]  }
 0x116   :  { %15517 = vmatprep.mubr.msk.bf16.mxu1 %vm656_vm0, %v18117_v33  ;;  %16925 = vmatpush3.bf16.msra.mxu1 %v19142_v43  ;;  %v18643_v43 = vld [vmem:[%s22439_s1 + $0x58] sm:$0xff]  }
 0x117   :  { %16922 = vmatprep.subr.bf16.mxu1 %v18641_v37  ;;  %v18176_v33 = vld [vmem:[%s22438_s0 + $0xf8] sm:$0xff]  }
 0x11a   :  { %15910 = vmatmul.mubr.msk.bf16.gmra.mrb[124].mxu0 %vm656_vm0, %v18091_v24  ;;  %16926 = vmatpush3.bf16.msra.mxu1 %v18641_v37  ;;  %v18168_v24 = vld [vmem:[%s22438_s0 + $0xd8] sm:$0xff]   ;;  %v18183_v37 = vld [vmem:[%s22438_s0 + $0x110] sm:$0xff]  }
 0x11b   :  { %15921 = vmatprep.mubr.msk.bf16.mxu0 %vm656_vm0, %v18094_v25  ;;  %16923 = vmatprep.subr.bf16.mxu1 %v18642_v39  ;;  %v18171_v25 = vld [vmem:[%s22438_s0 + $0xe0] sm:$0xff]  }
 0x11e   :  { %16927 = vmatpush3.bf16.msra.mxu1 %v18642_v39  ;;  %v18170_v39 = vld [vmem:[%s22438_s0 + $0x918] sm:$0xff]  }
 0x11f   :  { %16924 = vmatprep.subr.bf16.mxu1 %v18643_v43 }
 0x122   :  { %15922 = vmatmul.mubr.msk.bf16.vlgmr.msra.gmra.mrb[0].mxu0 %vm656_vm0, %v18095_v29  ;;  %16928 = vmatpush3.bf16.msra.mxu1 %v18643_v43  ;;  %v18172_v29 = vld [vmem:[%s22438_s0 + $0xe8] sm:$0xff]  }
 0x123   :  { %16050 = vmatpush3.bf16.msra.mxu0 %v19076_v26  ;;  %15925 = vmatprep.mubr.msk.bf16.mxu0 %vm656_vm0, %v18099_v30  ;;  %v18118_v26 = vld [vmem:[%s22438_s0 + $0x18] sm:$0xff]   ;;  %v18175_v30 = vld [vmem:[%s22438_s0 + $0xf0] sm:$0xff]   ;;  %v18174_v43 = vld [vmem:[%s22438_s0 + $0x928] sm:$0xff]  }
 0x124   :  { %16051 = vmatprep.subr.bf16.mxu0 %v18133_v32  ;;  %15518 = vmatmul.mubr.msk.bf16.gmra.mrb[4].mxu1 %vm656_vm0, %v18118_v26  ;;  %v18180_v26 = vld [vmem:[%s22438_s0 + $0x108] sm:$0xff]  }
 0x125   :  { %15521 = vmatprep.mubr.msk.bf16.mxu1 %vm656_vm0, %v18121_v38  ;;  %v19632_v38 = vld [vmem:[%s22439_s1 + $0xc0] sm:$0xff]  }
 0x127   :  { %16052 = vmatpush3.bf16.msra.mxu0 %v18133_v32  ;;  %v18164_v32 = vld [vmem:[%s22438_s0 + $0x900] sm:$0xff]  }
 0x128   :  { %16053 = vmatprep.subr.bf16.mxu0 %v18166_v34 }
 0x12a   :  { %15926 = vmatmul.mubr.msk.bf16.gmra.mrb[4].mxu0 %vm656_vm0, %v18100_v35  ;;  %v18165_v35 = vld [vmem:[%s22438_s0 + $0x908] sm:$0xff]  }
 0x12b   :  { %15929 = vmatprep.mubr.msk.bf16.mxu0 %vm656_vm0, %v18104_v36  ;;  %16054 = vmatpush3.bf16.msra.mxu0 %v18166_v34  ;;  %v18179_v34 = vld [vmem:[%s22438_s0 + $0x100] sm:$0xff]   ;;  %v18169_v36 = vld [vmem:[%s22438_s0 + $0x910] sm:$0xff]  }
 0x12c   :  { %15522 = vmatmul.mubr.msk.bf16.gmra.mrb[8].mxu1 %vm656_vm0, %v18122_v42  ;;  %16055 = vmatprep.subr.bf16.mxu0 %v18199_v5  ;;  %v18187_v42 = vld [vmem:[%s22438_s0 + $0x120] sm:$0xff]  }
 0x12d   :  { %15525 = vmatprep.mubr.msk.bf16.mxu1 %vm656_vm0, %v18125_v44  ;;  %v18177_v44 = vld [vmem:[%s22438_s0 + $0x930] sm:$0xff]  }
 0x12f   :  { %16056 = vmatpush3.bf16.msra.mxu0 %v18199_v5  ;;  %v18213_v5 = vld [vmem:[%s22438_s0 + $0x188] sm:$0xff]  }
 0x130   :  { %16185 = vmatprep.subr.bf16.mxu0 %v19632_v38 }
 0x132   :  { %15930 = vmatmul.mubr.msk.bf16.gmra.mrb[8].mxu0 %vm656_vm0, %v18106_v40  ;;  %v18173_v40 = vld [vmem:[%s22438_s0 + $0x920] sm:$0xff]  }
 0x133   :  { %15933 = vmatprep.mubr.msk.bf16.mxu0 %vm656_vm0, %v18110_v41  ;;  %v18184_v41 = vld [vmem:[%s22438_s0 + $0x118] sm:$0xff]  }
 0x134   :  { %15526 = vmatmul.mubr.msk.bf16.gmra.mrb[12].mxu1 %vm656_vm0, %v18126_v47  ;;  %v18178_v47 = vld [vmem:[%s22438_s0 + $0x938] sm:$0xff]  }
 0x135   :  { %15529 = vmatprep.mubr.msk.bf16.mxu1 %vm656_vm0, %v18129_v48  ;;  %v18181_v48 = vld [vmem:[%s22438_s0 + $0x940] sm:$0xff]  }
 0x13a   :  { %15934 = vmatmul.mubr.msk.bf16.gmra.mrb[12].mxu0 %vm656_vm0, %v18112_v45  ;;  %v18188_v45 = vld [vmem:[%s22438_s0 + $0x128] sm:$0xff]  }
 0x13b   :  { %15937 = vmatprep.mubr.msk.bf16.mxu0 %vm656_vm0, %v18115_v46  ;;  %v18191_v46 = vld [vmem:[%s22438_s0 + $0x130] sm:$0xff]  }
 0x13c   :  { %15530 = vmatmul.mubr.msk.bf16.gmra.mrb[16].mxu1 %vm656_vm0, %v18130_v51  ;;  %v18182_v51 = vld [vmem:[%s22438_s0 + $0x948] sm:$0xff]  }
 0x13d   :  { %15533 = vmatprep.mubr.msk.bf16.mxu1 %vm656_vm0, %v18134_v52  ;;  %v18185_v52 = vld [vmem:[%s22438_s0 + $0x950] sm:$0xff]  }
 0x142   :  { %15938 = vmatmul.mubr.msk.bf16.gmra.mrb[16].mxu0 %vm656_vm0, %v18116_v49  ;;  %v18192_v49 = vld [vmem:[%s22438_s0 + $0x138] sm:$0xff]  }
 0x143   :  { %15941 = vmatprep.mubr.msk.bf16.mxu0 %vm656_vm0, %v18119_v50  ;;  %v18195_v50 = vld [vmem:[%s22438_s0 + $0x140] sm:$0xff]  }
 0x144   :  { %15534 = vmatmul.mubr.msk.bf16.gmra.mrb[20].mxu1 %vm656_vm0, %v18135_v55  ;;  %v18186_v55 = vld [vmem:[%s22438_s0 + $0x958] sm:$0xff]  }
 0x145   :  { %15537 = vmatprep.mubr.msk.bf16.mxu1 %vm656_vm0, %v18138_v56  ;;  %v18189_v56 = vld [vmem:[%s22438_s0 + $0x960] sm:$0xff]  }
 0x14a   :  { %15942 = vmatmul.mubr.msk.bf16.gmra.mrb[20].mxu0 %vm656_vm0, %v18120_v53  ;;  %v18196_v53 = vld [vmem:[%s22438_s0 + $0x148] sm:$0xff]  }
 0x14b   :  { %15945 = vmatprep.mubr.msk.bf16.mxu0 %vm656_vm0, %v18123_v54  ;;  %v18200_v54 = vld [vmem:[%s22438_s0 + $0x150] sm:$0xff]  }
 0x14c   :  { %15538 = vmatmul.mubr.msk.bf16.gmra.mrb[24].mxu1 %vm656_vm0, %v18139_v59  ;;  %v18190_v59 = vld [vmem:[%s22438_s0 + $0x968] sm:$0xff]  }
 0x14d   :  { %15541 = vmatprep.mubr.msk.bf16.mxu1 %vm656_vm0, %v18142_v60  ;;  %v18193_v60 = vld [vmem:[%s22438_s0 + $0x970] sm:$0xff]  }
 0x152   :  { %15946 = vmatmul.mubr.msk.bf16.gmra.mrb[24].mxu0 %vm656_vm0, %v18124_v57  ;;  %v18201_v57 = vld [vmem:[%s22438_s0 + $0x158] sm:$0xff]  }
 0x153   :  { %15949 = vmatprep.mubr.msk.bf16.mxu0 %vm656_vm0, %v18127_v58  ;;  %v18204_v58 = vld [vmem:[%s22438_s0 + $0x160] sm:$0xff]  }
 0x154   :  { %15542 = vmatmul.mubr.msk.bf16.gmra.mrb[28].mxu1 %vm656_vm0, %v18143_v63  ;;  %v18194_v63 = vld [vmem:[%s22438_s0 + $0x978] sm:$0xff]  }
 0x155   :  { %15545 = vmatprep.mubr.msk.bf16.mxu1 %vm656_vm0, %v18146_v0  ;;  %v18197_v0 = vld [vmem:[%s22438_s0 + $0x980] sm:$0xff]  }
 0x15a   :  { %15950 = vmatmul.mubr.msk.bf16.gmra.mrb[28].mxu0 %vm656_vm0, %v18128_v61  ;;  %v18205_v61 = vld [vmem:[%s22438_s0 + $0x168] sm:$0xff]  }
 0x15b   :  { %15953 = vmatprep.mubr.msk.bf16.mxu0 %vm656_vm0, %v18131_v62  ;;  %v18208_v62 = vld [vmem:[%s22438_s0 + $0x170] sm:$0xff]  }
 0x15c   :  { %15546 = vmatmul.mubr.msk.bf16.gmra.mrb[32].mxu1 %vm656_vm0, %v18147_v3  ;;  %v18198_v3 = vld [vmem:[%s22438_s0 + $0x988] sm:$0xff]  }
 0x15d   :  { %15549 = vmatprep.mubr.msk.bf16.mxu1 %vm656_vm0, %v18150_v4  ;;  %v18202_v4 = vld [vmem:[%s22438_s0 + $0x990] sm:$0xff]  }
 0x162   :  { %15954 = vmatmul.mubr.msk.bf16.gmra.mrb[32].mxu0 %vm656_vm0, %v18132_v1  ;;  %v18209_v1 = vld [vmem:[%s22438_s0 + $0x178] sm:$0xff]  }
 0x163   :  { %15957 = vmatprep.mubr.msk.bf16.mxu0 %vm656_vm0, %v18136_v2  ;;  %v18212_v2 = vld [vmem:[%s22438_s0 + $0x180] sm:$0xff]  }
 0x164   :  { %15550 = vmatmul.mubr.msk.bf16.gmra.mrb[36].mxu1 %vm656_vm0, %v18151_v8  ;;  %v18206_v8 = vld [vmem:[%s22438_s0 + $0x9a0] sm:$0xff]  }
 0x165   :  { %15553 = vmatprep.mubr.msk.bf16.mxu1 %vm656_vm0, %v18154_v9  ;;  %v18217_v9 = vld [vmem:[%s22438_s0 + $0x198] sm:$0xff]  }
 0x16a   :  { %15958 = vmatmul.mubr.msk.bf16.gmra.mrb[36].mxu0 %vm656_vm0, %v18137_v6  ;;  %v18216_v6 = vld [vmem:[%s22438_s0 + $0x190] sm:$0xff]  }
 0x16b   :  { %15961 = vmatprep.mubr.msk.bf16.mxu0 %vm656_vm0, %v18140_v7  ;;  %v18203_v7 = vld [vmem:[%s22438_s0 + $0x998] sm:$0xff]  }
 0x16c   :  { %15554 = vmatmul.mubr.msk.bf16.gmra.mrb[40].mxu1 %vm656_vm0, %v18155_v12  ;;  %v18210_v12 = vld [vmem:[%s22438_s0 + $0x9b0] sm:$0xff]  }
 0x16d   :  { %15557 = vmatprep.mubr.msk.bf16.mxu1 %vm656_vm0, %v18158_v13  ;;  %v18221_v13 = vld [vmem:[%s22438_s0 + $0x1a8] sm:$0xff]  }
 0x172   :  { %15962 = vmatmul.mubr.msk.bf16.gmra.mrb[40].mxu0 %vm656_vm0, %v18141_v10  ;;  %v18220_v10 = vld [vmem:[%s22438_s0 + $0x1a0] sm:$0xff]  }
 0x173   :  { %15965 = vmatprep.mubr.msk.bf16.mxu0 %vm656_vm0, %v18144_v11  ;;  %v18207_v11 = vld [vmem:[%s22438_s0 + $0x9a8] sm:$0xff]  }
 0x174   :  { %15558 = vmatmul.mubr.msk.bf16.gmra.mrb[44].mxu1 %vm656_vm0, %v18159_v16  ;;  %v18214_v16 = vld [vmem:[%s22438_s0 + $0x9c0] sm:$0xff]  }
 0x175   :  { %15561 = vmatprep.mubr.msk.bf16.mxu1 %vm656_vm0, %v18162_v17  ;;  %v18225_v17 = vld [vmem:[%s22438_s0 + $0x1b8] sm:$0xff]  }
 0x17a   :  { %15966 = vmatmul.mubr.msk.bf16.gmra.mrb[44].mxu0 %vm656_vm0, %v18145_v14  ;;  %v18224_v14 = vld [vmem:[%s22438_s0 + $0x1b0] sm:$0xff]  }
 0x17b   :  { %15969 = vmatprep.mubr.msk.bf16.mxu0 %vm656_vm0, %v18148_v15  ;;  %v18211_v15 = vld [vmem:[%s22438_s0 + $0x9b8] sm:$0xff]  }
 0x17c   :  { %15562 = vmatmul.mubr.msk.bf16.gmra.mrb[48].mxu1 %vm656_vm0, %v18163_v20  ;;  %v18218_v20 = vld [vmem:[%s22438_s0 + $0x9d0] sm:$0xff]  }
 0x17d   :  { %15565 = vmatprep.mubr.msk.bf16.mxu1 %vm656_vm0, %v18167_v21  ;;  %v18229_v21 = vld [vmem:[%s22438_s0 + $0x1c8] sm:$0xff]  }
 0x182   :  { %15970 = vmatmul.mubr.msk.bf16.gmra.mrb[48].mxu0 %vm656_vm0, %v18149_v18  ;;  %v18228_v18 = vld [vmem:[%s22438_s0 + $0x1c0] sm:$0xff]  }
 0x183   :  { %15973 = vmatprep.mubr.msk.bf16.mxu0 %vm656_vm0, %v18152_v19  ;;  %v18215_v19 = vld [vmem:[%s22438_s0 + $0x9c8] sm:$0xff]  }
 0x184   :  { %15566 = vmatmul.mubr.msk.bf16.gmra.mrb[52].mxu1 %vm656_vm0, %v18168_v24  ;;  %v18222_v24 = vld [vmem:[%s22438_s0 + $0x9e0] sm:$0xff]  }
 0x185   :  { %15569 = vmatprep.mubr.msk.bf16.mxu1 %vm656_vm0, %v18171_v25  ;;  %v18234_v25 = vld [vmem:[%s22438_s0 + $0x1d8] sm:$0xff]  }
 0x18a   :  { %15974 = vmatmul.mubr.msk.bf16.gmra.mrb[52].mxu0 %vm656_vm0, %v18153_v22  ;;  %v18233_v22 = vld [vmem:[%s22438_s0 + $0x1d0] sm:$0xff]  }
 0x18b   :  { %15977 = vmatprep.mubr.msk.bf16.mxu0 %vm656_vm0, %v18156_v23  ;;  %v18219_v23 = vld [vmem:[%s22438_s0 + $0x9d8] sm:$0xff]  }
 0x18c   :  { %15570 = vmatmul.mubr.msk.bf16.gmra.mrb[56].mxu1 %vm656_vm0, %v18172_v29  ;;  %v18226_v29 = vld [vmem:[%s22438_s0 + $0x9f0] sm:$0xff]  }
 0x18d   :  { %15573 = vmatprep.mubr.msk.bf16.mxu1 %vm656_vm0, %v18175_v30  ;;  %v18238_v30 = vld [vmem:[%s22438_s0 + $0x1e8] sm:$0xff]  }
 0x192   :  { %15978 = vmatmul.mubr.msk.bf16.gmra.mrb[56].mxu0 %vm656_vm0, %v18157_v27  ;;  %v18237_v27 = vld [vmem:[%s22438_s0 + $0x1e0] sm:$0xff]  }
 0x193   :  { %15981 = vmatprep.mubr.msk.bf16.mxu0 %vm656_vm0, %v18160_v28  ;;  %v18223_v28 = vld [vmem:[%s22438_s0 + $0x9e8] sm:$0xff]  }
 0x194   :  { %15574 = vmatmul.mubr.msk.bf16.gmra.mrb[60].mxu1 %vm656_vm0, %v18176_v33  ;;  %v18230_v33 = vld [vmem:[%s22438_s0 + $0xa00] sm:$0xff]  }
 0x195   :  { %15577 = vmatprep.mubr.msk.bf16.mxu1 %vm656_vm0, %v18179_v34  ;;  %v18242_v34 = vld [vmem:[%s22438_s0 + $0x1f8] sm:$0xff]  }
 0x19a   :  { %15982 = vmatmul.mubr.msk.bf16.gmra.mrb[60].mxu0 %vm656_vm0, %v18161_v31  ;;  %v18241_v31 = vld [vmem:[%s22438_s0 + $0x1f0] sm:$0xff]  }
 0x19b   :  { %15985 = vmatprep.mubr.msk.bf16.mxu0 %vm656_vm0, %v18164_v32  ;;  %v18227_v32 = vld [vmem:[%s22438_s0 + $0x9f8] sm:$0xff]  }
 0x19c   :  { %15578 = vmatmul.mubr.msk.bf16.gmra.mrb[64].mxu1 %vm656_vm0, %v18180_v26  ;;  %v18235_v26 = vld [vmem:[%s22438_s0 + $0xa10] sm:$0xff]  }
 0x19d   :  { %15581 = vmatprep.mubr.msk.bf16.mxu1 %vm656_vm0, %v18183_v37  ;;  %v18246_v37 = vld [vmem:[%s22438_s0 + $0x428] sm:$0xff]  }
 0x1a2   :  { %15986 = vmatmul.mubr.msk.bf16.gmra.mrb[64].mxu0 %vm656_vm0, %v18165_v35  ;;  %v18245_v35 = vld [vmem:[%s22438_s0 + $0x420] sm:$0xff]  }
 0x1a3   :  { %15989 = vmatprep.mubr.msk.bf16.mxu0 %vm656_vm0, %v18169_v36  ;;  %v18231_v36 = vld [vmem:[%s22438_s0 + $0xa08] sm:$0xff]  }
 0x1a4   :  { %15582 = vmatmul.mubr.msk.bf16.gmra.mrb[68].mxu1 %vm656_vm0, %v18184_v41  ;;  %v18298_v41 = vld [vmem:[%s22439_s1 + $0xd0] sm:$0xff]  }
 0x1a5   :  { %15585 = vmatprep.mubr.msk.bf16.mxu1 %vm656_vm0, %v18187_v42  ;;  %v18236_v42 = vld [vmem:[%s22438_s0 + $0xa18] sm:$0xff]  }
 0x1aa   :  { %15990 = vmatmul.mubr.msk.bf16.gmra.mrb[68].mxu0 %vm656_vm0, %v18170_v39  ;;  %v18265_v39 = vld [vmem:[%s22439_s1 + $0xc8] sm:$0xff]  }
 0x1ab   :  { %15993 = vmatprep.mubr.msk.bf16.mxu0 %vm656_vm0, %v18173_v40  ;;  %v18249_v40 = vld [vmem:[%s22438_s0 + $0x430] sm:$0xff]  }
 0x1ac   :  { %15586 = vmatmul.mubr.msk.bf16.gmra.mrb[72].mxu1 %vm656_vm0, %v18188_v45  ;;  %v18240_v45 = vld [vmem:[%s22438_s0 + $0xa28] sm:$0xff]  }
 0x1ad   :  { %15589 = vmatprep.mubr.msk.bf16.mxu1 %vm656_vm0, %v18191_v46  ;;  %v18243_v46 = vld [vmem:[%s22438_s0 + $0xa30] sm:$0xff]  }
 0x1b2   :  { %15994 = vmatmul.mubr.msk.bf16.gmra.mrb[72].mxu0 %vm656_vm0, %v18174_v43  ;;  %v18239_v43 = vld [vmem:[%s22438_s0 + $0xa20] sm:$0xff]  }
 0x1b3   :  { %15997 = vmatprep.mubr.msk.bf16.mxu0 %vm656_vm0, %v18177_v44  ;;  %v18253_v44 = vld [vmem:[%s22438_s0 + $0x440] sm:$0xff]  }
 0x1b4   :  { %15590 = vmatmul.mubr.msk.bf16.gmra.mrb[76].mxu1 %vm656_vm0, %v18192_v49  ;;  %v18244_v49 = vld [vmem:[%s22438_s0 + $0xa38] sm:$0xff]  }
 0x1b5   :  { %15593 = vmatprep.mubr.msk.bf16.mxu1 %vm656_vm0, %v18195_v50  ;;  %v18247_v50 = vld [vmem:[%s22438_s0 + $0xa40] sm:$0xff]  }
 0x1ba   :  { %15998 = vmatmul.mubr.msk.bf16.gmra.mrb[76].mxu0 %vm656_vm0, %v18178_v47  ;;  %v18254_v47 = vld [vmem:[%s22438_s0 + $0x448] sm:$0xff]  }
 0x1bb   :  { %16001 = vmatprep.mubr.msk.bf16.mxu0 %vm656_vm0, %v18181_v48  ;;  %v18257_v48 = vld [vmem:[%s22438_s0 + $0x450] sm:$0xff]  }
 0x1bc   :  { %15594 = vmatmul.mubr.msk.bf16.gmra.mrb[80].mxu1 %vm656_vm0, %v18196_v53  ;;  %v18248_v53 = vld [vmem:[%s22438_s0 + $0xa48] sm:$0xff]  }
 0x1bd   :  { %15597 = vmatprep.mubr.msk.bf16.mxu1 %vm656_vm0, %v18200_v54  ;;  %v18251_v54 = vld [vmem:[%s22438_s0 + $0xa50] sm:$0xff]  }
 0x1c2   :  { %16002 = vmatmul.mubr.msk.bf16.gmra.mrb[80].mxu0 %vm656_vm0, %v18182_v51  ;;  %v18258_v51 = vld [vmem:[%s22438_s0 + $0x458] sm:$0xff]  }
 0x1c3   :  { %16005 = vmatprep.mubr.msk.bf16.mxu0 %vm656_vm0, %v18185_v52  ;;  %v18261_v52 = vld [vmem:[%s22438_s0 + $0x460] sm:$0xff]  }
 0x1c4   :  { %15598 = vmatmul.mubr.msk.bf16.gmra.mrb[84].mxu1 %vm656_vm0, %v18201_v57 }
 0x1c5   :  { %15601 = vmatprep.mubr.msk.bf16.mxu1 %vm656_vm0, %v18204_v58 }
 0x1ca   :  { %16006 = vmatmul.mubr.msk.bf16.gmra.mrb[84].mxu0 %vm656_vm0, %v18186_v55  ;;  %v18262_v55 = vld [vmem:[%s22438_s0 + $0x468] sm:$0xff]  }
 0x1cb   :  { %16009 = vmatprep.mubr.msk.bf16.mxu0 %vm656_vm0, %v18189_v56  ;;  %v18266_v56 = vld [vmem:[%s22438_s0 + $0x470] sm:$0xff]  }
 0x1cc   :  { %15602 = vmatmul.mubr.msk.bf16.gmra.mrb[88].mxu1 %vm656_vm0, %v18205_v61 }
 0x1cd   :  { %15605 = vmatprep.mubr.msk.bf16.mxu1 %vm656_vm0, %v18208_v62 }
 0x1d2   :  { %16010 = vmatmul.mubr.msk.bf16.gmra.mrb[88].mxu0 %vm656_vm0, %v18190_v59 }
 0x1d3   :  { %16013 = vmatprep.mubr.msk.bf16.mxu0 %vm656_vm0, %v18193_v60 }
 0x1d4   :  { %15606 = vmatmul.mubr.msk.bf16.gmra.mrb[92].mxu1 %vm656_vm0, %v18209_v1 }
 0x1d5   :  { %15609 = vmatprep.mubr.msk.bf16.mxu1 %vm656_vm0, %v18212_v2 }
 0x1da   :  { %16014 = vmatmul.mubr.msk.bf16.gmra.mrb[92].mxu0 %vm656_vm0, %v18194_v63 }
 0x1db   :  { %16017 = vmatprep.mubr.msk.bf16.mxu0 %vm656_vm0, %v18197_v0 }
 0x1dc   :  { %15610 = vmatmul.mubr.msk.bf16.gmra.mrb[96].mxu1 %vm656_vm0, %v18213_v5 }
 0x1dd   :  { %15613 = vmatprep.mubr.msk.bf16.mxu1 %vm656_vm0, %v18216_v6 }
 0x1e2   :  { %16018 = vmatmul.mubr.msk.bf16.gmra.mrb[96].mxu0 %vm656_vm0, %v18198_v3 }
 0x1e3   :  { %16021 = vmatprep.mubr.msk.bf16.mxu0 %vm656_vm0, %v18202_v4 }
 0x1e4   :  { %15614 = vmatmul.mubr.msk.bf16.gmra.mrb[100].mxu1 %vm656_vm0, %v18217_v9 }
 0x1e5   :  { %15617 = vmatprep.mubr.msk.bf16.mxu1 %vm656_vm0, %v18220_v10 }
 0x1ea   :  { %16022 = vmatmul.mubr.msk.bf16.gmra.mrb[100].mxu0 %vm656_vm0, %v18203_v7 }
 0x1eb   :  { %16025 = vmatprep.mubr.msk.bf16.mxu0 %vm656_vm0, %v18206_v8 }
 0x1ec   :  { %15618 = vmatmul.mubr.msk.bf16.gmra.mrb[104].mxu1 %vm656_vm0, %v18221_v13 }
 0x1ed   :  { %15621 = vmatprep.mubr.msk.bf16.mxu1 %vm656_vm0, %v18224_v14 }
 0x1f2   :  { %16026 = vmatmul.mubr.msk.bf16.gmra.mrb[104].mxu0 %vm656_vm0, %v18207_v11 }
 0x1f3   :  { %16029 = vmatprep.mubr.msk.bf16.mxu0 %vm656_vm0, %v18210_v12 }
 0x1f4   :  { %15622 = vmatmul.mubr.msk.bf16.gmra.mrb[108].mxu1 %vm656_vm0, %v18225_v17 }
 0x1f5   :  { %15625 = vmatprep.mubr.msk.bf16.mxu1 %vm656_vm0, %v18228_v18 }
 0x1fa   :  { %16030 = vmatmul.mubr.msk.bf16.gmra.mrb[108].mxu0 %vm656_vm0, %v18211_v15 }
 0x1fb   :  { %16033 = vmatprep.mubr.msk.bf16.mxu0 %vm656_vm0, %v18214_v16 }
 0x1fc   :  { %15626 = vmatmul.mubr.msk.bf16.gmra.mrb[112].mxu1 %vm656_vm0, %v18229_v21 }
 0x1fd   :  { %15629 = vmatprep.mubr.msk.bf16.mxu1 %vm656_vm0, %v18233_v22 }
 0x202   :  { %16034 = vmatmul.mubr.msk.bf16.gmra.mrb[112].mxu0 %vm656_vm0, %v18215_v19 }
 0x203   :  { %16037 = vmatprep.mubr.msk.bf16.mxu0 %vm656_vm0, %v18218_v20 }
 0x204   :  { %15630 = vmatmul.mubr.msk.bf16.gmra.mrb[116].mxu1 %vm656_vm0, %v18234_v25 }
 0x205   :  { %15633 = vmatprep.mubr.msk.bf16.mxu1 %vm656_vm0, %v18237_v27 }
 0x20a   :  { %16038 = vmatmul.mubr.msk.bf16.gmra.mrb[116].mxu0 %vm656_vm0, %v18219_v23 }
 0x20b   :  { %16041 = vmatprep.mubr.msk.bf16.mxu0 %vm656_vm0, %v18222_v24 }
 0x20c   :  { %15634 = vmatmul.mubr.msk.bf16.gmra.mrb[120].mxu1 %vm656_vm0, %v18238_v30 }
 0x20d   :  { %15637 = vmatprep.mubr.msk.bf16.mxu1 %vm656_vm0, %v18241_v31 }
 0x212   :  { %16042 = vmatmul.mubr.msk.bf16.gmra.mrb[120].mxu0 %vm656_vm0, %v18223_v28 }
 0x213   :  { %16045 = vmatprep.mubr.msk.bf16.mxu0 %vm656_vm0, %v18226_v29 }
 0x214   :  { %15638 = vmatmul.mubr.msk.bf16.gmra.mrb[124].mxu1 %vm656_vm0, %v18242_v34 }
 0x215   :  { %15657 = vmatprep.mubr.msk.bf16.mxu1 %vm656_vm0, %v18245_v35 }
 0x21a   :  { %16046 = vmatmul.mubr.msk.bf16.gmra.mrb[124].mxu0 %vm656_vm0, %v18227_v32 }
 0x21b   :  { %16057 = vmatprep.mubr.msk.bf16.mxu0 %vm656_vm0, %v18230_v33 }
 0x21c   :  { %15658 = vmatmul.mubr.msk.bf16.vlgmr.msra.gmra.mrb[8].mxu1 %vm656_vm0, %v18246_v37 }
 0x21d   :  { %15661 = vmatprep.mubr.msk.bf16.mxu1 %vm656_vm0, %v18249_v40 }
 0x222   :  { %16058 = vmatmul.mubr.msk.bf16.vlgmr.msra.gmra.mrb[0].mxu0 %vm656_vm0, %v18231_v36 }
 0x223   :  { %16186 = vmatpush3.bf16.msra.mxu0 %v19632_v38  ;;  %16061 = vmatprep.mubr.msk.bf16.mxu0 %vm656_vm0, %v18235_v26  ;;  %v18250_v38 = vld [vmem:[%s22438_s0 + $0x438] sm:$0xff]  }
 0x224   :  { %16187 = vmatprep.subr.bf16.mxu0 %v18265_v39  ;;  %15662 = vmatmul.mubr.msk.bf16.gmra.mrb[12].mxu1 %vm656_vm0, %v18250_v38 }
 0x225   :  { %15665 = vmatprep.mubr.msk.bf16.mxu1 %vm656_vm0, %v18253_v44 }
 0x227   :  { %16188 = vmatpush3.bf16.msra.mxu0 %v18265_v39 }
 0x228   :  { %16189 = vmatprep.subr.bf16.mxu0 %v18298_v41 }
 0x22a   :  { %16062 = vmatmul.mubr.msk.bf16.gmra.mrb[4].mxu0 %vm656_vm0, %v18236_v42 }
 0x22b   :  { %16065 = vmatprep.mubr.msk.bf16.mxu0 %vm656_vm0, %v18239_v43  ;;  %16190 = vmatpush3.bf16.msra.mxu0 %v18298_v41 }
 0x22c   :  { %15666 = vmatmul.mubr.msk.bf16.gmra.mrb[16].mxu1 %vm656_vm0, %v18254_v47 }
 0x22d   :  { %15669 = vmatprep.mubr.msk.bf16.mxu1 %vm656_vm0, %v18257_v48 }
 0x232   :  { %16066 = vmatmul.mubr.msk.bf16.gmra.mrb[8].mxu0 %vm656_vm0, %v18240_v45 }
 0x233   :  { %16069 = vmatprep.mubr.msk.bf16.mxu0 %vm656_vm0, %v18243_v46 }
 0x234   :  { %15670 = vmatmul.mubr.msk.bf16.gmra.mrb[20].mxu1 %vm656_vm0, %v18258_v51 }
 0x235   :  { %15673 = vmatprep.mubr.msk.bf16.mxu1 %vm656_vm0, %v18261_v52 }
 0x23a   :  { %16070 = vmatmul.mubr.msk.bf16.gmra.mrb[12].mxu0 %vm656_vm0, %v18244_v49 }
 0x23b   :  { %16073 = vmatprep.mubr.msk.bf16.mxu0 %vm656_vm0, %v18247_v50 }
 0x23c   :  { %15674 = vmatmul.mubr.msk.bf16.gmra.mrb[24].mxu1 %vm656_vm0, %v18262_v55 }
 0x23d   :  { %15677 = vmatprep.mubr.msk.bf16.mxu1 %vm656_vm0, %v18266_v56 }
 0x242   :  { %16074 = vmatmul.mubr.msk.bf16.gmra.mrb[16].mxu0 %vm656_vm0, %v18248_v53 }
 0x243   :  { %16077 = vmatprep.mubr.msk.bf16.mxu0 %vm656_vm0, %v18251_v54 }
 0x244   :  { %16 = vsyncpa [#allocation3], 0  ;;  %v18252_v57 = vld [vmem:[%s22438_s0 + $0xa58] sm:$0xff]   ;;  %v18255_v58 = vld [vmem:[%s22438_s0 + $0xa60] sm:$0xff]   ;;  %v20077_v22 = vpop.f32.mrb[0].mxu1  ;;  %vm18670_vm1 = vmmov 0  }
 0x245   :  { %v18267_v59 = vld [vmem:[%s22438_s0 + $0x478] sm:$0xff]   ;;  %v18270_v60 = vld [vmem:[%s22438_s0 + $0x480] sm:$0xff]   ;;  %v18256_v61 = vld [vmem:[%s22438_s0 + $0xa68] sm:$0xff]   ;;  %v20080_v23 = vpop.f32.mrb[1].mxu1  ;;  %s18671_s15 = smov [#allocation2]   ;;  %vm13376_vm2 = vcmask 254976  }
 0x246   :  { %15678 = vmatmul.mubr.msk.bf16.gmra.mrb[28].mxu1 %vm656_vm0, %v18267_v59  ;;  %v18259_v62 = vld [vmem:[%s22438_s0 + $0xa70] sm:$0xff]   ;;  %v18271_v63 = vld [vmem:[%s22438_s0 + $0x488] sm:$0xff]   ;;  %v18260_v1 = vld [vmem:[%s22438_s0 + $0xa78] sm:$0xff]   ;;  %v20097_v29 = vpop.f32.mrb[2].mxu1 }
 0x247   :  { %15681 = vmatprep.mubr.msk.bf16.mxu1 %vm656_vm0, %v18270_v60  ;;  %v18274_v0 = vld [vmem:[%s22438_s0 + $0x490] sm:$0xff]   ;;  %v18263_v2 = vld [vmem:[%s22438_s0 + $0xa80] sm:$0xff]   ;;  %v18275_v3 = vld [vmem:[%s22438_s0 + $0x498] sm:$0xff]   ;;  %v20100_v30 = vpop.f32.mrb[3].mxu1 }
 0x248   :  { %v18278_v4 = vld [vmem:[%s22438_s0 + $0x4a0] sm:$0xff]   ;;  %v18264_v5 = vld [vmem:[%s22438_s0 + $0xa88] sm:$0xff]   ;;  %v18268_v6 = vld [vmem:[%s22438_s0 + $0xa90] sm:$0xff]   ;;  %v20103_v31 = vpop.f32.mrb[4].mxu1 }
 0x249   :  { %v18279_v7 = vld [vmem:[%s22438_s0 + $0x4a8] sm:$0xff]   ;;  %v18282_v8 = vld [vmem:[%s22438_s0 + $0x4b0] sm:$0xff]   ;;  %v18331_v9 = vld [vmem:[%s22439_s1 + $0xd8] sm:$0xff]   ;;  %v20106_v32 = vpop.f32.mrb[5].mxu1 }
 0x24a   :  { %16078 = vmatmul.mubr.msk.bf16.gmra.mrb[20].mxu0 %vm656_vm0, %v18252_v57  ;;  %16191 = vmatprep.subr.bf16.mxu0 %v18331_v9  ;;  %v18269_v10 = vld [vmem:[%s22438_s0 + $0xa98] sm:$0xff]   ;;  %v18272_v11 = vld [vmem:[%s22438_s0 + $0xaa0] sm:$0xff]   ;;  %v18273_v14 = vld [vmem:[%s22438_s0 + $0xaa8] sm:$0xff]   ;;  %v20121_v26 = vpop.f32.mrb[6].mxu1 }
 0x24b   :  { %16081 = vmatprep.mubr.msk.bf16.mxu0 %vm656_vm0, %v18255_v58  ;;  %16192 = vmatpush3.bf16.msra.mxu0 %v18331_v9  ;;  %v18283_v12 = vld [vmem:[%s22438_s0 + $0x4b8] sm:$0xff]   ;;  %v18286_v13 = vld [vmem:[%s22438_s0 + $0x4c0] sm:$0xff]   ;;  %v18276_v15 = vld [vmem:[%s22438_s0 + $0xab0] sm:$0xff]   ;;  %v20124_v37 = vpop.f32.mrb[7].mxu1 }
 0x24c   :  { %v18287_v16 = vld [vmem:[%s22438_s0 + $0x4c8] sm:$0xff]   ;;  %v18290_v17 = vld [vmem:[%s22438_s0 + $0x4d0] sm:$0xff]   ;;  %v18277_v18 = vld [vmem:[%s22438_s0 + $0xab8] sm:$0xff]  }
 0x24d   :  { %v18280_v19 = vld [vmem:[%s22438_s0 + $0xac0] sm:$0xff]   ;;  %v18291_v20 = vld [vmem:[%s22438_s0 + $0x4d8] sm:$0xff]   ;;  %v18281_v24 = vld [vmem:[%s22438_s0 + $0xac8] sm:$0xff]  }
 0x24e   :  { %15682 = vmatmul.mubr.msk.bf16.gmra.mrb[32].mxu1 %vm656_vm0, %v18271_v63  ;;  %v18294_v21 = vld [vmem:[%s22438_s0 + $0x4e0] sm:$0xff]   ;;  %v18284_v25 = vld [vmem:[%s22438_s0 + $0xad0] sm:$0xff]   ;;  %v18295_v27 = vld [vmem:[%s22438_s0 + $0x4e8] sm:$0xff]  }
 0x24f   :  { %15685 = vmatprep.mubr.msk.bf16.mxu1 %vm656_vm0, %v18274_v0  ;;  %v18299_v28 = vld [vmem:[%s22438_s0 + $0x4f0] sm:$0xff]   ;;  %v18285_v33 = vld [vmem:[%s22438_s0 + $0xad8] sm:$0xff]   ;;  %v18288_v34 = vld [vmem:[%s22438_s0 + $0xae0] sm:$0xff]  }
 0x250   :  { %v18300_v35 = vld [vmem:[%s22438_s0 + $0x4f8] sm:$0xff]   ;;  %v18303_v36 = vld [vmem:[%s22438_s0 + $0x500] sm:$0xff]   ;;  %v18289_v39 = vld [vmem:[%s22438_s0 + $0xae8] sm:$0xff]  }
 0x251   :  { %v18292_v40 = vld [vmem:[%s22438_s0 + $0xaf0] sm:$0xff]   ;;  %v18304_v41 = vld [vmem:[%s22438_s0 + $0x508] sm:$0xff]   ;;  %v18293_v43 = vld [vmem:[%s22438_s0 + $0xaf8] sm:$0xff]  }
 0x252   :  { %16082 = vmatmul.mubr.msk.bf16.gmra.mrb[24].mxu0 %vm656_vm0, %v18256_v61  ;;  %v18307_v42 = vld [vmem:[%s22438_s0 + $0x510] sm:$0xff]   ;;  %v18296_v38 = vld [vmem:[%s22438_s0 + $0xb00] sm:$0xff]   ;;  %v18308_v44 = vld [vmem:[%s22438_s0 + $0x518] sm:$0xff]  }
 0x253   :  { %16085 = vmatprep.mubr.msk.bf16.mxu0 %vm656_vm0, %v18259_v62  ;;  %v18311_v45 = vld [vmem:[%s22438_s0 + $0x520] sm:$0xff]   ;;  %v18297_v46 = vld [vmem:[%s22438_s0 + $0xb08] sm:$0xff]   ;;  %v18301_v47 = vld [vmem:[%s22438_s0 + $0xb10] sm:$0xff]  }
 0x254   :  { %v18312_v48 = vld [vmem:[%s22438_s0 + $0x528] sm:$0xff]   ;;  %v18315_v49 = vld [vmem:[%s22438_s0 + $0x530] sm:$0xff]   ;;  %v20176_v50 = vld [vmem:[%s22439_s1 + $0xe0] sm:$0xff]  }
 0x255   :  { %16321 = vmatprep.subr.bf16.mxu0 %v20176_v50  ;;  %v18302_v51 = vld [vmem:[%s22438_s0 + $0xb18] sm:$0xff]   ;;  %v18305_v52 = vld [vmem:[%s22438_s0 + $0xb20] sm:$0xff]   ;;  %v18306_v55 = vld [vmem:[%s22438_s0 + $0xb28] sm:$0xff]  }
 0x256   :  { %15686 = vmatmul.mubr.msk.bf16.gmra.mrb[36].mxu1 %vm656_vm0, %v18275_v3  ;;  %v18316_v53 = vld [vmem:[%s22438_s0 + $0x538] sm:$0xff]   ;;  %v18319_v54 = vld [vmem:[%s22438_s0 + $0x540] sm:$0xff]   ;;  %v18309_v56 = vld [vmem:[%s22438_s0 + $0xb30] sm:$0xff]  }
 0x257   :  { %15689 = vmatprep.mubr.msk.bf16.mxu1 %vm656_vm0, %v18278_v4  ;;  %v18320_v57 = vld [vmem:[%s22438_s0 + $0x548] sm:$0xff]   ;;  %v18323_v58 = vld [vmem:[%s22438_s0 + $0x550] sm:$0xff]   ;;  %v18310_v59 = vld [vmem:[%s22438_s0 + $0xb38] sm:$0xff]  }
 0x258   :  { %v18313_v60 = vld [vmem:[%s22438_s0 + $0xb40] sm:$0xff]   ;;  %v18324_v61 = vld [vmem:[%s22438_s0 + $0x558] sm:$0xff]   ;;  %v18314_v63 = vld [vmem:[%s22438_s0 + $0xb48] sm:$0xff]  }
 0x259   :  { %v18327_v62 = vld [vmem:[%s22438_s0 + $0x560] sm:$0xff]   ;;  %v18317_v0 = vld [vmem:[%s22438_s0 + $0xb50] sm:$0xff]   ;;  %v18318_v3 = vld [vmem:[%s22438_s0 + $0xb58] sm:$0xff]  }
 0x25a   :  { %16086 = vmatmul.mubr.msk.bf16.gmra.mrb[28].mxu0 %vm656_vm0, %v18260_v1  ;;  %v18328_v1 = vld [vmem:[%s22438_s0 + $0x568] sm:$0xff]   ;;  %v18321_v4 = vld [vmem:[%s22438_s0 + $0xb60] sm:$0xff]  }
 0x25b   :  { %16089 = vmatprep.mubr.msk.bf16.mxu0 %vm656_vm0, %v18263_v2  ;;  %v18332_v2 = vld [vmem:[%s22438_s0 + $0x570] sm:$0xff]   ;;  %v18337_v9 = vld [vmem:[%s22438_s0 + $0x588] sm:$0xff]  }
 0x25e   :  { %15690 = vmatmul.mubr.msk.bf16.gmra.mrb[40].mxu1 %vm656_vm0, %v18279_v7  ;;  %v18322_v7 = vld [vmem:[%s22438_s0 + $0xb68] sm:$0xff]  }
 0x25f   :  { %15693 = vmatprep.mubr.msk.bf16.mxu1 %vm656_vm0, %v18282_v8  ;;  %v18325_v8 = vld [vmem:[%s22438_s0 + $0xb70] sm:$0xff]  }
 0x262   :  { %16090 = vmatmul.mubr.msk.bf16.gmra.mrb[32].mxu0 %vm656_vm0, %v18264_v5  ;;  %v18333_v5 = vld [vmem:[%s22438_s0 + $0x578] sm:$0xff]  }
 0x263   :  { %16093 = vmatprep.mubr.msk.bf16.mxu0 %vm656_vm0, %v18268_v6  ;;  %v18336_v6 = vld [vmem:[%s22438_s0 + $0x580] sm:$0xff]  }
 0x266   :  { %15694 = vmatmul.mubr.msk.bf16.gmra.mrb[44].mxu1 %vm656_vm0, %v18283_v12  ;;  %v18329_v12 = vld [vmem:[%s22438_s0 + $0xb80] sm:$0xff]  }
 0x267   :  { %15697 = vmatprep.mubr.msk.bf16.mxu1 %vm656_vm0, %v18286_v13  ;;  %v18341_v13 = vld [vmem:[%s22438_s0 + $0x598] sm:$0xff]  }
 0x26a   :  { %16094 = vmatmul.mubr.msk.bf16.gmra.mrb[36].mxu0 %vm656_vm0, %v18269_v10  ;;  %v18340_v10 = vld [vmem:[%s22438_s0 + $0x590] sm:$0xff]  }
 0x26b   :  { %16097 = vmatprep.mubr.msk.bf16.mxu0 %vm656_vm0, %v18272_v11  ;;  %v18326_v11 = vld [vmem:[%s22438_s0 + $0xb78] sm:$0xff]  }
 0x26e   :  { %15698 = vmatmul.mubr.msk.bf16.gmra.mrb[48].mxu1 %vm656_vm0, %v18287_v16  ;;  %v18334_v16 = vld [vmem:[%s22438_s0 + $0xb90] sm:$0xff]  }
 0x26f   :  { %15701 = vmatprep.mubr.msk.bf16.mxu1 %vm656_vm0, %v18290_v17  ;;  %v18345_v17 = vld [vmem:[%s22438_s0 + $0x5a8] sm:$0xff]  }
 0x272   :  { %16098 = vmatmul.mubr.msk.bf16.gmra.mrb[40].mxu0 %vm656_vm0, %v18273_v14  ;;  %v18344_v14 = vld [vmem:[%s22438_s0 + $0x5a0] sm:$0xff]  }
 0x273   :  { %16101 = vmatprep.mubr.msk.bf16.mxu0 %vm656_vm0, %v18276_v15  ;;  %v18330_v15 = vld [vmem:[%s22438_s0 + $0xb88] sm:$0xff]  }
 0x276   :  { %15702 = vmatmul.mubr.msk.bf16.gmra.mrb[52].mxu1 %vm656_vm0, %v18291_v20  ;;  %v18338_v20 = vld [vmem:[%s22438_s0 + $0xba0] sm:$0xff]  }
 0x277   :  { %15705 = vmatprep.mubr.msk.bf16.mxu1 %vm656_vm0, %v18294_v21  ;;  %v18349_v21 = vld [vmem:[%s22438_s0 + $0x5b8] sm:$0xff]  }
 0x27a   :  { %16102 = vmatmul.mubr.msk.bf16.gmra.mrb[44].mxu0 %vm656_vm0, %v18277_v18  ;;  %v18348_v18 = vld [vmem:[%s22438_s0 + $0x5b0] sm:$0xff]  }
 0x27b   :  { %16105 = vmatprep.mubr.msk.bf16.mxu0 %vm656_vm0, %v18280_v19  ;;  %v18335_v19 = vld [vmem:[%s22438_s0 + $0xb98] sm:$0xff]  }
 0x27e   :  { %15706 = vmatmul.mubr.msk.bf16.gmra.mrb[56].mxu1 %vm656_vm0, %v18295_v27  ;;  %v18342_v27 = vld [vmem:[%s22438_s0 + $0xbb0] sm:$0xff]  }
 0x27f   :  { %15709 = vmatprep.mubr.msk.bf16.mxu1 %vm656_vm0, %v18299_v28  ;;  %v18353_v28 = vld [vmem:[%s22438_s0 + $0x5c8] sm:$0xff]  }
 0x282   :  { %16106 = vmatmul.mubr.msk.bf16.gmra.mrb[48].mxu0 %vm656_vm0, %v18281_v24  ;;  %v18352_v24 = vld [vmem:[%s22438_s0 + $0x5c0] sm:$0xff]  }
 0x283   :  { %16109 = vmatprep.mubr.msk.bf16.mxu0 %vm656_vm0, %v18284_v25  ;;  %v18339_v25 = vld [vmem:[%s22438_s0 + $0xba8] sm:$0xff]  }
 0x286   :  { %15710 = vmatmul.mubr.msk.bf16.gmra.mrb[60].mxu1 %vm656_vm0, %v18300_v35  ;;  %v18346_v35 = vld [vmem:[%s22438_s0 + $0xbc0] sm:$0xff]  }
 0x287   :  { %15713 = vmatprep.mubr.msk.bf16.mxu1 %vm656_vm0, %v18303_v36 }
 0x28a   :  { %16110 = vmatmul.mubr.msk.bf16.gmra.mrb[52].mxu0 %vm656_vm0, %v18285_v33  ;;  %v18356_v33 = vld [vmem:[%s22438_s0 + $0x5d0] sm:$0xff]  }
 0x28b   :  { %16113 = vmatprep.mubr.msk.bf16.mxu0 %vm656_vm0, %v18288_v34  ;;  %v18343_v34 = vld [vmem:[%s22438_s0 + $0xbb8] sm:$0xff]  }
 0x28e   :  { %15714 = vmatmul.mubr.msk.bf16.gmra.mrb[64].mxu1 %vm656_vm0, %v18304_v41 }
 0x28f   :  { %15717 = vmatprep.mubr.msk.bf16.mxu1 %vm656_vm0, %v18307_v42  ;;  %v18360_v42 = vld [vmem:[%s22438_s0 + $0x5e0] sm:$0xff]  }
 0x292   :  { %16114 = vmatmul.mubr.msk.bf16.gmra.mrb[56].mxu0 %vm656_vm0, %v18289_v39 }
 0x293   :  { %16117 = vmatprep.mubr.msk.bf16.mxu0 %vm656_vm0, %v18292_v40  ;;  %v18357_v40 = vld [vmem:[%s22438_s0 + $0x5d8] sm:$0xff]  }
 0x296   :  { %15718 = vmatmul.mubr.msk.bf16.gmra.mrb[68].mxu1 %vm656_vm0, %v18308_v44  ;;  %v18350_v44 = vld [vmem:[%s22438_s0 + $0xbd0] sm:$0xff]  }
 0x297   :  { %15721 = vmatprep.mubr.msk.bf16.mxu1 %vm656_vm0, %v18311_v45 }
 0x29a   :  { %16118 = vmatmul.mubr.msk.bf16.gmra.mrb[60].mxu0 %vm656_vm0, %v18293_v43 }
 0x29b   :  { %16121 = vmatprep.mubr.msk.bf16.mxu0 %vm656_vm0, %v18296_v38  ;;  %v18347_v38 = vld [vmem:[%s22438_s0 + $0xbc8] sm:$0xff]  }
 0x29e   :  { %15722 = vmatmul.mubr.msk.bf16.gmra.mrb[72].mxu1 %vm656_vm0, %v18312_v48 }
 0x29f   :  { %15725 = vmatprep.mubr.msk.bf16.mxu1 %vm656_vm0, %v18315_v49  ;;  %v18365_v49 = vld [vmem:[%s22438_s0 + $0x5f0] sm:$0xff]  }
 0x2a2   :  { %16122 = vmatmul.mubr.msk.bf16.gmra.mrb[64].mxu0 %vm656_vm0, %v18297_v46 }
 0x2a3   :  { %16125 = vmatprep.mubr.msk.bf16.mxu0 %vm656_vm0, %v18301_v47  ;;  %v18361_v47 = vld [vmem:[%s22438_s0 + $0x5e8] sm:$0xff]  }
 0x2a6   :  { %15726 = vmatmul.mubr.msk.bf16.gmra.mrb[76].mxu1 %vm656_vm0, %v18316_v53  ;;  %v18354_v53 = vld [vmem:[%s22438_s0 + $0xbe0] sm:$0xff]  }
 0x2a7   :  { %15729 = vmatprep.mubr.msk.bf16.mxu1 %vm656_vm0, %v18319_v54 }
 0x2aa   :  { %16126 = vmatmul.mubr.msk.bf16.gmra.mrb[68].mxu0 %vm656_vm0, %v18302_v51 }
 0x2ab   :  { %16129 = vmatprep.mubr.msk.bf16.mxu0 %vm656_vm0, %v18305_v52  ;;  %v18351_v52 = vld [vmem:[%s22438_s0 + $0xbd8] sm:$0xff]  }
 0x2ae   :  { %15730 = vmatmul.mubr.msk.bf16.gmra.mrb[80].mxu1 %vm656_vm0, %v18320_v57 }
 0x2af   :  { %15733 = vmatprep.mubr.msk.bf16.mxu1 %vm656_vm0, %v18323_v58 }
 0x2b2   :  { %16130 = vmatmul.mubr.msk.bf16.gmra.mrb[72].mxu0 %vm656_vm0, %v18306_v55 }
 0x2b3   :  { %16133 = vmatprep.mubr.msk.bf16.mxu0 %vm656_vm0, %v18309_v56  ;;  %v18366_v56 = vld [vmem:[%s22438_s0 + $0x5f8] sm:$0xff]  }
 0x2b6   :  { %15734 = vmatmul.mubr.msk.bf16.gmra.mrb[84].mxu1 %vm656_vm0, %v18324_v61 }
 0x2b7   :  { %15737 = vmatprep.mubr.msk.bf16.mxu1 %vm656_vm0, %v18327_v62 }
 0x2ba   :  { %16134 = vmatmul.mubr.msk.bf16.gmra.mrb[76].mxu0 %vm656_vm0, %v18310_v59  ;;  %v18355_v59 = vld [vmem:[%s22438_s0 + $0xbe8] sm:$0xff]  }
 0x2bb   :  { %16137 = vmatprep.mubr.msk.bf16.mxu0 %vm656_vm0, %v18313_v60  ;;  %v18358_v60 = vld [vmem:[%s22438_s0 + $0xbf0] sm:$0xff]  }
 0x2be   :  { %15738 = vmatmul.mubr.msk.bf16.gmra.mrb[88].mxu1 %vm656_vm0, %v18328_v1  ;;  %v18359_v1 = vld [vmem:[%s22438_s0 + $0xbf8] sm:$0xff]  }
 0x2bf   :  { %15741 = vmatprep.mubr.msk.bf16.mxu1 %vm656_vm0, %v18332_v2  ;;  %v18362_v2 = vld [vmem:[%s22438_s0 + $0xc00] sm:$0xff]  }
 0x2c2   :  { %16138 = vmatmul.mubr.msk.bf16.gmra.mrb[80].mxu0 %vm656_vm0, %v18314_v63 }
 0x2c3   :  { %16141 = vmatprep.mubr.msk.bf16.mxu0 %vm656_vm0, %v18317_v0 }
 0x2c6   :  { %15742 = vmatmul.mubr.msk.bf16.gmra.mrb[92].mxu1 %vm656_vm0, %v18333_v5 }
 0x2c7   :  { %15745 = vmatprep.mubr.msk.bf16.mxu1 %vm656_vm0, %v18336_v6 }
 0x2ca   :  { %16142 = vmatmul.mubr.msk.bf16.gmra.mrb[84].mxu0 %vm656_vm0, %v18318_v3 }
 0x2cb   :  { %16145 = vmatprep.mubr.msk.bf16.mxu0 %vm656_vm0, %v18321_v4 }
 0x2ce   :  { %15746 = vmatmul.mubr.msk.bf16.gmra.mrb[96].mxu1 %vm656_vm0, %v18337_v9 }
 0x2cf   :  { %15749 = vmatprep.mubr.msk.bf16.mxu1 %vm656_vm0, %v18340_v10 }
 0x2d2   :  { %16146 = vmatmul.mubr.msk.bf16.gmra.mrb[88].mxu0 %vm656_vm0, %v18322_v7  ;;  %v18363_v7 = vld [vmem:[%s22438_s0 + $0xc08] sm:$0xff]  }
 0x2d3   :  { %16149 = vmatprep.mubr.msk.bf16.mxu0 %vm656_vm0, %v18325_v8  ;;  %v18367_v8 = vld [vmem:[%s22438_s0 + $0xc10] sm:$0xff]  }
 0x2d6   :  { %15750 = vmatmul.mubr.msk.bf16.gmra.mrb[100].mxu1 %vm656_vm0, %v18341_v13 }
 0x2d7   :  { %15753 = vmatprep.mubr.msk.bf16.mxu1 %vm656_vm0, %v18344_v14  ;;  %v18400_v14 = vld [vmem:[%s22439_s1 + $0xf0] sm:$0xff]  }
 0x2da   :  { %16150 = vmatmul.mubr.msk.bf16.gmra.mrb[92].mxu0 %vm656_vm0, %v18326_v11  ;;  %v18383_v11 = vld [vmem:[%s22439_s1 + $0xe8] sm:$0xff]  }
 0x2db   :  { %16153 = vmatprep.mubr.msk.bf16.mxu0 %vm656_vm0, %v18329_v12 }
 0x2de   :  { %15754 = vmatmul.mubr.msk.bf16.gmra.mrb[104].mxu1 %vm656_vm0, %v18345_v17 }
 0x2df   :  { %15757 = vmatprep.mubr.msk.bf16.mxu1 %vm656_vm0, %v18348_v18 }
 0x2e2   :  { %16154 = vmatmul.mubr.msk.bf16.gmra.mrb[96].mxu0 %vm656_vm0, %v18330_v15  ;;  %v18368_v15 = vld [vmem:[%s22438_s0 + $0xc18] sm:$0xff]  }
 0x2e3   :  { %16157 = vmatprep.mubr.msk.bf16.mxu0 %vm656_vm0, %v18334_v16  ;;  %v18369_v16 = vld [vmem:[%s22438_s0 + $0xc20] sm:$0xff]  }
 0x2e6   :  { %15758 = vmatmul.mubr.msk.bf16.gmra.mrb[108].mxu1 %vm656_vm0, %v18349_v21  ;;  %v18371_v21 = vld [vmem:[%s22438_s0 + $0xc30] sm:$0xff]  }
 0x2e7   :  { %15761 = vmatprep.mubr.msk.bf16.mxu1 %vm656_vm0, %v18352_v24 }
 0x2ea   :  { %16158 = vmatmul.mubr.msk.bf16.gmra.mrb[100].mxu0 %vm656_vm0, %v18335_v19 }
 0x2eb   :  { %16161 = vmatprep.mubr.msk.bf16.mxu0 %vm656_vm0, %v18338_v20  ;;  %v18370_v20 = vld [vmem:[%s22438_s0 + $0xc28] sm:$0xff]  }
 0x2ee   :  { %15762 = vmatmul.mubr.msk.bf16.gmra.mrb[112].mxu1 %vm656_vm0, %v18353_v28 }
 0x2ef   :  { %15765 = vmatprep.mubr.msk.bf16.mxu1 %vm656_vm0, %v18356_v33  ;;  %v20348_v36 = vpop.f32.mrb[8].mxu1  ;;  %v18372_v33 = vld [vmem:[%s22438_s0 + $0xc38] sm:$0xff]  }
 0x2f0   :  { %v20350_v39 = vpop.f32.mrb[9].mxu1 }
 0x2f1   :  { %v20355_v41 = vpop.f32.mrb[10].mxu1 }
 0x2f2   :  { %16162 = vmatmul.mubr.msk.bf16.gmra.mrb[104].mxu0 %vm656_vm0, %v18339_v25  ;;  %v20361_v43 = vpop.f32.mrb[11].mxu1 }
 0x2f3   :  { %16165 = vmatprep.mubr.msk.bf16.mxu0 %vm656_vm0, %v18342_v27 }
 0x2f6   :  { %15766 = vmatmul.mubr.msk.bf16.gmra.mrb[116].mxu1 %vm656_vm0, %v18357_v40 }
 0x2f7   :  { %15769 = vmatprep.mubr.msk.bf16.mxu1 %vm656_vm0, %v18360_v42  ;;  %v20372_v45 = vpop.f32.mrb[12].mxu1 }
 0x2f8   :  { %v20374_v46 = vpop.f32.mrb[13].mxu1 }
 0x2f9   :  { %v20379_v48 = vpop.f32.mrb[14].mxu1 }
 0x2fa   :  { %16166 = vmatmul.mubr.msk.bf16.gmra.mrb[108].mxu0 %vm656_vm0, %v18343_v34  ;;  %v20385_v51 = vpop.f32.mrb[15].mxu1  ;;  %v18373_v34 = vld [vmem:[%s22438_s0 + $0xc40] sm:$0xff]  }
 0x2fb   :  { %16169 = vmatprep.mubr.msk.bf16.mxu0 %vm656_vm0, %v18346_v35 }
 0x2fe   :  { %15770 = vmatmul.mubr.msk.bf16.gmra.mrb[120].mxu1 %vm656_vm0, %v18361_v47  ;;  %v18375_v47 = vld [vmem:[%s22438_s0 + $0xc50] sm:$0xff]  }
 0x2ff   :  { %15773 = vmatprep.mubr.msk.bf16.mxu1 %vm656_vm0, %v18365_v49  ;;  %v20396_v54 = vpop.f32.mrb[16].mxu1 }
 0x300   :  { %v20398_v55 = vpop.f32.mrb[17].mxu1 }
 0x301   :  { %v20403_v57 = vpop.f32.mrb[18].mxu1 }
 0x302   :  { %16170 = vmatmul.mubr.msk.bf16.gmra.mrb[112].mxu0 %vm656_vm0, %v18347_v38  ;;  %v20406_v58 = vpop.f32.mrb[19].mxu1 }
 0x303   :  { %16173 = vmatprep.mubr.msk.bf16.mxu0 %vm656_vm0, %v18350_v44  ;;  %v18374_v44 = vld [vmem:[%s22438_s0 + $0xc48] sm:$0xff]  }
 0x306   :  { %15774 = vmatmul.mubr.msk.bf16.gmra.mrb[124].mxu1 %vm656_vm0, %v18366_v56 }
 0x307   :  { %v20416_v61 = vpop.f32.mrb[20].mxu1 }
 0x308   :  { %v20418_v62 = vpop.f32.mrb[21].mxu1 }
 0x309   :  { %v20420_v63 = vpop.f32.mrb[22].mxu1 }
 0x30a   :  { %16174 = vmatmul.mubr.msk.bf16.gmra.mrb[116].mxu0 %vm656_vm0, %v18351_v52  ;;  %v20423_v0 = vpop.f32.mrb[23].mxu1 }
 0x30b   :  { %16177 = vmatprep.mubr.msk.bf16.mxu0 %vm656_vm0, %v18354_v53 }
 0x30f   :  { %v20432_v3 = vpop.f32.mrb[24].mxu1 }
 0x310   :  { %v20434_v4 = vpop.f32.mrb[25].mxu1 }
 0x311   :  { %v20436_v5 = vpop.f32.mrb[26].mxu1 }
 0x312   :  { %16178 = vmatmul.mubr.msk.bf16.gmra.mrb[120].mxu0 %vm656_vm0, %v18355_v59  ;;  %v20439_v6 = vpop.f32.mrb[27].mxu1  ;;  %v18376_v59 = vld [vmem:[%s22438_s0 + $0xc58] sm:$0xff]  }
 0x313   :  { %16181 = vmatprep.mubr.msk.bf16.mxu0 %vm656_vm0, %v18358_v60  ;;  %v18377_v60 = vld [vmem:[%s22438_s0 + $0xc60] sm:$0xff]  }
 0x319   :  { %v20448_v9 = vpop.f32.mrb[28].mxu1 }
 0x31a   :  { %16182 = vmatmul.mubr.msk.bf16.gmra.mrb[124].mxu0 %vm656_vm0, %v18359_v1  ;;  %v20450_v10 = vpop.f32.mrb[29].mxu1 }
 0x31b   :  { %16193 = vmatprep.mubr.msk.bf16.mxu0 %vm656_vm0, %v18362_v2  ;;  %v20455_v12 = vpop.f32.mrb[30].mxu1 }
 0x31c   :  { %v20458_v13 = vpop.f32.mrb[31].mxu1 }
 0x321   :  { %v20471_v17 = vpop.f32.mrb[32].mxu1 }
 0x322   :  { %16194 = vmatmul.mubr.msk.bf16.vlgmr.msra.gmra.mrb[0].mxu0 %vm656_vm0, %v18363_v7  ;;  %v20473_v18 = vpop.f32.mrb[33].mxu1 }
 0x323   :  { %16322 = vmatpush3.bf16.msra.mxu0 %v20176_v50  ;;  %16197 = vmatprep.mubr.msk.bf16.mxu0 %vm656_vm0, %v18367_v8  ;;  %v20475_v50 = vpop.f32.mrb[34].mxu1 }
 0x324   :  { %16323 = vmatprep.subr.bf16.mxu0 %v18383_v11  ;;  %v20478_v19 = vpop.f32.mrb[35].mxu1 }
 0x327   :  { %16324 = vmatpush3.bf16.msra.mxu0 %v18383_v11  ;;  %v18378_v11 = vld [vmem:[%s22438_s0 + $0xc68] sm:$0xff]  }
 0x328   :  { %16325 = vmatprep.subr.bf16.mxu0 %v18400_v14 }
 0x329   :  { %v20487_v24 = vpop.f32.mrb[36].mxu1 }
 0x32a   :  { %16198 = vmatmul.mubr.msk.bf16.gmra.mrb[4].mxu0 %vm656_vm0, %v18368_v15  ;;  %v20489_v25 = vpop.f32.mrb[37].mxu1 }
 0x32b   :  { %16201 = vmatprep.mubr.msk.bf16.mxu0 %vm656_vm0, %v18369_v16  ;;  %16326 = vmatpush3.bf16.msra.mxu0 %v18400_v14  ;;  %v20491_v27 = vpop.f32.mrb[38].mxu1  ;;  %v18379_v14 = vld [vmem:[%s22438_s0 + $0xc70] sm:$0xff]  }
 0x32c   :  { %v20494_v28 = vpop.f32.mrb[39].mxu1 }
 0x331   :  { %v20503_v35 = vpop.f32.mrb[40].mxu1 }
 0x332   :  { %16202 = vmatmul.mubr.msk.bf16.gmra.mrb[8].mxu0 %vm656_vm0, %v18370_v20  ;;  %v20505_v40 = vpop.f32.mrb[41].mxu1 }
 0x333   :  { %16205 = vmatprep.mubr.msk.bf16.mxu0 %vm656_vm0, %v18371_v21  ;;  %v20507_v42 = vpop.f32.mrb[42].mxu1 }
 0x334   :  { %v20510_v38 = vpop.f32.mrb[43].mxu1 }
 0x339   :  { %v20519_v49 = vpop.f32.mrb[44].mxu1 }
 0x33a   :  { %16206 = vmatmul.mubr.msk.bf16.gmra.mrb[12].mxu0 %vm656_vm0, %v18372_v33  ;;  %v20521_v52 = vpop.f32.mrb[45].mxu1  ;;  %v18380_v33 = vld [vmem:[%s22438_s0 + $0xc78] sm:$0xff]  }
 0x33b   :  { %16209 = vmatprep.mubr.msk.bf16.mxu0 %vm656_vm0, %v18373_v34  ;;  %v20523_v53 = vpop.f32.mrb[46].mxu1  ;;  %v18381_v34 = vld [vmem:[%s22438_s0 + $0xc80] sm:$0xff]  }
 0x33c   :  { %v20526_v56 = vpop.f32.mrb[47].mxu1 }
 0x341   :  { %v20535_v1 = vpop.f32.mrb[48].mxu1 }
 0x342   :  { %16210 = vmatmul.mubr.msk.bf16.gmra.mrb[16].mxu0 %vm656_vm0, %v18374_v44  ;;  %v20537_v2 = vpop.f32.mrb[49].mxu1 }
 0x343   :  { %16213 = vmatprep.mubr.msk.bf16.mxu0 %vm656_vm0, %v18375_v47  ;;  %v20539_v7 = vpop.f32.mrb[50].mxu1 }
 0x344   :  { %22452 = vst [vmem:[#allocation5_spill] sm:$0xff] %v20539_v7  ;;  %v20542_v8 = vpop.f32.mrb[51].mxu1 }
 0x345   :  { %22453 = vst [vmem:[#allocation6_spill] sm:$0xff] %v20542_v8 }
 0x349   :  { %v20551_v15 = vpop.f32.mrb[52].mxu1 }
 0x34a   :  { %16214 = vmatmul.mubr.msk.bf16.gmra.mrb[20].mxu0 %vm656_vm0, %v18376_v59  ;;  %22454 = vst [vmem:[#allocation7_spill] sm:$0xff] %v20551_v15  ;;  %v20553_v16 = vpop.f32.mrb[53].mxu1 }
 0x34b   :  { %16217 = vmatprep.mubr.msk.bf16.mxu0 %vm656_vm0, %v18377_v60  ;;  %22455 = vst [vmem:[#allocation8_spill] sm:$0xff] %v20553_v16  ;;  %v20555_v20 = vpop.f32.mrb[54].mxu1 }
 0x34c   :  { %22456 = vst [vmem:[#allocation9_spill] sm:$0xff] %v20555_v20  ;;  %v20558_v21 = vpop.f32.mrb[55].mxu1 }
 0x34d   :  { %22457 = vst [vmem:[#allocation10_spill] sm:$0xff] %v20558_v21 }
 0x351   :  { %v20567_v44 = vpop.f32.mrb[56].mxu1 }
 0x352   :  { %16218 = vmatmul.mubr.msk.bf16.gmra.mrb[24].mxu0 %vm656_vm0, %v18378_v11  ;;  %22458 = vst [vmem:[#allocation11_spill] sm:$0xff] %v20567_v44  ;;  %v20569_v47 = vpop.f32.mrb[57].mxu1  ;;  %v18382_v11 = vld [vmem:[%s22438_s0 + $0xc88] sm:$0xff]  }
 0x353   :  { %16221 = vmatprep.mubr.msk.bf16.mxu0 %vm656_vm0, %v18379_v14  ;;  %22459 = vst [vmem:[#allocation12_spill] sm:$0xff] %v20569_v47  ;;  %v20571_v59 = vpop.f32.mrb[58].mxu1  ;;  %v18384_v14 = vld [vmem:[%s22438_s0 + $0xc90] sm:$0xff]  }
 0x354   :  { %22460 = vst [vmem:[#allocation13_spill] sm:$0xff] %v20571_v59  ;;  %v20574_v60 = vpop.f32.mrb[59].mxu1 }
 0x355   :  { %22461 = vst [vmem:[#allocation14_spill] sm:$0xff] %v20574_v60 }
 0x359   :  { %v20583_v21 = vpop.f32.mrb[60].mxu1 }
 0x35a   :  { %16222 = vmatmul.mubr.msk.bf16.gmra.mrb[28].mxu0 %vm656_vm0, %v18380_v33  ;;  %22462 = vst [vmem:[#allocation15_spill] sm:$0xff] %v20583_v21  ;;  %v20585_v44 = vpop.f32.mrb[61].mxu1  ;;  %v18385_v21 = vld [vmem:[%s22438_s0 + $0xc98] sm:$0xff]  }
 0x35b   :  { %16225 = vmatprep.mubr.msk.bf16.mxu0 %vm656_vm0, %v18381_v34  ;;  %22463 = vst [vmem:[#allocation16_spill] sm:$0xff] %v20585_v44  ;;  %v20587_v47 = vpop.f32.mrb[62].mxu1  ;;  %v18417_v34 = vld [vmem:[%s22439_s1 + $0xf8] sm:$0xff]  }
 0x35c   :  { %22464 = vst [vmem:[#allocation17_spill] sm:$0xff] %v20587_v47  ;;  %v20590_v33 = vpop.f32.mrb[63].mxu1  ;;  %16327 = vmatprep.subr.bf16.mxu0 %v18417_v34  ;;  %v18386_v47 = vld [vmem:[%s22438_s0 + $0xca0] sm:$0xff]  }
 0x35d   :  { %22465 = vst [vmem:[#allocation18_spill] sm:$0xff] %v20590_v33  ;;  %16328 = vmatpush3.bf16.msra.mxu0 %v18417_v34  ;;  %v18388_v34 = vld [vmem:[%s22438_s0 + $0xcb0] sm:$0xff]  }
 0x361   :  { %v20602_v44 = vpop.f32.mrb[64].mxu1 }
 0x362   :  { %16226 = vmatmul.mubr.msk.bf16.gmra.mrb[32].mxu0 %vm656_vm0, %v18382_v11  ;;  %22466 = vst [vmem:[#allocation19_spill] sm:$0xff] %v20602_v44  ;;  %v20604_v11 = vpop.f32.mrb[65].mxu1 }
 0x363   :  { %16229 = vmatprep.mubr.msk.bf16.mxu0 %vm656_vm0, %v18384_v14  ;;  %22467 = vst [vmem:[#allocation20_spill] sm:$0xff] %v20604_v11  ;;  %v20606_v33 = vpop.f32.mrb[66].mxu1  ;;  %v18387_v14 = vld [vmem:[%s22438_s0 + $0xca8] sm:$0xff]  }
 0x364   :  { %22468 = vst [vmem:[#allocation21_spill] sm:$0xff] %v20606_v33  ;;  %v20609_v60 = vpop.f32.mrb[67].mxu1 }
 0x365   :  { %22469 = vst [vmem:[#allocation22_spill] sm:$0xff] %v20609_v60  ;;  %v18390_v60 = vld [vmem:[%s22438_s0 + $0xcc0] sm:$0xff]  }
 0x369   :  { %v20618_v59 = vpop.f32.mrb[68].mxu1 }
 0x36a   :  { %16230 = vmatmul.mubr.msk.bf16.gmra.mrb[36].mxu0 %vm656_vm0, %v18385_v21  ;;  %22470 = vst [vmem:[#allocation23_spill] sm:$0xff] %v20618_v59  ;;  %v20620_v44 = vpop.f32.mrb[69].mxu1 }
 0x36b   :  { %16233 = vmatprep.mubr.msk.bf16.mxu0 %vm656_vm0, %v18386_v47  ;;  %22471 = vst [vmem:[#allocation24_spill] sm:$0xff] %v20620_v44  ;;  %v20622_v11 = vpop.f32.mrb[70].mxu1  ;;  %v18389_v47 = vld [vmem:[%s22438_s0 + $0xcb8] sm:$0xff]  }
 0x36c   :  { %22472 = vst [vmem:[#allocation25_spill] sm:$0xff] %v20622_v11  ;;  %v20625_v21 = vpop.f32.mrb[71].mxu1 }
 0x36d   :  { %22473 = vst [vmem:[#allocation26_spill] sm:$0xff] %v20625_v21  ;;  %v18392_v21 = vld [vmem:[%s22438_s0 + $0xcd0] sm:$0xff]  }
 0x371   :  { %v20634_v33 = vpop.f32.mrb[72].mxu1 }
 0x372   :  { %16234 = vmatmul.mubr.msk.bf16.gmra.mrb[40].mxu0 %vm656_vm0, %v18387_v14  ;;  %22474 = vst [vmem:[#allocation27_spill] sm:$0xff] %v20634_v33  ;;  %v20636_v59 = vpop.f32.mrb[73].mxu1 }
 0x373   :  { %16237 = vmatprep.mubr.msk.bf16.mxu0 %vm656_vm0, %v18388_v34  ;;  %22475 = vst [vmem:[#allocation28_spill] sm:$0xff] %v20636_v59  ;;  %v20638_v44 = vpop.f32.mrb[74].mxu1  ;;  %v18391_v34 = vld [vmem:[%s22438_s0 + $0xcc8] sm:$0xff]  }
 0x374   :  { %22476 = vst [vmem:[#allocation29_spill] sm:$0xff] %v20638_v44  ;;  %v20641_v14 = vpop.f32.mrb[75].mxu1 }
 0x375   :  { %22477 = vst [vmem:[#allocation30_spill] sm:$0xff] %v20641_v14  ;;  %v18394_v14 = vld [vmem:[%s22438_s0 + $0xce0] sm:$0xff]  }
 0x379   :  { %v20650_v11 = vpop.f32.mrb[76].mxu1 }
 0x37a   :  { %16238 = vmatmul.mubr.msk.bf16.gmra.mrb[44].mxu0 %vm656_vm0, %v18389_v47  ;;  %22478 = vst [vmem:[#allocation31_spill] sm:$0xff] %v20650_v11  ;;  %v20652_v33 = vpop.f32.mrb[77].mxu1 }
 0x37b   :  { %16241 = vmatprep.mubr.msk.bf16.mxu0 %vm656_vm0, %v18390_v60  ;;  %22479 = vst [vmem:[#allocation32_spill] sm:$0xff] %v20652_v33  ;;  %v20654_v59 = vpop.f32.mrb[78].mxu1  ;;  %v18393_v60 = vld [vmem:[%s22438_s0 + $0xcd8] sm:$0xff]  }
 0x37c   :  { %22480 = vst [vmem:[#allocation33_spill] sm:$0xff] %v20654_v59  ;;  %v20657_v47 = vpop.f32.mrb[79].mxu1 }
 0x37d   :  { %22481 = vst [vmem:[#allocation34_spill] sm:$0xff] %v20657_v47  ;;  %v18396_v47 = vld [vmem:[%s22438_s0 + $0xcf0] sm:$0xff]  }
 0x381   :  { %v20666_v44 = vpop.f32.mrb[80].mxu1 }
 0x382   :  { %16242 = vmatmul.mubr.msk.bf16.gmra.mrb[48].mxu0 %vm656_vm0, %v18391_v34  ;;  %22482 = vst [vmem:[#allocation35_spill] sm:$0xff] %v20666_v44  ;;  %v20668_v11 = vpop.f32.mrb[81].mxu1 }
 0x383   :  { %16245 = vmatprep.mubr.msk.bf16.mxu0 %vm656_vm0, %v18392_v21  ;;  %22483 = vst [vmem:[#allocation36_spill] sm:$0xff] %v20668_v11  ;;  %v20670_v33 = vpop.f32.mrb[82].mxu1  ;;  %v18395_v21 = vld [vmem:[%s22438_s0 + $0xce8] sm:$0xff]  }
 0x384   :  { %22484 = vst [vmem:[#allocation37_spill] sm:$0xff] %v20670_v33  ;;  %v20673_v34 = vpop.f32.mrb[83].mxu1 }
 0x385   :  { %22485 = vst [vmem:[#allocation38_spill] sm:$0xff] %v20673_v34  ;;  %v18398_v34 = vld [vmem:[%s22438_s0 + $0xd00] sm:$0xff]  }
 0x389   :  { %v20682_v59 = vpop.f32.mrb[84].mxu1 }
 0x38a   :  { %16246 = vmatmul.mubr.msk.bf16.gmra.mrb[52].mxu0 %vm656_vm0, %v18393_v60  ;;  %22486 = vst [vmem:[#allocation39_spill] sm:$0xff] %v20682_v59  ;;  %v20684_v44 = vpop.f32.mrb[85].mxu1 }
 0x38b   :  { %16249 = vmatprep.mubr.msk.bf16.mxu0 %vm656_vm0, %v18394_v14  ;;  %22487 = vst [vmem:[#allocation40_spill] sm:$0xff] %v20684_v44  ;;  %v20686_v11 = vpop.f32.mrb[86].mxu1  ;;  %v18397_v14 = vld [vmem:[%s22438_s0 + $0xcf8] sm:$0xff]  }
 0x38c   :  { %22488 = vst [vmem:[#allocation41_spill] sm:$0xff] %v20686_v11  ;;  %v20689_v60 = vpop.f32.mrb[87].mxu1 }
 0x38d   :  { %22489 = vst [vmem:[#allocation42_spill] sm:$0xff] %v20689_v60  ;;  %v18401_v60 = vld [vmem:[%s22438_s0 + $0xd10] sm:$0xff]  }
 0x391   :  { %v20698_v33 = vpop.f32.mrb[88].mxu1 }
 0x392   :  { %16250 = vmatmul.mubr.msk.bf16.gmra.mrb[56].mxu0 %vm656_vm0, %v18395_v21  ;;  %22490 = vst [vmem:[#allocation43_spill] sm:$0xff] %v20698_v33  ;;  %v20700_v59 = vpop.f32.mrb[89].mxu1 }
 0x393   :  { %16253 = vmatprep.mubr.msk.bf16.mxu0 %vm656_vm0, %v18396_v47  ;;  %22491 = vst [vmem:[#allocation44_spill] sm:$0xff] %v20700_v59  ;;  %v20702_v44 = vpop.f32.mrb[90].mxu1  ;;  %v18399_v47 = vld [vmem:[%s22438_s0 + $0xd08] sm:$0xff]  }
 0x394   :  { %22492 = vst [vmem:[#allocation45_spill] sm:$0xff] %v20702_v44  ;;  %v20705_v21 = vpop.f32.mrb[91].mxu1 }
 0x395   :  { %22493 = vst [vmem:[#allocation46_spill] sm:$0xff] %v20705_v21  ;;  %v18403_v21 = vld [vmem:[%s22438_s0 + $0xd20] sm:$0xff]  }
 0x399   :  { %v20714_v11 = vpop.f32.mrb[92].mxu1 }
 0x39a   :  { %16254 = vmatmul.mubr.msk.bf16.gmra.mrb[60].mxu0 %vm656_vm0, %v18397_v14  ;;  %22494 = vst [vmem:[#allocation47_spill] sm:$0xff] %v20714_v11  ;;  %v20716_v33 = vpop.f32.mrb[93].mxu1 }
 0x39b   :  { %16257 = vmatprep.mubr.msk.bf16.mxu0 %vm656_vm0, %v18398_v34  ;;  %22495 = vst [vmem:[#allocation48_spill] sm:$0xff] %v20716_v33  ;;  %v20718_v59 = vpop.f32.mrb[94].mxu1  ;;  %v18402_v34 = vld [vmem:[%s22438_s0 + $0xd18] sm:$0xff]  }
 0x39c   :  { %22496 = vst [vmem:[#allocation49_spill] sm:$0xff] %v20718_v59  ;;  %v20721_v14 = vpop.f32.mrb[95].mxu1 }
 0x39d   :  { %22497 = vst [vmem:[#allocation50_spill] sm:$0xff] %v20721_v14 }
 0x3a1   :  { %v20730_v44 = vpop.f32.mrb[96].mxu1 }
 0x3a2   :  { %16258 = vmatmul.mubr.msk.bf16.gmra.mrb[64].mxu0 %vm656_vm0, %v18399_v47  ;;  %22498 = vst [vmem:[#allocation51_spill] sm:$0xff] %v20730_v44  ;;  %v20732_v11 = vpop.f32.mrb[97].mxu1  ;;  %v18404_v44 = vld [vmem:[%s22438_s0 + $0xd28] sm:$0xff]  }
 0x3a3   :  { %16261 = vmatprep.mubr.msk.bf16.mxu0 %vm656_vm0, %v18401_v60  ;;  %22499 = vst [vmem:[#allocation52_spill] sm:$0xff] %v20732_v11  ;;  %v20734_v33 = vpop.f32.mrb[98].mxu1  ;;  %v18436_v60 = vld [vmem:[%s22441_s3 + $0x40] sm:$0xff]  }
 0x3a4   :  { %22500 = vst [vmem:[#allocation53_spill] sm:$0xff] %v20734_v33  ;;  %v20737_v47 = vpop.f32.mrb[99].mxu1  ;;  %16457 = vmatprep.subr.bf16.mxu1 %v18436_v60  ;;  %v18405_v33 = vld [vmem:[%s22438_s0 + $0xd30] sm:$0xff]  }
 0x3a5   :  { %22501 = vst [vmem:[#allocation54_spill] sm:$0xff] %v20737_v47  ;;  %16458 = vmatpush3.bf16.msra.mxu1 %v18436_v60  ;;  %v18407_v60 = vld [vmem:[%s22438_s0 + $0xd40] sm:$0xff]  }
 0x3a9   :  { %v20749_v11 = vpop.f32.mrb[100].mxu1 }
 0x3aa   :  { %16262 = vmatmul.mubr.msk.bf16.gmra.mrb[68].mxu0 %vm656_vm0, %v18402_v34  ;;  %22502 = vst [vmem:[#allocation55_spill] sm:$0xff] %v20749_v11  ;;  %v20751_v34 = vpop.f32.mrb[101].mxu1 }
 0x3ab   :  { %16265 = vmatprep.mubr.msk.bf16.mxu0 %vm656_vm0, %v18403_v21  ;;  %22503 = vst [vmem:[#allocation56_spill] sm:$0xff] %v20751_v34  ;;  %v20753_v47 = vpop.f32.mrb[102].mxu1  ;;  %v18406_v21 = vld [vmem:[%s22438_s0 + $0xd38] sm:$0xff]  }
 0x3ac   :  { %22504 = vst [vmem:[#allocation57_spill] sm:$0xff] %v20753_v47  ;;  %v20756_v14 = vpop.f32.mrb[103].mxu1 }
 0x3ad   :  { %22505 = vst [vmem:[#allocation58_spill] sm:$0xff] %v20756_v14  ;;  %v18409_v14 = vld [vmem:[%s22438_s0 + $0xd50] sm:$0xff]  }
 0x3b1   :  { %v20765_v59 = vpop.f32.mrb[104].mxu1 }
 0x3b2   :  { %16266 = vmatmul.mubr.msk.bf16.gmra.mrb[72].mxu0 %vm656_vm0, %v18404_v44  ;;  %22506 = vst [vmem:[#allocation59_spill] sm:$0xff] %v20765_v59  ;;  %v20767_v11 = vpop.f32.mrb[105].mxu1 }
 0x3b3   :  { %16269 = vmatprep.mubr.msk.bf16.mxu0 %vm656_vm0, %v18405_v33  ;;  %22507 = vst [vmem:[#allocation60_spill] sm:$0xff] %v20767_v11  ;;  %v20769_v34 = vpop.f32.mrb[106].mxu1  ;;  %v18408_v33 = vld [vmem:[%s22438_s0 + $0xd48] sm:$0xff]  }
 0x3b4   :  { %22508 = vst [vmem:[#allocation61_spill] sm:$0xff] %v20769_v34  ;;  %v20772_v44 = vpop.f32.mrb[107].mxu1 }
 0x3b5   :  { %22509 = vst [vmem:[#allocation62_spill] sm:$0xff] %v20772_v44  ;;  %v18411_v44 = vld [vmem:[%s22438_s0 + $0xd60] sm:$0xff]  }
 0x3b9   :  { %v20781_v47 = vpop.f32.mrb[108].mxu1 }
 0x3ba   :  { %16270 = vmatmul.mubr.msk.bf16.gmra.mrb[76].mxu0 %vm656_vm0, %v18406_v21  ;;  %22510 = vst [vmem:[#allocation63_spill] sm:$0xff] %v20781_v47  ;;  %v20783_v59 = vpop.f32.mrb[109].mxu1 }
 0x3bb   :  { %16273 = vmatprep.mubr.msk.bf16.mxu0 %vm656_vm0, %v18407_v60  ;;  %22511 = vst [vmem:[#allocation64_spill] sm:$0xff] %v20783_v59  ;;  %v20785_v11 = vpop.f32.mrb[110].mxu1  ;;  %v18410_v60 = vld [vmem:[%s22438_s0 + $0xd58] sm:$0xff]  }
 0x3bc   :  { %22512 = vst [vmem:[#allocation65_spill] sm:$0xff] %v20785_v11  ;;  %v20788_v21 = vpop.f32.mrb[111].mxu1 }
 0x3bd   :  { %22513 = vst [vmem:[#allocation66_spill] sm:$0xff] %v20788_v21 }
 0x3c1   :  { %v20797_v34 = vpop.f32.mrb[112].mxu1 }
 0x3c2   :  { %16274 = vmatmul.mubr.msk.bf16.gmra.mrb[80].mxu0 %vm656_vm0, %v18408_v33  ;;  %22514 = vst [vmem:[#allocation67_spill] sm:$0xff] %v20797_v34  ;;  %v20799_v47 = vpop.f32.mrb[113].mxu1  ;;  %v18412_v34 = vld [vmem:[%s22438_s0 + $0xd68] sm:$0xff]  }
 0x3c3   :  { %16277 = vmatprep.mubr.msk.bf16.mxu0 %vm656_vm0, %v18409_v14  ;;  %22515 = vst [vmem:[#allocation68_spill] sm:$0xff] %v20799_v47  ;;  %v20801_v59 = vpop.f32.mrb[114].mxu1  ;;  %v18445_v14 = vld [vmem:[%s22441_s3 + $0x48] sm:$0xff]  }
 0x3c4   :  { %22516 = vst [vmem:[#allocation69_spill] sm:$0xff] %v20801_v59  ;;  %v20804_v33 = vpop.f32.mrb[115].mxu1  ;;  %16459 = vmatprep.subr.bf16.mxu1 %v18445_v14  ;;  %v18413_v59 = vld [vmem:[%s22438_s0 + $0xd70] sm:$0xff]  }
 0x3c5   :  { %22517 = vst [vmem:[#allocation70_spill] sm:$0xff] %v20804_v33  ;;  %16460 = vmatpush3.bf16.msra.mxu1 %v18445_v14  ;;  %v18415_v14 = vld [vmem:[%s22438_s0 + $0xd80] sm:$0xff]  }
 0x3c9   :  { %v20816_v47 = vpop.f32.mrb[116].mxu1 }
 0x3ca   :  { %16278 = vmatmul.mubr.msk.bf16.gmra.mrb[84].mxu0 %vm656_vm0, %v18410_v60  ;;  %22518 = vst [vmem:[#allocation71_spill] sm:$0xff] %v20816_v47  ;;  %v20818_v60 = vpop.f32.mrb[117].mxu1 }
 0x3cb   :  { %16281 = vmatprep.mubr.msk.bf16.mxu0 %vm656_vm0, %v18411_v44  ;;  %22519 = vst [vmem:[#allocation72_spill] sm:$0xff] %v20818_v60  ;;  %v20820_v33 = vpop.f32.mrb[118].mxu1  ;;  %v18414_v44 = vld [vmem:[%s22438_s0 + $0xd78] sm:$0xff]  }
 0x3cc   :  { %22520 = vst [vmem:[#allocation73_spill] sm:$0xff] %v20820_v33  ;;  %v20823_v21 = vpop.f32.mrb[119].mxu1 }
 0x3cd   :  { %22521 = vst [vmem:[#allocation74_spill] sm:$0xff] %v20823_v21  ;;  %v18418_v21 = vld [vmem:[%s22438_s0 + $0xd90] sm:$0xff]  }
 0x3d1   :  { %v20832_v11 = vpop.f32.mrb[120].mxu1 }
 0x3d2   :  { %16282 = vmatmul.mubr.msk.bf16.gmra.mrb[88].mxu0 %vm656_vm0, %v18412_v34  ;;  %22522 = vst [vmem:[#allocation75_spill] sm:$0xff] %v20832_v11  ;;  %v20834_v47 = vpop.f32.mrb[121].mxu1 }
 0x3d3   :  { %16285 = vmatprep.mubr.msk.bf16.mxu0 %vm656_vm0, %v18413_v59  ;;  %22523 = vst [vmem:[#allocation76_spill] sm:$0xff] %v20834_v47  ;;  %v20836_v60 = vpop.f32.mrb[122].mxu1  ;;  %v18416_v59 = vld [vmem:[%s22438_s0 + $0xd88] sm:$0xff]  }
 0x3d4   :  { %22524 = vst [vmem:[#allocation77_spill] sm:$0xff] %v20836_v60  ;;  %v20839_v34 = vpop.f32.mrb[123].mxu1 }
 0x3d5   :  { %22525 = vst [vmem:[#allocation78_spill] sm:$0xff] %v20839_v34  ;;  %v18420_v34 = vld [vmem:[%s22438_s0 + $0xda0] sm:$0xff]  }
 0x3d9   :  { %v20848_v33 = vpop.f32.mrb[124].mxu1 }
 0x3da   :  { %16286 = vmatmul.mubr.msk.bf16.gmra.mrb[92].mxu0 %vm656_vm0, %v18414_v44  ;;  %22526 = vst [vmem:[#allocation79_spill] sm:$0xff] %v20848_v33  ;;  %v20850_v11 = vpop.f32.mrb[125].mxu1 }
 0x3db   :  { %16289 = vmatprep.mubr.msk.bf16.mxu0 %vm656_vm0, %v18415_v14  ;;  %22527 = vst [vmem:[#allocation80_spill] sm:$0xff] %v20850_v11  ;;  %v20852_v47 = vpop.f32.mrb[126].mxu1  ;;  %v18419_v14 = vld [vmem:[%s22438_s0 + $0xd98] sm:$0xff]  }
 0x3dc   :  { %22528 = vst [vmem:[#allocation81_spill] sm:$0xff] %v20852_v47  ;;  %v20855_v44 = vpop.f32.mrb[127].mxu1  ;;  %v18454_v47 = vld [vmem:[%s22441_s3 + $0x50] sm:$0xff]  }
 0x3dd   :  { %22529 = vst [vmem:[#allocation82_spill] sm:$0xff] %v20855_v44  ;;  %16461 = vmatprep.subr.bf16.mxu1 %v18454_v47  ;;  %v18474_v44 = vld [vmem:[%s22438_s0 + $0xf28] sm:$0xff]  }
 0x3de   :  { %16462 = vmatpush3.bf16.msra.mxu1 %v18454_v47  ;;  %v18424_v47 = vld [vmem:[%s22438_s0 + $0xdc0] sm:$0xff]  }
 0x3e2   :  { %16290 = vmatmul.mubr.msk.bf16.gmra.mrb[96].mxu0 %vm656_vm0, %v18416_v59  ;;  %v18422_v59 = vld [vmem:[%s22438_s0 + $0xdb0] sm:$0xff]  }
 0x3e3   :  { %16293 = vmatprep.mubr.msk.bf16.mxu0 %vm656_vm0, %v18418_v21  ;;  %v18421_v21 = vld [vmem:[%s22438_s0 + $0xda8] sm:$0xff]  }
 0x3ea   :  { %16294 = vmatmul.mubr.msk.bf16.gmra.mrb[100].mxu0 %vm656_vm0, %v18419_v14  ;;  %v18423_v14 = vld [vmem:[%s22438_s0 + $0xdb8] sm:$0xff]  }
 0x3eb   :  { %16297 = vmatprep.mubr.msk.bf16.mxu0 %vm656_vm0, %v18420_v34  ;;  %v18425_v34 = vld [vmem:[%s22438_s0 + $0xdc8] sm:$0xff]  }
 0x3f2   :  { %16298 = vmatmul.mubr.msk.bf16.gmra.mrb[104].mxu0 %vm656_vm0, %v18421_v21  ;;  %v18426_v21 = vld [vmem:[%s22438_s0 + $0xdd0] sm:$0xff]  }
 0x3f3   :  { %16301 = vmatprep.mubr.msk.bf16.mxu0 %vm656_vm0, %v18422_v59  ;;  %v18427_v59 = vld [vmem:[%s22438_s0 + $0xdd8] sm:$0xff]  }
 0x3fa   :  { %16302 = vmatmul.mubr.msk.bf16.gmra.mrb[108].mxu0 %vm656_vm0, %v18423_v14  ;;  %v18428_v14 = vld [vmem:[%s22438_s0 + $0xde0] sm:$0xff]  }
 0x3fb   :  { %16305 = vmatprep.mubr.msk.bf16.mxu0 %vm656_vm0, %v18424_v47  ;;  %v18463_v47 = vld [vmem:[%s22441_s3 + $0x58] sm:$0xff]  }
 0x3fc   :  { %16463 = vmatprep.subr.bf16.mxu1 %v18463_v47 }
 0x3fd   :  { %16464 = vmatpush3.bf16.msra.mxu1 %v18463_v47  ;;  %v18433_v47 = vld [vmem:[%s22438_s0 + $0xe08] sm:$0xff]  }
 0x402   :  { %16306 = vmatmul.mubr.msk.bf16.gmra.mrb[112].mxu0 %vm656_vm0, %v18425_v34  ;;  %v18429_v34 = vld [vmem:[%s22438_s0 + $0xde8] sm:$0xff]  }
 0x403   :  { %16309 = vmatprep.mubr.msk.bf16.mxu0 %vm656_vm0, %v18426_v21  ;;  %v18430_v21 = vld [vmem:[%s22438_s0 + $0xdf0] sm:$0xff]  }
 0x40a   :  { %16310 = vmatmul.mubr.msk.bf16.gmra.mrb[116].mxu0 %vm656_vm0, %v18427_v59  ;;  %v18431_v59 = vld [vmem:[%s22438_s0 + $0xdf8] sm:$0xff]  }
 0x40b   :  { %16313 = vmatprep.mubr.msk.bf16.mxu0 %vm656_vm0, %v18428_v14  ;;  %v18432_v14 = vld [vmem:[%s22438_s0 + $0xe00] sm:$0xff]  }
 0x412   :  { %16314 = vmatmul.mubr.msk.bf16.gmra.mrb[120].mxu0 %vm656_vm0, %v18429_v34  ;;  %v18434_v34 = vld [vmem:[%s22438_s0 + $0xe10] sm:$0xff]  }
 0x413   :  { %16317 = vmatprep.mubr.msk.bf16.mxu0 %vm656_vm0, %v18430_v21  ;;  %v18470_v21 = vld [vmem:[%s22441_s3 + $0x60] sm:$0xff]  }
 0x414   :  { %16465 = vmatprep.subr.bf16.mxu1 %v18470_v21 }
 0x415   :  { %16466 = vmatpush3.bf16.msra.mxu1 %v18470_v21  ;;  %v18440_v21 = vld [vmem:[%s22438_s0 + $0xe38] sm:$0xff]  }
 0x41a   :  { %16318 = vmatmul.mubr.msk.bf16.gmra.mrb[124].mxu0 %vm656_vm0, %v18431_v59  ;;  %v18435_v59 = vld [vmem:[%s22438_s0 + $0xe18] sm:$0xff]  }
 0x41b   :  { %16329 = vmatprep.mubr.msk.bf16.mxu0 %vm656_vm0, %v18432_v14  ;;  %v18437_v14 = vld [vmem:[%s22438_s0 + $0xe20] sm:$0xff]  }
 0x422   :  { %16330 = vmatmul.mubr.msk.bf16.vlgmr.msra.gmra.mrb[0].mxu0 %vm656_vm0, %v18433_v47  ;;  %v18438_v47 = vld [vmem:[%s22438_s0 + $0xe28] sm:$0xff]  }
 0x423   :  { %16333 = vmatprep.mubr.msk.bf16.mxu0 %vm656_vm0, %v18434_v34  ;;  %v18439_v34 = vld [vmem:[%s22438_s0 + $0xe30] sm:$0xff]  }
 0x42a   :  { %16334 = vmatmul.mubr.msk.bf16.gmra.mrb[4].mxu0 %vm656_vm0, %v18435_v59  ;;  %v18441_v59 = vld [vmem:[%s22438_s0 + $0xe40] sm:$0xff]  }
 0x42b   :  { %16337 = vmatprep.mubr.msk.bf16.mxu0 %vm656_vm0, %v18437_v14  ;;  %v18442_v14 = vld [vmem:[%s22438_s0 + $0xe48] sm:$0xff]  }
 0x432   :  { %16338 = vmatmul.mubr.msk.bf16.gmra.mrb[8].mxu0 %vm656_vm0, %v18438_v47  ;;  %v18443_v47 = vld [vmem:[%s22438_s0 + $0xe50] sm:$0xff]  }
 0x433   :  { %16341 = vmatprep.mubr.msk.bf16.mxu0 %vm656_vm0, %v18439_v34  ;;  %v18479_v34 = vld [vmem:[%s22441_s3 + $0x68] sm:$0xff]  }
 0x434   :  { %16467 = vmatprep.subr.bf16.mxu1 %v18479_v34 }
 0x435   :  { %16468 = vmatpush3.bf16.msra.mxu1 %v18479_v34  ;;  %v18449_v34 = vld [vmem:[%s22438_s0 + $0xe78] sm:$0xff]  }
 0x43a   :  { %16342 = vmatmul.mubr.msk.bf16.gmra.mrb[12].mxu0 %vm656_vm0, %v18440_v21  ;;  %v18444_v21 = vld [vmem:[%s22438_s0 + $0xe58] sm:$0xff]  }
 0x43b   :  { %16345 = vmatprep.mubr.msk.bf16.mxu0 %vm656_vm0, %v18441_v59  ;;  %v18446_v59 = vld [vmem:[%s22438_s0 + $0xe60] sm:$0xff]  }
 0x442   :  { %16346 = vmatmul.mubr.msk.bf16.gmra.mrb[16].mxu0 %vm656_vm0, %v18442_v14  ;;  %v18447_v14 = vld [vmem:[%s22438_s0 + $0xe68] sm:$0xff]  }
 0x443   :  { %16349 = vmatprep.mubr.msk.bf16.mxu0 %vm656_vm0, %v18443_v47  ;;  %v18448_v47 = vld [vmem:[%s22438_s0 + $0xe70] sm:$0xff]  }
 0x44a   :  { %16350 = vmatmul.mubr.msk.bf16.gmra.mrb[20].mxu0 %vm656_vm0, %v18444_v21  ;;  %v18450_v21 = vld [vmem:[%s22438_s0 + $0xe80] sm:$0xff]  }
 0x44b   :  { %16353 = vmatprep.mubr.msk.bf16.mxu0 %vm656_vm0, %v18446_v59  ;;  %v18451_v59 = vld [vmem:[%s22438_s0 + $0xe88] sm:$0xff]  }
 0x452   :  { %16354 = vmatmul.mubr.msk.bf16.gmra.mrb[24].mxu0 %vm656_vm0, %v18447_v14  ;;  %v18452_v14 = vld [vmem:[%s22438_s0 + $0xe90] sm:$0xff]  }
 0x453   :  { %16357 = vmatprep.mubr.msk.bf16.mxu0 %vm656_vm0, %v18448_v47  ;;  %v18488_v47 = vld [vmem:[%s22441_s3 + $0x70] sm:$0xff]  }
 0x454   :  { %16469 = vmatprep.subr.bf16.mxu1 %v18488_v47 }
 0x455   :  { %16470 = vmatpush3.bf16.msra.mxu1 %v18488_v47  ;;  %v18458_v47 = vld [vmem:[%s22438_s0 + $0xeb8] sm:$0xff]  }
 0x45a   :  { %16358 = vmatmul.mubr.msk.bf16.gmra.mrb[28].mxu0 %vm656_vm0, %v18449_v34  ;;  %v18453_v34 = vld [vmem:[%s22438_s0 + $0xe98] sm:$0xff]  }
 0x45b   :  { %16361 = vmatprep.mubr.msk.bf16.mxu0 %vm656_vm0, %v18450_v21  ;;  %v18455_v21 = vld [vmem:[%s22438_s0 + $0xea0] sm:$0xff]  }
 0x462   :  { %16362 = vmatmul.mubr.msk.bf16.gmra.mrb[32].mxu0 %vm656_vm0, %v18451_v59  ;;  %v18456_v59 = vld [vmem:[%s22438_s0 + $0xea8] sm:$0xff]  }
 0x463   :  { %16365 = vmatprep.mubr.msk.bf16.mxu0 %vm656_vm0, %v18452_v14  ;;  %v18457_v14 = vld [vmem:[%s22438_s0 + $0xeb0] sm:$0xff]  }
 0x46a   :  { %16366 = vmatmul.mubr.msk.bf16.gmra.mrb[36].mxu0 %vm656_vm0, %v18453_v34  ;;  %v18459_v34 = vld [vmem:[%s22438_s0 + $0xec0] sm:$0xff]  }
 0x46b   :  { %16369 = vmatprep.mubr.msk.bf16.mxu0 %vm656_vm0, %v18455_v21  ;;  %v18460_v21 = vld [vmem:[%s22438_s0 + $0xec8] sm:$0xff]  }
 0x472   :  { %16370 = vmatmul.mubr.msk.bf16.gmra.mrb[40].mxu0 %vm656_vm0, %v18456_v59  ;;  %v18461_v59 = vld [vmem:[%s22438_s0 + $0xed0] sm:$0xff]  }
 0x473   :  { %16373 = vmatprep.mubr.msk.bf16.mxu0 %vm656_vm0, %v18457_v14  ;;  %v18497_v14 = vld [vmem:[%s22441_s3 + $0x78] sm:$0xff]  }
 0x474   :  { %16471 = vmatprep.subr.bf16.mxu1 %v18497_v14 }
 0x475   :  { %16472 = vmatpush3.bf16.msra.mxu1 %v18497_v14  ;;  %v18467_v14 = vld [vmem:[%s22438_s0 + $0xef8] sm:$0xff]  }
 0x47a   :  { %16374 = vmatmul.mubr.msk.bf16.gmra.mrb[44].mxu0 %vm656_vm0, %v18458_v47  ;;  %v18462_v47 = vld [vmem:[%s22438_s0 + $0xed8] sm:$0xff]  }
 0x47b   :  { %16377 = vmatprep.mubr.msk.bf16.mxu0 %vm656_vm0, %v18459_v34  ;;  %v18464_v34 = vld [vmem:[%s22438_s0 + $0xee0] sm:$0xff]  }
 0x482   :  { %16378 = vmatmul.mubr.msk.bf16.gmra.mrb[48].mxu0 %vm656_vm0, %v18460_v21  ;;  %v18465_v21 = vld [vmem:[%s22438_s0 + $0xee8] sm:$0xff]  }
 0x483   :  { %16381 = vmatprep.mubr.msk.bf16.mxu0 %vm656_vm0, %v18461_v59  ;;  %v18466_v59 = vld [vmem:[%s22438_s0 + $0xef0] sm:$0xff]  }
 0x48a   :  { %16382 = vmatmul.mubr.msk.bf16.gmra.mrb[52].mxu0 %vm656_vm0, %v18462_v47  ;;  %v18468_v47 = vld [vmem:[%s22438_s0 + $0xf00] sm:$0xff]  }
 0x48b   :  { %16385 = vmatprep.mubr.msk.bf16.mxu0 %vm656_vm0, %v18464_v34  ;;  %v18469_v34 = vld [vmem:[%s22438_s0 + $0xf08] sm:$0xff]  }
 0x492   :  { %16386 = vmatmul.mubr.msk.bf16.gmra.mrb[56].mxu0 %vm656_vm0, %v18465_v21  ;;  %v21066_v21 = vld [vmem:[%s22441_s3] sm:$0xff]  }
 0x493   :  { %16389 = vmatprep.mubr.msk.bf16.mxu0 %vm656_vm0, %v18466_v59  ;;  %v18471_v59 = vld [vmem:[%s22438_s0 + $0xf10] sm:$0xff]   ;;  %16489 = vmatprep.subr.bf16.mxu1 %v21066_v21 }
 0x49a   :  { %16390 = vmatmul.mubr.msk.bf16.gmra.mrb[60].mxu0 %vm656_vm0, %v18467_v14  ;;  %v18472_v14 = vld [vmem:[%s22438_s0 + $0xf18] sm:$0xff]  }
 0x49b   :  { %16393 = vmatprep.mubr.msk.bf16.mxu0 %vm656_vm0, %v18468_v47  ;;  %v18473_v47 = vld [vmem:[%s22438_s0 + $0xf20] sm:$0xff]  }
 0x4a2   :  { %16394 = vmatmul.mubr.msk.bf16.gmra.mrb[64].mxu0 %vm656_vm0, %v18469_v34  ;;  %v18475_v34 = vld [vmem:[%s22438_s0 + $0xf30] sm:$0xff]  }
 0x4a3   :  { %16397 = vmatprep.mubr.msk.bf16.mxu0 %vm656_vm0, %v18471_v59  ;;  %v18476_v59 = vld [vmem:[%s22438_s0 + $0xf38] sm:$0xff]  }
 0x4aa   :  { %16398 = vmatmul.mubr.msk.bf16.gmra.mrb[68].mxu0 %vm656_vm0, %v18472_v14  ;;  %v18477_v14 = vld [vmem:[%s22438_s0 + $0xf40] sm:$0xff]  }
 0x4ab   :  { %16401 = vmatprep.mubr.msk.bf16.mxu0 %vm656_vm0, %v18473_v47  ;;  %v18478_v47 = vld [vmem:[%s22438_s0 + $0xf48] sm:$0xff]  }
 0x4b2   :  { %16402 = vmatmul.mubr.msk.bf16.gmra.mrb[72].mxu0 %vm656_vm0, %v18474_v44  ;;  %v18480_v44 = vld [vmem:[%s22438_s0 + $0xf50] sm:$0xff]  }
 0x4b3   :  { %16405 = vmatprep.mubr.msk.bf16.mxu0 %vm656_vm0, %v18475_v34  ;;  %v18481_v34 = vld [vmem:[%s22438_s0 + $0xf58] sm:$0xff]  }
 0x4ba   :  { %16406 = vmatmul.mubr.msk.bf16.gmra.mrb[76].mxu0 %vm656_vm0, %v18476_v59  ;;  %v18482_v59 = vld [vmem:[%s22438_s0 + $0xf60] sm:$0xff]  }
 0x4bb   :  { %16409 = vmatprep.mubr.msk.bf16.mxu0 %vm656_vm0, %v18477_v14  ;;  %v18483_v14 = vld [vmem:[%s22438_s0 + $0xf68] sm:$0xff]  }
 0x4c2   :  { %16410 = vmatmul.mubr.msk.bf16.gmra.mrb[80].mxu0 %vm656_vm0, %v18478_v47  ;;  %v18484_v47 = vld [vmem:[%s22438_s0 + $0xf70] sm:$0xff]  }
 0x4c3   :  { %16413 = vmatprep.mubr.msk.bf16.mxu0 %vm656_vm0, %v18480_v44  ;;  %v18485_v44 = vld [vmem:[%s22438_s0 + $0xf78] sm:$0xff]  }
 0x4ca   :  { %16414 = vmatmul.mubr.msk.bf16.gmra.mrb[84].mxu0 %vm656_vm0, %v18481_v34  ;;  %v18486_v34 = vld [vmem:[%s22438_s0 + $0xf80] sm:$0xff]  }
 0x4cb   :  { %16417 = vmatprep.mubr.msk.bf16.mxu0 %vm656_vm0, %v18482_v59  ;;  %v18487_v59 = vld [vmem:[%s22438_s0 + $0xf88] sm:$0xff]  }
 0x4d2   :  { %16418 = vmatmul.mubr.msk.bf16.gmra.mrb[88].mxu0 %vm656_vm0, %v18483_v14  ;;  %v18489_v14 = vld [vmem:[%s22438_s0 + $0xf90] sm:$0xff]  }
 0x4d3   :  { %16421 = vmatprep.mubr.msk.bf16.mxu0 %vm656_vm0, %v18484_v47  ;;  %v18490_v47 = vld [vmem:[%s22438_s0 + $0xf98] sm:$0xff]  }
 0x4da   :  { %16422 = vmatmul.mubr.msk.bf16.gmra.mrb[92].mxu0 %vm656_vm0, %v18485_v44  ;;  %v18491_v44 = vld [vmem:[%s22438_s0 + $0xfa0] sm:$0xff]  }
 0x4db   :  { %16425 = vmatprep.mubr.msk.bf16.mxu0 %vm656_vm0, %v18486_v34  ;;  %v18492_v34 = vld [vmem:[%s22438_s0 + $0xfa8] sm:$0xff]  }
 0x4e2   :  { %16426 = vmatmul.mubr.msk.bf16.gmra.mrb[96].mxu0 %vm656_vm0, %v18487_v59  ;;  %v18493_v59 = vld [vmem:[%s22438_s0 + $0xfb0] sm:$0xff]  }
 0x4e3   :  { %16429 = vmatprep.mubr.msk.bf16.mxu0 %vm656_vm0, %v18489_v14 }
 0x4ea   :  { %16430 = vmatmul.mubr.msk.bf16.gmra.mrb[100].mxu0 %vm656_vm0, %v18490_v47  ;;  %v18494_v47 = vld [vmem:[%s22438_s0 + $0xfb8] sm:$0xff]  }
 0x4eb   :  { %16433 = vmatprep.mubr.msk.bf16.mxu0 %vm656_vm0, %v18491_v44  ;;  %v21161_v44 = vld [vmem:[%s22440_s2] ss:$0 sm:$0xff] }
 0x4f2   :  { %16434 = vmatmul.mubr.msk.bf16.gmra.mrb[104].mxu0 %vm656_vm0, %v18492_v34  ;;  %v18495_v34 = vld [vmem:[%s22438_s0 + $0xfc0] sm:$0xff]  }
 0x4f3   :  { %16437 = vmatprep.mubr.msk.bf16.mxu0 %vm656_vm0, %v18493_v59 }
 0x4f5   :  { %v16331_v14 = vpop.f32.mrb[0].mxu0 }
 0x4f6   :  { %v16929_v11 = vadd.f32 %v16331_v14, %v20077_v22  ;;  %v9906_v33 = vpop.f32.mrb[1].mxu0 }
 0x4f7   :  { %v16930_v60 = vadd.f32 %v9906_v33, %v20080_v23  ;;  %v16332_v20 = vpop.f32.mrb[2].mxu0 }
 0x4f8   :  { %v16931_v59 = vadd.f32 %v16332_v20, %v20097_v29  ;;  %v9909_v22 = vpop.f32.mrb[3].mxu0  ;;  %v21170_v16 = vadd.f32 %v16929_v11, %v21161_v44 }
 0x4f9   :  { %v16932_v14 = vadd.f32 %v9909_v22, %v20100_v30  ;;  %v21177_v23 = vadd.f32 %v16930_v60, %v21161_v44  ;;  %v18496_v60 = vld [vmem:[%s22438_s0 + $0xfc8] sm:$0xff]  }
 0x4fa   :  { %v21173_v15 = vadd.f32 %v16931_v59, %v21161_v44  ;;  %16438 = vmatmul.mubr.msk.bf16.gmra.mrb[108].mxu0 %vm656_vm0, %v18494_v47 }
 0x4fb   :  { %v21180_v33 = vadd.f32 %v16932_v14, %v21161_v44  ;;  %16441 = vmatprep.mubr.msk.bf16.mxu0 %vm656_vm0, %v18495_v34  ;;  %v18498_v34 = vld [vmem:[%s22438_s0 + $0xfd0] sm:$0xff]  }
 0x4fd   :  { %v16335_v30 = vpop.f32.mrb[4].mxu0 }
 0x4fe   :  { %v16933_v11 = vadd.f32 %v16335_v30, %v20103_v31  ;;  %v9922_v59 = vpop.f32.mrb[5].mxu0 }
 0x4ff   :  { %v16934_v47 = vadd.f32 %v9922_v59, %v20106_v32  ;;  %v16336_v22 = vpop.f32.mrb[6].mxu0 }
 0x500   :  { %v16935_v14 = vadd.f32 %v16336_v22, %v20121_v26  ;;  %v9925_v29 = vpop.f32.mrb[7].mxu0  ;;  %v21198_v20 = vadd.f32 %v16933_v11, %v21161_v44  ;;  %v18500_v22 = vld [vmem:[%s22438_s0 + $0xfe0] sm:$0xff]  }
 0x501   :  { %v16936_v8 = vadd.f32 %v9925_v29, %v20124_v37  ;;  %v21205_v32 = vadd.f32 %v16934_v47, %v21161_v44 }
 0x502   :  { %v21201_v31 = vadd.f32 %v16935_v14, %v21161_v44  ;;  %16442 = vmatmul.mubr.msk.bf16.gmra.mrb[112].mxu0 %vm656_vm0, %v18496_v60  ;;  %v18499_v60 = vld [vmem:[%s22438_s0 + $0xfd8] sm:$0xff]  }
 0x503   :  { %v21208_v30 = vadd.f32 %v16936_v8, %v21161_v44  ;;  %16445 = vmatprep.mubr.msk.bf16.mxu0 %vm656_vm0, %v18498_v34 }
 0x505   :  { %v16339_v37 = vpop.f32.mrb[8].mxu0 }
 0x506   :  { %v16937_v11 = vadd.f32 %v16339_v37, %v20348_v36  ;;  %v9938_v59 = vpop.f32.mrb[9].mxu0 }
 0x507   :  { %v16938_v47 = vadd.f32 %v9938_v59, %v20350_v39  ;;  %v16340_v8 = vpop.f32.mrb[10].mxu0 }
 0x508   :  { %v16939_v34 = vadd.f32 %v16340_v8, %v20355_v41  ;;  %v9941_v14 = vpop.f32.mrb[11].mxu0  ;;  %v21226_v29 = vadd.f32 %v16937_v11, %v21161_v44 }
 0x509   :  { %v16940_v26 = vadd.f32 %v9941_v14, %v20361_v43  ;;  %v21233_v39 = vadd.f32 %v16938_v47, %v21161_v44 }
 0x50a   :  { %v21229_v36 = vadd.f32 %v16939_v34, %v21161_v44  ;;  %16446 = vmatmul.mubr.msk.bf16.gmra.mrb[116].mxu0 %vm656_vm0, %v18499_v60  ;;  %v18501_v60 = vld [vmem:[%s22438_s0 + $0xfe8] sm:$0xff]  }
 0x50b   :  { %v21236_v37 = vadd.f32 %v16940_v26, %v21161_v44  ;;  %16449 = vmatprep.mubr.msk.bf16.mxu0 %vm656_vm0, %v18500_v22  ;;  %v18502_v22 = vld [vmem:[%s22438_s0 + $0xff0] sm:$0xff]  }
 0x50d   :  { %v16343_v43 = vpop.f32.mrb[12].mxu0 }
 0x50e   :  { %v16941_v59 = vadd.f32 %v16343_v43, %v20372_v45  ;;  %v9954_v8 = vpop.f32.mrb[13].mxu0 }
 0x50f   :  { %v16942_v47 = vadd.f32 %v9954_v8, %v20374_v46  ;;  %v16344_v26 = vpop.f32.mrb[14].mxu0 }
 0x510   :  { %v16943_v34 = vadd.f32 %v16344_v26, %v20379_v48  ;;  %v9957_v14 = vpop.f32.mrb[15].mxu0  ;;  %v21254_v11 = vadd.f32 %v16941_v59, %v21161_v44 }
 0x511   :  { %v16944_v41 = vadd.f32 %v9957_v14, %v20385_v51  ;;  %v21261_v46 = vadd.f32 %v16942_v47, %v21161_v44 }
 0x512   :  { %22530 = vst [vmem:[#allocation83_spill] sm:$0xff] %v21254_v11  ;;  %v21257_v45 = vadd.f32 %v16943_v34, %v21161_v44  ;;  %16450 = vmatmul.mubr.msk.bf16.gmra.mrb[120].mxu0 %vm656_vm0, %v18501_v60  ;;  %v18503_v60 = vld [vmem:[%s22438_s0 + $0xff8] sm:$0xff]  }
 0x513   :  { %v21264_v43 = vadd.f32 %v16944_v41, %v21161_v44  ;;  %16453 = vmatprep.mubr.msk.bf16.mxu0 %vm656_vm0, %v18502_v22 }
 0x514   :  { %22531 = vst [vmem:[#allocation84_spill] sm:$0xff] %v21257_v45 }
 0x515   :  { %v16347_v51 = vpop.f32.mrb[16].mxu0 }
 0x516   :  { %v16945_v8 = vadd.f32 %v16347_v51, %v20396_v54  ;;  %v9970_v26 = vpop.f32.mrb[17].mxu0 }
 0x517   :  { %v16946_v47 = vadd.f32 %v9970_v26, %v20398_v55  ;;  %v16348_v41 = vpop.f32.mrb[18].mxu0 }
 0x518   :  { %v16947_v34 = vadd.f32 %v16348_v41, %v20403_v57  ;;  %v9973_v22 = vpop.f32.mrb[19].mxu0  ;;  %v10570_v48 = vadd.f32 %v16945_v8, %v21161_v44  ;;  %v18505_v57 = vld [vmem:[%s22441_s3 + $0x8] sm:$0xff]  }
 0x519   :  { %v16948_v14 = vadd.f32 %v9973_v22, %v20406_v58  ;;  %v10568_v54 = vadd.f32 %v16946_v47, %v21161_v44 }
 0x51a   :  { %v10571_v11 = vadd.f32 %v16947_v34, %v21161_v44  ;;  %16454 = vmatmul.mubr.msk.bf16.gmra.mrb[124].mxu0 %vm656_vm0, %v18503_v60  ;;  %v18507_v34 = vld [vmem:[%s22441_s3 + $0x18] sm:$0xff]  }
 0x51b   :  { %v10569_v51 = vadd.f32 %v16948_v14, %v21161_v44 }
 0x51c   :  { %v10689_v59 = vpack.c.bf16 %v10571_v11, %v10570_v48 }
 0x51d   :  { %v16351_v45 = vpop.f32.mrb[20].mxu0  ;;  %v10688_v7 = vpack.c.bf16 %v10569_v51, %v10568_v54 }
 0x51e   :  { %v16949_v55 = vadd.f32 %v16351_v45, %v20416_v61  ;;  %v9986_v26 = vpop.f32.mrb[21].mxu0  ;;  %v18506_v45 = vld [vmem:[%s22441_s3 + $0x10] sm:$0xff]  }
 0x51f   :  { %v16950_v58 = vadd.f32 %v9986_v26, %v20418_v62  ;;  %v16352_v8 = vpop.f32.mrb[22].mxu0  ;;  %16473 = vmatprep.mubr.bf16.mxu1 %v10688_v7 }
 0x520   :  { %v16951_v60 = vadd.f32 %v16352_v8, %v20420_v63  ;;  %v9989_v41 = vpop.f32.mrb[23].mxu0  ;;  %16474 = vmatmul.mubr.bf16.vlgmr.msra.gmra.mrb[128].mxu1 %v10689_v59  ;;  %v10574_v11 = vadd.f32 %v16949_v55, %v21161_v44 }
 0x521   :  { %v16952_v47 = vadd.f32 %v9989_v41, %v20423_v0  ;;  %16490 = vmatpush3.bf16.msra.mxu1 %v21066_v21  ;;  %v10572_v62 = vadd.f32 %v16950_v58, %v21161_v44 }
 0x522   :  { %v10575_v61 = vadd.f32 %v16951_v60, %v21161_v44  ;;  %16491 = vmatprep.subr.bf16.mxu1 %v18505_v57 }
 0x523   :  { %v10573_v7 = vadd.f32 %v16952_v47, %v21161_v44  ;;  %v18509_v47 = vld [vmem:[%s22441_s3 + $0x28] sm:$0xff]  }
 0x524   :  { %v10691_v63 = vpack.c.bf16 %v10575_v61, %v10574_v11 }
 0x525   :  { %v16355_v48 = vpop.f32.mrb[24].mxu0  ;;  %16492 = vmatpush3.bf16.msra.mxu1 %v18505_v57  ;;  %v10690_v59 = vpack.c.bf16 %v10573_v7, %v10572_v62  ;;  %v18508_v57 = vld [vmem:[%s22441_s3 + $0x20] sm:$0xff]  }
 0x526   :  { %v16953_v0 = vadd.f32 %v16355_v48, %v20432_v3  ;;  %v10002_v21 = vpop.f32.mrb[25].mxu0  ;;  %16493 = vmatprep.subr.bf16.mxu1 %v18506_v45  ;;  %v18510_v48 = vld [vmem:[%s22441_s3 + $0x30] sm:$0xff]  }
 0x527   :  { %v16954_v22 = vadd.f32 %v10002_v21, %v20434_v4  ;;  %v16356_v14 = vpop.f32.mrb[26].mxu0  ;;  %16477 = vmatprep.mubr.bf16.mxu1 %v10690_v59 }
 0x528   :  { %v16955_v54 = vadd.f32 %v16356_v14, %v20436_v5  ;;  %v10005_v51 = vpop.f32.mrb[27].mxu0  ;;  %16478 = vmatmul.mubr.bf16.gmra.mrb[132].mxu1 %v10691_v63  ;;  %v10578_v26 = vadd.f32 %v16953_v0, %v21161_v44 }
 0x529   :  { %v16956_v55 = vadd.f32 %v10005_v51, %v20439_v6  ;;  %16494 = vmatpush3.bf16.msra.mxu1 %v18506_v45  ;;  %v10576_v4 = vadd.f32 %v16954_v22, %v21161_v44  ;;  %v18511_v22 = vld [vmem:[%s22441_s3 + $0x38] sm:$0xff]  }
 0x52a   :  { %v10579_v3 = vadd.f32 %v16955_v54, %v21161_v44  ;;  %16495 = vmatprep.subr.bf16.mxu1 %v18507_v34 }
 0x52b   :  { %v10577_v58 = vadd.f32 %v16956_v55, %v21161_v44 }
 0x52c   :  { %v10693_v8 = vpack.c.bf16 %v10579_v3, %v10578_v26 }
 0x52d   :  { %v16359_v5 = vpop.f32.mrb[28].mxu0  ;;  %16496 = vmatpush3.bf16.msra.mxu1 %v18507_v34  ;;  %v10692_v60 = vpack.c.bf16 %v10577_v58, %v10576_v4 }
 0x52e   :  { %v16957_v6 = vadd.f32 %v16359_v5, %v20448_v9  ;;  %v10018_v41 = vpop.f32.mrb[29].mxu0  ;;  %16497 = vmatprep.subr.bf16.mxu1 %v18508_v57  ;;  %v18513_v5 = vld [vmem:[%s22441_s3 + $0x88] sm:$0xff]  }
 0x52f   :  { %v16958_v11 = vadd.f32 %v10018_v41, %v20450_v10  ;;  %v16360_v61 = vpop.f32.mrb[30].mxu0  ;;  %16481 = vmatprep.mubr.bf16.mxu1 %v10692_v60 }
 0x530   :  { %v16959_v45 = vadd.f32 %v16360_v61, %v20455_v12  ;;  %v10021_v62 = vpop.f32.mrb[31].mxu0  ;;  %16482 = vmatmul.mubr.bf16.gmra.mrb[136].mxu1 %v10693_v8  ;;  %v10582_v63 = vadd.f32 %v16957_v6, %v21161_v44 }
 0x531   :  { %v16960_v7 = vadd.f32 %v10021_v62, %v20458_v13  ;;  %16498 = vmatpush3.bf16.msra.mxu1 %v18508_v57  ;;  %v10580_v10 = vadd.f32 %v16958_v11, %v21161_v44  ;;  %v22533_v11 = vpack.c.bf16 %v21173_v15, %v21170_v16 }
 0x532   :  { %v10583_v9 = vadd.f32 %v16959_v45, %v21161_v44  ;;  %16499 = vmatprep.subr.bf16.mxu1 %v18509_v47 }
 0x533   :  { %v10581_v59 = vadd.f32 %v16960_v7, %v21161_v44 }
 0x534   :  { %v10695_v0 = vpack.c.bf16 %v10583_v9, %v10582_v63  ;;  %v18515_v63 = vld [vmem:[%s22441_s3 + $0x98] sm:$0xff]  }
 0x535   :  { %v16363_v12 = vpop.f32.mrb[32].mxu0  ;;  %16500 = vmatpush3.bf16.msra.mxu1 %v18509_v47  ;;  %v10694_v21 = vpack.c.bf16 %v10581_v59, %v10580_v10 }
 0x536   :  { %v16961_v13 = vadd.f32 %v16363_v12, %v20471_v17  ;;  %v10034_v34 = vpop.f32.mrb[33].mxu0  ;;  %16501 = vmatprep.subr.bf16.mxu1 %v18510_v48  ;;  %v22532_v17 = vpack.c.bf16 %v21180_v33, %v21177_v23 }
 0x537   :  { %v16962_v14 = vadd.f32 %v10034_v34, %v20473_v18  ;;  %v16364_v54 = vpop.f32.mrb[34].mxu0  ;;  %16485 = vmatprep.mubr.bf16.mxu1 %v10694_v21  ;;  %v18512_v18 = vld [vmem:[%s22441_s3 + $0x80] sm:$0xff]  }
 0x538   :  { %v16963_v51 = vadd.f32 %v16364_v54, %v20475_v50  ;;  %v10037_v55 = vpop.f32.mrb[35].mxu0  ;;  %16486 = vmatmul.mubr.bf16.gmra.mrb[140].mxu1 %v10695_v0  ;;  %v21337_v3 = vadd.f32 %v16961_v13, %v21161_v44  ;;  %v22535_v0 = vpack.c.bf16 %v21201_v31, %v21198_v20 }
 0x539   :  { %v16964_v26 = vadd.f32 %v10037_v55, %v20478_v19  ;;  %16502 = vmatpush3.bf16.msra.mxu1 %v18510_v48  ;;  %16505 = vmatprep.mubr.bf16.mxu1 %v22532_v17  ;;  %v21346_v50 = vadd.f32 %v16962_v14, %v21161_v44 }
 0x53a   :  { %v21340_v57 = vadd.f32 %v16963_v51, %v21161_v44  ;;  %16503 = vmatprep.subr.bf16.mxu1 %v18511_v22 }
 0x53b   :  { %v21349_v19 = vadd.f32 %v16964_v26, %v21161_v44  ;;  %v22537_v26 = vpack.c.bf16 %v21229_v36, %v21226_v29 }
 0x53c   :  { %v10697_v23 = vpack.c.bf16 %v21340_v57, %v21337_v3 }
 0x53d   :  { %v16367_v33 = vpop.f32.mrb[36].mxu0  ;;  %16504 = vmatpush3.bf16.msra.mxu1 %v18511_v22  ;;  %v10696_v4 = vpack.c.bf16 %v21349_v19, %v21346_v50  ;;  %v18517_v22 = vld [vmem:[%s22441_s3 + $0xa8] sm:$0xff]  }
 0x53e   :  { %v16965_v58 = vadd.f32 %v16367_v33, %v20487_v24  ;;  %v10050_v8 = vpop.f32.mrb[37].mxu0  ;;  %16521 = vmatprep.subr.bf16.mxu1 %v18512_v18  ;;  %v22534_v24 = vpack.c.bf16 %v21208_v30, %v21205_v32 }
 0x53f   :  { %v16966_v60 = vadd.f32 %v10050_v8, %v20489_v25  ;;  %v16368_v6 = vpop.f32.mrb[38].mxu0  ;;  %v18519_v8 = vld [vmem:[%s22441_s3 + $0xb8] sm:$0xff]  }
 0x540   :  { %v16967_v41 = vadd.f32 %v16368_v6, %v20491_v27  ;;  %v10053_v47 = vpop.f32.mrb[39].mxu0  ;;  %16506 = vmatmul.mubr.bf16.vlgmr.msra.gmra.mrb[128].mxu1 %v22533_v11  ;;  %v21369_v45 = vadd.f32 %v16965_v58, %v21161_v44  ;;  %v18514_v27 = vld [vmem:[%s22441_s3 + $0x90] sm:$0xff]   ;;  %v22539_v6 = vld [vmem:[#allocation5_spill] sm:$0xff]  ;;  %v22540_v11 = vld [vmem:[#allocation84_spill] sm:$0xff] }
 0x541   :  { %v16968_v61 = vadd.f32 %v10053_v47, %v20494_v28  ;;  %16509 = vmatprep.mubr.bf16.mxu1 %v22534_v24  ;;  %16522 = vmatpush3.bf16.msra.mxu1 %v18512_v18  ;;  %v21378_v15 = vadd.f32 %v16966_v60, %v21161_v44 }
 0x542   :  { %v21372_v25 = vadd.f32 %v16967_v41, %v21161_v44  ;;  %16523 = vmatprep.subr.bf16.mxu1 %v18513_v5 }
 0x543   :  { %v21381_v28 = vadd.f32 %v16968_v61, %v21161_v44  ;;  %v22541_v61 = vld [vmem:[#allocation83_spill] sm:$0xff] }
 0x544   :  { %v10699_v16 = vpack.c.bf16 %v21372_v25, %v21369_v45  ;;  %v22542_v24 = vpack.c.bf16 %v22540_v11, %v22541_v61 }
 0x545   :  { %v16371_v32 = vpop.f32.mrb[40].mxu0  ;;  %16524 = vmatpush3.bf16.msra.mxu1 %v18513_v5  ;;  %v10698_v30 = vpack.c.bf16 %v21381_v28, %v21378_v15 }
 0x546   :  { %v16969_v62 = vadd.f32 %v16371_v32, %v20503_v35  ;;  %v10066_v7 = vpop.f32.mrb[41].mxu0  ;;  %16525 = vmatprep.subr.bf16.mxu1 %v18514_v27  ;;  %v22536_v35 = vpack.c.bf16 %v21236_v37, %v21233_v39 }
 0x547   :  { %v16970_v9 = vadd.f32 %v10066_v7, %v20505_v40  ;;  %v16372_v48 = vpop.f32.mrb[42].mxu0 }
 0x548   :  { %v16971_v10 = vadd.f32 %v16372_v48, %v20507_v42  ;;  %v10069_v59 = vpop.f32.mrb[43].mxu0  ;;  %16510 = vmatmul.mubr.bf16.gmra.mrb[132].mxu1 %v22535_v0  ;;  %v21401_v21 = vadd.f32 %v16969_v62, %v21161_v44  ;;  %v18516_v42 = vld [vmem:[%s22441_s3 + $0xa0] sm:$0xff]  }
 0x549   :  { %v16972_v12 = vadd.f32 %v10069_v59, %v20510_v38  ;;  %16513 = vmatprep.mubr.bf16.mxu1 %v22536_v35  ;;  %16526 = vmatpush3.bf16.msra.mxu1 %v18514_v27  ;;  %v21410_v20 = vadd.f32 %v16970_v9, %v21161_v44  ;;  %v22543_v27 = vld [vmem:[#allocation6_spill] sm:$0xff]  ;;  %v18520_v62 = vld [vmem:[%s22441_s3 + $0xc0] sm:$0xff]   ;;  %v22544_v9 = vld [vmem:[#allocation7_spill] sm:$0xff] }
 0x54a   :  { %v21404_v40 = vadd.f32 %v16971_v10, %v21161_v44  ;;  %16527 = vmatprep.subr.bf16.mxu1 %v18515_v63  ;;  %v18521_v59 = vld [vmem:[%s22441_s3 + $0xc8] sm:$0xff]   ;;  %v22545_v0 = vld [vmem:[#allocation8_spill] sm:$0xff] }
 0x54b   :  { %v21413_v38 = vadd.f32 %v16972_v12, %v21161_v44 }
 0x54c   :  { %v10701_v31 = vpack.c.bf16 %v21404_v40, %v21401_v21 }
 0x54d   :  { %v16375_v39 = vpop.f32.mrb[44].mxu0  ;;  %16528 = vmatpush3.bf16.msra.mxu1 %v18515_v63  ;;  %v10700_v37 = vpack.c.bf16 %v21413_v38, %v21410_v20 }
 0x54e   :  { %v16973_v13 = vadd.f32 %v16375_v39, %v20519_v49  ;;  %v10082_v34 = vpop.f32.mrb[45].mxu0  ;;  %16529 = vmatprep.subr.bf16.mxu1 %v18516_v42  ;;  %v22538_v49 = vpack.c.bf16 %v21264_v43, %v21261_v46 }
 0x54f   :  { %v16974_v14 = vadd.f32 %v10082_v34, %v20521_v52  ;;  %v16376_v54 = vpop.f32.mrb[46].mxu0  ;;  %v22547_v34 = vld [vmem:[#allocation10_spill] sm:$0xff] }
 0x550   :  { %v16975_v51 = vadd.f32 %v16376_v54, %v20523_v53  ;;  %v10085_v55 = vpop.f32.mrb[47].mxu0  ;;  %16514 = vmatmul.mubr.bf16.gmra.mrb[136].mxu1 %v22537_v26  ;;  %v21433_v18 = vadd.f32 %v16973_v13, %v21161_v44  ;;  %v18518_v53 = vld [vmem:[%s22441_s3 + $0xb0] sm:$0xff]  }
 0x551   :  { %v16976_v17 = vadd.f32 %v10085_v55, %v20526_v56  ;;  %16517 = vmatprep.mubr.bf16.mxu1 %v22538_v49  ;;  %16530 = vmatpush3.bf16.msra.mxu1 %v18516_v42  ;;  %v21442_v29 = vadd.f32 %v16974_v14, %v21161_v44  ;;  %v22546_v42 = vld [vmem:[#allocation9_spill] sm:$0xff]  ;;  %v22549_v49 = vld [vmem:[#allocation12_spill] sm:$0xff] }
 0x552   :  { %v21436_v52 = vadd.f32 %v16975_v51, %v21161_v44  ;;  %16531 = vmatprep.subr.bf16.mxu1 %v18517_v22  ;;  %v18522_v51 = vld [vmem:[%s22441_s3 + $0xd0] sm:$0xff]  }
 0x553   :  { %v21445_v56 = vadd.f32 %v16976_v17, %v21161_v44  ;;  %v18523_v17 = vld [vmem:[%s22441_s3 + $0xd8] sm:$0xff]  }
 0x554   :  { %v10703_v36 = vpack.c.bf16 %v21436_v52, %v21433_v18 }
 0x555   :  { %v16379_v46 = vpop.f32.mrb[48].mxu0  ;;  %16532 = vmatpush3.bf16.msra.mxu1 %v18517_v22  ;;  %v10702_v43 = vpack.c.bf16 %v21445_v56, %v21442_v29 }
 0x556   :  { %v16977_v33 = vadd.f32 %v16379_v46, %v20535_v1  ;;  %v10098_v58 = vpop.f32.mrb[49].mxu0  ;;  %16533 = vmatprep.subr.bf16.mxu1 %v18518_v53 }
 0x557   :  { %v16978_v5 = vadd.f32 %v10098_v58, %v20537_v2  ;;  %v16380_v60 = vpop.f32.mrb[50].mxu0 }
 0x558   :  { %v16979_v41 = vadd.f32 %v16380_v60, %v22539_v6  ;;  %v10101_v47 = vpop.f32.mrb[51].mxu0  ;;  %16518 = vmatmul.mubr.bf16.gmra.mrb[140].mxu1 %v22542_v24  ;;  %v21465_v1 = vadd.f32 %v16977_v33, %v21161_v44  ;;  %v22550_v33 = vld [vmem:[#allocation13_spill] sm:$0xff] }
 0x559   :  { %v16980_v32 = vadd.f32 %v10101_v47, %v22543_v27  ;;  %16534 = vmatpush3.bf16.msra.mxu1 %v18518_v53  ;;  %16537 = vmatprep.mubr.bf16.mxu1 %v10696_v4  ;;  %v21474_v7 = vadd.f32 %v16978_v5, %v21161_v44  ;;  %v22551_v5 = vld [vmem:[#allocation14_spill] sm:$0xff]  ;;  %v18524_v47 = vld [vmem:[%s22441_s3 + $0xe0] sm:$0xff]  }
 0x55a   :  { %v21468_v2 = vadd.f32 %v16979_v41, %v21161_v44  ;;  %16535 = vmatprep.subr.bf16.mxu1 %v18519_v8  ;;  %v18525_v24 = vld [vmem:[%s22441_s3 + $0xe8] sm:$0xff]   ;;  %v22553_v27 = vld [vmem:[#allocation16_spill] sm:$0xff] }
 0x55b   :  { %v21477_v63 = vadd.f32 %v16980_v32, %v21161_v44 }
 0x55c   :  { %v10705_v50 = vpack.c.bf16 %v21468_v2, %v21465_v1 }
 0x55d   :  { %v16383_v19 = vpop.f32.mrb[52].mxu0  ;;  %16536 = vmatpush3.bf16.msra.mxu1 %v18519_v8  ;;  %v10704_v4 = vpack.c.bf16 %v21477_v63, %v21474_v7 }
 0x55e   :  { %v16981_v48 = vadd.f32 %v16383_v19, %v22544_v9  ;;  %v10114_v10 = vpop.f32.mrb[53].mxu0  ;;  %16553 = vmatprep.subr.bf16.mxu1 %v18520_v62  ;;  %v22554_v19 = vld [vmem:[#allocation17_spill] sm:$0xff] }
 0x55f   :  { %v16982_v12 = vadd.f32 %v10114_v10, %v22545_v0  ;;  %v16384_v35 = vpop.f32.mrb[54].mxu0  ;;  %v22555_v10 = vld [vmem:[#allocation18_spill] sm:$0xff] }
 0x560   :  { %v16983_v39 = vadd.f32 %v16384_v35, %v22546_v42  ;;  %v10117_v13 = vpop.f32.mrb[55].mxu0  ;;  %16538 = vmatmul.mubr.bf16.vlgmr.msra.gmra.mrb[128].mxu1 %v10697_v23  ;;  %v21497_v14 = vadd.f32 %v16981_v48, %v21161_v44  ;;  %v18526_v35 = vld [vmem:[%s22441_s3 + $0xf0] sm:$0xff]  }
 0x561   :  { %v16984_v22 = vadd.f32 %v10117_v13, %v22547_v34  ;;  %16541 = vmatprep.mubr.bf16.mxu1 %v10698_v30  ;;  %16554 = vmatpush3.bf16.msra.mxu1 %v18520_v62  ;;  %v21506_v3 = vadd.f32 %v16982_v12, %v21161_v44  ;;  %v22548_v30 = vld [vmem:[#allocation11_spill] sm:$0xff]  ;;  %v22557_v34 = vld [vmem:[#allocation20_spill] sm:$0xff] }
 0x562   :  { %v21500_v54 = vadd.f32 %v16983_v39, %v21161_v44  ;;  %16555 = vmatprep.subr.bf16.mxu1 %v18521_v59  ;;  %v18527_v13 = vld [vmem:[%s22441_s3 + $0xf8] sm:$0xff]  }
 0x563   :  { %v21509_v57 = vadd.f32 %v16984_v22, %v21161_v44 }
 0x564   :  { %v10707_v23 = vpack.c.bf16 %v21500_v54, %v21497_v14 }
 0x565   :  { %v16387_v15 = vpop.f32.mrb[56].mxu0  ;;  %16556 = vmatpush3.bf16.msra.mxu1 %v18521_v59  ;;  %v10706_v28 = vpack.c.bf16 %v21509_v57, %v21506_v3 }
 0x566   :  { %v16985_v55 = vadd.f32 %v16387_v15, %v22548_v30  ;;  %v10130_v26 = vpop.f32.mrb[57].mxu0  ;;  %16557 = vmatprep.subr.bf16.mxu1 %v18522_v51  ;;  %v22558_v15 = vld [vmem:[#allocation21_spill] sm:$0xff] }
 0x567   :  { %v16986_v53 = vadd.f32 %v10130_v26, %v22549_v49  ;;  %v16388_v46 = vpop.f32.mrb[58].mxu0  ;;  %v22559_v26 = vld [vmem:[#allocation22_spill] sm:$0xff] }
 0x568   :  { %v16987_v58 = vadd.f32 %v16388_v46, %v22550_v33  ;;  %v10133_v8 = vpop.f32.mrb[59].mxu0  ;;  %16542 = vmatmul.mubr.bf16.gmra.mrb[132].mxu1 %v10699_v16  ;;  %v21529_v6 = vadd.f32 %v16985_v55, %v21161_v44  ;;  %v18528_v46 = vld [vmem:[%s22441_s3 + $0x100] sm:$0xff]  }
 0x569   :  { %v16988_v60 = vadd.f32 %v10133_v8, %v22551_v5  ;;  %16545 = vmatprep.mubr.bf16.mxu1 %v10700_v37  ;;  %16558 = vmatpush3.bf16.msra.mxu1 %v18522_v51  ;;  %v21538_v45 = vadd.f32 %v16986_v53, %v21161_v44  ;;  %v22552_v37 = vld [vmem:[#allocation15_spill] sm:$0xff]  ;;  %v18529_v8 = vld [vmem:[%s22441_s3 + $0x108] sm:$0xff]   ;;  %v22561_v5 = vld [vmem:[#allocation24_spill] sm:$0xff] }
 0x56a   :  { %v21532_v41 = vadd.f32 %v16987_v58, %v21161_v44  ;;  %16559 = vmatprep.subr.bf16.mxu1 %v18523_v17 }
 0x56b   :  { %v21541_v25 = vadd.f32 %v16988_v60, %v21161_v44 }
 0x56c   :  { %v10709_v16 = vpack.c.bf16 %v21532_v41, %v21529_v6 }
 0x56d   :  { %v16391_v20 = vpop.f32.mrb[60].mxu0  ;;  %16560 = vmatpush3.bf16.msra.mxu1 %v18523_v17  ;;  %v10708_v38 = vpack.c.bf16 %v21541_v25, %v21538_v45 }
 0x56e   :  { %v16989_v11 = vadd.f32 %v16391_v20, %v22552_v37  ;;  %v10146_v61 = vpop.f32.mrb[61].mxu0  ;;  %16561 = vmatprep.subr.bf16.mxu1 %v18524_v47  ;;  %v22562_v20 = vld [vmem:[#allocation25_spill] sm:$0xff] }
 0x56f   :  { %v16990_v32 = vadd.f32 %v10146_v61, %v22553_v27  ;;  %v16392_v62 = vpop.f32.mrb[62].mxu0  ;;  %v22563_v61 = vld [vmem:[#allocation26_spill] sm:$0xff] }
 0x570   :  { %v16991_v9 = vadd.f32 %v16392_v62, %v22554_v19  ;;  %v10149_v48 = vpop.f32.mrb[63].mxu0  ;;  %16546 = vmatmul.mubr.bf16.gmra.mrb[136].mxu1 %v10701_v31  ;;  %v21561_v0 = vadd.f32 %v16989_v11, %v21161_v44  ;;  %v18530_v62 = vld [vmem:[%s22441_s3 + $0x110] sm:$0xff]  }
 0x571   :  { %v16992_v59 = vadd.f32 %v10149_v48, %v22555_v10  ;;  %16549 = vmatprep.mubr.bf16.mxu1 %v10702_v43  ;;  %16562 = vmatpush3.bf16.msra.mxu1 %v18524_v47  ;;  %v21570_v21 = vadd.f32 %v16990_v32, %v21161_v44  ;;  %v22556_v43 = vld [vmem:[#allocation19_spill] sm:$0xff]  ;;  %v22565_v10 = vld [vmem:[#allocation28_spill] sm:$0xff] }
 0x572   :  { %v21564_v12 = vadd.f32 %v16991_v9, %v21161_v44  ;;  %16563 = vmatprep.subr.bf16.mxu1 %v18525_v24  ;;  %v18531_v48 = vld [vmem:[%s22441_s3 + $0x118] sm:$0xff]  }
 0x573   :  { %v21573_v40 = vadd.f32 %v16992_v59, %v21161_v44 }
 0x574   :  { %v10711_v31 = vpack.c.bf16 %v21564_v12, %v21561_v0 }
 0x575   :  { %v16395_v29 = vpop.f32.mrb[64].mxu0  ;;  %16564 = vmatpush3.bf16.msra.mxu1 %v18525_v24  ;;  %v10710_v56 = vpack.c.bf16 %v21573_v40, %v21570_v21 }
 0x576   :  { %v16993_v42 = vadd.f32 %v16395_v29, %v22556_v43  ;;  %v10162_v39 = vpop.f32.mrb[65].mxu0  ;;  %16565 = vmatprep.subr.bf16.mxu1 %v18526_v35  ;;  %v22566_v29 = vld [vmem:[#allocation29_spill] sm:$0xff] }
 0x577   :  { %v16994_v22 = vadd.f32 %v10162_v39, %v22557_v34  ;;  %v16396_v51 = vpop.f32.mrb[66].mxu0  ;;  %v22567_v39 = vld [vmem:[#allocation30_spill] sm:$0xff] }
 0x578   :  { %v16995_v30 = vadd.f32 %v16396_v51, %v22558_v15  ;;  %v10165_v55 = vpop.f32.mrb[67].mxu0  ;;  %16550 = vmatmul.mubr.bf16.gmra.mrb[140].mxu1 %v10703_v36  ;;  %v21593_v49 = vadd.f32 %v16993_v42, %v21161_v44  ;;  %v18532_v51 = vld [vmem:[%s22441_s3 + $0x120] sm:$0xff]  }
 0x579   :  { %v16996_v17 = vadd.f32 %v10165_v55, %v22559_v26  ;;  %16566 = vmatpush3.bf16.msra.mxu1 %v18526_v35  ;;  %16569 = vmatprep.mubr.bf16.mxu1 %v10704_v4  ;;  %v21602_v18 = vadd.f32 %v16994_v22, %v21161_v44  ;;  %v22560_v4 = vld [vmem:[#allocation23_spill] sm:$0xff]  ;;  %v18533_v55 = vld [vmem:[%s22441_s3 + $0x128] sm:$0xff]   ;;  %v22569_v26 = vld [vmem:[#allocation32_spill] sm:$0xff] }
 0x57a   :  { %v21596_v53 = vadd.f32 %v16995_v30, %v21161_v44  ;;  %16567 = vmatprep.subr.bf16.mxu1 %v18527_v13 }
 0x57b   :  { %v21605_v52 = vadd.f32 %v16996_v17, %v21161_v44 }
 0x57c   :  { %v10713_v36 = vpack.c.bf16 %v21596_v53, %v21593_v49 }
 0x57d   :  { %v16399_v7 = vpop.f32.mrb[68].mxu0  ;;  %16568 = vmatpush3.bf16.msra.mxu1 %v18527_v13  ;;  %v10712_v63 = vpack.c.bf16 %v21605_v52, %v21602_v18 }
 0x57e   :  { %v16997_v33 = vadd.f32 %v16399_v7, %v22560_v4  ;;  %v10178_v58 = vpop.f32.mrb[69].mxu0  ;;  %16585 = vmatprep.subr.bf16.mxu1 %v18528_v46  ;;  %v22570_v7 = vld [vmem:[#allocation33_spill] sm:$0xff] }
 0x57f   :  { %v16998_v60 = vadd.f32 %v10178_v58, %v22561_v5  ;;  %v16400_v47 = vpop.f32.mrb[70].mxu0  ;;  %v22571_v58 = vld [vmem:[#allocation34_spill] sm:$0xff] }
 0x580   :  { %v16999_v37 = vadd.f32 %v16400_v47, %v22562_v20  ;;  %v10181_v11 = vpop.f32.mrb[71].mxu0  ;;  %16570 = vmatmul.mubr.bf16.vlgmr.msra.gmra.mrb[128].mxu1 %v10705_v50  ;;  %v21625_v27 = vadd.f32 %v16997_v33, %v21161_v44  ;;  %v18534_v47 = vld [vmem:[%s22441_s3 + $0x130] sm:$0xff]  }
 0x581   :  { %v17000_v24 = vadd.f32 %v10181_v11, %v22563_v61  ;;  %16573 = vmatprep.mubr.bf16.mxu1 %v10706_v28  ;;  %16586 = vmatpush3.bf16.msra.mxu1 %v18528_v46  ;;  %v21634_v1 = vadd.f32 %v16998_v60, %v21161_v44  ;;  %v22564_v28 = vld [vmem:[#allocation27_spill] sm:$0xff]  ;;  %v22573_v61 = vld [vmem:[#allocation36_spill] sm:$0xff] }
 0x582   :  { %v21628_v32 = vadd.f32 %v16999_v37, %v21161_v44  ;;  %16587 = vmatprep.subr.bf16.mxu1 %v18529_v8  ;;  %v18535_v11 = vld [vmem:[%s22441_s3 + $0x138] sm:$0xff]  }
 0x583   :  { %v21637_v2 = vadd.f32 %v17000_v24, %v21161_v44 }
 0x584   :  { %v10715_v50 = vpack.c.bf16 %v21628_v32, %v21625_v27 }
 0x585   :  { %v16403_v3 = vpop.f32.mrb[72].mxu0  ;;  %16588 = vmatpush3.bf16.msra.mxu1 %v18529_v8  ;;  %v10714_v57 = vpack.c.bf16 %v21637_v2, %v21634_v1 }
 0x586   :  { %v17001_v19 = vadd.f32 %v16403_v3, %v22564_v28  ;;  %v10194_v9 = vpop.f32.mrb[73].mxu0  ;;  %16589 = vmatprep.subr.bf16.mxu1 %v18530_v62  ;;  %v22574_v3 = vld [vmem:[#allocation37_spill] sm:$0xff] }
 0x587   :  { %v17002_v59 = vadd.f32 %v10194_v9, %v22565_v10  ;;  %v16404_v35 = vpop.f32.mrb[74].mxu0  ;;  %v22575_v9 = vld [vmem:[#allocation38_spill] sm:$0xff] }
 0x588   :  { %v17003_v43 = vadd.f32 %v16404_v35, %v22566_v29  ;;  %v10197_v42 = vpop.f32.mrb[75].mxu0  ;;  %16574 = vmatmul.mubr.bf16.gmra.mrb[132].mxu1 %v10707_v23  ;;  %v21657_v34 = vadd.f32 %v17001_v19, %v21161_v44  ;;  %v18536_v35 = vld [vmem:[%s22441_s3 + $0x140] sm:$0xff]  }
 0x589   :  { %v17004_v13 = vadd.f32 %v10197_v42, %v22567_v39  ;;  %16577 = vmatprep.mubr.bf16.mxu1 %v10708_v38  ;;  %16590 = vmatpush3.bf16.msra.mxu1 %v18530_v62  ;;  %v21666_v14 = vadd.f32 %v17002_v59, %v21161_v44  ;;  %v22568_v38 = vld [vmem:[#allocation31_spill] sm:$0xff]  ;;  %v18537_v42 = vld [vmem:[%s22441_s3 + $0x148] sm:$0xff]   ;;  %v22577_v39 = vld [vmem:[#allocation40_spill] sm:$0xff] }
 0x58a   :  { %v21660_v22 = vadd.f32 %v17003_v43, %v21161_v44  ;;  %16591 = vmatprep.subr.bf16.mxu1 %v18531_v48 }
 0x58b   :  { %v21669_v54 = vadd.f32 %v17004_v13, %v21161_v44 }
 0x58c   :  { %v10717_v23 = vpack.c.bf16 %v21660_v22, %v21657_v34 }
 0x58d   :  { %v16407_v45 = vpop.f32.mrb[76].mxu0  ;;  %16592 = vmatpush3.bf16.msra.mxu1 %v18531_v48  ;;  %v10716_v25 = vpack.c.bf16 %v21669_v54, %v21666_v14 }
 0x58e   :  { %v17005_v15 = vadd.f32 %v16407_v45, %v22568_v38  ;;  %v10210_v30 = vpop.f32.mrb[77].mxu0  ;;  %16593 = vmatprep.subr.bf16.mxu1 %v18532_v51  ;;  %v22578_v45 = vld [vmem:[#allocation41_spill] sm:$0xff] }
 0x58f   :  { %v17006_v17 = vadd.f32 %v10210_v30, %v22569_v26  ;;  %v16408_v46 = vpop.f32.mrb[78].mxu0  ;;  %v22579_v30 = vld [vmem:[#allocation42_spill] sm:$0xff] }
 0x590   :  { %v17007_v4 = vadd.f32 %v16408_v46, %v22570_v7  ;;  %v10213_v33 = vpop.f32.mrb[79].mxu0  ;;  %16578 = vmatmul.mubr.bf16.gmra.mrb[136].mxu1 %v10709_v16  ;;  %v21689_v5 = vadd.f32 %v17005_v15, %v21161_v44  ;;  %v18538_v46 = vld [vmem:[%s22441_s3 + $0x150] sm:$0xff]  }
 0x591   :  { %v17008_v8 = vadd.f32 %v10213_v33, %v22571_v58  ;;  %16581 = vmatprep.mubr.bf16.mxu1 %v10710_v56  ;;  %16594 = vmatpush3.bf16.msra.mxu1 %v18532_v51  ;;  %v21698_v6 = vadd.f32 %v17006_v17, %v21161_v44  ;;  %v22572_v56 = vld [vmem:[#allocation35_spill] sm:$0xff]  ;;  %v22581_v58 = vld [vmem:[#allocation44_spill] sm:$0xff] }
 0x592   :  { %v21692_v60 = vadd.f32 %v17007_v4, %v21161_v44  ;;  %16595 = vmatprep.subr.bf16.mxu1 %v18533_v55  ;;  %v18539_v33 = vld [vmem:[%s22441_s3 + $0x158] sm:$0xff]  }
 0x593   :  { %v21701_v41 = vadd.f32 %v17008_v8, %v21161_v44 }
 0x594   :  { %v10719_v16 = vpack.c.bf16 %v21692_v60, %v21689_v5  ;;  %v18544_v5 = vld [vmem:[%s22441_s3 + $0x180] sm:$0xff]  }
 0x595   :  { %v16411_v21 = vpop.f32.mrb[80].mxu0  ;;  %16596 = vmatpush3.bf16.msra.mxu1 %v18533_v55  ;;  %v10718_v40 = vpack.c.bf16 %v21701_v41, %v21698_v6 }
 0x596   :  { %v17009_v20 = vadd.f32 %v16411_v21, %v22572_v56  ;;  %v10226_v37 = vpop.f32.mrb[81].mxu0  ;;  %16597 = vmatprep.subr.bf16.mxu1 %v18534_v47  ;;  %v22582_v21 = vld [vmem:[#allocation45_spill] sm:$0xff] }
 0x597   :  { %v17010_v24 = vadd.f32 %v10226_v37, %v22573_v61  ;;  %v16412_v62 = vpop.f32.mrb[82].mxu0  ;;  %v22583_v37 = vld [vmem:[#allocation46_spill] sm:$0xff] }
 0x598   :  { %v17011_v28 = vadd.f32 %v16412_v62, %v22574_v3  ;;  %v10229_v19 = vpop.f32.mrb[83].mxu0  ;;  %16582 = vmatmul.mubr.bf16.gmra.mrb[140].mxu1 %v10711_v31  ;;  %v21721_v10 = vadd.f32 %v17009_v20, %v21161_v44  ;;  %v18540_v62 = vld [vmem:[%s22441_s3 + $0x160] sm:$0xff]  }
 0x599   :  { %v17012_v48 = vadd.f32 %v10229_v19, %v22575_v9  ;;  %16598 = vmatpush3.bf16.msra.mxu1 %v18534_v47  ;;  %16601 = vmatprep.mubr.bf16.mxu1 %v10712_v63  ;;  %v21730_v0 = vadd.f32 %v17010_v24, %v21161_v44  ;;  %v22576_v63 = vld [vmem:[#allocation39_spill] sm:$0xff]  ;;  %v18541_v19 = vld [vmem:[%s22441_s3 + $0x168] sm:$0xff]   ;;  %v22585_v9 = vld [vmem:[#allocation48_spill] sm:$0xff] }
 0x59a   :  { %v21724_v59 = vadd.f32 %v17011_v28, %v21161_v44  ;;  %16599 = vmatprep.subr.bf16.mxu1 %v18535_v11 }
 0x59b   :  { %v21733_v12 = vadd.f32 %v17012_v48, %v21161_v44 }
 0x59c   :  { %v10721_v31 = vpack.c.bf16 %v21724_v59, %v21721_v10 }
 0x59d   :  { %v16415_v18 = vpop.f32.mrb[84].mxu0  ;;  %16600 = vmatpush3.bf16.msra.mxu1 %v18535_v11  ;;  %v10720_v52 = vpack.c.bf16 %v21733_v12, %v21730_v0 }
 0x59e   :  { %v17013_v29 = vadd.f32 %v16415_v18, %v22576_v63  ;;  %v10242_v43 = vpop.f32.mrb[85].mxu0  ;;  %16617 = vmatprep.subr.bf16.mxu1 %v18536_v35  ;;  %v22586_v18 = vld [vmem:[#allocation49_spill] sm:$0xff] }
 0x59f   :  { %v17014_v13 = vadd.f32 %v10242_v43, %v22577_v39  ;;  %v16416_v51 = vpop.f32.mrb[86].mxu0  ;;  %v22587_v43 = vld [vmem:[#allocation50_spill] sm:$0xff] }
 0x5a0   :  { %v17015_v38 = vadd.f32 %v16416_v51, %v22578_v45  ;;  %v10245_v15 = vpop.f32.mrb[87].mxu0  ;;  %16602 = vmatmul.mubr.bf16.vlgmr.msra.gmra.mrb[128].mxu1 %v10713_v36  ;;  %v21753_v26 = vadd.f32 %v17013_v29, %v21161_v44  ;;  %v18542_v51 = vld [vmem:[%s22441_s3 + $0x170] sm:$0xff]  }
 0x5a1   :  { %v17016_v55 = vadd.f32 %v10245_v15, %v22579_v30  ;;  %16605 = vmatprep.mubr.bf16.mxu1 %v10714_v57  ;;  %16618 = vmatpush3.bf16.msra.mxu1 %v18536_v35  ;;  %v21762_v49 = vadd.f32 %v17014_v13, %v21161_v44  ;;  %v22580_v57 = vld [vmem:[#allocation43_spill] sm:$0xff]  ;;  %v22589_v30 = vld [vmem:[#allocation52_spill] sm:$0xff] }
 0x5a2   :  { %v21756_v17 = vadd.f32 %v17015_v38, %v21161_v44  ;;  %16619 = vmatprep.subr.bf16.mxu1 %v18537_v42  ;;  %v18543_v15 = vld [vmem:[%s22441_s3 + $0x178] sm:$0xff]  }
 0x5a3   :  { %v21765_v53 = vadd.f32 %v17016_v55, %v21161_v44 }
 0x5a4   :  { %v10723_v36 = vpack.c.bf16 %v21756_v17, %v21753_v26 }
 0x5a5   :  { %v16419_v1 = vpop.f32.mrb[88].mxu0  ;;  %16620 = vmatpush3.bf16.msra.mxu1 %v18537_v42  ;;  %v10722_v2 = vpack.c.bf16 %v21765_v53, %v21762_v49 }
 0x5a6   :  { %v17017_v7 = vadd.f32 %v16419_v1, %v22580_v57  ;;  %v10258_v4 = vpop.f32.mrb[89].mxu0  ;;  %16621 = vmatprep.subr.bf16.mxu1 %v18538_v46 }
 0x5a7   :  { %v17018_v8 = vadd.f32 %v10258_v4, %v22581_v58  ;;  %v16420_v47 = vpop.f32.mrb[90].mxu0 }
 0x5a8   :  { %v17019_v56 = vadd.f32 %v16420_v47, %v22582_v21  ;;  %v10261_v20 = vpop.f32.mrb[91].mxu0  ;;  %16606 = vmatmul.mubr.bf16.gmra.mrb[132].mxu1 %v10715_v50  ;;  %v21785_v61 = vadd.f32 %v17017_v7, %v21161_v44  ;;  %v22591_v7 = vld [vmem:[#allocation54_spill] sm:$0xff]  ;;  %v22592_v47 = vld [vmem:[#allocation55_spill] sm:$0xff] }
 0x5a9   :  { %v17020_v11 = vadd.f32 %v10261_v20, %v22583_v37  ;;  %16609 = vmatprep.mubr.bf16.mxu1 %v10716_v25  ;;  %16622 = vmatpush3.bf16.msra.mxu1 %v18538_v46  ;;  %v21794_v27 = vadd.f32 %v17018_v8, %v21161_v44  ;;  %v22584_v25 = vld [vmem:[#allocation47_spill] sm:$0xff]  ;;  %v22590_v46 = vld [vmem:[#allocation53_spill] sm:$0xff]  ;;  %v22593_v37 = vld [vmem:[#allocation56_spill] sm:$0xff] }
 0x5aa   :  { %v21788_v24 = vadd.f32 %v17019_v56, %v21161_v44  ;;  %16623 = vmatprep.subr.bf16.mxu1 %v18539_v33  ;;  %v18545_v20 = vld [vmem:[%s22441_s3 + $0x188] sm:$0xff]  }
 0x5ab   :  { %v21797_v32 = vadd.f32 %v17020_v11, %v21161_v44 }
 0x5ac   :  { %v10725_v50 = vpack.c.bf16 %v21788_v24, %v21785_v61 }
 0x5ad   :  { %v16423_v14 = vpop.f32.mrb[92].mxu0  ;;  %16624 = vmatpush3.bf16.msra.mxu1 %v18539_v33  ;;  %v10724_v54 = vpack.c.bf16 %v21797_v32, %v21794_v27  ;;  %v21851_v33 = vld [vmem:[%s22440_s2] ss:$0 sm:$0xff] }
 0x5ae   :  { %v17021_v3 = vadd.f32 %v16423_v14, %v22584_v25  ;;  %v10274_v28 = vpop.f32.mrb[93].mxu0  ;;  %16625 = vmatprep.subr.bf16.mxu1 %v18540_v62  ;;  %v22594_v14 = vld [vmem:[#allocation57_spill] sm:$0xff] }
 0x5af   :  { %v17022_v48 = vadd.f32 %v10274_v28, %v22585_v9  ;;  %v16424_v35 = vpop.f32.mrb[94].mxu0  ;;  %v22595_v28 = vld [vmem:[#allocation58_spill] sm:$0xff] }
 0x5b0   :  { %v17023_v63 = vadd.f32 %v16424_v35, %v22586_v18  ;;  %v10277_v29 = vpop.f32.mrb[95].mxu0  ;;  %16610 = vmatmul.mubr.bf16.gmra.mrb[136].mxu1 %v10717_v23  ;;  %v21817_v39 = vadd.f32 %v17021_v3, %v21161_v44  ;;  %v18546_v35 = vld [vmem:[%s22441_s3 + $0x190] sm:$0xff]  }
 0x5b1   :  { %v17024_v42 = vadd.f32 %v10277_v29, %v22587_v43  ;;  %16613 = vmatprep.mubr.bf16.mxu1 %v10718_v40  ;;  %16626 = vmatpush3.bf16.msra.mxu1 %v18540_v62  ;;  %v21826_v34 = vadd.f32 %v17022_v48, %v21161_v44  ;;  %v22588_v40 = vld [vmem:[#allocation51_spill] sm:$0xff]  ;;  %v22597_v43 = vld [vmem:[#allocation60_spill] sm:$0xff] }
 0x5b2   :  { %v21820_v13 = vadd.f32 %v17023_v63, %v21161_v44  ;;  %16627 = vmatprep.subr.bf16.mxu1 %v18541_v19  ;;  %v18547_v29 = vld [vmem:[%s22441_s3 + $0x198] sm:$0xff]  }
 0x5b3   :  { %v21829_v22 = vadd.f32 %v17024_v42, %v21161_v44 }
 0x5b4   :  { %v10727_v23 = vpack.c.bf16 %v21820_v13, %v21817_v39 }
 0x5b5   :  { %v16427_v6 = vpop.f32.mrb[96].mxu0  ;;  %16628 = vmatpush3.bf16.msra.mxu1 %v18541_v19  ;;  %v10726_v41 = vpack.c.bf16 %v21829_v22, %v21826_v34 }
 0x5b6   :  { %v17025_v45 = vadd.f32 %v16427_v6, %v22588_v40  ;;  %v10290_v38 = vpop.f32.mrb[97].mxu0  ;;  %16629 = vmatprep.subr.bf16.mxu1 %v18542_v51  ;;  %v22598_v6 = vld [vmem:[#allocation61_spill] sm:$0xff] }
 0x5b7   :  { %v17026_v55 = vadd.f32 %v10290_v38, %v22589_v30  ;;  %v16428_v44 = vpop.f32.mrb[98].mxu0  ;;  %v22599_v38 = vld [vmem:[#allocation62_spill] sm:$0xff] }
 0x5b8   :  { %v17027_v1 = vadd.f32 %v16428_v44, %v22590_v46  ;;  %v10293_v57 = vpop.f32.mrb[99].mxu0  ;;  %16614 = vmatmul.mubr.bf16.gmra.mrb[140].mxu1 %v10719_v16  ;;  %v21854_v58 = vadd.f32 %v21851_v33, %v17025_v45  ;;  %v18548_v44 = vld [vmem:[%s22441_s3 + $0x1a0] sm:$0xff]  }
 0x5b9   :  { %v17028_v4 = vadd.f32 %v10293_v57, %v22591_v7  ;;  %16630 = vmatpush3.bf16.msra.mxu1 %v18542_v51  ;;  %16633 = vmatprep.mubr.bf16.mxu1 %v10720_v52  ;;  %v21863_v60 = vadd.f32 %v21851_v33, %v17026_v55  ;;  %v18549_v57 = vld [vmem:[%s22441_s3 + $0x1a8] sm:$0xff]   ;;  %v22601_v7 = vld [vmem:[#allocation64_spill] sm:$0xff] }
 0x5ba   :  { %v21857_v8 = vadd.f32 %v21851_v33, %v17027_v1  ;;  %16631 = vmatprep.subr.bf16.mxu1 %v18543_v15 }
 0x5bb   :  { %v21866_v16 = vadd.f32 %v21851_v33, %v17028_v4 }
 0x5bc   :  { %v10729_v0 = vpack.c.bf16 %v21857_v8, %v21854_v58 }
 0x5bd   :  { %v16431_v12 = vpop.f32.mrb[100].mxu0  ;;  %16632 = vmatpush3.bf16.msra.mxu1 %v18543_v15  ;;  %v10728_v52 = vpack.c.bf16 %v21866_v16, %v21863_v60 }
 0x5be   :  { %v17029_v21 = vadd.f32 %v16431_v12, %v22592_v47  ;;  %v10306_v56 = vpop.f32.mrb[101].mxu0  ;;  %16649 = vmatprep.subr.bf16.mxu1 %v18544_v5  ;;  %v22602_v12 = vld [vmem:[#allocation65_spill] sm:$0xff] }
 0x5bf   :  { %v17030_v11 = vadd.f32 %v10306_v56, %v22593_v37  ;;  %v16432_v62 = vpop.f32.mrb[102].mxu0  ;;  %v22603_v56 = vld [vmem:[#allocation66_spill] sm:$0xff] }
 0x5c0   :  { %v17031_v25 = vadd.f32 %v16432_v62, %v22594_v14  ;;  %v10309_v3 = vpop.f32.mrb[103].mxu0  ;;  %16634 = vmatmul.mubr.bf16.vlgmr.msra.gmra.mrb[128].mxu1 %v10721_v31  ;;  %v21886_v9 = vadd.f32 %v21851_v33, %v17029_v21  ;;  %v18550_v62 = vld [vmem:[%s22441_s3 + $0x1b0] sm:$0xff]  }
 0x5c1   :  { %v17032_v19 = vadd.f32 %v10309_v3, %v22595_v28  ;;  %16637 = vmatprep.mubr.bf16.mxu1 %v10722_v2  ;;  %16650 = vmatpush3.bf16.msra.mxu1 %v18544_v5  ;;  %v21895_v10 = vadd.f32 %v21851_v33, %v17030_v11  ;;  %v22596_v2 = vld [vmem:[#allocation59_spill] sm:$0xff]  ;;  %v22605_v28 = vld [vmem:[#allocation68_spill] sm:$0xff] }
 0x5c2   :  { %v21889_v48 = vadd.f32 %v21851_v33, %v17031_v25  ;;  %16651 = vmatprep.subr.bf16.mxu1 %v18545_v20  ;;  %v18551_v3 = vld [vmem:[%s22441_s3 + $0x1b8] sm:$0xff]  }
 0x5c3   :  { %v21898_v59 = vadd.f32 %v21851_v33, %v17032_v19 }
 0x5c4   :  { %v10731_v31 = vpack.c.bf16 %v21889_v48, %v21886_v9 }
 0x5c5   :  { %v16435_v49 = vpop.f32.mrb[104].mxu0  ;;  %16652 = vmatpush3.bf16.msra.mxu1 %v18545_v20  ;;  %v10730_v53 = vpack.c.bf16 %v21898_v59, %v21895_v10 }
 0x5c6   :  { %v17033_v18 = vadd.f32 %v16435_v49, %v22596_v2  ;;  %v10322_v63 = vpop.f32.mrb[105].mxu0  ;;  %16653 = vmatprep.subr.bf16.mxu1 %v18546_v35  ;;  %v22606_v49 = vld [vmem:[#allocation69_spill] sm:$0xff] }
 0x5c7   :  { %v17034_v42 = vadd.f32 %v10322_v63, %v22597_v43  ;;  %v16436_v51 = vpop.f32.mrb[106].mxu0  ;;  %v22607_v63 = vld [vmem:[#allocation70_spill] sm:$0xff] }
 0x5c8   :  { %v17035_v40 = vadd.f32 %v16436_v51, %v22598_v6  ;;  %v10325_v45 = vpop.f32.mrb[107].mxu0  ;;  %16638 = vmatmul.mubr.bf16.gmra.mrb[132].mxu1 %v10723_v36  ;;  %v21918_v30 = vadd.f32 %v21851_v33, %v17033_v18  ;;  %v18552_v51 = vld [vmem:[%s22441_s3 + $0x1c0] sm:$0xff]  }
 0x5c9   :  { %v17036_v15 = vadd.f32 %v10325_v45, %v22599_v38  ;;  %16641 = vmatprep.mubr.bf16.mxu1 %v10724_v54  ;;  %16654 = vmatpush3.bf16.msra.mxu1 %v18546_v35  ;;  %v21927_v26 = vadd.f32 %v21851_v33, %v17034_v42  ;;  %v22600_v54 = vld [vmem:[#allocation63_spill] sm:$0xff]  ;;  %v18553_v45 = vld [vmem:[%s22441_s3 + $0x1c8] sm:$0xff]   ;;  %v22609_v38 = vld [vmem:[#allocation72_spill] sm:$0xff] }
 0x5ca   :  { %v21921_v55 = vadd.f32 %v21851_v33, %v17035_v40  ;;  %16655 = vmatprep.subr.bf16.mxu1 %v18547_v29 }
 0x5cb   :  { %v21930_v17 = vadd.f32 %v21851_v33, %v17036_v15 }
 0x5cc   :  { %v10733_v36 = vpack.c.bf16 %v21921_v55, %v21918_v30 }
 0x5cd   :  { %v16439_v27 = vpop.f32.mrb[108].mxu0  ;;  %16656 = vmatpush3.bf16.msra.mxu1 %v18547_v29  ;;  %v10732_v32 = vpack.c.bf16 %v21930_v17, %v21927_v26  ;;  %v22616_v26 = vld [vmem:[#allocation79_spill] sm:$0xff] }
 0x5ce   :  { %v17037_v46 = vadd.f32 %v16439_v27, %v22600_v54  ;;  %v10338_v1 = vpop.f32.mrb[109].mxu0  ;;  %16657 = vmatprep.subr.bf16.mxu1 %v18548_v44  ;;  %v22610_v27 = vld [vmem:[#allocation73_spill] sm:$0xff] }
 0x5cf   :  { %v17038_v4 = vadd.f32 %v10338_v1, %v22601_v7  ;;  %v16440_v5 = vpop.f32.mrb[110].mxu0  ;;  %v22611_v1 = vld [vmem:[#allocation74_spill] sm:$0xff] }
 0x5d0   :  { %v17039_v47 = vadd.f32 %v16440_v5, %v22602_v12  ;;  %v10341_v21 = vpop.f32.mrb[111].mxu0  ;;  %16642 = vmatmul.mubr.bf16.gmra.mrb[136].mxu1 %v10725_v50  ;;  %v21950_v37 = vadd.f32 %v21851_v33, %v17037_v46  ;;  %v18554_v5 = vld [vmem:[%s22441_s3 + $0x1d0] sm:$0xff]  }
 0x5d1   :  { %v17040_v20 = vadd.f32 %v10341_v21, %v22603_v56  ;;  %16645 = vmatprep.mubr.bf16.mxu1 %v10726_v41  ;;  %16658 = vmatpush3.bf16.msra.mxu1 %v18548_v44  ;;  %v21959_v61 = vadd.f32 %v21851_v33, %v17038_v4  ;;  %v22604_v41 = vld [vmem:[#allocation67_spill] sm:$0xff]  ;;  %v22613_v56 = vld [vmem:[#allocation76_spill] sm:$0xff] }
 0x5d2   :  { %v21953_v11 = vadd.f32 %v21851_v33, %v17039_v47  ;;  %16659 = vmatprep.subr.bf16.mxu1 %v18549_v57  ;;  %v18555_v21 = vld [vmem:[%s22441_s3 + $0x1d8] sm:$0xff]  }
 0x5d3   :  { %v21962_v24 = vadd.f32 %v21851_v33, %v17040_v20 }
 0x5d4   :  { %v10735_v50 = vpack.c.bf16 %v21953_v11, %v21950_v37  ;;  %v18562_v37 = vld [vmem:[%s22443_s5 + $0x50] sm:$0xff]   ;;  %v18563_v11 = vld [vmem:[%s22443_s5 + $0x58] sm:$0xff]  }
 0x5d5   :  { %v16443_v34 = vpop.f32.mrb[112].mxu0  ;;  %16660 = vmatpush3.bf16.msra.mxu1 %v18549_v57  ;;  %v10734_v22 = vpack.c.bf16 %v21962_v24, %v21959_v61  ;;  %v18559_v61 = vld [vmem:[%s22441_s3 + $0x1f8] sm:$0xff]   ;;  %v18561_v24 = vld [vmem:[%s22443_s5 + $0x48] sm:$0xff]  }
 0x5d6   :  { %v17041_v14 = vadd.f32 %v16443_v34, %v22604_v41  ;;  %v10354_v25 = vpop.f32.mrb[113].mxu0  ;;  %16661 = vmatprep.subr.bf16.mxu1 %v18550_v62  ;;  %v22614_v34 = vld [vmem:[#allocation77_spill] sm:$0xff] }
 0x5d7   :  { %v17042_v19 = vadd.f32 %v10354_v25, %v22605_v28  ;;  %v16444_v35 = vpop.f32.mrb[114].mxu0  ;;  %v22615_v25 = vld [vmem:[#allocation78_spill] sm:$0xff] }
 0x5d8   :  { %v17043_v2 = vadd.f32 %v16444_v35, %v22606_v49  ;;  %v10357_v18 = vpop.f32.mrb[115].mxu0  ;;  %16646 = vmatmul.mubr.bf16.gmra.mrb[140].mxu1 %v10727_v23  ;;  %v21982_v43 = vadd.f32 %v21851_v33, %v17041_v14  ;;  %v18556_v35 = vld [vmem:[%s22441_s3 + $0x1e0] sm:$0xff]  }
 0x5d9   :  { %v17044_v29 = vadd.f32 %v10357_v18, %v22607_v63  ;;  %16662 = vmatpush3.bf16.msra.mxu1 %v18550_v62  ;;  %16665 = vmatprep.mubr.bf16.mxu1 %v10728_v52  ;;  %v21991_v39 = vadd.f32 %v21851_v33, %v17042_v19  ;;  %v22608_v52 = vld [vmem:[#allocation71_spill] sm:$0xff]  ;;  %v18557_v18 = vld [vmem:[%s22441_s3 + $0x1e8] sm:$0xff]   ;;  %v22617_v63 = vld [vmem:[#allocation80_spill] sm:$0xff] }
 0x5da   :  { %v21985_v42 = vadd.f32 %v21851_v33, %v17043_v2  ;;  %16663 = vmatprep.subr.bf16.mxu1 %v18551_v3 }
 0x5db   :  { %v21994_v13 = vadd.f32 %v21851_v33, %v17044_v29 }
 0x5dc   :  { %v10737_v23 = vpack.c.bf16 %v21985_v42, %v21982_v43  ;;  %v18566_v43 = vld [vmem:[%s22443_s5 + $0x70] sm:$0xff]   ;;  %v18567_v42 = vld [vmem:[%s22443_s5 + $0x78] sm:$0xff]  }
 0x5dd   :  { %v16447_v60 = vpop.f32.mrb[116].mxu0  ;;  %16664 = vmatpush3.bf16.msra.mxu1 %v18551_v3  ;;  %v10736_v16 = vpack.c.bf16 %v21994_v13, %v21991_v39  ;;  %v18568_v39 = vld [vmem:[%s22443_s5] sm:$0xff]  }
 0x5de   :  { %v17045_v6 = vadd.f32 %v16447_v60, %v22608_v52  ;;  %v10370_v40 = vpop.f32.mrb[117].mxu0  ;;  %16681 = vmatprep.subr.bf16.mxu1 %v18552_v51  ;;  %v22618_v60 = vld [vmem:[#allocation81_spill] sm:$0xff] }
 0x5df   :  { %v17046_v15 = vadd.f32 %v10370_v40, %v22609_v38  ;;  %v16448_v44 = vpop.f32.mrb[118].mxu0  ;;  %v22619_v40 = vld [vmem:[#allocation82_spill] sm:$0xff] }
 0x5e0   :  { %v17047_v54 = vadd.f32 %v16448_v44, %v22610_v27  ;;  %v10373_v46 = vpop.f32.mrb[119].mxu0  ;;  %16666 = vmatmul.mubr.bf16.vlgmr.msra.gmra.mrb[128].mxu1 %v10729_v0  ;;  %v22014_v7 = vadd.f32 %v21851_v33, %v17045_v6  ;;  %v18558_v44 = vld [vmem:[%s22441_s3 + $0x1f0] sm:$0xff]  }
 0x5e1   :  { %v17048_v57 = vadd.f32 %v10373_v46, %v22611_v1  ;;  %16669 = vmatprep.mubr.bf16.mxu1 %v10730_v53  ;;  %16682 = vmatpush3.bf16.msra.mxu1 %v18552_v51  ;;  %v10668_v58 = vadd.f32 %v21851_v33, %v17046_v15  ;;  %v22612_v53 = vld [vmem:[#allocation75_spill] sm:$0xff] }
 0x5e2   :  { %v22017_v4 = vadd.f32 %v21851_v33, %v17047_v54  ;;  %16683 = vmatprep.subr.bf16.mxu1 %v18553_v45 }
 0x5e3   :  { %v10669_v8 = vadd.f32 %v21851_v33, %v17048_v57 }
 0x5e4   :  { %v10739_v0 = vpack.c.bf16 %v22017_v4, %v22014_v7 }
 0x5e5   :  { %v16451_v10 = vpop.f32.mrb[120].mxu0  ;;  %16684 = vmatpush3.bf16.msra.mxu1 %v18553_v45  ;;  %v10738_v59 = vpack.c.bf16 %v10669_v8, %v10668_v58 }
 0x5e6   :  { %v17049_v12 = vadd.f32 %v16451_v10, %v22612_v53  ;;  %v10386_v47 = vpop.f32.mrb[121].mxu0  ;;  %16685 = vmatprep.subr.bf16.mxu1 %v18554_v5 }
 0x5e7   :  { %v17050_v20 = vadd.f32 %v10386_v47, %v22613_v56  ;;  %v16452_v62 = vpop.f32.mrb[122].mxu0 }
 0x5e8   :  { %v17051_v41 = vadd.f32 %v16452_v62, %v22614_v34  ;;  %v10389_v14 = vpop.f32.mrb[123].mxu0  ;;  %16670 = vmatmul.mubr.bf16.gmra.mrb[132].mxu1 %v10731_v31  ;;  %v10674_v28 = vadd.f32 %v21851_v33, %v17049_v12  ;;  %v18569_v62 = vld [vmem:[%s22443_s5 + $0x8] sm:$0xff]  }
 0x5e9   :  { %v17052_v3 = vadd.f32 %v10389_v14, %v22615_v25  ;;  %16673 = vmatprep.mubr.bf16.mxu1 %v10732_v32  ;;  %16686 = vmatpush3.bf16.msra.mxu1 %v18554_v5  ;;  %v10672_v49 = vadd.f32 %v21851_v33, %v17050_v20 }
 0x5ea   :  { %v10675_v19 = vadd.f32 %v21851_v33, %v17051_v41  ;;  %16687 = vmatprep.subr.bf16.mxu1 %v18555_v21 }
 0x5eb   :  { %v10673_v9 = vadd.f32 %v21851_v33, %v17052_v3 }
 0x5ec   :  { %v10741_v48 = vpack.c.bf16 %v10675_v19, %v10674_v28  ;;  %v18570_v19 = vld [vmem:[%s22443_s5 + $0x10] sm:$0xff]  }
 0x5ed   :  { %v16455_v31 = vpop.f32.mrb[124].mxu0  ;;  %16688 = vmatpush3.bf16.msra.mxu1 %v18555_v21  ;;  %v10740_v2 = vpack.c.bf16 %v10673_v9, %v10672_v49 }
 0x5ee   :  { %v17053_v17 = vadd.f32 %v16455_v31, %v22616_v26  ;;  %v10402_v32 = vpop.f32.mrb[125].mxu0  ;;  %16689 = vmatprep.subr.bf16.mxu1 %v18556_v35  ;;  %v18571_v31 = vld [vmem:[%s22443_s5 + $0x18] sm:$0xff]  }
 0x5ef   :  { %v17054_v29 = vadd.f32 %v10402_v32, %v22617_v63  ;;  %v16456_v51 = vpop.f32.mrb[126].mxu0 }
 0x5f0   :  { %v17055_v52 = vadd.f32 %v16456_v51, %v22618_v60  ;;  %v10405_v6 = vpop.f32.mrb[127].mxu0  ;;  %16674 = vmatmul.mubr.bf16.gmra.mrb[136].mxu1 %v10733_v36  ;;  %v10678_v38 = vadd.f32 %v21851_v33, %v17053_v17  ;;  %v18572_v51 = vld [vmem:[%s22443_s5 + $0x20] sm:$0xff]  }
 0x5f1   :  { %v17056_v45 = vadd.f32 %v10405_v6, %v22619_v40  ;;  %16677 = vmatprep.mubr.bf16.mxu1 %v10734_v22  ;;  %16690 = vmatpush3.bf16.msra.mxu1 %v18556_v35  ;;  %v10676_v27 = vadd.f32 %v21851_v33, %v17054_v29  ;;  %v18565_v22 = vld [vmem:[%s22443_s5 + $0x68] sm:$0xff]  }
 0x5f2   :  { %v10679_v15 = vadd.f32 %v21851_v33, %v17055_v52  ;;  %16691 = vmatprep.subr.bf16.mxu1 %v18557_v18  ;;  %v18573_v40 = vld [vmem:[%s22443_s5 + $0x28] sm:$0xff]  }
 0x5f3   :  { %v10677_v30 = vadd.f32 %v21851_v33, %v17056_v45  ;;  %v18560_v33 = vld [vmem:[%s22443_s5 + $0x40] sm:$0xff]   ;;  %v18574_v45 = vld [vmem:[%s22443_s5 + $0x30] sm:$0xff]  }
 0x5f4   :  { %v10743_v55 = vpack.c.bf16 %v10679_v15, %v10678_v38  ;;  %v18575_v38 = vld [vmem:[%s22443_s5 + $0x38] sm:$0xff]   ;;  %v18576_v15 = vld [vmem:[%s22443_s5 + $0x80] sm:$0xff]  }
 0x5f5   :  { %16692 = vmatpush3.bf16.msra.mxu1 %v18557_v18  ;;  %v10742_v36 = vpack.c.bf16 %v10677_v30, %v10676_v27  ;;  %v18578_v27 = vld [vmem:[%s22443_s5 + $0x90] sm:$0xff]   ;;  %v18579_v30 = vld [vmem:[%s22443_s5 + $0x98] sm:$0xff]  }
 0x5f6   :  { %16693 = vmatprep.subr.bf16.mxu1 %v18558_v44 }
 0x5f8   :  { %16678 = vmatmul.mubr.bf16.gmra.mrb[140].mxu1 %v10735_v50  ;;  %v18564_v50 = vld [vmem:[%s22443_s5 + $0x60] sm:$0xff]  }
 0x5f9   :  { %16694 = vmatpush3.bf16.msra.mxu1 %v18558_v44  ;;  %16697 = vmatprep.mubr.bf16.mxu1 %v10736_v16  ;;  %v18577_v44 = vld [vmem:[%s22443_s5 + $0x88] sm:$0xff]  }
 0x5fa   :  { %16695 = vmatprep.subr.bf16.mxu1 %v18559_v61 }
 0x5fd   :  { %16696 = vmatpush3.bf16.msra.mxu1 %v18559_v61  ;;  %v18582_v61 = vld [vmem:[%s22443_s5 + $0xb0] sm:$0xff]  }
 0x5fe   :  { %16713 = vmatprep.subr.bf16.mxu1 %v18560_v33 }
 0x600   :  { %16698 = vmatmul.mubr.bf16.vlgmr.msra.gmra.mrb[128].mxu1 %v10737_v23  ;;  %v14513_v23 = vld [vmem:[%s22442_s4] ss:$0 sm:$0xff] }
 0x601   :  { %16701 = vmatprep.mubr.bf16.mxu1 %v10738_v59  ;;  %16714 = vmatpush3.bf16.msra.mxu1 %v18560_v33  ;;  %v18583_v33 = vld [vmem:[%s22443_s5 + $0xb8] sm:$0xff]  }
 0x602   :  { %16715 = vmatprep.subr.bf16.mxu1 %v18561_v24 }
 0x605   :  { %16716 = vmatpush3.bf16.msra.mxu1 %v18561_v24  ;;  %v18584_v24 = vld [vmem:[%s22443_s5 + $0xc0] sm:$0xff]  }
 0x606   :  { %16717 = vmatprep.subr.bf16.mxu1 %v18562_v37 }
 0x608   :  { %16702 = vmatmul.mubr.bf16.gmra.mrb[132].mxu1 %v10739_v0 }
 0x609   :  { %16705 = vmatprep.mubr.bf16.mxu1 %v10740_v2  ;;  %16718 = vmatpush3.bf16.msra.mxu1 %v18562_v37  ;;  %v18585_v37 = vld [vmem:[%s22443_s5 + $0xc8] sm:$0xff]  }
 0x60a   :  { %16719 = vmatprep.subr.bf16.mxu1 %v18563_v11 }
 0x60d   :  { %16720 = vmatpush3.bf16.msra.mxu1 %v18563_v11  ;;  %v18586_v11 = vld [vmem:[%s22443_s5 + $0xd0] sm:$0xff]  }
 0x60e   :  { %16721 = vmatprep.subr.bf16.mxu1 %v18564_v50 }
 0x610   :  { %16706 = vmatmul.mubr.bf16.gmra.mrb[136].mxu1 %v10741_v48 }
 0x611   :  { %16709 = vmatprep.mubr.bf16.mxu1 %v10742_v36  ;;  %16722 = vmatpush3.bf16.msra.mxu1 %v18564_v50  ;;  %v18581_v36 = vld [vmem:[%s22443_s5 + $0xa8] sm:$0xff]   ;;  %v18587_v50 = vld [vmem:[%s22443_s5 + $0xd8] sm:$0xff]  }
 0x612   :  { %16723 = vmatprep.subr.bf16.mxu1 %v18565_v22 }
 0x615   :  { %16724 = vmatpush3.bf16.msra.mxu1 %v18565_v22  ;;  %v18588_v22 = vld [vmem:[%s22443_s5 + $0xe0] sm:$0xff]  }
 0x616   :  { %16725 = vmatprep.subr.bf16.mxu1 %v18566_v43 }
 0x618   :  { %16710 = vmatmul.mubr.bf16.gmra.mrb[140].mxu1 %v10743_v55  ;;  %v18580_v55 = vld [vmem:[%s22443_s5 + $0xa0] sm:$0xff]  }
 0x619   :  { %16726 = vmatpush3.bf16.msra.mxu1 %v18566_v43  ;;  %v18589_v43 = vld [vmem:[%s22443_s5 + $0xe8] sm:$0xff]  }
 0x61a   :  { %16727 = vmatprep.subr.bf16.mxu1 %v18567_v42 }
 0x61d   :  { %16728 = vmatpush3.bf16.msra.mxu1 %v18567_v42  ;;  %v18590_v42 = vld [vmem:[%s22443_s5 + $0xf0] sm:$0xff]  }
 0x61e   :  { %16733 = vmatprep.subr.bf16.mxu1 %v18568_v39 }
 0x6d3   :  { %v16699_v13 = vpop.f32.mrb[128].mxu1 }
 0x6d4   :  { %v12049_v16 = vpop.f32.mrb[129].mxu1  ;;  %v22111_v46 = vadd.f32 %v16699_v13, %v14513_v23  ;;  %v18592_v13 = vld [vmem:[%s22445_s7 + $0x40] sm:$0xff]  }
 0x6d5   :  { %v16700_v54 = vpop.f32.mrb[130].mxu1  ;;  %v12135_v7 = vadd.f32 %v14513_v23, %v12049_v16  ;;  %v18593_v16 = vld [vmem:[%s22445_s7 + $0x48] sm:$0xff]  }
 0x6d6   :  { %v22113_v1 = vadd.f32 %v16700_v54, %v14513_v23  ;;  %v12052_v57 = vpop.f32.mrb[131].mxu1  ;;  %v18594_v54 = vld [vmem:[%s22445_s7 + $0x50] sm:$0xff]  }
 0x6d7   :  { %v12136_v4 = vadd.f32 %v14513_v23, %v12052_v57  ;;  %v18597_v57 = vld [vmem:[%s22445_s7 + $0x68] sm:$0xff]  }
 0x6d8   :  { %v12152_v5 = vpack.c.bf16 %v22113_v1, %v22111_v46  ;;  %v18595_v46 = vld [vmem:[%s22445_s7 + $0x58] sm:$0xff]   ;;  %v18596_v1 = vld [vmem:[%s22445_s7 + $0x60] sm:$0xff]  }
 0x6d9   :  { %v12151_v58 = vpack.c.bf16 %v12136_v4, %v12135_v7  ;;  %v18598_v7 = vld [vmem:[%s22445_s7 + $0x70] sm:$0xff]   ;;  %v18599_v4 = vld [vmem:[%s22445_s7 + $0x78] sm:$0xff]  }
 0x6db   :  { %v16703_v8 = vpop.f32.mrb[132].mxu1 }
 0x6dc   :  { %v12065_v0 = vpop.f32.mrb[133].mxu1  ;;  %v12141_v59 = vadd.f32 %v16703_v8, %v14513_v23 }
 0x6dd   :  { %v16704_v10 = vpop.f32.mrb[134].mxu1  ;;  %v12139_v47 = vadd.f32 %v14513_v23, %v12065_v0 }
 0x6de   :  { %v12142_v53 = vadd.f32 %v16704_v10, %v14513_v23  ;;  %v12068_v12 = vpop.f32.mrb[135].mxu1 }
 0x6df   :  { %v12140_v21 = vadd.f32 %v14513_v23, %v12068_v12 }
 0x6e0   :  { %v12154_v56 = vpack.c.bf16 %v12142_v53, %v12141_v59 }
 0x6e1   :  { %v12153_v20 = vpack.c.bf16 %v12140_v21, %v12139_v47 }
 0x6e3   :  { %v16707_v34 = vpop.f32.mrb[136].mxu1  ;;  %16729 = vmatprep.mubr.bf16.mxu1 %v12153_v20  ;;  %v18600_v20 = vld [vmem:[%s22445_s7] sm:$0xff]  }
 0x6e4   :  { %v22120_v41 = vadd.f32 %v16707_v34, %v14513_v23  ;;  %v12081_v14 = vpop.f32.mrb[137].mxu1  ;;  %16730 = vmatmul.mubr.bf16.vlgmr.msra.gmra.mrb[144].mxu1 %v12154_v56  ;;  %v18601_v34 = vld [vmem:[%s22445_s7 + $0x8] sm:$0xff]  }
 0x6e5   :  { %16734 = vmatpush3.bf16.msra.mxu1 %v18568_v39  ;;  %v16708_v25 = vpop.f32.mrb[138].mxu1  ;;  %16749 = vmatprep.mubr.bf16.mxu1 %v12151_v58  ;;  %v12143_v35 = vadd.f32 %v14513_v23, %v12081_v14  ;;  %v18591_v39 = vld [vmem:[%s22443_s5 + $0xf8] sm:$0xff]  }
 0x6e6   :  { %v22122_v3 = vadd.f32 %v16708_v25, %v14513_v23  ;;  %v12084_v28 = vpop.f32.mrb[139].mxu1  ;;  %16735 = vmatprep.subr.bf16.mxu1 %v18569_v62  ;;  %v18603_v14 = vld [vmem:[%s22445_s7 + $0x18] sm:$0xff]   ;;  %v18604_v25 = vld [vmem:[%s22445_s7 + $0x20] sm:$0xff]  }
 0x6e7   :  { %v12144_v49 = vadd.f32 %v14513_v23, %v12084_v28  ;;  %v18606_v28 = vld [vmem:[%s22445_s7 + $0x30] sm:$0xff]  }
 0x6e8   :  { %v12156_v9 = vpack.c.bf16 %v22122_v3, %v22120_v41  ;;  %v18602_v41 = vld [vmem:[%s22445_s7 + $0x10] sm:$0xff]   ;;  %v18605_v3 = vld [vmem:[%s22445_s7 + $0x28] sm:$0xff]  }
 0x6e9   :  { %v12155_v48 = vpack.c.bf16 %v12144_v49, %v12143_v35  ;;  %16736 = vmatpush3.bf16.msra.mxu1 %v18569_v62  ;;  %v18608_v35 = vld [vmem:[%s22445_s7 + $0x80] sm:$0xff]   ;;  %v18609_v49 = vld [vmem:[%s22445_s7 + $0x88] sm:$0xff]  }
 0x6ea   :  { %16737 = vmatprep.subr.bf16.mxu1 %v18570_v19 }
 0x6eb   :  { %v16711_v2 = vpop.f32.mrb[140].mxu1 }
 0x6ec   :  { %v22132_v26 = vadd.f32 %v16711_v2, %v14513_v23  ;;  %v12097_v17 = vpop.f32.mrb[141].mxu1  ;;  %v18613_v2 = vld [vmem:[%s22445_s7 + $0xa8] sm:$0xff]  }
 0x6ed   :  { %v12147_v32 = vadd.f32 %v14513_v23, %v12097_v17  ;;  %16738 = vmatpush3.bf16.msra.mxu1 %v18570_v19  ;;  %v16712_v18 = vpop.f32.mrb[142].mxu1  ;;  %v18607_v19 = vld [vmem:[%s22445_s7 + $0x38] sm:$0xff]  }
 0x6ee   :  { %v22134_v63 = vadd.f32 %v16712_v18, %v14513_v23  ;;  %v12100_v29 = vpop.f32.mrb[143].mxu1  ;;  %16739 = vmatprep.subr.bf16.mxu1 %v18571_v31  ;;  %v18615_v17 = vld [vmem:[%s22445_s7 + $0xb8] sm:$0xff]   ;;  %v18617_v18 = vld [vmem:[%s22445_s7 + $0xc8] sm:$0xff]  }
 0x6ef   :  { %v12148_v60 = vadd.f32 %v14513_v23, %v12100_v29  ;;  %v18669_v23 = vmov 0.0   ;;  %v18619_v29 = vld [vmem:[%s22445_s7 + $0xd8] sm:$0xff]  }
 0x6f0   :  { %v12158_v52 = vpack.c.bf16 %v22134_v63, %v22132_v26  ;;  %v18614_v26 = vld [vmem:[%s22445_s7 + $0xb0] sm:$0xff]  }
 0x6f1   :  { %v12157_v6 = vpack.c.bf16 %v12148_v60, %v12147_v32  ;;  %16740 = vmatpush3.bf16.msra.mxu1 %v18571_v31  ;;  %v18612_v31 = vld [vmem:[%s22445_s7 + $0xa0] sm:$0xff]   ;;  %v18618_v63 = vld [vmem:[%s22445_s7 + $0xd0] sm:$0xff]   ;;  %v18621_v60 = vld [vmem:[%s22445_s7 + $0xe8] sm:$0xff]  }
 0x6f2   :  { %16741 = vmatprep.subr.bf16.mxu1 %v18572_v51  ;;  %v18616_v32 = vld [vmem:[%s22445_s7 + $0xc0] sm:$0xff]  }
 0x6f5   :  { %16742 = vmatpush3.bf16.msra.mxu1 %v18572_v51  ;;  %v18620_v51 = vld [vmem:[%s22445_s7 + $0xe0] sm:$0xff]  }
 0x6f6   :  { %16743 = vmatprep.subr.bf16.mxu1 %v18573_v40 }
 0x6f9   :  { %16744 = vmatpush3.bf16.msra.mxu1 %v18573_v40 }
 0x6fa   :  { %16745 = vmatprep.subr.bf16.mxu1 %v18574_v45 }
 0x6fd   :  { %16746 = vmatpush3.bf16.msra.mxu1 %v18574_v45  ;;  %v18624_v45 = vld [vmem:[%s22447_s9] sm:$0xff]  }
 0x6fe   :  { %16747 = vmatprep.subr.bf16.mxu1 %v18575_v38 }
 0x701   :  { %16748 = vmatpush3.bf16.msra.mxu1 %v18575_v38  ;;  %v18625_v38 = vld [vmem:[%s22447_s9 + $0x8] sm:$0xff]  }
 0x702   :  { %16753 = vmatprep.subr.bf16.mxu1 %v18576_v15 }
 0x704   :  { %16750 = vmatmul.mubr.bf16.vlgmr.msra.gmra.mrb[144].mxu1 %v12152_v5  ;;  %v14546_v5 = vld [vmem:[%s22444_s6] ss:$0 sm:$0xff]  ;;  %s13384_s6 = sshll.u32 %s18671_s15, 4  ;;  %s13385_s6 = int_to_ptr.vmem [resolvable:$true] %s13384_s6 }
 0x705   :  { %16754 = vmatpush3.bf16.msra.mxu1 %v18576_v15  ;;  %16769 = vmatprep.mubr.bf16.mxu1 %v12155_v48  ;;  %v18611_v48 = vld [vmem:[%s22445_s7 + $0x98] sm:$0xff]   ;;  %v18626_v15 = vld [vmem:[%s22447_s9 + $0x10] sm:$0xff]   ;;  %s18645_s16 = scalar_lea.vmem %s13385_s6, 32  ;;  %p18650_p1 = scmp.lt.s32.totalorder %s13385_s6, %s13385_s6 }
 0x706   :  { %16755 = vmatprep.subr.bf16.mxu1 %v18577_v44  ;;  %p18646_p0 = scmp.ne.s32.totalorder %s13385_s6, %s18645_s16  ;;  %p18651_p2 = scmp.lt.s32.totalorder %s18645_s16, %s18645_s16 }
 0x708   :  { %p18652_p3 = por %p18651_p2, %p18650_p1 }
 0x709   :  { %16756 = vmatpush3.bf16.msra.mxu1 %v18577_v44  ;;  %v18627_v44 = vld [vmem:[%s22447_s9 + $0x18] sm:$0xff]  }
 0x70a   :  { %16757 = vmatprep.subr.bf16.mxu1 %v18578_v27  ;;  %p18653_p4 = pnand %p18652_p3, %p18646_p0 }
 0x70d   :  { %16758 = vmatpush3.bf16.msra.mxu1 %v18578_v27 }
 0x70e   :  { %16759 = vmatprep.subr.bf16.mxu1 %v18579_v30 }
 0x711   :  { %16760 = vmatpush3.bf16.msra.mxu1 %v18579_v30 }
 0x712   :  { %16761 = vmatprep.subr.bf16.mxu1 %v18580_v55 }
 0x715   :  { %16762 = vmatpush3.bf16.msra.mxu1 %v18580_v55 }
 0x716   :  { %16763 = vmatprep.subr.bf16.mxu1 %v18581_v36 }
 0x719   :  { %16764 = vmatpush3.bf16.msra.mxu1 %v18581_v36 }
 0x71a   :  { %16765 = vmatprep.subr.bf16.mxu1 %v18582_v61 }
 0x71d   :  { %16766 = vmatpush3.bf16.msra.mxu1 %v18582_v61 }
 0x71e   :  { %16767 = vmatprep.subr.bf16.mxu1 %v18583_v33 }
 0x721   :  { %16768 = vmatpush3.bf16.msra.mxu1 %v18583_v33 }
 0x722   :  { %16773 = vmatprep.subr.bf16.mxu1 %v18584_v24 }
 0x724   :  { %16770 = vmatmul.mubr.bf16.vlgmr.msra.gmra.mrb[144].mxu1 %v12156_v9  ;;  %v18610_v9 = vld [vmem:[%s22445_s7 + $0x90] sm:$0xff]  }
 0x725   :  { %16774 = vmatpush3.bf16.msra.mxu1 %v18584_v24  ;;  %16789 = vmatprep.mubr.bf16.mxu1 %v12157_v6  ;;  %v18623_v6 = vld [vmem:[%s22445_s7 + $0xf8] sm:$0xff]  }
 0x726   :  { %16775 = vmatprep.subr.bf16.mxu1 %v18585_v37 }
 0x729   :  { %16776 = vmatpush3.bf16.msra.mxu1 %v18585_v37 }
 0x72a   :  { %16777 = vmatprep.subr.bf16.mxu1 %v18586_v11 }
 0x72d   :  { %16778 = vmatpush3.bf16.msra.mxu1 %v18586_v11 }
 0x72e   :  { %16779 = vmatprep.subr.bf16.mxu1 %v18587_v50 }
 0x731   :  { %16780 = vmatpush3.bf16.msra.mxu1 %v18587_v50 }
 0x732   :  { %16781 = vmatprep.subr.bf16.mxu1 %v18588_v22 }
 0x735   :  { %16782 = vmatpush3.bf16.msra.mxu1 %v18588_v22 }
 0x736   :  { %16783 = vmatprep.subr.bf16.mxu1 %v18589_v43 }
 0x739   :  { %16784 = vmatpush3.bf16.msra.mxu1 %v18589_v43 }
 0x73a   :  { %16785 = vmatprep.subr.bf16.mxu1 %v18590_v42 }
 0x73d   :  { %16786 = vmatpush3.bf16.msra.mxu1 %v18590_v42 }
 0x73e   :  { %16787 = vmatprep.subr.bf16.mxu1 %v18591_v39 }
 0x741   :  { %16788 = vmatpush3.bf16.msra.mxu1 %v18591_v39 }
 0x742   :  { %16793 = vmatprep.subr.bf16.mxu1 %v18669_v23 }
 0x744   :  { %16790 = vmatmul.mubr.bf16.vlgmr.msra.gmra.mrb[144].mxu1 %v12158_v52  ;;  %v18622_v52 = vld [vmem:[%s22445_s7 + $0xf0] sm:$0xff]  }
 0x745   :  { %16794 = vmatpush3.bf16.msra.mxu1 %v18592_v13  ;;  %16809 = vmatprep.mubr.msk.bf16.mxu1 %vm18670_vm1, %v18669_v23 }
 0x746   :  { %16795 = vmatprep.subr.bf16.mxu1 %v18669_v23 }
 0x749   :  { %16796 = vmatpush3.bf16.msra.mxu1 %v18593_v16  ;;  %v14579_v16 = vld [vmem:[%s22446_s8] ss:$0 sm:$0xff] }
 0x74a   :  { %16797 = vmatprep.subr.bf16.mxu1 %v18669_v23 }
 0x74d   :  { %16798 = vmatpush3.bf16.msra.mxu1 %v18594_v54 }
 0x74e   :  { %16799 = vmatprep.subr.bf16.mxu1 %v18669_v23 }
 0x751   :  { %16800 = vmatpush3.bf16.msra.mxu1 %v18595_v46 }
 0x752   :  { %16801 = vmatprep.subr.bf16.mxu1 %v18669_v23 }
 0x755   :  { %16802 = vmatpush3.bf16.msra.mxu1 %v18596_v1 }
 0x756   :  { %16803 = vmatprep.subr.bf16.mxu1 %v18669_v23 }
 0x759   :  { %16804 = vmatpush3.bf16.msra.mxu1 %v18597_v57 }
 0x75a   :  { %16805 = vmatprep.subr.bf16.mxu1 %v18669_v23 }
 0x75d   :  { %16806 = vmatpush3.bf16.msra.mxu1 %v18598_v7 }
 0x75e   :  { %16807 = vmatprep.subr.bf16.mxu1 %v18669_v23 }
 0x761   :  { %16808 = vmatpush3.bf16.msra.mxu1 %v18599_v4  ;;  %v18628_v4 = vld [vmem:[%s22447_s9 + $0x20] sm:$0xff]  }
 0x762   :  { %16813 = vmatprep.subr.bf16.mxu1 %v18669_v23 }
 0x817   :  { %v16791_v58 = vpop.f32.mrb[144].mxu1 }
 0x818   :  { %v12628_v8 = vadd.f32 %v16791_v58, %v14546_v5  ;;  %v12600_v0 = vpop.f32.mrb[145].mxu1  ;;  %v18629_v58 = vld [vmem:[%s22447_s9 + $0x28] sm:$0xff]  }
 0x819   :  { %v16792_v10 = vpop.f32.mrb[146].mxu1  ;;  %v12626_v12 = vadd.f32 %v14546_v5, %v12600_v0  ;;  %v18631_v0 = vld [vmem:[%s22447_s9 + $0x38] sm:$0xff]  }
 0x81a   :  { %v12629_v59 = vadd.f32 %v16792_v10, %v14546_v5  ;;  %v12603_v53 = vpop.f32.mrb[147].mxu1  ;;  %v18632_v10 = vld [vmem:[%s22447_s9 + $0x40] sm:$0xff]  }
 0x81b   :  { %v12627_v47 = vadd.f32 %v14546_v5, %v12603_v53  ;;  %v18634_v53 = vld [vmem:[%s22447_s9 + $0x50] sm:$0xff]  }
 0x81c   :  { %v22239_v21 = vpack.c.bf16 %v12629_v59, %v12628_v8  ;;  %v18630_v8 = vld [vmem:[%s22447_s9 + $0x30] sm:$0xff]   ;;  %v18633_v59 = vld [vmem:[%s22447_s9 + $0x48] sm:$0xff]  }
 0x81d   :  { %v12630_v56 = vpack.c.bf16 %v12627_v47, %v12626_v12  ;;  %v18635_v12 = vld [vmem:[%s22447_s9 + $0x58] sm:$0xff]   ;;  %v18636_v47 = vld [vmem:[%s22447_s9 + $0x60] sm:$0xff]  }
 0x81e   :  { %v12965_v40 = vrot.slane %v22239_v21, 4 }
 0x81f   :  { %v12665_v62 = vrot.slane %v12630_v56, 4 }
 0x821   :  { %16810 = vmatmul.mubr.bf16.vlgmr.msra.gmra.mrb[148].mxu1 %v12665_v62 }
 0x822   :  { %16814 = vmatpush3.bf16.msra.mxu1 %v18600_v20  ;;  %16829 = vmatprep.mubr.msk.bf16.mxu1 %vm18670_vm1, %v18669_v23  ;;  %v18639_v20 = vld [vmem:[%s22447_s9 + $0x78] sm:$0xff]  }
 0x823   :  { %16815 = vmatprep.subr.bf16.mxu1 %v18669_v23 }
 0x826   :  { %16816 = vmatpush3.bf16.msra.mxu1 %v18601_v34 }
 0x827   :  { %16817 = vmatprep.subr.bf16.mxu1 %v18669_v23 }
 0x82a   :  { %16818 = vmatpush3.bf16.msra.mxu1 %v18602_v41 }
 0x82b   :  { %16819 = vmatprep.subr.bf16.mxu1 %v18669_v23 }
 0x82e   :  { %16820 = vmatpush3.bf16.msra.mxu1 %v18603_v14 }
 0x82f   :  { %16821 = vmatprep.subr.bf16.mxu1 %v18669_v23 }
 0x832   :  { %16822 = vmatpush3.bf16.msra.mxu1 %v18604_v25 }
 0x833   :  { %16823 = vmatprep.subr.bf16.mxu1 %v18669_v23 }
 0x836   :  { %16824 = vmatpush3.bf16.msra.mxu1 %v18605_v3 }
 0x837   :  { %16825 = vmatprep.subr.bf16.mxu1 %v18669_v23 }
 0x83a   :  { %16826 = vmatpush3.bf16.msra.mxu1 %v18606_v28 }
 0x83b   :  { %16827 = vmatprep.subr.bf16.mxu1 %v18669_v23 }
 0x83e   :  { %16828 = vmatpush3.bf16.msra.mxu1 %v18607_v19 }
 0x83f   :  { %16833 = vmatprep.subr.bf16.mxu1 %v18669_v23 }
 0x841   :  { %16830 = vmatmul.mubr.bf16.vlgmr.msra.gmra.mrb[152].mxu1 %v12630_v56  ;;  %v18638_v56 = vld [vmem:[%s22447_s9 + $0x70] sm:$0xff]  }
 0x842   :  { %16834 = vmatpush3.bf16.msra.mxu1 %v18608_v35  ;;  %16849 = vmatprep.mubr.msk.bf16.mxu1 %vm18670_vm1, %v18669_v23 }
 0x843   :  { %16835 = vmatprep.subr.bf16.mxu1 %v18669_v23 }
 0x846   :  { %16836 = vmatpush3.bf16.msra.mxu1 %v18609_v49 }
 0x847   :  { %16837 = vmatprep.subr.bf16.mxu1 %v18669_v23 }
 0x84a   :  { %16838 = vmatpush3.bf16.msra.mxu1 %v18610_v9 }
 0x84b   :  { %16839 = vmatprep.subr.bf16.mxu1 %v18669_v23 }
 0x84e   :  { %16840 = vmatpush3.bf16.msra.mxu1 %v18611_v48 }
 0x84f   :  { %16841 = vmatprep.subr.bf16.mxu1 %v18669_v23 }
 0x852   :  { %16842 = vmatpush3.bf16.msra.mxu1 %v18612_v31 }
 0x853   :  { %16843 = vmatprep.subr.bf16.mxu1 %v18669_v23 }
 0x856   :  { %16844 = vmatpush3.bf16.msra.mxu1 %v18613_v2 }
 0x857   :  { %16845 = vmatprep.subr.bf16.mxu1 %v18669_v23 }
 0x85a   :  { %16846 = vmatpush3.bf16.msra.mxu1 %v18614_v26 }
 0x85b   :  { %16847 = vmatprep.subr.bf16.mxu1 %v18669_v23 }
 0x85e   :  { %16848 = vmatpush3.bf16.msra.mxu1 %v18615_v17 }
 0x85f   :  { %16853 = vmatprep.subr.bf16.mxu1 %v18669_v23 }
 0x861   :  { %16850 = vmatmul.mubr.bf16.vlgmr.msra.gmra.mrb[156].mxu1 %v22239_v21  ;;  %v18637_v21 = vld [vmem:[%s22447_s9 + $0x68] sm:$0xff]  }
 0x862   :  { %16854 = vmatpush3.bf16.msra.mxu1 %v18616_v32  ;;  %16869 = vmatprep.mubr.msk.bf16.mxu1 %vm18670_vm1, %v18669_v23 }
 0x863   :  { %16855 = vmatprep.subr.bf16.mxu1 %v18669_v23 }
 0x866   :  { %16856 = vmatpush3.bf16.msra.mxu1 %v18617_v18 }
 0x867   :  { %16857 = vmatprep.subr.bf16.mxu1 %v18669_v23 }
 0x86a   :  { %16858 = vmatpush3.bf16.msra.mxu1 %v18618_v63 }
 0x86b   :  { %16859 = vmatprep.subr.bf16.mxu1 %v18669_v23 }
 0x86e   :  { %16860 = vmatpush3.bf16.msra.mxu1 %v18619_v29  ;;  %v14600_v29 = vld [vmem:[%s22448_s10] ss:$0 sm:$0xff] }
 0x86f   :  { %16861 = vmatprep.subr.bf16.mxu1 %v18669_v23 }
 0x872   :  { %16862 = vmatpush3.bf16.msra.mxu1 %v18620_v51 }
 0x873   :  { %16863 = vmatprep.subr.bf16.mxu1 %v18669_v23 }
 0x876   :  { %16864 = vmatpush3.bf16.msra.mxu1 %v18621_v60 }
 0x877   :  { %16865 = vmatprep.subr.bf16.mxu1 %v18669_v23 }
 0x87a   :  { %16866 = vmatpush3.bf16.msra.mxu1 %v18622_v52 }
 0x87b   :  { %16867 = vmatprep.subr.bf16.mxu1 %v18669_v23 }
 0x87e   :  { %16868 = vmatpush3.bf16.msra.mxu1 %v18623_v6 }
 0x87f   :  { %16873 = vmatprep.subr.bf16.mxu1 %v18669_v23 }
 0x881   :  { %16870 = vmatmul.mubr.bf16.vlgmr.msra.gmra.mrb[160].mxu1 %v12965_v40 }
 0x882   :  { %16881 = vmatprep.mubr.msk.bf16.mxu1 %vm18670_vm1, %v18669_v23  ;;  %16874 = vmatpush3.bf16.msra.mxu1 %v18624_v45 }
 0x883   :  { %16875 = vmatprep.subr.bf16.mxu1 %v18669_v23 }
 0x886   :  { %16876 = vmatpush3.bf16.msra.mxu1 %v18625_v38 }
 0x887   :  { %16877 = vmatprep.subr.bf16.mxu1 %v18669_v23 }
 0x88a   :  { %16878 = vmatpush3.bf16.msra.mxu1 %v18626_v15 }
 0x88b   :  { %16879 = vmatprep.subr.bf16.mxu1 %v18669_v23 }
 0x88e   :  { %16880 = vmatpush3.bf16.msra.mxu1 %v18627_v44 }
 0x88f   :  { %16885 = vmatprep.subr.bf16.mxu1 %v18669_v23 }
 0x8f4   :  { %v12749_v27 = vpop.f32.mrb[148].mxu1 }
 0x8f5   :  { %v16811_v30 = vpop.f32.mrb[149].mxu1 }
 0x8f6   :  { %v12752_v55 = vpop.f32.mrb[150].mxu1 }
 0x8f7   :  { %v16812_v36 = vpop.f32.mrb[151].mxu1 }
 0x914   :  { %v12837_v61 = vpop.f32.mrb[152].mxu1 }
 0x915   :  { %v12838_v33 = vadd.f32 %v12837_v61, %v12749_v27  ;;  %v16831_v24 = vpop.f32.mrb[153].mxu1 }
 0x916   :  { %v12840_v37 = vpop.f32.mrb[154].mxu1 }
 0x917   :  { %v16832_v11 = vpop.f32.mrb[155].mxu1 }
 0x934   :  { %v12941_v50 = vpop.f32.mrb[156].mxu1 }
 0x935   :  { %v12947_v22 = vadd.f32 %v12941_v50, %v12838_v33  ;;  %v16851_v43 = vpop.f32.mrb[157].mxu1 }
 0x936   :  { %v12944_v42 = vpop.f32.mrb[158].mxu1 }
 0x937   :  { %v16852_v39 = vpop.f32.mrb[159].mxu1 }
 0x954   :  { %v13049_v13 = vpop.f32.mrb[160].mxu1 }
 0x955   :  { %v13055_v54 = vadd.f32 %v13049_v13, %v12947_v22  ;;  %v16871_v46 = vpop.f32.mrb[161].mxu1 }
 0x956   :  { %v13052_v1 = vpop.f32.mrb[162].mxu1 }
 0x957   :  { %v13063_v57 = vadd.f32 %v14579_v16, %v13055_v54  ;;  %v16872_v7 = vpop.f32.mrb[163].mxu1 }
 0x959   :  { %v13064_v5 = vpack.c.bf16 %v13063_v57, %v13063_v57 }
 0x95b   :  { %16882 = vmatmul.mubr.msk.bf16.vlgmr.msra.gmra.mrb[164].mxu1 %vm656_vm0, %v13064_v5 }
 0x95c   :  { %16886 = vmatpush3.bf16.msra.mxu1 %v18628_v4  ;;  %16893 = vmatprep.mubr.msk.bf16.mxu1 %vm18670_vm1, %v18669_v23 }
 0x95d   :  { %16887 = vmatprep.subr.bf16.mxu1 %v18669_v23 }
 0x960   :  { %16888 = vmatpush3.bf16.msra.mxu1 %v18629_v58 }
 0x961   :  { %16889 = vmatprep.subr.bf16.mxu1 %v18669_v23 }
 0x964   :  { %16890 = vmatpush3.bf16.msra.mxu1 %v18630_v8 }
 0x965   :  { %16891 = vmatprep.subr.bf16.mxu1 %v18669_v23 }
 0x968   :  { %16892 = vmatpush3.bf16.msra.mxu1 %v18631_v0 }
 0x969   :  { %16897 = vmatprep.subr.bf16.mxu1 %v18669_v23 }
 0x96b   :  { %16894 = vmatmul.mubr.msk.bf16.vlgmr.msra.gmra.mrb[168].mxu1 %vm656_vm0, %v13064_v5 }
 0x96c   :  { %16898 = vmatpush3.bf16.msra.mxu1 %v18632_v10  ;;  %16905 = vmatprep.mubr.msk.bf16.mxu1 %vm18670_vm1, %v18669_v23 }
 0x96d   :  { %16899 = vmatprep.subr.bf16.mxu1 %v18669_v23 }
 0x970   :  { %16900 = vmatpush3.bf16.msra.mxu1 %v18633_v59 }
 0x971   :  { %16901 = vmatprep.subr.bf16.mxu1 %v18669_v23 }
 0x974   :  { %16902 = vmatpush3.bf16.msra.mxu1 %v18634_v53 }
 0x975   :  { %16903 = vmatprep.subr.bf16.mxu1 %v18669_v23 }
 0x978   :  { %16904 = vmatpush3.bf16.msra.mxu1 %v18635_v12 }
 0x979   :  { %16909 = vmatprep.subr.bf16.mxu1 %v18669_v23 }
 0x97b   :  { %16906 = vmatmul.mubr.msk.bf16.vlgmr.msra.gmra.mrb[172].mxu1 %vm656_vm0, %v13064_v5 }
 0x97c   :  { %16910 = vmatpush3.bf16.msra.mxu1 %v18636_v47  ;;  %16917 = vmatprep.mubr.msk.bf16.mxu1 %vm18670_vm1, %v18669_v23 }
 0x97d   :  { %16911 = vmatprep.subr.bf16.mxu1 %v18669_v23 }
 0x980   :  { %16912 = vmatpush3.bf16.msra.mxu1 %v18637_v21 }
 0x981   :  { %16913 = vmatprep.subr.bf16.mxu1 %v18669_v23 }
 0x984   :  { %16914 = vmatpush3.bf16.msra.mxu1 %v18638_v56 }
 0x985   :  { %16915 = vmatprep.subr.bf16.mxu1 %v18669_v23 }
 0x988   :  { %16916 = vmatpush3.bf16.msra.mxu1 %v18639_v20 }
 0x98b   :  { %16918 = vmatmul.mubr.msk.bf16.vlgmr.msra.gmra.mrb[176].mxu1 %vm656_vm0, %v13064_v5 }
 0xa2e   :  { %v13134_v62 = vpop.f32.mrb[164].mxu1 }
 0xa2f   :  { %v16883_v34 = vpop.f32.mrb[165].mxu1 }
 0xa30   :  { %v13137_v41 = vpop.f32.mrb[166].mxu1 }
 0xa31   :  { %v16884_v14 = vpop.f32.mrb[167].mxu1 }
 0xa3e   :  { %v13206_v25 = vpop.f32.mrb[168].mxu1 }
 0xa3f   :  { %v13213_v3 = vrot.slane %v13206_v25, 2  ;;  %v16895_v28 = vpop.f32.mrb[169].mxu1 }
 0xa40   :  { %v13209_v19 = vpop.f32.mrb[170].mxu1 }
 0xa41   :  { %v13215_v35 = vadd.f32 %v13213_v3, %v13134_v62  ;;  %v16896_v49 = vpop.f32.mrb[171].mxu1 }
 0xa4e   :  { %v13282_v9 = vpop.f32.mrb[172].mxu1 }
 0xa4f   :  { %v13289_v48 = vrot.slane %v13282_v9, 4  ;;  %v16907_v31 = vpop.f32.mrb[173].mxu1 }
 0xa50   :  { %v13285_v2 = vpop.f32.mrb[174].mxu1 }
 0xa51   :  { %v13291_v26 = vadd.f32 %v13289_v48, %v13215_v35  ;;  %v16908_v17 = vpop.f32.mrb[175].mxu1 }
 0xa5e   :  { %v13358_v23 = vpop.f32.mrb[176].mxu1 }
 0xa5f   :  { %v13365_v32 = vrot.slane %v13358_v23, 6  ;;  %v16919_v18 = vpop.f32.mrb[177].mxu1 }
 0xa60   :  { %v13361_v63 = vpop.f32.mrb[178].mxu1 }
 0xa61   :  { %v13367_v51 = vadd.f32 %v13365_v32, %v13291_v26  ;;  %v16920_v60 = vpop.f32.mrb[179].mxu1 }
 0xa63   :  { %v13375_v52 = vadd.f32 %v14600_v29, %v13367_v51 }
 0xa65   :  { %13377 = vst.msk [vmem:[#allocation2] sm:$0x3] %vm13376_vm2, %v13375_v52 }
 0xa66   :  { %18656 = shalt.err (!%p18653_p4)
}
 0xa67   :  { %s18657_s18 = scalar_lea.hbm %s22449_s11, 32 }
 0xa68   :  { %p18658_p5 = scmp.ne.s32.totalorder %s22449_s11, %s18657_s18  ;;  %p18661_p6 = scmp.lt.u32.totalorder %s18657_s18, %s22449_s11 }
 0xa6a   :  { %p18663_p7 = pnand %p18661_p6, %p18658_p5 }
 0xa6c   :  { %18666 = shalt.err (!%p18663_p7)
}
 0xa6d   :  { %13387 = dma.vmem_to_hbm [thread:$0]  %s13385_s6, 32, %s22449_s11, [#allocation3]  }
 0xa6e   :  { %18667 = dma.done.wait [#allocation3], 32  }
 0xa6f   :  { %18668 = vsyncadd [#allocation3], 4294967264 }
 0xa70   :  { %13391 = vsyncpa [#allocation3], 1 }

</bundles_post_ra>
